<compile_context>
chip_gen: v5e
topology: v5e:2x2
jax: 0.10.0
libtpu: 0.0.40
codegen_flags: <defaults>
</compile_context>

<pallas_src>
import jax
import jax.numpy as jnp
from jax.experimental import pallas as pl
from jax.experimental.pallas import tpu as pltpu

# ---------------- configuration ----------------------------------------------
BATCH = 2
IMAGE_SIZE = 28        # architecture hard-codes 28 -> 14 -> 7 -> 4 spatial
IMAGE_CHANNEL = 3
CONV_DIM = 8
LATENT_DIM = 16
BN_EPS = 1e-5
LANES = 128
KSIZE = 5

# subpixel decomposition of a stride-2, k=5 ConvTranspose2d:
#   even output rows/cols use kernel taps {4,2,0} over input window {j-1,j,j+1}
#   odd  output rows/cols use kernel taps {3,1}   over input window {j,  j+1}
TAPS_EVEN = (4, 2, 0)
TAPS_ODD = (3, 1)
PHASES = ((0, 0), (0, 1), (1, 0), (1, 1))   # (row parity, col parity)


def _round_up(x, m):
    return (x + m - 1) // m * m


def _vmem():
    return pl.BlockSpec(memory_space=pltpu.MemorySpace.VMEM)


# ---------------- Pallas kernels ----------------------------------------------
def _mm_bn_relu_kernel(a_ref, w_ref, b_ref, g_ref, be_ref, o_ref):
    # matmul + bias + BatchNorm(batch statistics over M) + ReLU, one epilogue.
    y = (jnp.dot(a_ref[...], w_ref[...], preferred_element_type=jnp.float32)
         + b_ref[...])
    m = y.shape[0]
    mean = jnp.sum(y, axis=0, keepdims=True) / m
    d = y - mean
    var = jnp.sum(d * d, axis=0, keepdims=True) / m      # biased, like torch BN
    scale = g_ref[...] * jax.lax.rsqrt(var + BN_EPS)
    shift = be_ref[...] - mean * scale
    o_ref[...] = jnp.maximum(y * scale + shift, 0.0).astype(o_ref.dtype)


def _fc_reparam_kernel(a_ref, w_ref, b_ref, eps_ref, o_ref):
    # encoder fc (mu|logvar merged into one 256-wide dot) + reparameterization.
    y = (jnp.dot(a_ref[...], w_ref[...], preferred_element_type=jnp.float32)
         + b_ref[...])
    mu = y[:, :LANES]
    logvar = y[:, LANES:]
    o_ref[...] = mu + jnp.exp(logvar * 0.5) * eps_ref[...]


def _tconv4_bn_relu_kernel(a0, a1, a2, a3, w0, w1, w2, w3, b_ref, g_ref, be_ref,
                           o0, o1, o2, o3):
    # 4-phase subpixel ConvTranspose2d + bias + BN2d (stats over ALL phases,
    # i.e. every output position) + ReLU, one launch, four lane-dense outputs.
    ys = []
    for a, w in ((a0, w0), (a1, w1), (a2, w2), (a3, w3)):
        ys.append(jnp.dot(a[...], w[...], preferred_element_type=jnp.float32)
                  + b_ref[...])
    m_total = sum(y.shape[0] for y in ys)
    mean = sum(jnp.sum(y, axis=0, keepdims=True) for y in ys) / m_total
    var = sum(jnp.sum((y - mean) ** 2, axis=0, keepdims=True) for y in ys) / m_total
    scale = g_ref[...] * jax.lax.rsqrt(var + BN_EPS)
    shift = be_ref[...] - mean * scale
    for y, o in zip(ys, (o0, o1, o2, o3)):
        o[...] = jnp.maximum(y * scale + shift, 0.0).astype(o.dtype)


def _tconv4_tanh_kernel(a0, a1, a2, a3, w0, w1, w2, w3, b_ref, o0, o1, o2, o3):
    # final decoder layer: 4-phase ConvTranspose2d + bias + tanh, one launch.
    for a, w, o in ((a0, w0, o0), (a1, w1, o1), (a2, w2, o2), (a3, w3, o3)):
        y = (jnp.dot(a[...], w[...], preferred_element_type=jnp.float32)
             + b_ref[...])
        o[...] = jnp.tanh(y).astype(o.dtype)


# ---------------- Pallas wrappers ---------------------------------------------
def mm_bn_relu(a, w, b, g, be, out_dtype=jnp.bfloat16):
    M = a.shape[0]
    Np = w.shape[1]
    return pl.pallas_call(
        _mm_bn_relu_kernel,
        out_shape=jax.ShapeDtypeStruct((M, Np), out_dtype),
        in_specs=[_vmem()] * 5,
        out_specs=_vmem(),
    )(a, w, b, g, be)


def fc_reparam(flat, w, b, eps_pad):
    M = flat.shape[0]
    return pl.pallas_call(
        _fc_reparam_kernel,
        out_shape=jax.ShapeDtypeStruct((M, LANES), jnp.float32),
        in_specs=[_vmem()] * 4,
        out_specs=_vmem(),
    )(flat, w, b, eps_pad)


def tconv4(pats, layer, out_dtype, *, final_tanh):
    Np = layer["w"][0].shape[1]
    out_shape = tuple(jax.ShapeDtypeStruct((p.shape[0], Np), out_dtype)
                      for p in pats)
    out_specs = tuple(_vmem() for _ in pats)
    if final_tanh:
        return pl.pallas_call(
            _tconv4_tanh_kernel,
            out_shape=out_shape,
            in_specs=[_vmem()] * 9,
            out_specs=out_specs,
        )(*pats, *layer["w"], layer["b"])
    return pl.pallas_call(
        _tconv4_bn_relu_kernel,
        out_shape=out_shape,
        in_specs=[_vmem()] * 11,
        out_specs=out_specs,
    )(*pats, *layer["w"], layer["b"], layer["g"], layer["be"])


# ---------------- im2col glue (XLA) -------------------------------------------
def _im2col_stride2(x_nhwc, kp):
    """Encoder 5x5 stride-2 pad-2 patches; K zero-pad folded into the output."""
    N, H, W, C = x_nhwc.shape
    xp = jnp.pad(x_nhwc, ((0, 0), (2, 2), (2, 2), (0, 0)))
    OH = (H + 4 - KSIZE) // 2 + 1
    OW = (W + 4 - KSIZE) // 2 + 1
    cols = []
    for kh in range(KSIZE):
        for kw in range(KSIZE):
            cols.append(xp[:, kh:kh + 2 * (OH - 1) + 1:2,
                           kw:kw + 2 * (OW - 1) + 1:2, :])
    patches = jnp.stack(cols, axis=3).reshape(N * OH * OW, KSIZE * KSIZE * C)
    K = KSIZE * KSIZE * C
    if kp > K:
        patches = jnp.pad(patches, ((0, 0), (0, kp - K)))
    return patches, (N, OH, OW)


def _phase_conf(parity, op):
    if parity == 0:                      # even output positions
        return (1, 1), TAPS_EVEN
    return (0, op), TAPS_ODD             # odd output positions


def _phase_patches(h, py, px, op, kp):
    """Stride-1 im2col for one subpixel phase of a stride-2 ConvTranspose2d."""
    N, H, W, C = h.shape
    (pyl, pyh), ty = _phase_conf(py, op)
    (pxl, pxh), tx = _phase_conf(px, op)
    ny = H + pyl + pyh - len(ty) + 1
    nx = W + pxl + pxh - len(tx) + 1
    xp = jnp.pad(h, ((0, 0), (pyl, pyh), (pxl, pxh), (0, 0)))
    cols = []
    for dy in range(len(ty)):
        for dx in range(len(tx)):
            cols.append(xp[:, dy:dy + ny, dx:dx + nx, :])
    patches = jnp.stack(cols, axis=3).reshape(N * ny * nx, len(ty) * len(tx) * C)
    K = len(ty) * len(tx) * C
    if kp > K:
        patches = jnp.pad(patches, ((0, 0), (0, kp - K)))
    return patches, (ny, nx)


# ---------------- layer helpers ------------------------------------------------
def conv_bn_relu(h_nhwc, layer, cout):
    patches, (n, oh, ow) = _im2col_stride2(h_nhwc, layer["w"].shape[0])
    y = mm_bn_relu(patches, layer["w"], layer["b"], layer["g"], layer["be"])
    return y.reshape(n, oh, ow, LANES)[..., :cout]        # slice only for im2col


def tconv_layer(h_nhwc, layer, op, cout, *, final_tanh=False):
    N, H, W, _ = h_nhwc.shape
    H_out, W_out = 2 * H - 1 + op, 2 * W - 1 + op
    pats, dims = [], []
    for (py, px), w in zip(PHASES, layer["w"]):
        p, d = _phase_patches(h_nhwc, py, px, op, w.shape[0])
        pats.append(p)
        dims.append(d)
    out_dtype = jnp.float32 if final_tanh else jnp.bfloat16
    ys = tconv4(pats, layer, out_dtype, final_tanh=final_tanh)
    out = jnp.zeros((N, H_out, W_out, cout), out_dtype)
    for (py, px), (ny, nx), y in zip(PHASES, dims, ys):
        out = out.at[:, py::2, px::2, :].set(y.reshape(N, ny, nx, -1)[..., :cout])
    return out


# ---------------- parameters (torch-equivalent layout) -------------------------
def init_params(key):
    cd, ld, ic = CONV_DIM, LATENT_DIM, IMAGE_CHANNEL
    ks = jax.random.split(key, 24)
    n = lambda k, shp, s=0.05: s * jax.random.normal(k, shp, jnp.float32)
    p = {}
    # ---- encoder (gaussian) ----
    p["e_w1"] = n(ks[0], (cd, ic, 5, 5));         p["e_b1"] = jnp.zeros((cd,))
    p["e_g1"] = 1.0 + n(ks[1], (cd,), 0.1);       p["e_be1"] = n(ks[2], (cd,), 0.1)
    p["e_w2"] = n(ks[3], (cd * 2, cd, 5, 5));     p["e_b2"] = jnp.zeros((cd * 2,))
    p["e_g2"] = 1.0 + n(ks[4], (cd * 2,), 0.1);   p["e_be2"] = n(ks[5], (cd * 2,), 0.1)
    p["e_w3"] = n(ks[6], (cd * 4, cd * 2, 5, 5)); p["e_b3"] = jnp.zeros((cd * 4,))
    p["e_g3"] = 1.0 + n(ks[7], (cd * 4,), 0.1);   p["e_be3"] = n(ks[8], (cd * 4,), 0.1)
    p["e_fc_w"] = n(ks[9], (cd * 4 * 4 * 4, ld * 2))
    p["e_fc_b"] = jnp.zeros((ld * 2,))
    # ---- decoder (deterministic) ----
    p["d_fc_w"] = n(ks[10], (ld, cd * 4 * 4 * 4))
    p["d_fc_b"] = jnp.zeros((cd * 4 * 4 * 4,))
    p["d_g0"] = 1.0 + n(ks[11], (cd * 4 * 4 * 4,), 0.1)
    p["d_be0"] = n(ks[12], (cd * 4 * 4 * 4,), 0.1)
    p["d_w1"] = n(ks[13], (cd * 4, cd * 2, 5, 5)); p["d_b1"] = jnp.zeros((cd * 2,))
    p["d_g1"] = 1.0 + n(ks[14], (cd * 2,), 0.1);   p["d_be1"] = n(ks[15], (cd * 2,), 0.1)
    p["d_w2"] = n(ks[16], (cd * 2, cd, 5, 5));     p["d_b2"] = jnp.zeros((cd,))
    p["d_g2"] = 1.0 + n(ks[17], (cd,), 0.1);       p["d_be2"] = n(ks[18], (cd,), 0.1)
    p["d_w3"] = n(ks[19], (cd, ic, 5, 5));         p["d_b3"] = jnp.zeros((ic,))
    return p


# ---------------- one-time weight preparation ----------------------------------
# NOTE: padded output channels rely on zero gamma/beta/bias/weight columns so
# that padded lanes stay exactly 0 through the fused BN+ReLU epilogue.
def _prep_conv(w_oihw, b, gamma, beta):
    cout, cin, kh, kw = w_oihw.shape
    K = kh * kw * cin
    Kp, Np = _round_up(K, LANES), _round_up(cout, LANES)
    w_mat = jnp.transpose(w_oihw, (2, 3, 1, 0)).reshape(K, cout)
    return {
        "w": jnp.pad(w_mat, ((0, Kp - K), (0, Np - cout))).astype(jnp.bfloat16),
        "b": jnp.pad(b, (0, Np - cout)).reshape(1, Np).astype(jnp.float32),
        "g": jnp.pad(gamma, (0, Np - cout)).reshape(1, Np).astype(jnp.float32),
        "be": jnp.pad(beta, (0, Np - cout)).reshape(1, Np).astype(jnp.float32),
    }


def _prep_tconv(w_iohw, b, gamma=None, beta=None):
    cin, cout, kh, kw = w_iohw.shape
    Np = _round_up(cout, LANES)
    ws = []
    for (py, px) in PHASES:
        ty = TAPS_EVEN if py == 0 else TAPS_ODD
        tx = TAPS_EVEN if px == 0 else TAPS_ODD
        sub = jnp.take(w_iohw, jnp.asarray(ty), axis=2)
        sub = jnp.take(sub, jnp.asarray(tx), axis=3)          # (cin,cout,|ty|,|tx|)
        sub = jnp.transpose(sub, (2, 3, 0, 1))                # (|ty|,|tx|,cin,cout)
        K = len(ty) * len(tx) * cin
        Kp = _round_up(K, LANES)
        mat = sub.reshape(K, cout)
        ws.append(jnp.pad(mat, ((0, Kp - K), (0, Np - cout))).astype(jnp.bfloat16))
    out = {"w": ws,
           "b": jnp.pad(b, (0, Np - cout)).reshape(1, Np).astype(jnp.float32)}
    if gamma is not None:
        out["g"] = jnp.pad(gamma, (0, Np - cout)).reshape(1, Np).astype(jnp.float32)
        out["be"] = jnp.pad(beta, (0, Np - cout)).reshape(1, Np).astype(jnp.float32)
    return out


def _prep_efc(w, bias):
    # merge mu / logvar columns into one (K, 256) weight for a single 256-wide dot:
    # mu -> lanes [0,128), logvar -> lanes [128,256) (only LATENT_DIM real each).
    K = w.shape[0]
    wm = jnp.zeros((K, 2 * LANES), jnp.float32)
    wm = wm.at[:, :LATENT_DIM].set(w[:, :LATENT_DIM])
    wm = wm.at[:, LANES:LANES + LATENT_DIM].set(w[:, LATENT_DIM:])
    bm = jnp.zeros((1, 2 * LANES), jnp.float32)
    bm = bm.at[0, :LATENT_DIM].set(bias[:LATENT_DIM])
    bm = bm.at[0, LANES:LANES + LATENT_DIM].set(bias[LATENT_DIM:])
    return {"w": wm.astype(jnp.bfloat16), "b": bm}


def _prep_dfc(w, bias, gamma, beta):
    K, N = w.shape                                            # (16, 512)
    Kp = _round_up(K, LANES)
    return {"w": jnp.pad(w, ((0, Kp - K), (0, 0))).astype(jnp.bfloat16),
            "b": bias.reshape(1, N).astype(jnp.float32),
            "g": gamma.reshape(1, N).astype(jnp.float32),
            "be": beta.reshape(1, N).astype(jnp.float32)}


def prepare_params(p):
    return {
        "e1": _prep_conv(p["e_w1"], p["e_b1"], p["e_g1"], p["e_be1"]),
        "e2": _prep_conv(p["e_w2"], p["e_b2"], p["e_g2"], p["e_be2"]),
        "e3": _prep_conv(p["e_w3"], p["e_b3"], p["e_g3"], p["e_be3"]),
        "e_fc": _prep_efc(p["e_fc_w"], p["e_fc_b"]),
        "d_fc": _prep_dfc(p["d_fc_w"], p["d_fc_b"], p["d_g0"], p["d_be0"]),
        "d1": _prep_tconv(p["d_w1"], p["d_b1"], p["d_g1"], p["d_be1"]),
        "d2": _prep_tconv(p["d_w2"], p["d_b2"], p["d_g2"], p["d_be2"]),
        "d3": _prep_tconv(p["d_w3"], p["d_b3"]),
    }


# ---------------- model forward -------------------------------------------------
def encoder_forward(pp, x_nchw):
    h = jnp.transpose(x_nchw, (0, 2, 3, 1)).astype(jnp.bfloat16)   # NCHW -> NHWC
    h = conv_bn_relu(h, pp["e1"], CONV_DIM)
    h = conv_bn_relu(h, pp["e2"], CONV_DIM * 2)
    h = conv_bn_relu(h, pp["e3"], CONV_DIM * 4)
    N = h.shape[0]
    return jnp.transpose(h, (0, 3, 1, 2)).reshape(N, -1)   # torch NCHW flatten


def decoder_forward(pp, z):
    L = pp["d_fc"]
    z_p = jnp.pad(z.astype(jnp.bfloat16),
                  ((0, 0), (0, L["w"].shape[0] - z.shape[1])))
    y = mm_bn_relu(z_p, L["w"], L["b"], L["g"], L["be"])    # fc + BN1d + ReLU
    N = y.shape[0]
    h = jnp.transpose(y.reshape(N, CONV_DIM * 4, 4, 4), (0, 2, 3, 1))  # NHWC
    h = tconv_layer(h, pp["d1"], op=0, cout=CONV_DIM * 2)
    h = tconv_layer(h, pp["d2"], op=1, cout=CONV_DIM)
    x = tconv_layer(h, pp["d3"], op=1, cout=IMAGE_CHANNEL, final_tanh=True)
    return jnp.transpose(x, (0, 3, 1, 2))                   # NHWC -> NCHW


@jax.jit
def dcae_forward(pp, x, z, eps):
    """DCAE.forward(x, z) with enc_dist='gaussian', dec_dist='deterministic'."""
    flat = encoder_forward(pp, x)                                    # (N, 512) bf16
    L = pp["e_fc"]
    eps_pad = jnp.pad(eps.astype(jnp.float32),
                      ((0, 0), (0, LANES - LATENT_DIM)))
    z_pad = fc_reparam(flat, L["w"], L["b"], eps_pad)
    z_fake = z_pad[:, :LATENT_DIM]
    x_fake = decoder_forward(pp, z)
    return z_fake, x_fake


# ---------------- main -----------------------------------------------------------
if __name__ == "__main__":
    key = jax.random.PRNGKey(0)
    k_par, k_x, k_z, k_eps = jax.random.split(key, 4)
    params = init_params(k_par)
    pp = prepare_params(params)

    x = jax.random.normal(k_x, (BATCH, IMAGE_CHANNEL, IMAGE_SIZE, IMAGE_SIZE),
                          jnp.float32)
    z = jax.random.normal(k_z, (BATCH, LATENT_DIM), jnp.float32)
    eps = jax.random.normal(k_eps, (BATCH, LATENT_DIM), jnp.float32)

    z_fake, x_fake = dcae_forward(pp, x, z, eps)
    jax.block_until_ready((z_fake, x_fake))

    assert z_fake.shape == (BATCH, LATENT_DIM)
    assert x_fake.shape == (BATCH, IMAGE_CHANNEL, IMAGE_SIZE, IMAGE_SIZE)
    assert bool(jnp.all(jnp.isfinite(z_fake))) and bool(jnp.all(jnp.isfinite(x_fake)))
    print("KERNEL_OK")
</pallas_src>

<mosaic_0001>
module attributes {stable_mosaic.version = 11 : i64} {
  func.func @_mm_bn_relu_kernel(%arg0: memref<2x128xbf16, #tpu.memory_space<vmem>>, %arg1: memref<128x512xbf16, #tpu.memory_space<vmem>>, %arg2: memref<1x512xf32, #tpu.memory_space<vmem>>, %arg3: memref<1x512xf32, #tpu.memory_space<vmem>>, %arg4: memref<1x512xf32, #tpu.memory_space<vmem>>, %arg5: memref<2x512xbf16, #tpu.memory_space<vmem>>) attributes {dimension_semantics = [], scalar_prefetch = 0 : i64, scratch_operands = 0 : i64, tpu.core_type = #tpu.core_type<tc>} {
    %c0 = arith.constant 0 : index
    %c0_0 = arith.constant 0 : index
    %0 = vector.load %arg0[%c0, %c0_0] : memref<2x128xbf16, #tpu.memory_space<vmem>>, vector<2x128xbf16>
    %c0_1 = arith.constant 0 : index
    %c0_2 = arith.constant 0 : index
    %1 = vector.load %arg1[%c0_1, %c0_2] : memref<128x512xbf16, #tpu.memory_space<vmem>>, vector<128x512xbf16>
    %cst = arith.constant dense<0.000000e+00> : vector<2x512xf32>
    %2 = tpu.matmul %0, %1, %cst {dimension_numbers = #tpu.dot_dimension_numbers<[1], [0], [0], [1], [0, 0, 1, 1], [], []>} : vector<2x128xbf16>, vector<128x512xbf16>, vector<2x512xf32> -> vector<2x512xf32>
    %c0_3 = arith.constant 0 : index
    %c0_4 = arith.constant 0 : index
    %3 = vector.load %arg2[%c0_3, %c0_4] : memref<1x512xf32, #tpu.memory_space<vmem>>, vector<1x512xf32>
    %4 = vector.broadcast %3 : vector<1x512xf32> to vector<2x512xf32>
    %5 = arith.addf %2, %4 : vector<2x512xf32>
    %cst_5 = arith.constant dense<0.000000e+00> : vector<512xf32>
    %6 = vector.multi_reduction <add>, %5, %cst_5 [0] : vector<2x512xf32> to vector<512xf32>
    %7 = vector.shape_cast %6 : vector<512xf32> to vector<1x512xf32>
    %cst_6 = arith.constant 2.000000e+00 : f32
    %8 = vector.broadcast %cst_6 : f32 to vector<1x512xf32>
    %9 = arith.divf %7, %8 : vector<1x512xf32>
    %10 = vector.broadcast %9 : vector<1x512xf32> to vector<2x512xf32>
    %11 = arith.subf %5, %10 : vector<2x512xf32>
    %12 = arith.mulf %11, %11 : vector<2x512xf32>
    %cst_7 = arith.constant dense<0.000000e+00> : vector<512xf32>
    %13 = vector.multi_reduction <add>, %12, %cst_7 [0] : vector<2x512xf32> to vector<512xf32>
    %14 = vector.shape_cast %13 : vector<512xf32> to vector<1x512xf32>
    %cst_8 = arith.constant 2.000000e+00 : f32
    %15 = vector.broadcast %cst_8 : f32 to vector<1x512xf32>
    %16 = arith.divf %14, %15 : vector<1x512xf32>
    %c0_9 = arith.constant 0 : index
    %c0_10 = arith.constant 0 : index
    %17 = vector.load %arg3[%c0_9, %c0_10] : memref<1x512xf32, #tpu.memory_space<vmem>>, vector<1x512xf32>
    %cst_11 = arith.constant 9.99999974E-6 : f32
    %18 = vector.broadcast %cst_11 : f32 to vector<1x512xf32>
    %19 = arith.addf %16, %18 : vector<1x512xf32>
    %20 = math.rsqrt %19 : vector<1x512xf32>
    %21 = arith.mulf %17, %20 : vector<1x512xf32>
    %c0_12 = arith.constant 0 : index
    %c0_13 = arith.constant 0 : index
    %22 = vector.load %arg4[%c0_12, %c0_13] : memref<1x512xf32, #tpu.memory_space<vmem>>, vector<1x512xf32>
    %23 = arith.mulf %9, %21 : vector<1x512xf32>
    %24 = arith.subf %22, %23 : vector<1x512xf32>
    %25 = vector.broadcast %21 : vector<1x512xf32> to vector<2x512xf32>
    %26 = arith.mulf %5, %25 : vector<2x512xf32>
    %27 = vector.broadcast %24 : vector<1x512xf32> to vector<2x512xf32>
    %28 = arith.addf %26, %27 : vector<2x512xf32>
    %cst_14 = arith.constant 0.000000e+00 : f32
    %29 = vector.broadcast %cst_14 : f32 to vector<2x512xf32>
    %30 = arith.maximumf %28, %29 : vector<2x512xf32>
    %31 = arith.truncf %30 : vector<2x512xf32> to vector<2x512xbf16>
    %c0_15 = arith.constant 0 : index
    %c0_16 = arith.constant 0 : index
    %32 = vector.load %arg5[%c0_15, %c0_16] : memref<2x512xbf16, #tpu.memory_space<vmem>>, vector<2x512xbf16>
    tpu.vector_store %arg5[%c0_15, %c0_16], %31 {strides = array<i32>} : memref<2x512xbf16, #tpu.memory_space<vmem>>, vector<2x512xbf16>,
    return
  }
}

module attributes {stable_mosaic.version = 11 : i64} {
  func.func @_tconv4_bn_relu_kernel(%arg0: memref<32x384xbf16, #tpu.memory_space<vmem>>, %arg1: memref<24x256xbf16, #tpu.memory_space<vmem>>, %arg2: memref<24x256xbf16, #tpu.memory_space<vmem>>, %arg3: memref<18x128xbf16, #tpu.memory_space<vmem>>, %arg4: memref<384x128xbf16, #tpu.memory_space<vmem>>, %arg5: memref<256x128xbf16, #tpu.memory_space<vmem>>, %arg6: memref<256x128xbf16, #tpu.memory_space<vmem>>, %arg7: memref<128x128xbf16, #tpu.memory_space<vmem>>, %arg8: memref<1x128xf32, #tpu.memory_space<vmem>>, %arg9: memref<1x128xf32, #tpu.memory_space<vmem>>, %arg10: memref<1x128xf32, #tpu.memory_space<vmem>>, %arg11: memref<32x128xbf16, #tpu.memory_space<vmem>>, %arg12: memref<24x128xbf16, #tpu.memory_space<vmem>>, %arg13: memref<24x128xbf16, #tpu.memory_space<vmem>>, %arg14: memref<18x128xbf16, #tpu.memory_space<vmem>>) attributes {dimension_semantics = [], scalar_prefetch = 0 : i64, scratch_operands = 0 : i64, tpu.core_type = #tpu.core_type<tc>} {
    %c0 = arith.constant 0 : index
    %c0_0 = arith.constant 0 : index
    %0 = vector.load %arg0[%c0, %c0_0] : memref<32x384xbf16, #tpu.memory_space<vmem>>, vector<32x384xbf16>
    %c0_1 = arith.constant 0 : index
    %c0_2 = arith.constant 0 : index
    %1 = vector.load %arg4[%c0_1, %c0_2] : memref<384x128xbf16, #tpu.memory_space<vmem>>, vector<384x128xbf16>
    %cst = arith.constant dense<0.000000e+00> : vector<32x128xf32>
    %2 = tpu.matmul %0, %1, %cst {dimension_numbers = #tpu.dot_dimension_numbers<[1], [0], [0], [1], [0, 0, 1, 1], [], []>} : vector<32x384xbf16>, vector<384x128xbf16>, vector<32x128xf32> -> vector<32x128xf32>
    %c0_3 = arith.constant 0 : index
    %c0_4 = arith.constant 0 : index
    %3 = vector.load %arg8[%c0_3, %c0_4] : memref<1x128xf32, #tpu.memory_space<vmem>>, vector<1x128xf32>
    %4 = vector.broadcast %3 : vector<1x128xf32> to vector<32x128xf32>
    %5 = arith.addf %2, %4 : vector<32x128xf32>
    %c0_5 = arith.constant 0 : index
    %c0_6 = arith.constant 0 : index
    %6 = vector.load %arg1[%c0_5, %c0_6] : memref<24x256xbf16, #tpu.memory_space<vmem>>, vector<24x256xbf16>
    %c0_7 = arith.constant 0 : index
    %c0_8 = arith.constant 0 : index
    %7 = vector.load %arg5[%c0_7, %c0_8] : memref<256x128xbf16, #tpu.memory_space<vmem>>, vector<256x128xbf16>
    %cst_9 = arith.constant dense<0.000000e+00> : vector<24x128xf32>
    %8 = tpu.matmul %6, %7, %cst_9 {dimension_numbers = #tpu.dot_dimension_numbers<[1], [0], [0], [1], [0, 0, 1, 1], [], []>} : vector<24x256xbf16>, vector<256x128xbf16>, vector<24x128xf32> -> vector<24x128xf32>
    %c0_10 = arith.constant 0 : index
    %c0_11 = arith.constant 0 : index
    %9 = vector.load %arg8[%c0_10, %c0_11] : memref<1x128xf32, #tpu.memory_space<vmem>>, vector<1x128xf32>
    %10 = vector.broadcast %9 : vector<1x128xf32> to vector<24x128xf32>
    %11 = arith.addf %8, %10 : vector<24x128xf32>
    %c0_12 = arith.constant 0 : index
    %c0_13 = arith.constant 0 : index
    %12 = vector.load %arg2[%c0_12, %c0_13] : memref<24x256xbf16, #tpu.memory_space<vmem>>, vector<24x256xbf16>
    %c0_14 = arith.constant 0 : index
    %c0_15 = arith.constant 0 : index
    %13 = vector.load %arg6[%c0_14, %c0_15] : memref<256x128xbf16, #tpu.memory_space<vmem>>, vector<256x128xbf16>
    %cst_16 = arith.constant dense<0.000000e+00> : vector<24x128xf32>
    %14 = tpu.matmul %12, %13, %cst_16 {dimension_numbers = #tpu.dot_dimension_numbers<[1], [0], [0], [1], [0, 0, 1, 1], [], []>} : vector<24x256xbf16>, vector<256x128xbf16>, vector<24x128xf32> -> vector<24x128xf32>
    %c0_17 = arith.constant 0 : index
    %c0_18 = arith.constant 0 : index
    %15 = vector.load %arg8[%c0_17, %c0_18] : memref<1x128xf32, #tpu.memory_space<vmem>>, vector<1x128xf32>
    %16 = vector.broadcast %15 : vector<1x128xf32> to vector<24x128xf32>
    %17 = arith.addf %14, %16 : vector<24x128xf32>
    %c0_19 = arith.constant 0 : index
    %c0_20 = arith.constant 0 : index
    %18 = vector.load %arg3[%c0_19, %c0_20] : memref<18x128xbf16, #tpu.memory_space<vmem>>, vector<18x128xbf16>
    %c0_21 = arith.constant 0 : index
    %c0_22 = arith.constant 0 : index
    %19 = vector.load %arg7[%c0_21, %c0_22] : memref<128x128xbf16, #tpu.memory_space<vmem>>, vector<128x128xbf16>
    %cst_23 = arith.constant dense<0.000000e+00> : vector<18x128xf32>
    %20 = tpu.matmul %18, %19, %cst_23 {dimension_numbers = #tpu.dot_dimension_numbers<[1], [0], [0], [1], [0, 0, 1, 1], [], []>} : vector<18x128xbf16>, vector<128x128xbf16>, vector<18x128xf32> -> vector<18x128xf32>
    %c0_24 = arith.constant 0 : index
    %c0_25 = arith.constant 0 : index
    %21 = vector.load %arg8[%c0_24, %c0_25] : memref<1x128xf32, #tpu.memory_space<vmem>>, vector<1x128xf32>
    %22 = vector.broadcast %21 : vector<1x128xf32> to vector<18x128xf32>
    %23 = arith.addf %20, %22 : vector<18x128xf32>
    %cst_26 = arith.constant dense<0.000000e+00> : vector<128xf32>
    %24 = vector.multi_reduction <add>, %5, %cst_26 [0] : vector<32x128xf32> to vector<128xf32>
    %25 = vector.shape_cast %24 : vector<128xf32> to vector<1x128xf32>
    %cst_27 = arith.constant 0.000000e+00 : f32
    %26 = vector.broadcast %cst_27 : f32 to vector<1x128xf32>
    %27 = arith.addf %26, %25 : vector<1x128xf32>
    %cst_28 = arith.constant dense<0.000000e+00> : vector<128xf32>
    %28 = vector.multi_reduction <add>, %11, %cst_28 [0] : vector<24x128xf32> to vector<128xf32>
    %29 = vector.shape_cast %28 : vector<128xf32> to vector<1x128xf32>
    %30 = arith.addf %27, %29 : vector<1x128xf32>
    %cst_29 = arith.constant dense<0.000000e+00> : vector<128xf32>
    %31 = vector.multi_reduction <add>, %17, %cst_29 [0] : vector<24x128xf32> to vector<128xf32>
    %32 = vector.shape_cast %31 : vector<128xf32> to vector<1x128xf32>
    %33 = arith.addf %30, %32 : vector<1x128xf32>
    %cst_30 = arith.constant dense<0.000000e+00> : vector<128xf32>
    %34 = vector.multi_reduction <add>, %23, %cst_30 [0] : vector<18x128xf32> to vector<128xf32>
    %35 = vector.shape_cast %34 : vector<128xf32> to vector<1x128xf32>
    %36 = arith.addf %33, %35 : vector<1x128xf32>
    %cst_31 = arith.constant 9.800000e+01 : f32
    %37 = vector.broadcast %cst_31 : f32 to vector<1x128xf32>
    %38 = arith.divf %36, %37 : vector<1x128xf32>
    %39 = vector.broadcast %38 : vector<1x128xf32> to vector<32x128xf32>
    %40 = arith.subf %5, %39 : vector<32x128xf32>
    %41 = arith.mulf %40, %40 : vector<32x128xf32>
    %cst_32 = arith.constant dense<0.000000e+00> : vector<128xf32>
    %42 = vector.multi_reduction <add>, %41, %cst_32 [0] : vector<32x128xf32> to vector<128xf32>
    %43 = vector.shape_cast %42 : vector<128xf32> to vector<1x128xf32>
    %cst_33 = arith.constant 0.000000e+00 : f32
    %44 = vector.broadcast %cst_33 : f32 to vector<1x128xf32>
    %45 = arith.addf %44, %43 : vector<1x128xf32>
    %46 = vector.broadcast %38 : vector<1x128xf32> to vector<24x128xf32>
    %47 = arith.subf %11, %46 : vector<24x128xf32>
    %48 = arith.mulf %47, %47 : vector<24x128xf32>
    %cst_34 = arith.constant dense<0.000000e+00> : vector<128xf32>
    %49 = vector.multi_reduction <add>, %48, %cst_34 [0] : vector<24x128xf32> to vector<128xf32>
    %50 = vector.shape_cast %49 : vector<128xf32> to vector<1x128xf32>
    %51 = arith.addf %45, %50 : vector<1x128xf32>
    %52 = vector.broadcast %38 : vector<1x128xf32> to vector<24x128xf32>
    %53 = arith.subf %17, %52 : vector<24x128xf32>
    %54 = arith.mulf %53, %53 : vector<24x128xf32>
    %cst_35 = arith.constant dense<0.000000e+00> : vector<128xf32>
    %55 = vector.multi_reduction <add>, %54, %cst_35 [0] : vector<24x128xf32> to vector<128xf32>
    %56 = vector.shape_cast %55 : vector<128xf32> to vector<1x128xf32>
    %57 = arith.addf %51, %56 : vector<1x128xf32>
    %58 = vector.broadcast %38 : vector<1x128xf32> to vector<18x128xf32>
    %59 = arith.subf %23, %58 : vector<18x128xf32>
    %60 = arith.mulf %59, %59 : vector<18x128xf32>
    %cst_36 = arith.constant dense<0.000000e+00> : vector<128xf32>
    %61 = vector.multi_reduction <add>, %60, %cst_36 [0] : vector<18x128xf32> to vector<128xf32>
    %62 = vector.shape_cast %61 : vector<128xf32> to vector<1x128xf32>
    %63 = arith.addf %57, %62 : vector<1x128xf32>
    %cst_37 = arith.constant 9.800000e+01 : f32
    %64 = vector.broadcast %cst_37 : f32 to vector<1x128xf32>
    %65 = arith.divf %63, %64 : vector<1x128xf32>
    %c0_38 = arith.constant 0 : index
    %c0_39 = arith.constant 0 : index
    %66 = vector.load %arg9[%c0_38, %c0_39] : memref<1x128xf32, #tpu.memory_space<vmem>>, vector<1x128xf32>
    %cst_40 = arith.constant 9.99999974E-6 : f32
    %67 = vector.broadcast %cst_40 : f32 to vector<1x128xf32>
    %68 = arith.addf %65, %67 : vector<1x128xf32>
    %69 = math.rsqrt %68 : vector<1x128xf32>
    %70 = arith.mulf %66, %69 : vector<1x128xf32>
    %c0_41 = arith.constant 0 : index
    %c0_42 = arith.constant 0 : index
    %71 = vector.load %arg10[%c0_41, %c0_42] : memref<1x128xf32, #tpu.memory_space<vmem>>, vector<1x128xf32>
    %72 = arith.mulf %38, %70 : vector<1x128xf32>
    %73 = arith.subf %71, %72 : vector<1x128xf32>
    %74 = vector.broadcast %70 : vector<1x128xf32> to vector<32x128xf32>
    %75 = arith.mulf %5, %74 : vector<32x128xf32>
    %76 = vector.broadcast %73 : vector<1x128xf32> to vector<32x128xf32>
    %77 = arith.addf %75, %76 : vector<32x128xf32>
    %cst_43 = arith.constant 0.000000e+00 : f32
    %78 = vector.broadcast %cst_43 : f32 to vector<32x128xf32>
    %79 = arith.maximumf %77, %78 : vector<32x128xf32>
    %80 = arith.truncf %79 : vector<32x128xf32> to vector<32x128xbf16>
    %c0_44 = arith.constant 0 : index
    %c0_45 = arith.constant 0 : index
    %81 = vector.load %arg11[%c0_44, %c0_45] : memref<32x128xbf16, #tpu.memory_space<vmem>>, vector<32x128xbf16>
    tpu.vector_store %arg11[%c0_44, %c0_45], %80 {strides = array<i32>} : memref<32x128xbf16, #tpu.memory_space<vmem>>, vector<32x128xbf16>,
    %82 = vector.broadcast %70 : vector<1x128xf32> to vector<24x128xf32>
    %83 = arith.mulf %11, %82 : vector<24x128xf32>
    %84 = vector.broadcast %73 : vector<1x128xf32> to vector<24x128xf32>
    %85 = arith.addf %83, %84 : vector<24x128xf32>
    %cst_46 = arith.constant 0.000000e+00 : f32
    %86 = vector.broadcast %cst_46 : f32 to vector<24x128xf32>
    %87 = arith.maximumf %85, %86 : vector<24x128xf32>
    %88 = arith.truncf %87 : vector<24x128xf32> to vector<24x128xbf16>
    %c0_47 = arith.constant 0 : index
    %c0_48 = arith.constant 0 : index
    %89 = vector.load %arg12[%c0_47, %c0_48] : memref<24x128xbf16, #tpu.memory_space<vmem>>, vector<24x128xbf16>
    tpu.vector_store %arg12[%c0_47, %c0_48], %88 {strides = array<i32>} : memref<24x128xbf16, #tpu.memory_space<vmem>>, vector<24x128xbf16>,
    %90 = vector.broadcast %70 : vector<1x128xf32> to vector<24x128xf32>
    %91 = arith.mulf %17, %90 : vector<24x128xf32>
    %92 = vector.broadcast %73 : vector<1x128xf32> to vector<24x128xf32>
    %93 = arith.addf %91, %92 : vector<24x128xf32>
    %cst_49 = arith.constant 0.000000e+00 : f32
    %94 = vector.broadcast %cst_49 : f32 to vector<24x128xf32>
    %95 = arith.maximumf %93, %94 : vector<24x128xf32>
    %96 = arith.truncf %95 : vector<24x128xf32> to vector<24x128xbf16>
    %c0_50 = arith.constant 0 : index
    %c0_51 = arith.constant 0 : index
    %97 = vector.load %arg13[%c0_50, %c0_51] : memref<24x128xbf16, #tpu.memory_space<vmem>>, vector<24x128xbf16>
    tpu.vector_store %arg13[%c0_50, %c0_51], %96 {strides = array<i32>} : memref<24x128xbf16, #tpu.memory_space<vmem>>, vector<24x128xbf16>,
    %98 = vector.broadcast %70 : vector<1x128xf32> to vector<18x128xf32>
    %99 = arith.mulf %23, %98 : vector<18x128xf32>
    %100 = vector.broadcast %73 : vector<1x128xf32> to vector<18x128xf32>
    %101 = arith.addf %99, %100 : vector<18x128xf32>
    %cst_52 = arith.constant 0.000000e+00 : f32
    %102 = vector.broadcast %cst_52 : f32 to vector<18x128xf32>
    %103 = arith.maximumf %101, %102 : vector<18x128xf32>
    %104 = arith.truncf %103 : vector<18x128xf32> to vector<18x128xbf16>
    %c0_53 = arith.constant 0 : index
    %c0_54 = arith.constant 0 : index
    %105 = vector.load %arg14[%c0_53, %c0_54] : memref<18x128xbf16, #tpu.memory_space<vmem>>, vector<18x128xbf16>
    tpu.vector_store %arg14[%c0_53, %c0_54], %104 {strides = array<i32>} : memref<18x128xbf16, #tpu.memory_space<vmem>>, vector<18x128xbf16>,
    return
  }
}

module attributes {stable_mosaic.version = 11 : i64} {
  func.func @_tconv4_bn_relu_kernel(%arg0: memref<98x256xbf16, #tpu.memory_space<vmem>>, %arg1: memref<98x128xbf16, #tpu.memory_space<vmem>>, %arg2: memref<98x128xbf16, #tpu.memory_space<vmem>>, %arg3: memref<98x128xbf16, #tpu.memory_space<vmem>>, %arg4: memref<256x128xbf16, #tpu.memory_space<vmem>>, %arg5: memref<128x128xbf16, #tpu.memory_space<vmem>>, %arg6: memref<128x128xbf16, #tpu.memory_space<vmem>>, %arg7: memref<128x128xbf16, #tpu.memory_space<vmem>>, %arg8: memref<1x128xf32, #tpu.memory_space<vmem>>, %arg9: memref<1x128xf32, #tpu.memory_space<vmem>>, %arg10: memref<1x128xf32, #tpu.memory_space<vmem>>, %arg11: memref<98x128xbf16, #tpu.memory_space<vmem>>, %arg12: memref<98x128xbf16, #tpu.memory_space<vmem>>, %arg13: memref<98x128xbf16, #tpu.memory_space<vmem>>, %arg14: memref<98x128xbf16, #tpu.memory_space<vmem>>) attributes {dimension_semantics = [], scalar_prefetch = 0 : i64, scratch_operands = 0 : i64, tpu.core_type = #tpu.core_type<tc>} {
    %c0 = arith.constant 0 : index
    %c0_0 = arith.constant 0 : index
    %0 = vector.load %arg0[%c0, %c0_0] : memref<98x256xbf16, #tpu.memory_space<vmem>>, vector<98x256xbf16>
    %c0_1 = arith.constant 0 : index
    %c0_2 = arith.constant 0 : index
    %1 = vector.load %arg4[%c0_1, %c0_2] : memref<256x128xbf16, #tpu.memory_space<vmem>>, vector<256x128xbf16>
    %cst = arith.constant dense<0.000000e+00> : vector<98x128xf32>
    %2 = tpu.matmul %0, %1, %cst {dimension_numbers = #tpu.dot_dimension_numbers<[1], [0], [0], [1], [0, 0, 1, 1], [], []>} : vector<98x256xbf16>, vector<256x128xbf16>, vector<98x128xf32> -> vector<98x128xf32>
    %c0_3 = arith.constant 0 : index
    %c0_4 = arith.constant 0 : index
    %3 = vector.load %arg8[%c0_3, %c0_4] : memref<1x128xf32, #tpu.memory_space<vmem>>, vector<1x128xf32>
    %4 = vector.broadcast %3 : vector<1x128xf32> to vector<98x128xf32>
    %5 = arith.addf %2, %4 : vector<98x128xf32>
    %c0_5 = arith.constant 0 : index
    %c0_6 = arith.constant 0 : index
    %6 = vector.load %arg1[%c0_5, %c0_6] : memref<98x128xbf16, #tpu.memory_space<vmem>>, vector<98x128xbf16>
    %c0_7 = arith.constant 0 : index
    %c0_8 = arith.constant 0 : index
    %7 = vector.load %arg5[%c0_7, %c0_8] : memref<128x128xbf16, #tpu.memory_space<vmem>>, vector<128x128xbf16>
    %cst_9 = arith.constant dense<0.000000e+00> : vector<98x128xf32>
    %8 = tpu.matmul %6, %7, %cst_9 {dimension_numbers = #tpu.dot_dimension_numbers<[1], [0], [0], [1], [0, 0, 1, 1], [], []>} : vector<98x128xbf16>, vector<128x128xbf16>, vector<98x128xf32> -> vector<98x128xf32>
    %c0_10 = arith.constant 0 : index
    %c0_11 = arith.constant 0 : index
    %9 = vector.load %arg8[%c0_10, %c0_11] : memref<1x128xf32, #tpu.memory_space<vmem>>, vector<1x128xf32>
    %10 = vector.broadcast %9 : vector<1x128xf32> to vector<98x128xf32>
    %11 = arith.addf %8, %10 : vector<98x128xf32>
    %c0_12 = arith.constant 0 : index
    %c0_13 = arith.constant 0 : index
    %12 = vector.load %arg2[%c0_12, %c0_13] : memref<98x128xbf16, #tpu.memory_space<vmem>>, vector<98x128xbf16>
    %c0_14 = arith.constant 0 : index
    %c0_15 = arith.constant 0 : index
    %13 = vector.load %arg6[%c0_14, %c0_15] : memref<128x128xbf16, #tpu.memory_space<vmem>>, vector<128x128xbf16>
    %cst_16 = arith.constant dense<0.000000e+00> : vector<98x128xf32>
    %14 = tpu.matmul %12, %13, %cst_16 {dimension_numbers = #tpu.dot_dimension_numbers<[1], [0], [0], [1], [0, 0, 1, 1], [], []>} : vector<98x128xbf16>, vector<128x128xbf16>, vector<98x128xf32> -> vector<98x128xf32>
    %c0_17 = arith.constant 0 : index
    %c0_18 = arith.constant 0 : index
    %15 = vector.load %arg8[%c0_17, %c0_18] : memref<1x128xf32, #tpu.memory_space<vmem>>, vector<1x128xf32>
    %16 = vector.broadcast %15 : vector<1x128xf32> to vector<98x128xf32>
    %17 = arith.addf %14, %16 : vector<98x128xf32>
    %c0_19 = arith.constant 0 : index
    %c0_20 = arith.constant 0 : index
    %18 = vector.load %arg3[%c0_19, %c0_20] : memref<98x128xbf16, #tpu.memory_space<vmem>>, vector<98x128xbf16>
    %c0_21 = arith.constant 0 : index
    %c0_22 = arith.constant 0 : index
    %19 = vector.load %arg7[%c0_21, %c0_22] : memref<128x128xbf16, #tpu.memory_space<vmem>>, vector<128x128xbf16>
    %cst_23 = arith.constant dense<0.000000e+00> : vector<98x128xf32>
    %20 = tpu.matmul %18, %19, %cst_23 {dimension_numbers = #tpu.dot_dimension_numbers<[1], [0], [0], [1], [0, 0, 1, 1], [], []>} : vector<98x128xbf16>, vector<128x128xbf16>, vector<98x128xf32> -> vector<98x128xf32>
    %c0_24 = arith.constant 0 : index
    %c0_25 = arith.constant 0 : index
    %21 = vector.load %arg8[%c0_24, %c0_25] : memref<1x128xf32, #tpu.memory_space<vmem>>, vector<1x128xf32>
    %22 = vector.broadcast %21 : vector<1x128xf32> to vector<98x128xf32>
    %23 = arith.addf %20, %22 : vector<98x128xf32>
    %cst_26 = arith.constant dense<0.000000e+00> : vector<128xf32>
    %24 = vector.multi_reduction <add>, %5, %cst_26 [0] : vector<98x128xf32> to vector<128xf32>
    %25 = vector.shape_cast %24 : vector<128xf32> to vector<1x128xf32>
    %cst_27 = arith.constant 0.000000e+00 : f32
    %26 = vector.broadcast %cst_27 : f32 to vector<1x128xf32>
    %27 = arith.addf %26, %25 : vector<1x128xf32>
    %cst_28 = arith.constant dense<0.000000e+00> : vector<128xf32>
    %28 = vector.multi_reduction <add>, %11, %cst_28 [0] : vector<98x128xf32> to vector<128xf32>
    %29 = vector.shape_cast %28 : vector<128xf32> to vector<1x128xf32>
    %30 = arith.addf %27, %29 : vector<1x128xf32>
    %cst_29 = arith.constant dense<0.000000e+00> : vector<128xf32>
    %31 = vector.multi_reduction <add>, %17, %cst_29 [0] : vector<98x128xf32> to vector<128xf32>
    %32 = vector.shape_cast %31 : vector<128xf32> to vector<1x128xf32>
    %33 = arith.addf %30, %32 : vector<1x128xf32>
    %cst_30 = arith.constant dense<0.000000e+00> : vector<128xf32>
    %34 = vector.multi_reduction <add>, %23, %cst_30 [0] : vector<98x128xf32> to vector<128xf32>
    %35 = vector.shape_cast %34 : vector<128xf32> to vector<1x128xf32>
    %36 = arith.addf %33, %35 : vector<1x128xf32>
    %cst_31 = arith.constant 3.920000e+02 : f32
    %37 = vector.broadcast %cst_31 : f32 to vector<1x128xf32>
    %38 = arith.divf %36, %37 : vector<1x128xf32>
    %39 = vector.broadcast %38 : vector<1x128xf32> to vector<98x128xf32>
    %40 = arith.subf %5, %39 : vector<98x128xf32>
    %41 = arith.mulf %40, %40 : vector<98x128xf32>
    %cst_32 = arith.constant dense<0.000000e+00> : vector<128xf32>
    %42 = vector.multi_reduction <add>, %41, %cst_32 [0] : vector<98x128xf32> to vector<128xf32>
    %43 = vector.shape_cast %42 : vector<128xf32> to vector<1x128xf32>
    %cst_33 = arith.constant 0.000000e+00 : f32
    %44 = vector.broadcast %cst_33 : f32 to vector<1x128xf32>
    %45 = arith.addf %44, %43 : vector<1x128xf32>
    %46 = vector.broadcast %38 : vector<1x128xf32> to vector<98x128xf32>
    %47 = arith.subf %11, %46 : vector<98x128xf32>
    %48 = arith.mulf %47, %47 : vector<98x128xf32>
    %cst_34 = arith.constant dense<0.000000e+00> : vector<128xf32>
    %49 = vector.multi_reduction <add>, %48, %cst_34 [0] : vector<98x128xf32> to vector<128xf32>
    %50 = vector.shape_cast %49 : vector<128xf32> to vector<1x128xf32>
    %51 = arith.addf %45, %50 : vector<1x128xf32>
    %52 = vector.broadcast %38 : vector<1x128xf32> to vector<98x128xf32>
    %53 = arith.subf %17, %52 : vector<98x128xf32>
    %54 = arith.mulf %53, %53 : vector<98x128xf32>
    %cst_35 = arith.constant dense<0.000000e+00> : vector<128xf32>
    %55 = vector.multi_reduction <add>, %54, %cst_35 [0] : vector<98x128xf32> to vector<128xf32>
    %56 = vector.shape_cast %55 : vector<128xf32> to vector<1x128xf32>
    %57 = arith.addf %51, %56 : vector<1x128xf32>
    %58 = vector.broadcast %38 : vector<1x128xf32> to vector<98x128xf32>
    %59 = arith.subf %23, %58 : vector<98x128xf32>
    %60 = arith.mulf %59, %59 : vector<98x128xf32>
    %cst_36 = arith.constant dense<0.000000e+00> : vector<128xf32>
    %61 = vector.multi_reduction <add>, %60, %cst_36 [0] : vector<98x128xf32> to vector<128xf32>
    %62 = vector.shape_cast %61 : vector<128xf32> to vector<1x128xf32>
    %63 = arith.addf %57, %62 : vector<1x128xf32>
    %cst_37 = arith.constant 3.920000e+02 : f32
    %64 = vector.broadcast %cst_37 : f32 to vector<1x128xf32>
    %65 = arith.divf %63, %64 : vector<1x128xf32>
    %c0_38 = arith.constant 0 : index
    %c0_39 = arith.constant 0 : index
    %66 = vector.load %arg9[%c0_38, %c0_39] : memref<1x128xf32, #tpu.memory_space<vmem>>, vector<1x128xf32>
    %cst_40 = arith.constant 9.99999974E-6 : f32
    %67 = vector.broadcast %cst_40 : f32 to vector<1x128xf32>
    %68 = arith.addf %65, %67 : vector<1x128xf32>
    %69 = math.rsqrt %68 : vector<1x128xf32>
    %70 = arith.mulf %66, %69 : vector<1x128xf32>
    %c0_41 = arith.constant 0 : index
    %c0_42 = arith.constant 0 : index
    %71 = vector.load %arg10[%c0_41, %c0_42] : memref<1x128xf32, #tpu.memory_space<vmem>>, vector<1x128xf32>
    %72 = arith.mulf %38, %70 : vector<1x128xf32>
    %73 = arith.subf %71, %72 : vector<1x128xf32>
    %74 = vector.broadcast %70 : vector<1x128xf32> to vector<98x128xf32>
    %75 = arith.mulf %5, %74 : vector<98x128xf32>
    %76 = vector.broadcast %73 : vector<1x128xf32> to vector<98x128xf32>
    %77 = arith.addf %75, %76 : vector<98x128xf32>
    %cst_43 = arith.constant 0.000000e+00 : f32
    %78 = vector.broadcast %cst_43 : f32 to vector<98x128xf32>
    %79 = arith.maximumf %77, %78 : vector<98x128xf32>
    %80 = arith.truncf %79 : vector<98x128xf32> to vector<98x128xbf16>
    %c0_44 = arith.constant 0 : index
    %c0_45 = arith.constant 0 : index
    %81 = vector.load %arg11[%c0_44, %c0_45] : memref<98x128xbf16, #tpu.memory_space<vmem>>, vector<98x128xbf16>
    tpu.vector_store %arg11[%c0_44, %c0_45], %80 {strides = array<i32>} : memref<98x128xbf16, #tpu.memory_space<vmem>>, vector<98x128xbf16>,
    %82 = vector.broadcast %70 : vector<1x128xf32> to vector<98x128xf32>
    %83 = arith.mulf %11, %82 : vector<98x128xf32>
    %84 = vector.broadcast %73 : vector<1x128xf32> to vector<98x128xf32>
    %85 = arith.addf %83, %84 : vector<98x128xf32>
    %cst_46 = arith.constant 0.000000e+00 : f32
    %86 = vector.broadcast %cst_46 : f32 to vector<98x128xf32>
    %87 = arith.maximumf %85, %86 : vector<98x128xf32>
    %88 = arith.truncf %87 : vector<98x128xf32> to vector<98x128xbf16>
    %c0_47 = arith.constant 0 : index
    %c0_48 = arith.constant 0 : index
    %89 = vector.load %arg12[%c0_47, %c0_48] : memref<98x128xbf16, #tpu.memory_space<vmem>>, vector<98x128xbf16>
    tpu.vector_store %arg12[%c0_47, %c0_48], %88 {strides = array<i32>} : memref<98x128xbf16, #tpu.memory_space<vmem>>, vector<98x128xbf16>,
    %90 = vector.broadcast %70 : vector<1x128xf32> to vector<98x128xf32>
    %91 = arith.mulf %17, %90 : vector<98x128xf32>
    %92 = vector.broadcast %73 : vector<1x128xf32> to vector<98x128xf32>
    %93 = arith.addf %91, %92 : vector<98x128xf32>
    %cst_49 = arith.constant 0.000000e+00 : f32
    %94 = vector.broadcast %cst_49 : f32 to vector<98x128xf32>
    %95 = arith.maximumf %93, %94 : vector<98x128xf32>
    %96 = arith.truncf %95 : vector<98x128xf32> to vector<98x128xbf16>
    %c0_50 = arith.constant 0 : index
    %c0_51 = arith.constant 0 : index
    %97 = vector.load %arg13[%c0_50, %c0_51] : memref<98x128xbf16, #tpu.memory_space<vmem>>, vector<98x128xbf16>
    tpu.vector_store %arg13[%c0_50, %c0_51], %96 {strides = array<i32>} : memref<98x128xbf16, #tpu.memory_space<vmem>>, vector<98x128xbf16>,
    %98 = vector.broadcast %70 : vector<1x128xf32> to vector<98x128xf32>
    %99 = arith.mulf %23, %98 : vector<98x128xf32>
    %100 = vector.broadcast %73 : vector<1x128xf32> to vector<98x128xf32>
    %101 = arith.addf %99, %100 : vector<98x128xf32>
    %cst_52 = arith.constant 0.000000e+00 : f32
    %102 = vector.broadcast %cst_52 : f32 to vector<98x128xf32>
    %103 = arith.maximumf %101, %102 : vector<98x128xf32>
    %104 = arith.truncf %103 : vector<98x128xf32> to vector<98x128xbf16>
    %c0_53 = arith.constant 0 : index
    %c0_54 = arith.constant 0 : index
    %105 = vector.load %arg14[%c0_53, %c0_54] : memref<98x128xbf16, #tpu.memory_space<vmem>>, vector<98x128xbf16>
    tpu.vector_store %arg14[%c0_53, %c0_54], %104 {strides = array<i32>} : memref<98x128xbf16, #tpu.memory_space<vmem>>, vector<98x128xbf16>,
    return
  }
}

module attributes {stable_mosaic.version = 11 : i64} {
  func.func @_tconv4_tanh_kernel(%arg0: memref<392x128xbf16, #tpu.memory_space<vmem>>, %arg1: memref<392x128xbf16, #tpu.memory_space<vmem>>, %arg2: memref<392x128xbf16, #tpu.memory_space<vmem>>, %arg3: memref<392x128xbf16, #tpu.memory_space<vmem>>, %arg4: memref<128x128xbf16, #tpu.memory_space<vmem>>, %arg5: memref<128x128xbf16, #tpu.memory_space<vmem>>, %arg6: memref<128x128xbf16, #tpu.memory_space<vmem>>, %arg7: memref<128x128xbf16, #tpu.memory_space<vmem>>, %arg8: memref<1x128xf32, #tpu.memory_space<vmem>>, %arg9: memref<392x128xf32, #tpu.memory_space<vmem>>, %arg10: memref<392x128xf32, #tpu.memory_space<vmem>>, %arg11: memref<392x128xf32, #tpu.memory_space<vmem>>, %arg12: memref<392x128xf32, #tpu.memory_space<vmem>>) attributes {dimension_semantics = [], scalar_prefetch = 0 : i64, scratch_operands = 0 : i64, tpu.core_type = #tpu.core_type<tc>} {
    %c0 = arith.constant 0 : index
    %c0_0 = arith.constant 0 : index
    %0 = vector.load %arg0[%c0, %c0_0] : memref<392x128xbf16, #tpu.memory_space<vmem>>, vector<392x128xbf16>
    %c0_1 = arith.constant 0 : index
    %c0_2 = arith.constant 0 : index
    %1 = vector.load %arg4[%c0_1, %c0_2] : memref<128x128xbf16, #tpu.memory_space<vmem>>, vector<128x128xbf16>
    %cst = arith.constant dense<0.000000e+00> : vector<392x128xf32>
    %2 = tpu.matmul %0, %1, %cst {dimension_numbers = #tpu.dot_dimension_numbers<[1], [0], [0], [1], [0, 0, 1, 1], [], []>} : vector<392x128xbf16>, vector<128x128xbf16>, vector<392x128xf32> -> vector<392x128xf32>
    %c0_3 = arith.constant 0 : index
    %c0_4 = arith.constant 0 : index
    %3 = vector.load %arg8[%c0_3, %c0_4] : memref<1x128xf32, #tpu.memory_space<vmem>>, vector<1x128xf32>
    %4 = vector.broadcast %3 : vector<1x128xf32> to vector<392x128xf32>
    %5 = arith.addf %2, %4 : vector<392x128xf32>
    %6 = math.tanh %5 : vector<392x128xf32>
    %c0_5 = arith.constant 0 : index
    %c0_6 = arith.constant 0 : index
    %7 = vector.load %arg9[%c0_5, %c0_6] : memref<392x128xf32, #tpu.memory_space<vmem>>, vector<392x128xf32>
    tpu.vector_store %arg9[%c0_5, %c0_6], %6 {strides = array<i32>} : memref<392x128xf32, #tpu.memory_space<vmem>>, vector<392x128xf32>,
    %c0_7 = arith.constant 0 : index
    %c0_8 = arith.constant 0 : index
    %8 = vector.load %arg1[%c0_7, %c0_8] : memref<392x128xbf16, #tpu.memory_space<vmem>>, vector<392x128xbf16>
    %c0_9 = arith.constant 0 : index
    %c0_10 = arith.constant 0 : index
    %9 = vector.load %arg5[%c0_9, %c0_10] : memref<128x128xbf16, #tpu.memory_space<vmem>>, vector<128x128xbf16>
    %cst_11 = arith.constant dense<0.000000e+00> : vector<392x128xf32>
    %10 = tpu.matmul %8, %9, %cst_11 {dimension_numbers = #tpu.dot_dimension_numbers<[1], [0], [0], [1], [0, 0, 1, 1], [], []>} : vector<392x128xbf16>, vector<128x128xbf16>, vector<392x128xf32> -> vector<392x128xf32>
    %c0_12 = arith.constant 0 : index
    %c0_13 = arith.constant 0 : index
    %11 = vector.load %arg8[%c0_12, %c0_13] : memref<1x128xf32, #tpu.memory_space<vmem>>, vector<1x128xf32>
    %12 = vector.broadcast %11 : vector<1x128xf32> to vector<392x128xf32>
    %13 = arith.addf %10, %12 : vector<392x128xf32>
    %14 = math.tanh %13 : vector<392x128xf32>
    %c0_14 = arith.constant 0 : index
    %c0_15 = arith.constant 0 : index
    %15 = vector.load %arg10[%c0_14, %c0_15] : memref<392x128xf32, #tpu.memory_space<vmem>>, vector<392x128xf32>
    tpu.vector_store %arg10[%c0_14, %c0_15], %14 {strides = array<i32>} : memref<392x128xf32, #tpu.memory_space<vmem>>, vector<392x128xf32>,
    %c0_16 = arith.constant 0 : index
    %c0_17 = arith.constant 0 : index
    %16 = vector.load %arg2[%c0_16, %c0_17] : memref<392x128xbf16, #tpu.memory_space<vmem>>, vector<392x128xbf16>
    %c0_18 = arith.constant 0 : index
    %c0_19 = arith.constant 0 : index
    %17 = vector.load %arg6[%c0_18, %c0_19] : memref<128x128xbf16, #tpu.memory_space<vmem>>, vector<128x128xbf16>
    %cst_20 = arith.constant dense<0.000000e+00> : vector<392x128xf32>
    %18 = tpu.matmul %16, %17, %cst_20 {dimension_numbers = #tpu.dot_dimension_numbers<[1], [0], [0], [1], [0, 0, 1, 1], [], []>} : vector<392x128xbf16>, vector<128x128xbf16>, vector<392x128xf32> -> vector<392x128xf32>
    %c0_21 = arith.constant 0 : index
    %c0_22 = arith.constant 0 : index
    %19 = vector.load %arg8[%c0_21, %c0_22] : memref<1x128xf32, #tpu.memory_space<vmem>>, vector<1x128xf32>
    %20 = vector.broadcast %19 : vector<1x128xf32> to vector<392x128xf32>
    %21 = arith.addf %18, %20 : vector<392x128xf32>
    %22 = math.tanh %21 : vector<392x128xf32>
    %c0_23 = arith.constant 0 : index
    %c0_24 = arith.constant 0 : index
    %23 = vector.load %arg11[%c0_23, %c0_24] : memref<392x128xf32, #tpu.memory_space<vmem>>, vector<392x128xf32>
    tpu.vector_store %arg11[%c0_23, %c0_24], %22 {strides = array<i32>} : memref<392x128xf32, #tpu.memory_space<vmem>>, vector<392x128xf32>,
    %c0_25 = arith.constant 0 : index
    %c0_26 = arith.constant 0 : index
    %24 = vector.load %arg3[%c0_25, %c0_26] : memref<392x128xbf16, #tpu.memory_space<vmem>>, vector<392x128xbf16>
    %c0_27 = arith.constant 0 : index
    %c0_28 = arith.constant 0 : index
    %25 = vector.load %arg7[%c0_27, %c0_28] : memref<128x128xbf16, #tpu.memory_space<vmem>>, vector<128x128xbf16>
    %cst_29 = arith.constant dense<0.000000e+00> : vector<392x128xf32>
    %26 = tpu.matmul %24, %25, %cst_29 {dimension_numbers = #tpu.dot_dimension_numbers<[1], [0], [0], [1], [0, 0, 1, 1], [], []>} : vector<392x128xbf16>, vector<128x128xbf16>, vector<392x128xf32> -> vector<392x128xf32>
    %c0_30 = arith.constant 0 : index
    %c0_31 = arith.constant 0 : index
    %27 = vector.load %arg8[%c0_30, %c0_31] : memref<1x128xf32, #tpu.memory_space<vmem>>, vector<1x128xf32>
    %28 = vector.broadcast %27 : vector<1x128xf32> to vector<392x128xf32>
    %29 = arith.addf %26, %28 : vector<392x128xf32>
    %30 = math.tanh %29 : vector<392x128xf32>
    %c0_32 = arith.constant 0 : index
    %c0_33 = arith.constant 0 : index
    %31 = vector.load %arg12[%c0_32, %c0_33] : memref<392x128xf32, #tpu.memory_space<vmem>>, vector<392x128xf32>
    tpu.vector_store %arg12[%c0_32, %c0_33], %30 {strides = array<i32>} : memref<392x128xf32, #tpu.memory_space<vmem>>, vector<392x128xf32>,
    return
  }
}

module attributes {stable_mosaic.version = 11 : i64} {
  func.func @_mm_bn_relu_kernel(%arg0: memref<392x128xbf16, #tpu.memory_space<vmem>>, %arg1: memref<128x128xbf16, #tpu.memory_space<vmem>>, %arg2: memref<1x128xf32, #tpu.memory_space<vmem>>, %arg3: memref<1x128xf32, #tpu.memory_space<vmem>>, %arg4: memref<1x128xf32, #tpu.memory_space<vmem>>, %arg5: memref<392x128xbf16, #tpu.memory_space<vmem>>) attributes {dimension_semantics = [], scalar_prefetch = 0 : i64, scratch_operands = 0 : i64, tpu.core_type = #tpu.core_type<tc>} {
    %c0 = arith.constant 0 : index
    %c0_0 = arith.constant 0 : index
    %0 = vector.load %arg0[%c0, %c0_0] : memref<392x128xbf16, #tpu.memory_space<vmem>>, vector<392x128xbf16>
    %c0_1 = arith.constant 0 : index
    %c0_2 = arith.constant 0 : index
    %1 = vector.load %arg1[%c0_1, %c0_2] : memref<128x128xbf16, #tpu.memory_space<vmem>>, vector<128x128xbf16>
    %cst = arith.constant dense<0.000000e+00> : vector<392x128xf32>
    %2 = tpu.matmul %0, %1, %cst {dimension_numbers = #tpu.dot_dimension_numbers<[1], [0], [0], [1], [0, 0, 1, 1], [], []>} : vector<392x128xbf16>, vector<128x128xbf16>, vector<392x128xf32> -> vector<392x128xf32>
    %c0_3 = arith.constant 0 : index
    %c0_4 = arith.constant 0 : index
    %3 = vector.load %arg2[%c0_3, %c0_4] : memref<1x128xf32, #tpu.memory_space<vmem>>, vector<1x128xf32>
    %4 = vector.broadcast %3 : vector<1x128xf32> to vector<392x128xf32>
    %5 = arith.addf %2, %4 : vector<392x128xf32>
    %cst_5 = arith.constant dense<0.000000e+00> : vector<128xf32>
    %6 = vector.multi_reduction <add>, %5, %cst_5 [0] : vector<392x128xf32> to vector<128xf32>
    %7 = vector.shape_cast %6 : vector<128xf32> to vector<1x128xf32>
    %cst_6 = arith.constant 3.920000e+02 : f32
    %8 = vector.broadcast %cst_6 : f32 to vector<1x128xf32>
    %9 = arith.divf %7, %8 : vector<1x128xf32>
    %10 = vector.broadcast %9 : vector<1x128xf32> to vector<392x128xf32>
    %11 = arith.subf %5, %10 : vector<392x128xf32>
    %12 = arith.mulf %11, %11 : vector<392x128xf32>
    %cst_7 = arith.constant dense<0.000000e+00> : vector<128xf32>
    %13 = vector.multi_reduction <add>, %12, %cst_7 [0] : vector<392x128xf32> to vector<128xf32>
    %14 = vector.shape_cast %13 : vector<128xf32> to vector<1x128xf32>
    %cst_8 = arith.constant 3.920000e+02 : f32
    %15 = vector.broadcast %cst_8 : f32 to vector<1x128xf32>
    %16 = arith.divf %14, %15 : vector<1x128xf32>
    %c0_9 = arith.constant 0 : index
    %c0_10 = arith.constant 0 : index
    %17 = vector.load %arg3[%c0_9, %c0_10] : memref<1x128xf32, #tpu.memory_space<vmem>>, vector<1x128xf32>
    %cst_11 = arith.constant 9.99999974E-6 : f32
    %18 = vector.broadcast %cst_11 : f32 to vector<1x128xf32>
    %19 = arith.addf %16, %18 : vector<1x128xf32>
    %20 = math.rsqrt %19 : vector<1x128xf32>
    %21 = arith.mulf %17, %20 : vector<1x128xf32>
    %c0_12 = arith.constant 0 : index
    %c0_13 = arith.constant 0 : index
    %22 = vector.load %arg4[%c0_12, %c0_13] : memref<1x128xf32, #tpu.memory_space<vmem>>, vector<1x128xf32>
    %23 = arith.mulf %9, %21 : vector<1x128xf32>
    %24 = arith.subf %22, %23 : vector<1x128xf32>
    %25 = vector.broadcast %21 : vector<1x128xf32> to vector<392x128xf32>
    %26 = arith.mulf %5, %25 : vector<392x128xf32>
    %27 = vector.broadcast %24 : vector<1x128xf32> to vector<392x128xf32>
    %28 = arith.addf %26, %27 : vector<392x128xf32>
    %cst_14 = arith.constant 0.000000e+00 : f32
    %29 = vector.broadcast %cst_14 : f32 to vector<392x128xf32>
    %30 = arith.maximumf %28, %29 : vector<392x128xf32>
    %31 = arith.truncf %30 : vector<392x128xf32> to vector<392x128xbf16>
    %c0_15 = arith.constant 0 : index
    %c0_16 = arith.constant 0 : index
    %32 = vector.load %arg5[%c0_15, %c0_16] : memref<392x128xbf16, #tpu.memory_space<vmem>>, vector<392x128xbf16>
    tpu.vector_store %arg5[%c0_15, %c0_16], %31 {strides = array<i32>} : memref<392x128xbf16, #tpu.memory_space<vmem>>, vector<392x128xbf16>,
    return
  }
}

module attributes {stable_mosaic.version = 11 : i64} {
  func.func @_mm_bn_relu_kernel(%arg0: memref<98x256xbf16, #tpu.memory_space<vmem>>, %arg1: memref<256x128xbf16, #tpu.memory_space<vmem>>, %arg2: memref<1x128xf32, #tpu.memory_space<vmem>>, %arg3: memref<1x128xf32, #tpu.memory_space<vmem>>, %arg4: memref<1x128xf32, #tpu.memory_space<vmem>>, %arg5: memref<98x128xbf16, #tpu.memory_space<vmem>>) attributes {dimension_semantics = [], scalar_prefetch = 0 : i64, scratch_operands = 0 : i64, tpu.core_type = #tpu.core_type<tc>} {
    %c0 = arith.constant 0 : index
    %c0_0 = arith.constant 0 : index
    %0 = vector.load %arg0[%c0, %c0_0] : memref<98x256xbf16, #tpu.memory_space<vmem>>, vector<98x256xbf16>
    %c0_1 = arith.constant 0 : index
    %c0_2 = arith.constant 0 : index
    %1 = vector.load %arg1[%c0_1, %c0_2] : memref<256x128xbf16, #tpu.memory_space<vmem>>, vector<256x128xbf16>
    %cst = arith.constant dense<0.000000e+00> : vector<98x128xf32>
    %2 = tpu.matmul %0, %1, %cst {dimension_numbers = #tpu.dot_dimension_numbers<[1], [0], [0], [1], [0, 0, 1, 1], [], []>} : vector<98x256xbf16>, vector<256x128xbf16>, vector<98x128xf32> -> vector<98x128xf32>
    %c0_3 = arith.constant 0 : index
    %c0_4 = arith.constant 0 : index
    %3 = vector.load %arg2[%c0_3, %c0_4] : memref<1x128xf32, #tpu.memory_space<vmem>>, vector<1x128xf32>
    %4 = vector.broadcast %3 : vector<1x128xf32> to vector<98x128xf32>
    %5 = arith.addf %2, %4 : vector<98x128xf32>
    %cst_5 = arith.constant dense<0.000000e+00> : vector<128xf32>
    %6 = vector.multi_reduction <add>, %5, %cst_5 [0] : vector<98x128xf32> to vector<128xf32>
    %7 = vector.shape_cast %6 : vector<128xf32> to vector<1x128xf32>
    %cst_6 = arith.constant 9.800000e+01 : f32
    %8 = vector.broadcast %cst_6 : f32 to vector<1x128xf32>
    %9 = arith.divf %7, %8 : vector<1x128xf32>
    %10 = vector.broadcast %9 : vector<1x128xf32> to vector<98x128xf32>
    %11 = arith.subf %5, %10 : vector<98x128xf32>
    %12 = arith.mulf %11, %11 : vector<98x128xf32>
    %cst_7 = arith.constant dense<0.000000e+00> : vector<128xf32>
    %13 = vector.multi_reduction <add>, %12, %cst_7 [0] : vector<98x128xf32> to vector<128xf32>
    %14 = vector.shape_cast %13 : vector<128xf32> to vector<1x128xf32>
    %cst_8 = arith.constant 9.800000e+01 : f32
    %15 = vector.broadcast %cst_8 : f32 to vector<1x128xf32>
    %16 = arith.divf %14, %15 : vector<1x128xf32>
    %c0_9 = arith.constant 0 : index
    %c0_10 = arith.constant 0 : index
    %17 = vector.load %arg3[%c0_9, %c0_10] : memref<1x128xf32, #tpu.memory_space<vmem>>, vector<1x128xf32>
    %cst_11 = arith.constant 9.99999974E-6 : f32
    %18 = vector.broadcast %cst_11 : f32 to vector<1x128xf32>
    %19 = arith.addf %16, %18 : vector<1x128xf32>
    %20 = math.rsqrt %19 : vector<1x128xf32>
    %21 = arith.mulf %17, %20 : vector<1x128xf32>
    %c0_12 = arith.constant 0 : index
    %c0_13 = arith.constant 0 : index
    %22 = vector.load %arg4[%c0_12, %c0_13] : memref<1x128xf32, #tpu.memory_space<vmem>>, vector<1x128xf32>
    %23 = arith.mulf %9, %21 : vector<1x128xf32>
    %24 = arith.subf %22, %23 : vector<1x128xf32>
    %25 = vector.broadcast %21 : vector<1x128xf32> to vector<98x128xf32>
    %26 = arith.mulf %5, %25 : vector<98x128xf32>
    %27 = vector.broadcast %24 : vector<1x128xf32> to vector<98x128xf32>
    %28 = arith.addf %26, %27 : vector<98x128xf32>
    %cst_14 = arith.constant 0.000000e+00 : f32
    %29 = vector.broadcast %cst_14 : f32 to vector<98x128xf32>
    %30 = arith.maximumf %28, %29 : vector<98x128xf32>
    %31 = arith.truncf %30 : vector<98x128xf32> to vector<98x128xbf16>
    %c0_15 = arith.constant 0 : index
    %c0_16 = arith.constant 0 : index
    %32 = vector.load %arg5[%c0_15, %c0_16] : memref<98x128xbf16, #tpu.memory_space<vmem>>, vector<98x128xbf16>
    tpu.vector_store %arg5[%c0_15, %c0_16], %31 {strides = array<i32>} : memref<98x128xbf16, #tpu.memory_space<vmem>>, vector<98x128xbf16>,
    return
  }
}

module attributes {stable_mosaic.version = 11 : i64} {
  func.func @_mm_bn_relu_kernel(%arg0: memref<32x512xbf16, #tpu.memory_space<vmem>>, %arg1: memref<512x128xbf16, #tpu.memory_space<vmem>>, %arg2: memref<1x128xf32, #tpu.memory_space<vmem>>, %arg3: memref<1x128xf32, #tpu.memory_space<vmem>>, %arg4: memref<1x128xf32, #tpu.memory_space<vmem>>, %arg5: memref<32x128xbf16, #tpu.memory_space<vmem>>) attributes {dimension_semantics = [], scalar_prefetch = 0 : i64, scratch_operands = 0 : i64, tpu.core_type = #tpu.core_type<tc>} {
    %c0 = arith.constant 0 : index
    %c0_0 = arith.constant 0 : index
    %0 = vector.load %arg0[%c0, %c0_0] : memref<32x512xbf16, #tpu.memory_space<vmem>>, vector<32x512xbf16>
    %c0_1 = arith.constant 0 : index
    %c0_2 = arith.constant 0 : index
    %1 = vector.load %arg1[%c0_1, %c0_2] : memref<512x128xbf16, #tpu.memory_space<vmem>>, vector<512x128xbf16>
    %cst = arith.constant dense<0.000000e+00> : vector<32x128xf32>
    %2 = tpu.matmul %0, %1, %cst {dimension_numbers = #tpu.dot_dimension_numbers<[1], [0], [0], [1], [0, 0, 1, 1], [], []>} : vector<32x512xbf16>, vector<512x128xbf16>, vector<32x128xf32> -> vector<32x128xf32>
    %c0_3 = arith.constant 0 : index
    %c0_4 = arith.constant 0 : index
    %3 = vector.load %arg2[%c0_3, %c0_4] : memref<1x128xf32, #tpu.memory_space<vmem>>, vector<1x128xf32>
    %4 = vector.broadcast %3 : vector<1x128xf32> to vector<32x128xf32>
    %5 = arith.addf %2, %4 : vector<32x128xf32>
    %cst_5 = arith.constant dense<0.000000e+00> : vector<128xf32>
    %6 = vector.multi_reduction <add>, %5, %cst_5 [0] : vector<32x128xf32> to vector<128xf32>
    %7 = vector.shape_cast %6 : vector<128xf32> to vector<1x128xf32>
    %cst_6 = arith.constant 3.200000e+01 : f32
    %8 = vector.broadcast %cst_6 : f32 to vector<1x128xf32>
    %9 = arith.divf %7, %8 : vector<1x128xf32>
    %10 = vector.broadcast %9 : vector<1x128xf32> to vector<32x128xf32>
    %11 = arith.subf %5, %10 : vector<32x128xf32>
    %12 = arith.mulf %11, %11 : vector<32x128xf32>
    %cst_7 = arith.constant dense<0.000000e+00> : vector<128xf32>
    %13 = vector.multi_reduction <add>, %12, %cst_7 [0] : vector<32x128xf32> to vector<128xf32>
    %14 = vector.shape_cast %13 : vector<128xf32> to vector<1x128xf32>
    %cst_8 = arith.constant 3.200000e+01 : f32
    %15 = vector.broadcast %cst_8 : f32 to vector<1x128xf32>
    %16 = arith.divf %14, %15 : vector<1x128xf32>
    %c0_9 = arith.constant 0 : index
    %c0_10 = arith.constant 0 : index
    %17 = vector.load %arg3[%c0_9, %c0_10] : memref<1x128xf32, #tpu.memory_space<vmem>>, vector<1x128xf32>
    %cst_11 = arith.constant 9.99999974E-6 : f32
    %18 = vector.broadcast %cst_11 : f32 to vector<1x128xf32>
    %19 = arith.addf %16, %18 : vector<1x128xf32>
    %20 = math.rsqrt %19 : vector<1x128xf32>
    %21 = arith.mulf %17, %20 : vector<1x128xf32>
    %c0_12 = arith.constant 0 : index
    %c0_13 = arith.constant 0 : index
    %22 = vector.load %arg4[%c0_12, %c0_13] : memref<1x128xf32, #tpu.memory_space<vmem>>, vector<1x128xf32>
    %23 = arith.mulf %9, %21 : vector<1x128xf32>
    %24 = arith.subf %22, %23 : vector<1x128xf32>
    %25 = vector.broadcast %21 : vector<1x128xf32> to vector<32x128xf32>
    %26 = arith.mulf %5, %25 : vector<32x128xf32>
    %27 = vector.broadcast %24 : vector<1x128xf32> to vector<32x128xf32>
    %28 = arith.addf %26, %27 : vector<32x128xf32>
    %cst_14 = arith.constant 0.000000e+00 : f32
    %29 = vector.broadcast %cst_14 : f32 to vector<32x128xf32>
    %30 = arith.maximumf %28, %29 : vector<32x128xf32>
    %31 = arith.truncf %30 : vector<32x128xf32> to vector<32x128xbf16>
    %c0_15 = arith.constant 0 : index
    %c0_16 = arith.constant 0 : index
    %32 = vector.load %arg5[%c0_15, %c0_16] : memref<32x128xbf16, #tpu.memory_space<vmem>>, vector<32x128xbf16>
    tpu.vector_store %arg5[%c0_15, %c0_16], %31 {strides = array<i32>} : memref<32x128xbf16, #tpu.memory_space<vmem>>, vector<32x128xbf16>,
    return
  }
}

module attributes {stable_mosaic.version = 11 : i64} {
  func.func @_fc_reparam_kernel(%arg0: memref<2x512xbf16, #tpu.memory_space<vmem>>, %arg1: memref<512x256xbf16, #tpu.memory_space<vmem>>, %arg2: memref<1x256xf32, #tpu.memory_space<vmem>>, %arg3: memref<2x128xf32, #tpu.memory_space<vmem>>, %arg4: memref<2x128xf32, #tpu.memory_space<vmem>>) attributes {dimension_semantics = [], scalar_prefetch = 0 : i64, scratch_operands = 0 : i64, tpu.core_type = #tpu.core_type<tc>} {
    %c0 = arith.constant 0 : index
    %c0_0 = arith.constant 0 : index
    %0 = vector.load %arg0[%c0, %c0_0] : memref<2x512xbf16, #tpu.memory_space<vmem>>, vector<2x512xbf16>
    %c0_1 = arith.constant 0 : index
    %c0_2 = arith.constant 0 : index
    %1 = vector.load %arg1[%c0_1, %c0_2] : memref<512x256xbf16, #tpu.memory_space<vmem>>, vector<512x256xbf16>
    %cst = arith.constant dense<0.000000e+00> : vector<2x256xf32>
    %2 = tpu.matmul %0, %1, %cst {dimension_numbers = #tpu.dot_dimension_numbers<[1], [0], [0], [1], [0, 0, 1, 1], [], []>} : vector<2x512xbf16>, vector<512x256xbf16>, vector<2x256xf32> -> vector<2x256xf32>
    %c0_3 = arith.constant 0 : index
    %c0_4 = arith.constant 0 : index
    %3 = vector.load %arg2[%c0_3, %c0_4] : memref<1x256xf32, #tpu.memory_space<vmem>>, vector<1x256xf32>
    %4 = vector.broadcast %3 : vector<1x256xf32> to vector<2x256xf32>
    %5 = arith.addf %2, %4 : vector<2x256xf32>
    %6 = vector.extract_strided_slice %5 {offsets = [0, 0], sizes = [2, 128], strides = [1, 1]} : vector<2x256xf32> to vector<2x128xf32>
    %7 = vector.extract_strided_slice %5 {offsets = [0, 128], sizes = [2, 128], strides = [1, 1]} : vector<2x256xf32> to vector<2x128xf32>
    %cst_5 = arith.constant 5.000000e-01 : f32
    %8 = vector.broadcast %cst_5 : f32 to vector<2x128xf32>
    %9 = arith.mulf %7, %8 : vector<2x128xf32>
    %10 = math.exp %9 : vector<2x128xf32>
    %c0_6 = arith.constant 0 : index
    %c0_7 = arith.constant 0 : index
    %11 = vector.load %arg3[%c0_6, %c0_7] : memref<2x128xf32, #tpu.memory_space<vmem>>, vector<2x128xf32>
    %12 = arith.mulf %10, %11 : vector<2x128xf32>
    %13 = arith.addf %6, %12 : vector<2x128xf32>
    %c0_8 = arith.constant 0 : index
    %c0_9 = arith.constant 0 : index
    %14 = vector.load %arg4[%c0_8, %c0_9] : memref<2x128xf32, #tpu.memory_space<vmem>>, vector<2x128xf32>
    tpu.vector_store %arg4[%c0_8, %c0_9], %13 {strides = array<i32>} : memref<2x128xf32, #tpu.memory_space<vmem>>, vector<2x128xf32>,
    return
  }
}

</mosaic_0001>

<bundles_post_ra>
// kernel: dcae_forward.12
= control target key start
LH: loop header
LB: loop body
LE: loop exit
PB: predicated region body
PF: predicated region fallthrough
CT: control target
= control target key end

     0   :  { %10 = vsyncpa [#allocation3], 0  ;;  %s698_s21 = smov [#allocation2]   ;;  %s699_s23 = smov 256   ;;  %s819_s0 = inlined_call_operand.vmem [shape: bf16[2,128], index: 0, kind: input, shape index: {}]   ;;  %s820_s1 = inlined_call_operand.hbm [shape: bf16[128,512], index: 1, kind: input, shape index: {}]   ;;  %s821_s2 = inlined_call_operand.vmem [shape: f32[1,512], index: 2, kind: input, shape index: {}]   ;;  %s822_s3 = inlined_call_operand.vmem [shape: f32[1,512], index: 3, kind: input, shape index: {}]   ;;  %s823_s4 = inlined_call_operand.vmem [shape: f32[1,512], index: 4, kind: input, shape index: {}]   ;;  %s824_s5 = inlined_call_operand.vmem [shape: bf16[2,512], index: 5, kind: output, shape index: {}]  }
   0x1   :  { %s17_s20 = sshll.u32 %s820_s1, 4  ;;  %s19_s22 = sshll.u32 %s698_s21, 4  ;;  %s18_s20 = int_to_ptr.hbm [resolvable:$true] %s17_s20  ;;  %s20_s22 = int_to_ptr.vmem [resolvable:$true] %s19_s22 }
   0x2   :  { %s700_s24 = smov 16  }
   0x3   :  { %25 = dma.hbm_to_vmem [thread:$0]  %s18_s20, 4096, %s20_s22, [#allocation3], %s699_s23, %s699_s23, %s700_s24  }
   0x4   :  { %696 = dma.done.wait [#allocation3], 4096  }
   0x5   :  { %697 = vsyncadd [#allocation3], 4294963200  ;;  %v612_v0 = vld [vmem:[#allocation2 + $0xe0] sm:$0xf]  ;;  %v656_v1 = vld [vmem:[#allocation2 + $0xec] sm:$0xf0] }
   0x6   :  { %v654_v2 = vld [vmem:[#allocation2 + $0xe4] sm:$0xf]  ;;  %v613_v3 = vor.u32 %v656_v1, %v612_v0  ;;  %v614_v4 = vld [vmem:[#allocation2 + $0xf0] sm:$0xf0]  ;;  %v620_v5 = vld [vmem:[#allocation2 + $0xe8] sm:$0xf] }
   0x7   :  { %v657_v6 = vld [vmem:[#allocation2 + $0xf4] sm:$0xf0]  ;;  %v617_v7 = vor.u32 %v654_v2, %v614_v4  ;;  %v655_v9 = vld [vmem:[#allocation2 + $0xec] sm:$0xf]  ;;  %v622_v10 = vld [vmem:[#allocation2 + $0xf8] sm:$0xf0] }
   0x8   :  { %v621_v8 = vor.u32 %v657_v6, %v620_v5  ;;  %v596_v11 = vld [vmem:[#allocation2 + $0xc0] sm:$0xf]  ;;  %239 = vmatpush.bf16.msra.mxu0 %v613_v3  ;;  %v625_v12 = vor.u32 %v655_v9, %v622_v10  ;;  %v652_v13 = vld [vmem:[#allocation2 + $0xcc] sm:$0xf0]  ;;  %v650_v14 = vld [vmem:[#allocation2 + $0xc4] sm:$0xf] }
   0x9   :  { %v598_v15 = vld [vmem:[#allocation2 + $0xd0] sm:$0xf0]  ;;  %252 = vmatpush.bf16.msra.mxu1 %v617_v7  ;;  %v597_v16 = vor.u32 %v652_v13, %v596_v11  ;;  %v604_v18 = vld [vmem:[#allocation2 + $0xc8] sm:$0xf]  ;;  %v653_v19 = vld [vmem:[#allocation2 + $0xd4] sm:$0xf0] }
   0xa   :  { %265 = vmatpush.bf16.msra.mxu2 %v621_v8  ;;  %v601_v17 = vor.u32 %v650_v14, %v598_v15  ;;  %v651_v20 = vld [vmem:[#allocation2 + $0xcc] sm:$0xf]  ;;  %278 = vmatpush.bf16.msra.mxu3 %v625_v12  ;;  %v605_v21 = vor.u32 %v653_v19, %v604_v18  ;;  %v606_v22 = vld [vmem:[#allocation2 + $0xd8] sm:$0xf0]  ;;  %v580_v23 = vld [vmem:[#allocation2 + $0xa0] sm:$0xf] }
   0xb   :  { %v648_v24 = vld [vmem:[#allocation2 + $0xac] sm:$0xf0]  ;;  %v609_v25 = vor.u32 %v651_v20, %v606_v22  ;;  %v646_v26 = vld [vmem:[#allocation2 + $0xa4] sm:$0xf]  ;;  %v582_v27 = vld [vmem:[#allocation2 + $0xb0] sm:$0xf0] }
   0xc   :  { %v588_v28 = vld [vmem:[#allocation2 + $0xa8] sm:$0xf]  ;;  %240 = vmatpush.bf16.msra.mxu0 %v597_v16  ;;  %v581_v29 = vor.u32 %v648_v24, %v580_v23  ;;  %v649_v30 = vld [vmem:[#allocation2 + $0xb4] sm:$0xf0]  ;;  %v647_v31 = vld [vmem:[#allocation2 + $0xac] sm:$0xf]  ;;  %v585_v33 = vor.u32 %v646_v26, %v582_v27 }
   0xd   :  { %v590_v32 = vld [vmem:[#allocation2 + $0xb8] sm:$0xf0]  ;;  %253 = vmatpush.bf16.msra.mxu1 %v601_v17  ;;  %v589_v34 = vor.u32 %v649_v30, %v588_v28  ;;  %v564_v35 = vld [vmem:[#allocation2 + $0x80] sm:$0xf]  ;;  %v644_v36 = vld [vmem:[#allocation2 + $0x8c] sm:$0xf0] }
   0xe   :  { %266 = vmatpush.bf16.msra.mxu2 %v605_v21  ;;  %v642_v37 = vld [vmem:[#allocation2 + $0x84] sm:$0xf]  ;;  %279 = vmatpush.bf16.msra.mxu3 %v609_v25  ;;  %v593_v38 = vor.u32 %v647_v31, %v590_v32  ;;  %v566_v39 = vld [vmem:[#allocation2 + $0x90] sm:$0xf0]  ;;  %v572_v40 = vld [vmem:[#allocation2 + $0x88] sm:$0xf]  ;;  %v565_v44 = vor.u32 %v644_v36, %v564_v35 }
   0xf   :  { %v645_v41 = vld [vmem:[#allocation2 + $0x94] sm:$0xf0]  ;;  %v643_v42 = vld [vmem:[#allocation2 + $0x8c] sm:$0xf]  ;;  %v574_v43 = vld [vmem:[#allocation2 + $0x98] sm:$0xf0]  ;;  %v569_v45 = vor.u32 %v642_v37, %v566_v39 }
  0x10   :  { %241 = vmatpush.bf16.msra.mxu0 %v581_v29  ;;  %v573_v46 = vor.u32 %v645_v41, %v572_v40  ;;  %v548_v47 = vld [vmem:[#allocation2 + $0x60] sm:$0xf]  ;;  %v640_v48 = vld [vmem:[#allocation2 + $0x6c] sm:$0xf0]  ;;  %v638_v49 = vld [vmem:[#allocation2 + $0x64] sm:$0xf]  ;;  %v577_v50 = vor.u32 %v643_v42, %v574_v43 }
  0x11   :  { %254 = vmatpush.bf16.msra.mxu1 %v585_v33  ;;  %v550_v51 = vld [vmem:[#allocation2 + $0x70] sm:$0xf0]  ;;  %v556_v52 = vld [vmem:[#allocation2 + $0x68] sm:$0xf]  ;;  %v641_v53 = vld [vmem:[#allocation2 + $0x74] sm:$0xf0]  ;;  %v549_v56 = vor.u32 %v640_v48, %v548_v47 }
  0x12   :  { %267 = vmatpush.bf16.msra.mxu2 %v589_v34  ;;  %280 = vmatpush.bf16.msra.mxu3 %v593_v38  ;;  %v639_v54 = vld [vmem:[#allocation2 + $0x6c] sm:$0xf]  ;;  %v558_v55 = vld [vmem:[#allocation2 + $0x78] sm:$0xf0]  ;;  %v553_v57 = vor.u32 %v638_v49, %v550_v51  ;;  %v557_v58 = vor.u32 %v641_v53, %v556_v52  ;;  %v532_v59 = vld [vmem:[#allocation2 + $0x40] sm:$0xf] }
  0x13   :  { %v636_v60 = vld [vmem:[#allocation2 + $0x4c] sm:$0xf0]  ;;  %v634_v61 = vld [vmem:[#allocation2 + $0x44] sm:$0xf]  ;;  %v561_v62 = vor.u32 %v639_v54, %v558_v55  ;;  %v534_v63 = vld [vmem:[#allocation2 + $0x50] sm:$0xf0] }
  0x14   :  { %242 = vmatpush.bf16.msra.mxu0 %v565_v44  ;;  %v540_v0 = vld [vmem:[#allocation2 + $0x48] sm:$0xf]  ;;  %v637_v1 = vld [vmem:[#allocation2 + $0x54] sm:$0xf0]  ;;  %v635_v2 = vld [vmem:[#allocation2 + $0x4c] sm:$0xf]  ;;  %v533_v4 = vor.u32 %v636_v60, %v532_v59  ;;  %v537_v5 = vor.u32 %v634_v61, %v534_v63 }
  0x15   :  { %255 = vmatpush.bf16.msra.mxu1 %v569_v45  ;;  %v542_v3 = vld [vmem:[#allocation2 + $0x58] sm:$0xf0]  ;;  %v541_v6 = vor.u32 %v637_v1, %v540_v0  ;;  %v516_v7 = vld [vmem:[#allocation2 + $0x20] sm:$0xf]  ;;  %v632_v8 = vld [vmem:[#allocation2 + $0x2c] sm:$0xf0] }
  0x16   :  { %268 = vmatpush.bf16.msra.mxu2 %v573_v46  ;;  %281 = vmatpush.bf16.msra.mxu3 %v577_v50  ;;  %v630_v9 = vld [vmem:[#allocation2 + $0x24] sm:$0xf]  ;;  %v545_v10 = vor.u32 %v635_v2, %v542_v3  ;;  %v518_v11 = vld [vmem:[#allocation2 + $0x30] sm:$0xf0]  ;;  %v524_v12 = vld [vmem:[#allocation2 + $0x28] sm:$0xf]  ;;  %v517_v16 = vor.u32 %v632_v8, %v516_v7 }
  0x17   :  { %v633_v13 = vld [vmem:[#allocation2 + $0x34] sm:$0xf0]  ;;  %v631_v14 = vld [vmem:[#allocation2 + $0x2c] sm:$0xf]  ;;  %v526_v15 = vld [vmem:[#allocation2 + $0x38] sm:$0xf0]  ;;  %v521_v17 = vor.u32 %v630_v9, %v518_v11 }
  0x18   :  { %243 = vmatpush.bf16.msra.mxu0 %v549_v56  ;;  %v525_v18 = vor.u32 %v633_v13, %v524_v12  ;;  %v500_v19 = vld [vmem:[#allocation2] sm:$0xf]  ;;  %v628_v20 = vld [vmem:[#allocation2 + $0xc] sm:$0xf0]  ;;  %v626_v21 = vld [vmem:[#allocation2 + $0x4] sm:$0xf]  ;;  %v529_v22 = vor.u32 %v631_v14, %v526_v15 }
  0x19   :  { %256 = vmatpush.bf16.msra.mxu1 %v553_v57  ;;  %v502_v23 = vld [vmem:[#allocation2 + $0x10] sm:$0xf0]  ;;  %v508_v24 = vld [vmem:[#allocation2 + $0x8] sm:$0xf]  ;;  %v629_v25 = vld [vmem:[#allocation2 + $0x14] sm:$0xf0]  ;;  %v501_v28 = vor.u32 %v628_v20, %v500_v19 }
  0x1a   :  { %269 = vmatpush.bf16.msra.mxu2 %v557_v58  ;;  %282 = vmatpush.bf16.msra.mxu3 %v561_v62  ;;  %v627_v26 = vld [vmem:[#allocation2 + $0xc] sm:$0xf]  ;;  %v510_v27 = vld [vmem:[#allocation2 + $0x18] sm:$0xf0]  ;;  %v505_v29 = vor.u32 %v626_v21, %v502_v23  ;;  %v509_v30 = vor.u32 %v629_v25, %v508_v24  ;;  %v36_v32 = vld [vmem:[%s819_s0] sm:$0x1] }
  0x1b   :  { %v513_v31 = vor.u32 %v627_v26, %v510_v27  ;;  %v701_v33 = vmov 2.0   ;;  %v69_v35 = vld [vmem:[%s821_s2] sm:$0xf]  ;;  %vm291_vm0 = vcmask 1041408   ;;  %vm423_vm12 = vcmask 1040384  }
  0x1c   :  { %244 = vmatpush.bf16.msra.mxu0 %v533_v4  ;;  %662 = vrcp.f32 %v701_v33  ;;  %v71_v36 = vperm.slane %v69_v35, 0  ;;  %v72_v38 = vperm.slane %v69_v35, 1  ;;  %v73_v47 = vperm.slane %v69_v35, 2 }
  0x1d   :  { %257 = vmatpush.bf16.msra.mxu1 %v537_v5  ;;  %v74_v50 = vperm.slane %v69_v35, 3  ;;  %vm425_vm14 = vcmask 1042434  }
  0x1e   :  { %270 = vmatpush.bf16.msra.mxu2 %v541_v6  ;;  %283 = vmatpush.bf16.msra.mxu3 %v545_v10 }
  0x20   :  { %245 = vmatpush.bf16.msra.mxu0 %v517_v16 }
  0x21   :  { %258 = vmatpush.bf16.msra.mxu1 %v521_v17 }
  0x22   :  { %271 = vmatpush.bf16.msra.mxu2 %v525_v18  ;;  %284 = vmatpush.bf16.msra.mxu3 %v529_v22  ;;  %v663_v34 = vpop.eup %662 }
  0x23   :  { %v321_v37 = vmul.f32 2.0, %v663_v34  ;;  %vm325_vm1 = vweird.f32 %v663_v34 }
  0x24   :  { %246 = vmatpush.bf16.msra.mxu0 %v501_v28 }
  0x25   :  { %259 = vmatpush.bf16.msra.mxu1 %v505_v29  ;;  %v322_v41 = vsub.f32 1.0, %v321_v37 }
  0x26   :  { %272 = vmatpush.bf16.msra.mxu2 %v509_v30  ;;  %285 = vmatpush.bf16.msra.mxu3 %v513_v31 }
  0x27   :  { %247 = vmatmul.bf16.vlgmr.msra.gmra.mxu0 %v36_v32  ;;  %v323_v48 = vmul.f32 %v663_v34, %v322_v41 }
  0x28   :  { %260 = vmatmul.bf16.vlgmr.msra.gmra.mxu1 %v36_v32 }
  0x29   :  { %273 = vmatmul.bf16.vlgmr.msra.gmra.mxu2 %v36_v32  ;;  %286 = vmatmul.bf16.vlgmr.msra.gmra.mxu3 %v36_v32  ;;  %v324_v58 = vadd.f32 %v663_v34, %v323_v48 }
  0x2b   :  { %v757_v5 = vsel %vm325_vm1, %v663_v34, %v324_v58 }
  0xa4   :  { %v248_v39 = vpop.f32.mrf.mxu0 }
  0xa5   :  { %v741_v40 = vadd.f32 %v248_v39, %v71_v36  ;;  %v261_v42 = vpop.f32.mrf.mxu1 }
  0xa6   :  { %v743_v43 = vadd.f32 %v261_v42, %v72_v38 }
  0xa7   :  { %v292_v44 = vsel %vm291_vm0, %v741_v40, 0.0 }
  0xa8   :  { %v293_v45 = vrot.slane %v292_v44, 4  ;;  %v299_v46 = vsel %vm291_vm0, %v743_v43, 0.0 }
  0xa9   :  { %v300_v49 = vrot.slane %v299_v46, 4 }
  0xaa   :  { %v294_v51 = vadd.f32 %v293_v45, %v292_v44 }
  0xab   :  { %v301_v52 = vadd.f32 %v300_v49, %v299_v46 }
  0xac   :  { %v274_v53 = vpop.f32.mrf.mxu2  ;;  %v295_v54 = vrot.slane %v294_v51, 2  ;;  %v287_v56 = vpop.f32.mrf.mxu3 }
  0xad   :  { %v749_v55 = vadd.f32 %v274_v53, %v73_v47  ;;  %v250_v57 = vpop.f32.mrf.mxu0  ;;  %v302_v59 = vrot.slane %v301_v52, 2  ;;  %v751_v60 = vadd.f32 %v287_v56, %v74_v50  ;;  %v263_v61 = vpop.f32.mrf.mxu1 }
  0xae   :  { %v296_v62 = vadd.f32 %v295_v54, %v294_v51 }
  0xaf   :  { %v306_v63 = vsel %vm291_vm0, %v749_v55, 0.0  ;;  %v303_v0 = vadd.f32 %v302_v59, %v301_v52  ;;  %v313_v2 = vsel %vm291_vm0, %v751_v60, 0.0 }
  0xb0   :  { %v307_v1 = vrot.slane %v306_v63, 4  ;;  %v297_v3 = vrot.slane %v296_v62, 1  ;;  %v314_v4 = vrot.slane %v313_v2, 4 }
  0xb1   :  { %v304_v6 = vrot.slane %v303_v0, 1 }
  0xb2   :  { %v308_v7 = vadd.f32 %v307_v1, %v306_v63  ;;  %v298_v8 = vadd.f32 %v297_v3, %v296_v62  ;;  %v315_v9 = vadd.f32 %v314_v4, %v313_v2 }
  0xb3   :  { %v305_v10 = vadd.f32 %v304_v6, %v303_v0 }
  0xb4   :  { %v309_v11 = vrot.slane %v308_v7, 2  ;;  %v276_v12 = vpop.f32.mrf.mxu2  ;;  %v760_v13 = vmul.f32 %v757_v5, %v298_v8  ;;  %v316_v14 = vrot.slane %v315_v9, 2  ;;  %v289_v15 = vpop.f32.mrf.mxu3 }
  0xb5   :  { %v763_v16 = vmul.f32 %v757_v5, %v305_v10 }
  0xb6   :  { %v310_v17 = vadd.f32 %v309_v11, %v308_v7  ;;  %v331_v18 = vsub.f32 %v741_v40, %v760_v13  ;;  %v317_v19 = vadd.f32 %v316_v14, %v315_v9 }
  0xb7   :  { %v332_v20 = vsub.f32 %v743_v43, %v763_v16 }
  0xb8   :  { %v311_v21 = vrot.slane %v310_v17, 1  ;;  %v335_v22 = vmul.f32 %v331_v18, %v331_v18  ;;  %v318_v23 = vrot.slane %v317_v19, 1 }
  0xb9   :  { %v336_v24 = vmul.f32 %v332_v20, %v332_v20 }
  0xba   :  { %v312_v25 = vadd.f32 %v311_v21, %v310_v17  ;;  %v339_v26 = vsel %vm291_vm0, %v335_v22, 0.0  ;;  %v319_v27 = vadd.f32 %v318_v23, %v317_v19 }
  0xbb   :  { %v340_v28 = vrot.slane %v339_v26, 4  ;;  %v346_v29 = vsel %vm291_vm0, %v336_v24, 0.0 }
  0xbc   :  { %v772_v30 = vmul.f32 %v757_v5, %v312_v25  ;;  %v347_v31 = vrot.slane %v346_v29, 4  ;;  %v775_v32 = vmul.f32 %v757_v5, %v319_v27 }
  0xbd   :  { %v341_v33 = vadd.f32 %v340_v28, %v339_v26 }
  0xbe   :  { %v333_v34 = vsub.f32 %v749_v55, %v772_v30  ;;  %v348_v35 = vadd.f32 %v347_v31, %v346_v29  ;;  %v334_v36 = vsub.f32 %v751_v60, %v775_v32 }
  0xbf   :  { %v342_v37 = vrot.slane %v341_v33, 2 }
  0xc0   :  { %v337_v38 = vmul.f32 %v333_v34, %v333_v34  ;;  %v349_v39 = vrot.slane %v348_v35, 2  ;;  %v338_v41 = vmul.f32 %v334_v36, %v334_v36 }
  0xc1   :  { %v343_v42 = vadd.f32 %v342_v37, %v341_v33 }
  0xc2   :  { %v353_v44 = vsel %vm291_vm0, %v337_v38, 0.0  ;;  %v350_v45 = vadd.f32 %v349_v39, %v348_v35  ;;  %v360_v47 = vsel %vm291_vm0, %v338_v41, 0.0 }
  0xc3   :  { %v354_v46 = vrot.slane %v353_v44, 4  ;;  %v344_v48 = vrot.slane %v343_v42, 1  ;;  %v361_v49 = vrot.slane %v360_v47, 4 }
  0xc4   :  { %v351_v50 = vrot.slane %v350_v45, 1 }
  0xc5   :  { %v355_v51 = vadd.f32 %v354_v46, %v353_v44  ;;  %v345_v52 = vadd.f32 %v344_v48, %v343_v42  ;;  %v362_v53 = vadd.f32 %v361_v49, %v360_v47  ;;  %v371_v46 = vld [vmem:[%s822_s3] sm:$0xf] }
  0xc6   :  { %v352_v54 = vadd.f32 %v351_v50, %v350_v45 }
  0xc7   :  { %v356_v56 = vrot.slane %v355_v51, 2  ;;  %v367_v57 = vmul.f32 %v345_v52, %v757_v5  ;;  %v363_v58 = vrot.slane %v362_v53, 2 }
  0xc8   :  { %v368_v59 = vmul.f32 %v352_v54, %v757_v5 }
  0xc9   :  { %v357_v61 = vadd.f32 %v356_v56, %v355_v51  ;;  %v372_v62 = vadd.f32 1e-05, %v367_v57  ;;  %v364_v63 = vadd.f32 %v363_v58, %v362_v53 }
  0xca   :  { %v373_v0 = vadd.f32 1e-05, %v368_v59 }
  0xcb   :  { %v358_v1 = vrot.slane %v357_v61, 1  ;;  %664 = vrsqrt.f32 %v372_v62  ;;  %v365_v2 = vrot.slane %v364_v63, 1  ;;  %vm382_vm13 = vweird.f32 %v372_v62 }
  0xcc   :  { %666 = vrsqrt.f32 %v373_v0  ;;  %vm392_vm3 = vweird.f32 %v373_v0 }
  0xcd   :  { %v359_v3 = vadd.f32 %v358_v1, %v357_v61  ;;  %v366_v4 = vadd.f32 %v365_v2, %v364_v63  ;;  %v430_v1 = vld [vmem:[%s823_s4] sm:$0xf] }
  0xcf   :  { %v369_v6 = vmul.f32 %v359_v3, %v757_v5  ;;  %v370_v7 = vmul.f32 %v366_v4, %v757_v5 }
  0xd1   :  { %v374_v8 = vadd.f32 1e-05, %v369_v6  ;;  %v665_v9 = vpop.eup %664  ;;  %v375_v10 = vadd.f32 1e-05, %v370_v7 }
  0xd2   :  { %v667_v11 = vpop.eup %666  ;;  %v377_v12 = vmul.f32 %v665_v9, %v372_v62  ;;  %vm383_vm8 = vweird.f32 %v665_v9 }
  0xd3   :  { %668 = vrsqrt.f32 %v374_v8  ;;  %v387_v14 = vmul.f32 %v667_v11, %v373_v0  ;;  %vm393_vm2 = vweird.f32 %v667_v11  ;;  %vm402_vm7 = vweird.f32 %v374_v8  ;;  %vm384_vm15 = vmor %vm382_vm13, %vm383_vm8 }
  0xd4   :  { %670 = vrsqrt.f32 %v375_v10  ;;  %v378_v17 = vmul.f32 %v665_v9, %v377_v12  ;;  %vm787_vm4 = vmor %vm392_vm3, %vm393_vm2  ;;  %vm412_vm10 = vweird.f32 %v375_v10 }
  0xd5   :  { %v388_v15 = vmul.f32 %v667_v11, %v387_v14 }
  0xd6   :  { %v379_v23 = vmul.f32 0.5, %v378_v17 }
  0xd7   :  { %v389_v18 = vmul.f32 0.5, %v388_v15 }
  0xd8   :  { %v380_v28 = vsub.f32 1.5, %v379_v23 }
  0xd9   :  { %v669_v19 = vpop.eup %668  ;;  %v390_v21 = vsub.f32 1.5, %v389_v18 }
  0xda   :  { %v671_v20 = vpop.eup %670  ;;  %v397_v22 = vmul.f32 %v669_v19, %v374_v8  ;;  %vm403_vm5 = vweird.f32 %v669_v19  ;;  %v381_v37 = vmul.f32 %v665_v9, %v380_v28 }
  0xdb   :  { %v407_v24 = vmul.f32 %v671_v20, %v375_v10  ;;  %v391_v26 = vmul.f32 %v667_v11, %v390_v21  ;;  %vm413_vm6 = vweird.f32 %v671_v20  ;;  %vm404_vm9 = vmor %vm402_vm7, %vm403_vm5 }
  0xdc   :  { %v398_v25 = vmul.f32 %v669_v19, %v397_v22  ;;  %vm414_vm11 = vmor %vm412_vm10, %vm413_vm6  ;;  %v385_v47 = vsel %vm384_vm15, %v665_v9, %v381_v37 }
  0xdd   :  { %v408_v5 = vmul.f32 %v671_v20, %v407_v24  ;;  %v395_v34 = vsel %vm787_vm4, %v667_v11, %v391_v26 }
  0xde   :  { %v399_v27 = vmul.f32 0.5, %v398_v25  ;;  %v420_v41 = vrot.slane %v395_v34, 7 }
  0xdf   :  { %v409_v29 = vmul.f32 0.5, %v408_v5 }
  0xe0   :  { %v400_v33 = vsub.f32 1.5, %v399_v27  ;;  %v424_v48 = vsel %vm423_vm12, %v385_v47, %v420_v41 }
  0xe1   :  { %v410_v35 = vsub.f32 1.5, %v409_v29 }
  0xe2   :  { %v401_v36 = vmul.f32 %v669_v19, %v400_v33 }
  0xe3   :  { %v411_v38 = vmul.f32 %v671_v20, %v410_v35 }
  0xe4   :  { %v405_v39 = vsel %vm404_vm9, %v669_v19, %v401_v36 }
  0xe5   :  { %v415_v42 = vsel %vm414_vm11, %v671_v20, %v411_v38  ;;  %v421_v44 = vrot.slane %v405_v39, 6 }
  0xe6   :  { %v422_v45 = vrot.slane %v415_v42, 5 }
  0xe8   :  { %v426_v49 = vsel %vm425_vm14, %v421_v44, %v422_v45 }
  0xe9   :  { %v427_v50 = vsel %vm291_vm0, %v424_v48, %v426_v49 }
  0xea   :  { %v429_v51 = vmul.f32 %v427_v50, %v371_v46 }
  0xec   :  { %v432_v52 = vperm.slane %v429_v51, 0  ;;  %v433_v53 = vperm.slane %v429_v51, 1  ;;  %v434_v54 = vperm.slane %v429_v51, 2  ;;  %v435_v56 = vperm.slane %v429_v51, 3 }
  0xee   :  { %v441_v57 = vmul.f32 %v433_v53, %v763_v16  ;;  %v442_v58 = vmul.f32 %v434_v54, %v772_v30  ;;  %v443_v59 = vmul.f32 %v435_v56, %v775_v32  ;;  %v440_v61 = vmul.f32 %v432_v52, %v760_v13 }
  0xef   :  { %v456_v30 = vmul.f32 %v432_v52, %v741_v40  ;;  %v457_v32 = vmul.f32 %v433_v53, %v743_v43  ;;  %v458_v13 = vmul.f32 %v434_v54, %v749_v55  ;;  %v459_v6 = vmul.f32 %v435_v56, %v751_v60 }
  0xf0   :  { %v448_v62 = vrot.slane %v441_v57, 7  ;;  %v449_v63 = vrot.slane %v442_v58, 6  ;;  %v450_v0 = vrot.slane %v443_v59, 5 }
  0xf2   :  { %v451_v2 = vsel %vm423_vm12, %v440_v61, %v448_v62  ;;  %v452_v3 = vsel %vm425_vm14, %v449_v63, %v450_v0 }
  0xf3   :  { %v453_v4 = vsel %vm291_vm0, %v451_v2, %v452_v3 }
  0xf4   :  { %v455_v16 = vsub.f32 %v430_v1, %v453_v4 }
  0xf6   :  { %v461_v7 = vperm.slane %v455_v16, 0  ;;  %v462_v8 = vperm.slane %v455_v16, 1  ;;  %v463_v9 = vperm.slane %v455_v16, 2  ;;  %v464_v10 = vperm.slane %v455_v16, 3 }
  0xf8   :  { %v469_v11 = vadd.f32 %v461_v7, %v456_v30  ;;  %v470_v12 = vadd.f32 %v462_v8, %v457_v32  ;;  %v471_v14 = vadd.f32 %v463_v9, %v458_v13  ;;  %v472_v15 = vadd.f32 %v464_v10, %v459_v6 }
  0xfa   :  { %v473_v17 = vmax.f32 %v469_v11, 0.0  ;;  %v474_v18 = vmax.f32 %v470_v12, 0.0  ;;  %v475_v19 = vmax.f32 %v471_v14, 0.0  ;;  %v476_v20 = vmax.f32 %v472_v15, 0.0 }
  0xfc   :  { %v477_v21 = vpack.c.bf16 %v474_v18, %v473_v17  ;;  %v478_v40 = vpack.c.bf16 %v476_v20, %v475_v19 }
  0xfe   :  { %v481_v22 = vrot.slane %v477_v21, 3  ;;  %v482_v43 = vrot.slane %v478_v40, 6  ;;  %v483_v23 = vrot.slane %v478_v40, 1 }
 0x100   :  { %v486_v55 = vsel %vm423_vm12, %v477_v21, %v481_v22  ;;  %v489_v60 = vsel %vm425_vm14, %v482_v43, %v483_v23 }
 0x101   :  { %v490_v24 = vsel %vm291_vm0, %v486_v55, %v489_v60 }
 0x102   :  { %492 = vst [vmem:[%s824_s5] sm:$0xf] %v490_v24 }
 0x103   :  { %497 = vsyncpa [#allocation3], 1 }

// kernel: dcae_forward.13
= control target key start
LH: loop header
LB: loop body
LE: loop exit
PB: predicated region body
PF: predicated region fallthrough
CT: control target
= control target key end

     0   :  { %vm827_vm0 = vcmask 1041408   ;;  %s1884_s4 = inlined_call_operand.vmem [shape: bf16[384,128], index: 4, kind: input, shape index: {}]   ;;  %s1885_s5 = inlined_call_operand.vmem [shape: bf16[256,128], index: 5, kind: input, shape index: {}]   ;;  %s1886_s0 = inlined_call_operand.vmem [shape: bf16[32,384], index: 0, kind: input, shape index: {}]   ;;  %s1887_s8 = inlined_call_operand.vmem [shape: f32[1,128], index: 8, kind: input, shape index: {}]   ;;  %s1888_s1 = inlined_call_operand.vmem [shape: bf16[24,256], index: 1, kind: input, shape index: {}]   ;;  %s1889_s6 = inlined_call_operand.vmem [shape: bf16[256,128], index: 6, kind: input, shape index: {}]   ;;  %s1890_s7 = inlined_call_operand.vmem [shape: bf16[128,128], index: 7, kind: input, shape index: {}]   ;;  %s1891_s2 = inlined_call_operand.vmem [shape: bf16[24,256], index: 2, kind: input, shape index: {}]   ;;  %s1892_s3 = inlined_call_operand.vmem [shape: bf16[18,128], index: 3, kind: input, shape index: {}]   ;;  %s1893_s9 = inlined_call_operand.vmem [shape: f32[1,128], index: 9, kind: input, shape index: {}]   ;;  %s1894_s10 = inlined_call_operand.vmem [shape: f32[1,128], index: 10, kind: input, shape index: {}]   ;;  %s1895_s11 = inlined_call_operand.vmem [shape: bf16[32,128], index: 11, kind: output, shape index: {0}]   ;;  %s1896_s12 = inlined_call_operand.vmem [shape: bf16[24,128], index: 12, kind: output, shape index: {1}]   ;;  %s1897_s13 = inlined_call_operand.vmem [shape: bf16[24,128], index: 13, kind: output, shape index: {2}]   ;;  %s1898_s14 = inlined_call_operand.vmem [shape: bf16[18,128], index: 14, kind: output, shape index: {3}]  }
   0x1   :  { %v1326_v0 = vld [vmem:[%s1884_s4 + $0x38] sm:$0xff]  ;;  %v1325_v4 = vld [vmem:[%s1884_s4 + $0x30] sm:$0xff]  ;;  %v1324_v8 = vld [vmem:[%s1884_s4 + $0x28] sm:$0xff] }
   0x2   :  { %v1334_v1 = vld [vmem:[%s1884_s4 + $0x78] sm:$0xff]  ;;  %278 = vmatpush.bf16.msra.mxu0 %v1326_v0  ;;  %v1333_v5 = vld [vmem:[%s1884_s4 + $0x70] sm:$0xff]  ;;  %v1332_v9 = vld [vmem:[%s1884_s4 + $0x68] sm:$0xff] }
   0x3   :  { %v1342_v2 = vld [vmem:[%s1884_s4 + $0xb8] sm:$0xff]  ;;  %297 = vmatpush.bf16.msra.mxu1 %v1334_v1  ;;  %v1341_v6 = vld [vmem:[%s1884_s4 + $0xb0] sm:$0xff]  ;;  %v1340_v10 = vld [vmem:[%s1884_s4 + $0xa8] sm:$0xff] }
   0x4   :  { %v1352_v3 = vld [vmem:[%s1885_s5 + $0x38] sm:$0xff]  ;;  %316 = vmatpush.bf16.msra.mxu2 %v1342_v2  ;;  %v1351_v7 = vld [vmem:[%s1885_s5 + $0x30] sm:$0xff]  ;;  %v1350_v11 = vld [vmem:[%s1885_s5 + $0x28] sm:$0xff] }
   0x5   :  { %483 = vmatpush.bf16.msra.mxu3 %v1352_v3  ;;  %v1323_v12 = vld [vmem:[%s1884_s4 + $0x20] sm:$0xff]  ;;  %v1322_v16 = vld [vmem:[%s1884_s4 + $0x18] sm:$0xff]  ;;  %v1321_v20 = vld [vmem:[%s1884_s4 + $0x10] sm:$0xff] }
   0x6   :  { %279 = vmatpush.bf16.msra.mxu0 %v1325_v4  ;;  %v1331_v13 = vld [vmem:[%s1884_s4 + $0x60] sm:$0xff]  ;;  %v1330_v17 = vld [vmem:[%s1884_s4 + $0x58] sm:$0xff]  ;;  %v1329_v21 = vld [vmem:[%s1884_s4 + $0x50] sm:$0xff] }
   0x7   :  { %298 = vmatpush.bf16.msra.mxu1 %v1333_v5  ;;  %v1339_v14 = vld [vmem:[%s1884_s4 + $0xa0] sm:$0xff]  ;;  %v1338_v18 = vld [vmem:[%s1884_s4 + $0x98] sm:$0xff]  ;;  %v1337_v22 = vld [vmem:[%s1884_s4 + $0x90] sm:$0xff] }
   0x8   :  { %317 = vmatpush.bf16.msra.mxu2 %v1341_v6  ;;  %v1349_v15 = vld [vmem:[%s1885_s5 + $0x20] sm:$0xff]  ;;  %v1348_v19 = vld [vmem:[%s1885_s5 + $0x18] sm:$0xff]  ;;  %v1347_v23 = vld [vmem:[%s1885_s5 + $0x10] sm:$0xff] }
   0x9   :  { %484 = vmatpush.bf16.msra.mxu3 %v1351_v7  ;;  %v1320_v24 = vld [vmem:[%s1884_s4 + $0x8] sm:$0xff]  ;;  %v1319_v28 = vld [vmem:[%s1884_s4] sm:$0xff]  ;;  %v1017_v35 = vld [vmem:[%s1886_s0 + $0xc] sm:$0xf0] }
   0xa   :  { %280 = vmatpush.bf16.msra.mxu0 %v1324_v8  ;;  %v1328_v25 = vld [vmem:[%s1884_s4 + $0x48] sm:$0xff]  ;;  %v1327_v29 = vld [vmem:[%s1884_s4 + $0x40] sm:$0xff]  ;;  %v1315_v37 = vld [vmem:[%s1886_s0 + $0x10] sm:$0xf0] }
   0xb   :  { %299 = vmatpush.bf16.msra.mxu1 %v1332_v9  ;;  %v1336_v26 = vld [vmem:[%s1884_s4 + $0x88] sm:$0xff]  ;;  %v1335_v30 = vld [vmem:[%s1884_s4 + $0x80] sm:$0xff]  ;;  %v1378_v40 = vld [vmem:[%s1889_s6 + $0x78] sm:$0xff] }
   0xc   :  { %318 = vmatpush.bf16.msra.mxu2 %v1340_v10  ;;  %v1346_v27 = vld [vmem:[%s1885_s5 + $0x8] sm:$0xff]  ;;  %v1345_v31 = vld [vmem:[%s1885_s5] sm:$0xff]  ;;  %v1360_v41 = vld [vmem:[%s1885_s5 + $0x78] sm:$0xff] }
   0xd   :  { %485 = vmatpush.bf16.msra.mxu3 %v1350_v11  ;;  %v1015_v32 = vld [vmem:[%s1886_s0] sm:$0xf]  ;;  %v1314_v33 = vld [vmem:[%s1886_s0 + $0x8] sm:$0xf0]  ;;  %v1313_v34 = vld [vmem:[%s1886_s0 + $0x4] sm:$0xf] }
   0xe   :  { %281 = vmatpush.bf16.msra.mxu0 %v1323_v12  ;;  %v1023_v36 = vld [vmem:[%s1886_s0 + $0x8] sm:$0xf]  ;;  %v1135_v38 = vld [vmem:[%s1888_s1] sm:$0xf]  ;;  %v1016_v42 = vor.u32 %v1314_v33, %v1015_v32  ;;  %v1020_v43 = vor.u32 %v1313_v34, %v1017_v35  ;;  %v1370_v46 = vld [vmem:[%s1889_s6 + $0x38] sm:$0xff] }
   0xf   :  { %300 = vmatpush.bf16.msra.mxu1 %v1331_v13  ;;  %v1344_v39 = vld [vmem:[%s1888_s1 + $0x4] sm:$0xf0]  ;;  %v1024_v44 = vor.u32 %v1315_v37, %v1023_v36  ;;  %v1387_v47 = vld [vmem:[%s1890_s7 + $0x38] sm:$0xff]  ;;  %v1377_v48 = vld [vmem:[%s1889_s6 + $0x70] sm:$0xff] }
  0x10   :  { %319 = vmatpush.bf16.msra.mxu2 %v1339_v14  ;;  %v1136_v45 = vor.u32 %v1344_v39, %v1135_v38  ;;  %v1359_v49 = vld [vmem:[%s1885_s5 + $0x70] sm:$0xff]  ;;  %v1376_v52 = vld [vmem:[%s1889_s6 + $0x68] sm:$0xff]  ;;  %v1375_v57 = vld [vmem:[%s1889_s6 + $0x60] sm:$0xff] }
  0x11   :  { %486 = vmatpush.bf16.msra.mxu3 %v1349_v15  ;;  %v1369_v50 = vld [vmem:[%s1889_s6 + $0x30] sm:$0xff]  ;;  %v1358_v53 = vld [vmem:[%s1885_s5 + $0x68] sm:$0xff]  ;;  %v1357_v58 = vld [vmem:[%s1885_s5 + $0x60] sm:$0xff] }
  0x12   :  { %282 = vmatpush.bf16.msra.mxu0 %v1322_v16  ;;  %v1386_v51 = vld [vmem:[%s1890_s7 + $0x30] sm:$0xff]  ;;  %v1368_v54 = vld [vmem:[%s1889_s6 + $0x28] sm:$0xff]  ;;  %v1367_v59 = vld [vmem:[%s1889_s6 + $0x20] sm:$0xff] }
  0x13   :  { %301 = vmatpush.bf16.msra.mxu1 %v1330_v17  ;;  %v1385_v55 = vld [vmem:[%s1890_s7 + $0x28] sm:$0xff]  ;;  %v1655_v56 = vld [vmem:[%s1888_s1 + $0x10] sm:$0xff]  ;;  %v1027_v60 = vld [vmem:[%s1886_s0 + $0x18] sm:$0xf] }
  0x14   :  { %320 = vmatpush.bf16.msra.mxu2 %v1338_v18  ;;  %v1317_v61 = vld [vmem:[%s1886_s0 + $0x20] sm:$0xf0]  ;;  %v1316_v62 = vld [vmem:[%s1886_s0 + $0x1c] sm:$0xf]  ;;  %v1029_v63 = vld [vmem:[%s1886_s0 + $0x24] sm:$0xf0]  ;;  %v377_v0 = vunpack.c.l.b16 %v1655_v56  ;;  %v378_v36 = vunpack.c.h.b16 %v1655_v56 }
  0x15   :  { %487 = vmatpush.bf16.msra.mxu3 %v1348_v19  ;;  %v1384_v1 = vld [vmem:[%s1890_s7 + $0x20] sm:$0xff]  ;;  %v1318_v3 = vld [vmem:[%s1886_s0 + $0x28] sm:$0xf0]  ;;  %v1374_v4 = vld [vmem:[%s1889_s6 + $0x58] sm:$0xff]  ;;  %v1028_v6 = vor.u32 %v1317_v61, %v1027_v60  ;;  %v1032_v7 = vor.u32 %v1316_v62, %v1029_v63 }
  0x16   :  { %283 = vmatpush.bf16.msra.mxu0 %v1321_v20  ;;  %v1035_v2 = vld [vmem:[%s1886_s0 + $0x20] sm:$0xf]  ;;  %v1356_v5 = vld [vmem:[%s1885_s5 + $0x58] sm:$0xff]  ;;  %v381_v9 = vpack.c.b16 %v377_v0, %v377_v0  ;;  %v1373_v12 = vld [vmem:[%s1889_s6 + $0x50] sm:$0xff] }
  0x17   :  { %302 = vmatpush.bf16.msra.mxu1 %v1329_v21  ;;  %v1036_v8 = vor.u32 %v1318_v3, %v1035_v2  ;;  %v1366_v10 = vld [vmem:[%s1889_s6 + $0x18] sm:$0xff]  ;;  %v1355_v13 = vld [vmem:[%s1885_s5 + $0x50] sm:$0xff]  ;;  %v1372_v16 = vld [vmem:[%s1889_s6 + $0x48] sm:$0xff] }
  0x18   :  { %321 = vmatpush.bf16.msra.mxu2 %v1337_v22  ;;  %v1383_v11 = vld [vmem:[%s1890_s7 + $0x18] sm:$0xff]  ;;  %v1365_v14 = vld [vmem:[%s1889_s6 + $0x10] sm:$0xff]  ;;  %v1354_v17 = vld [vmem:[%s1885_s5 + $0x48] sm:$0xff] }
  0x19   :  { %488 = vmatpush.bf16.msra.mxu3 %v1347_v23  ;;  %v1382_v15 = vld [vmem:[%s1890_s7 + $0x10] sm:$0xff]  ;;  %v1364_v18 = vld [vmem:[%s1889_s6 + $0x8] sm:$0xff]  ;;  %v1371_v20 = vld [vmem:[%s1889_s6 + $0x40] sm:$0xff] }
  0x1a   :  { %284 = vmatpush.bf16.msra.mxu0 %v1320_v24  ;;  %v1381_v19 = vld [vmem:[%s1890_s7 + $0x8] sm:$0xff]  ;;  %v1353_v21 = vld [vmem:[%s1885_s5 + $0x40] sm:$0xff]  ;;  %v521_v34 = vld [vmem:[%s1891_s2 + $0x10] sm:$0xff] }
  0x1b   :  { %303 = vmatpush.bf16.msra.mxu1 %v1328_v25  ;;  %v1363_v22 = vld [vmem:[%s1889_s6] sm:$0xff]  ;;  %v1137_v25 = vld [vmem:[%s1888_s1 + $0x8] sm:$0xf0]  ;;  %v705_v35 = vld [vmem:[%s1892_s3 + $0x8] sm:$0x1]  ;;  %v561_v37 = vunpack.c.l.b16 %v521_v34  ;;  %v562_v38 = vunpack.c.h.b16 %v521_v34 }
  0x1c   :  { %322 = vmatpush.bf16.msra.mxu2 %v1336_v26  ;;  %v1380_v23 = vld [vmem:[%s1890_s7] sm:$0xff]  ;;  %v727_v39 = vunpack.c.l.b16 %v705_v35 }
  0x1d   :  { %489 = vmatpush.bf16.msra.mxu3 %v1346_v27  ;;  %v1343_v24 = vld [vmem:[%s1888_s1 + $0x4] sm:$0xf]  ;;  %v1207_v26 = vld [vmem:[%s1891_s2] sm:$0xf]  ;;  %v1362_v27 = vld [vmem:[%s1891_s2 + $0x4] sm:$0xf0] }
  0x1e   :  { %285 = vmatpush.bf16.msra.mxu0 %v1319_v28  ;;  %v1361_v28 = vld [vmem:[%s1891_s2 + $0x4] sm:$0xf] }
  0x1f   :  { %304 = vmatpush.bf16.msra.mxu1 %v1327_v29  ;;  %v1209_v29 = vld [vmem:[%s1891_s2 + $0x8] sm:$0xf0]  ;;  %v1379_v33 = vld [vmem:[%s1892_s3] sm:$0xff] }
  0x20   :  { %323 = vmatpush.bf16.msra.mxu2 %v1335_v30  ;;  %v1140_v30 = vor.u32 %v1343_v24, %v1137_v25  ;;  %v1212_v32 = vor.u32 %v1361_v28, %v1209_v29 }
  0x21   :  { %490 = vmatpush.bf16.msra.mxu3 %v1345_v31  ;;  %286 = vmatmul.bf16.vlgmr.msra.gmra.mxu0 %v1016_v42  ;;  %v1208_v31 = vor.u32 %v1362_v27, %v1207_v26  ;;  %v566_v42 = vpack.c.b16 %v562_v38, %v562_v38  ;;  %v1420_v27 = vmov 98.0  }
  0x22   :  { %501 = vmatpush.bf16.msrb.mxu0 %v1360_v41  ;;  %305 = vmatmul.bf16.vlgmr.msra.gmra.mxu1 %v1020_v43  ;;  %v565_v41 = vpack.c.b16 %v561_v37, %v561_v37  ;;  %v729_v43 = vpack.c.b16 %v727_v39, %v727_v39  ;;  %1416 = vrcp.f32 %v1420_v27 }
  0x23   :  { %324 = vmatmul.bf16.vlgmr.msra.gmra.mxu2 %v1024_v44  ;;  %667 = vmatpush.bf16.msrb.mxu1 %v1370_v46 }
  0x24   :  { %685 = vmatpush.bf16.msrb.mxu2 %v1378_v40  ;;  %491 = vmatmul.bf16.vlgmr.msra.gmra.mxu3 %v1136_v45  ;;  %v382_v40 = vpack.c.b16 %v378_v36, %v378_v36 }
  0x25   :  { %780 = vmatpush.bf16.msrb.mxu3 %v1387_v47 }
  0x26   :  { %502 = vmatpush.bf16.msrb.mxu0 %v1359_v49 }
  0x27   :  { %668 = vmatpush.bf16.msrb.mxu1 %v1369_v50 }
  0x28   :  { %686 = vmatpush.bf16.msrb.mxu2 %v1377_v48  ;;  %v1417_v38 = vpop.eup %1416 }
  0x29   :  { %781 = vmatpush.bf16.msrb.mxu3 %v1386_v51  ;;  %vm842_vm1 = vweird.f32 %v1417_v38 }
  0x2a   :  { %503 = vmatpush.bf16.msrb.mxu0 %v1358_v53 }
  0x2b   :  { %669 = vmatpush.bf16.msrb.mxu1 %v1368_v54 }
  0x2c   :  { %687 = vmatpush.bf16.msrb.mxu2 %v1376_v52 }
  0x2d   :  { %782 = vmatpush.bf16.msrb.mxu3 %v1385_v55 }
  0x2e   :  { %504 = vmatpush.bf16.msrb.mxu0 %v1357_v58  ;;  %v1415_v58 = vld [vmem:[%s1887_s8] ss:$0 sm:$0xff] }
  0x2f   :  { %670 = vmatpush.bf16.msrb.mxu1 %v1367_v59 }
  0x30   :  { %688 = vmatpush.bf16.msrb.mxu2 %v1375_v57 }
  0x31   :  { %783 = vmatpush.bf16.msrb.mxu3 %v1384_v1  ;;  %291 = vmatmul.bf16.gmra.mxu0 %v1028_v6 }
  0x32   :  { %505 = vmatpush.bf16.msrb.mxu0 %v1356_v5  ;;  %310 = vmatmul.bf16.gmra.mxu1 %v1032_v7 }
  0x33   :  { %329 = vmatmul.bf16.gmra.mxu2 %v1036_v8  ;;  %671 = vmatpush.bf16.msrb.mxu1 %v1366_v10 }
  0x34   :  { %689 = vmatpush.bf16.msrb.mxu2 %v1374_v4  ;;  %496 = vmatmul.bf16.gmra.mxu3 %v381_v9 }
  0x35   :  { %784 = vmatpush.bf16.msrb.mxu3 %v1383_v11 }
  0x36   :  { %506 = vmatpush.bf16.msrb.mxu0 %v1355_v13 }
  0x37   :  { %672 = vmatpush.bf16.msrb.mxu1 %v1365_v14 }
  0x38   :  { %690 = vmatpush.bf16.msrb.mxu2 %v1373_v12 }
  0x39   :  { %785 = vmatpush.bf16.msrb.mxu3 %v1382_v15 }
  0x3a   :  { %507 = vmatpush.bf16.msrb.mxu0 %v1354_v17 }
  0x3b   :  { %673 = vmatpush.bf16.msrb.mxu1 %v1364_v18 }
  0x3c   :  { %691 = vmatpush.bf16.msrb.mxu2 %v1372_v16 }
  0x3d   :  { %786 = vmatpush.bf16.msrb.mxu3 %v1381_v19 }
  0x3e   :  { %508 = vmatpush.bf16.msrb.mxu0 %v1353_v21 }
  0x3f   :  { %674 = vmatpush.bf16.msrb.mxu1 %v1363_v22 }
  0x40   :  { %692 = vmatpush.bf16.msrb.mxu2 %v1371_v20 }
  0x41   :  { %787 = vmatpush.bf16.msrb.mxu3 %v1380_v23  ;;  %509 = vmatmul.bf16.vlgmr.msrb.gmra.mxu0 %v1140_v30 }
  0x42   :  { %675 = vmatmul.bf16.vlgmr.msrb.gmra.mxu1 %v1208_v31 }
  0x43   :  { %693 = vmatmul.bf16.vlgmr.msrb.gmra.mxu2 %v1212_v32 }
  0x44   :  { %788 = vmatmul.bf16.vlgmr.msrb.gmra.mxu3 %v1379_v33 }
  0x51   :  { %514 = vmatmul.bf16.gmra.mxu0 %v382_v40 }
  0x52   :  { %680 = vmatmul.bf16.gmra.mxu1 %v565_v41 }
  0x53   :  { %698 = vmatmul.bf16.gmra.mxu2 %v566_v42 }
  0x54   :  { %793 = vmatmul.bf16.gmra.mxu3 %v729_v43 }
  0x9e   :  { %v287_v44 = vpop.f32.mrf.mxu0 }
  0x9f   :  { %v306_v45 = vpop.f32.mrf.mxu1  ;;  %v288_v59 = vadd.f32 %v1415_v58, %v287_v44 }
  0xa1   :  { %v307_v2 = vadd.f32 %v306_v45, %v288_v59 }
  0xa6   :  { %v325_v46 = vpop.f32.mrf.mxu2  ;;  %v289_v48 = vpop.f32.mrf.mxu0 }
  0xa7   :  { %v492_v47 = vpop.f32.mrf.mxu3  ;;  %v308_v49 = vpop.f32.mrf.mxu1  ;;  %v290_v60 = vadd.f32 %v1415_v58, %v289_v48  ;;  %v1769_v7 = vadd.f32 %v325_v46, %v307_v2 }
  0xa8   :  { %v493_v19 = vadd.f32 %v1415_v58, %v492_v47 }
  0xa9   :  { %v309_v3 = vadd.f32 %v308_v49, %v290_v60 }
  0xae   :  { %v327_v50 = vpop.f32.mrf.mxu2  ;;  %v292_v52 = vpop.f32.mrf.mxu0 }
  0xaf   :  { %v494_v51 = vpop.f32.mrf.mxu3  ;;  %v311_v53 = vpop.f32.mrf.mxu1  ;;  %v293_v61 = vadd.f32 %v1415_v58, %v292_v52  ;;  %v1767_v6 = vadd.f32 %v327_v50, %v309_v3 }
  0xb0   :  { %v495_v17 = vadd.f32 %v1415_v58, %v494_v51  ;;  %v838_v51 = vmul.f32 98.0, %v1417_v38 }
  0xb1   :  { %v312_v4 = vadd.f32 %v311_v53, %v293_v61  ;;  %v798_v11 = vadd.f32 %v1767_v6, %v1769_v7 }
  0xb2   :  { %v839_v61 = vsub.f32 1.0, %v838_v51 }
  0xb6   :  { %v330_v54 = vpop.f32.mrf.mxu2  ;;  %v294_v56 = vpop.f32.mrf.mxu0 }
  0xb7   :  { %v497_v55 = vpop.f32.mrf.mxu3  ;;  %v313_v57 = vpop.f32.mrf.mxu1  ;;  %v295_v5 = vadd.f32 %v1415_v58, %v294_v56  ;;  %v1771_v8 = vadd.f32 %v330_v54, %v312_v4 }
  0xb8   :  { %v498_v21 = vadd.f32 %v1415_v58, %v497_v55 }
  0xb9   :  { %v314_v9 = vadd.f32 %v313_v57, %v295_v5  ;;  %v799_v16 = vadd.f32 %v798_v11, %v1771_v8  ;;  %v840_v5 = vmul.f32 %v1417_v38, %v839_v61 }
  0xbe   :  { %v332_v62 = vpop.f32.mrf.mxu2  ;;  %v510_v0 = vpop.f32.mrf.mxu0 }
  0xbf   :  { %v499_v63 = vpop.f32.mrf.mxu3  ;;  %v676_v1 = vpop.f32.mrf.mxu1  ;;  %v1775_v12 = vadd.f32 %v332_v62, %v314_v9  ;;  %v1781_v22 = vadd.f32 %v510_v0, %v493_v19 }
  0xc0   :  { %v677_v31 = vadd.f32 %v1415_v58, %v676_v1 }
  0xc1   :  { %v800_v18 = vadd.f32 %v799_v16, %v1775_v12  ;;  %v841_v16 = vadd.f32 %v1417_v38, %v840_v5 }
  0xc3   :  { %v801_v24 = vrot.slane %v800_v18, 4 }
  0xc5   :  { %v802_v34 = vadd.f32 %v801_v24, %v800_v18  ;;  %v1807_v24 = vsel %vm842_vm1, %v1417_v38, %v841_v16 }
  0xc6   :  { %v694_v10 = vpop.f32.mrf.mxu2  ;;  %v512_v14 = vpop.f32.mrf.mxu0 }
  0xc7   :  { %v789_v13 = vpop.f32.mrf.mxu3  ;;  %v678_v15 = vpop.f32.mrf.mxu1  ;;  %v1779_v20 = vadd.f32 %v512_v14, %v495_v17  ;;  %v1790_v39 = vadd.f32 %v694_v10, %v677_v31  ;;  %v803_v43 = vrot.slane %v802_v34, 2 }
  0xc8   :  { %v679_v32 = vadd.f32 %v1415_v58, %v678_v15  ;;  %v1794_v44 = vadd.f32 %v1415_v58, %v789_v13 }
  0xc9   :  { %v808_v28 = vadd.f32 %v1779_v20, %v1781_v22  ;;  %v804_v57 = vadd.f32 %v803_v43, %v802_v34 }
  0xcb   :  { %v805_v1 = vrot.slane %v804_v57, 1 }
  0xcd   :  { %v806_v13 = vadd.f32 %v805_v1, %v804_v57 }
  0xce   :  { %v696_v23 = vpop.f32.mrf.mxu2  ;;  %v515_v26 = vpop.f32.mrf.mxu0 }
  0xcf   :  { %v791_v25 = vpop.f32.mrf.mxu3  ;;  %v1785_v29 = vadd.f32 %v515_v26, %v498_v21  ;;  %v681_v30 = vpop.f32.mrf.mxu1  ;;  %v1788_v35 = vadd.f32 %v696_v23, %v679_v32 }
  0xd0   :  { %v682_v36 = vadd.f32 %v1415_v58, %v681_v30  ;;  %v1792_v40 = vadd.f32 %v1415_v58, %v791_v25 }
  0xd1   :  { %v809_v33 = vadd.f32 %v808_v28, %v1785_v29  ;;  %v817_v45 = vadd.f32 %v1788_v35, %v1790_v39 }
  0xd2   :  { %v826_v53 = vadd.f32 %v1792_v40, %v1794_v44 }
  0xd3   :  { %v810_v37 = vrot.slane %v809_v33, 4 }
  0xd5   :  { %v811_v41 = vadd.f32 %v810_v37, %v809_v33 }
  0xd6   :  { %v699_v42 = vpop.f32.mrf.mxu2  ;;  %v517_v48 = vpop.f32.mrf.mxu0 }
  0xd7   :  { %v1798_v46 = vadd.f32 %v699_v42, %v682_v36  ;;  %v794_v47 = vpop.f32.mrf.mxu3  ;;  %v812_v49 = vrot.slane %v811_v41, 2  ;;  %v683_v52 = vpop.f32.mrf.mxu1 }
  0xd8   :  { %v1800_v50 = vadd.f32 %v1415_v58, %v794_v47 }
  0xd9   :  { %v818_v54 = vadd.f32 %v817_v45, %v1798_v46  ;;  %v813_v55 = vadd.f32 %v812_v49, %v811_v41 }
  0xda   :  { %v828_v56 = vsel %vm827_vm0, %v1800_v50, 0.0 }
  0xdb   :  { %v819_v59 = vrot.slane %v818_v54, 4  ;;  %v829_v60 = vadd.f32 %v828_v56, %v826_v53  ;;  %v814_v62 = vrot.slane %v813_v55, 1 }
  0xdd   :  { %v820_v63 = vadd.f32 %v819_v59, %v818_v54  ;;  %v830_v0 = vrot.slane %v829_v60, 4  ;;  %v815_v9 = vadd.f32 %v814_v62, %v813_v55 }
  0xde   :  { %v701_v58 = vpop.f32.mrf.mxu2 }
  0xdf   :  { %v821_v2 = vrot.slane %v820_v63, 2  ;;  %v831_v3 = vadd.f32 %v830_v0, %v829_v60  ;;  %v796_v4 = vpop.f32.mrf.mxu3  ;;  %v816_v17 = vadd.f32 %v815_v9, %v806_v13 }
  0xe1   :  { %v822_v10 = vadd.f32 %v821_v2, %v820_v63  ;;  %v832_v11 = vrot.slane %v831_v3, 2 }
  0xe3   :  { %v823_v14 = vrot.slane %v822_v10, 1  ;;  %v833_v15 = vadd.f32 %v832_v11, %v831_v3 }
  0xe5   :  { %v824_v18 = vadd.f32 %v823_v14, %v822_v10  ;;  %v834_v19 = vrot.slane %v833_v15, 1 }
  0xe7   :  { %v825_v21 = vadd.f32 %v824_v18, %v816_v17  ;;  %v835_v23 = vadd.f32 %v834_v19, %v833_v15 }
  0xe9   :  { %v836_v25 = vadd.f32 %v835_v23, %v825_v21 }
  0xeb   :  { %v1810_v26 = vmul.f32 %v1807_v24, %v836_v25 }
  0xed   :  { %v845_v27 = vsub.f32 %v1769_v7, %v1810_v26  ;;  %v846_v28 = vsub.f32 %v1767_v6, %v1810_v26  ;;  %v847_v30 = vsub.f32 %v1771_v8, %v1810_v26  ;;  %v863_v31 = vsub.f32 %v1781_v22, %v1810_v26 }
  0xee   :  { %v864_v32 = vsub.f32 %v1779_v20, %v1810_v26  ;;  %v865_v33 = vsub.f32 %v1785_v29, %v1810_v26  ;;  %v878_v34 = vsub.f32 %v1790_v39, %v1810_v26  ;;  %v848_v36 = vsub.f32 %v1775_v12, %v1810_v26 }
  0xef   :  { %v849_v37 = vmul.f32 %v845_v27, %v845_v27  ;;  %v850_v38 = vmul.f32 %v846_v28, %v846_v28  ;;  %v851_v41 = vmul.f32 %v847_v30, %v847_v30  ;;  %v866_v42 = vmul.f32 %v863_v31, %v863_v31 }
  0xf0   :  { %v867_v43 = vmul.f32 %v864_v32, %v864_v32  ;;  %v868_v45 = vmul.f32 %v865_v33, %v865_v33  ;;  %v879_v47 = vsub.f32 %v1788_v35, %v1810_v26  ;;  %v880_v49 = vsub.f32 %v1798_v46, %v1810_v26 }
  0xf1   :  { %v853_v48 = vadd.f32 %v850_v38, %v849_v37  ;;  %v881_v51 = vmul.f32 %v878_v34, %v878_v34  ;;  %v893_v52 = vsub.f32 %v1794_v44, %v1810_v26  ;;  %v894_v55 = vsub.f32 %v1792_v40, %v1810_v26 }
  0xf2   :  { %v869_v53 = vadd.f32 %v867_v43, %v866_v42  ;;  %v882_v54 = vmul.f32 %v879_v47, %v879_v47  ;;  %v895_v56 = vsub.f32 %v1800_v50, %v1810_v26  ;;  %v852_v57 = vmul.f32 %v848_v36, %v848_v36 }
  0xf3   :  { %v854_v59 = vadd.f32 %v853_v48, %v851_v41  ;;  %v883_v60 = vmul.f32 %v880_v49, %v880_v49  ;;  %v896_v61 = vmul.f32 %v893_v52, %v893_v52  ;;  %v897_v0 = vmul.f32 %v894_v55, %v894_v55  ;;  %v910_v55 = vld [vmem:[%s1893_s9] sm:$0x1] }
  0xf4   :  { %v870_v62 = vadd.f32 %v869_v53, %v868_v45  ;;  %v884_v63 = vadd.f32 %v882_v54, %v881_v51  ;;  %v898_v58 = vmul.f32 %v895_v56, %v895_v56 }
  0xf5   :  { %v855_v1 = vadd.f32 %v854_v59, %v852_v57  ;;  %v899_v4 = vadd.f32 %v897_v0, %v896_v61 }
  0xf6   :  { %v871_v2 = vrot.slane %v870_v62, 4  ;;  %v885_v3 = vadd.f32 %v884_v63, %v883_v60  ;;  %v900_v5 = vsel %vm827_vm0, %v898_v58, 0.0 }
  0xf7   :  { %v856_v9 = vrot.slane %v855_v1, 4  ;;  %v901_v13 = vadd.f32 %v900_v5, %v899_v4 }
  0xf8   :  { %v872_v10 = vadd.f32 %v871_v2, %v870_v62  ;;  %v886_v11 = vrot.slane %v885_v3, 4 }
  0xf9   :  { %v857_v14 = vadd.f32 %v856_v9, %v855_v1  ;;  %v902_v17 = vrot.slane %v901_v13, 4 }
  0xfa   :  { %v873_v15 = vrot.slane %v872_v10, 2  ;;  %v887_v16 = vadd.f32 %v886_v11, %v885_v3 }
  0xfb   :  { %v858_v18 = vrot.slane %v857_v14, 2  ;;  %v903_v23 = vadd.f32 %v902_v17, %v901_v13 }
  0xfc   :  { %v874_v19 = vadd.f32 %v873_v15, %v872_v10  ;;  %v888_v21 = vrot.slane %v887_v16, 2 }
  0xfd   :  { %v859_v25 = vadd.f32 %v858_v18, %v857_v14  ;;  %v904_v30 = vrot.slane %v903_v23, 2 }
  0xfe   :  { %v875_v27 = vrot.slane %v874_v19, 1  ;;  %v889_v28 = vadd.f32 %v888_v21, %v887_v16 }
  0xff   :  { %v860_v31 = vrot.slane %v859_v25, 1  ;;  %v905_v33 = vadd.f32 %v904_v30, %v903_v23 }
 0x100   :  { %v890_v32 = vrot.slane %v889_v28, 1  ;;  %v876_v36 = vadd.f32 %v875_v27, %v874_v19 }
 0x101   :  { %v861_v34 = vadd.f32 %v860_v31, %v859_v25  ;;  %v906_v37 = vrot.slane %v905_v33, 1 }
 0x102   :  { %v891_v41 = vadd.f32 %v890_v32, %v889_v28 }
 0x103   :  { %v877_v38 = vadd.f32 %v876_v36, %v861_v34  ;;  %v907_v43 = vadd.f32 %v906_v37, %v905_v33 }
 0x105   :  { %v892_v42 = vadd.f32 %v891_v41, %v877_v38 }
 0x107   :  { %v908_v45 = vadd.f32 %v907_v43, %v892_v42 }
 0x109   :  { %v909_v47 = vmul.f32 %v908_v45, %v1807_v24  ;;  %v923_v24 = vld [vmem:[%s1894_s10] sm:$0x1] }
 0x10b   :  { %v911_v48 = vadd.f32 1e-05, %v909_v47 }
 0x10d   :  { %1418 = vrsqrt.f32 %v911_v48  ;;  %vm918_vm3 = vweird.f32 %v911_v48 }
 0x113   :  { %v1419_v49 = vpop.eup %1418 }
 0x114   :  { %v913_v51 = vmul.f32 %v1419_v49, %v911_v48  ;;  %vm919_vm2 = vweird.f32 %v1419_v49 }
 0x115   :  { %vm920_vm4 = vmor %vm918_vm3, %vm919_vm2 }
 0x116   :  { %v914_v52 = vmul.f32 %v1419_v49, %v913_v51 }
 0x118   :  { %v915_v53 = vmul.f32 0.5, %v914_v52 }
 0x11a   :  { %v916_v54 = vsub.f32 1.5, %v915_v53 }
 0x11c   :  { %v917_v56 = vmul.f32 %v1419_v49, %v916_v54 }
 0x11e   :  { %v921_v57 = vsel %vm920_vm4, %v1419_v49, %v917_v56 }
 0x11f   :  { %v922_v59 = vmul.f32 %v921_v57, %v910_v55 }
 0x121   :  { %v924_v60 = vmul.f32 %v922_v59, %v1810_v26  ;;  %v927_v61 = vperm.slane %v922_v59, 0 }
 0x123   :  { %v925_v62 = vsub.f32 %v923_v24, %v924_v60  ;;  %v929_v63 = vmul.f32 %v927_v61, %v1769_v7  ;;  %v930_v0 = vmul.f32 %v927_v61, %v1767_v6  ;;  %v931_v58 = vmul.f32 %v927_v61, %v1771_v8 }
 0x124   :  { %v932_v1 = vmul.f32 %v927_v61, %v1775_v12  ;;  %v952_v2 = vmul.f32 %v927_v61, %v1781_v22  ;;  %v953_v3 = vmul.f32 %v927_v61, %v1779_v20  ;;  %v954_v5 = vmul.f32 %v927_v61, %v1785_v29 }
 0x125   :  { %v934_v4 = vperm.slane %v925_v62, 0  ;;  %v967_v9 = vmul.f32 %v927_v61, %v1790_v39  ;;  %v968_v26 = vmul.f32 %v927_v61, %v1788_v35  ;;  %v969_v10 = vmul.f32 %v927_v61, %v1798_v46 }
 0x126   :  { %v982_v7 = vmul.f32 %v927_v61, %v1794_v44  ;;  %v983_v6 = vmul.f32 %v927_v61, %v1792_v40  ;;  %v984_v8 = vmul.f32 %v927_v61, %v1800_v50 }
 0x127   :  { %v936_v12 = vadd.f32 %v934_v4, %v929_v63  ;;  %v937_v11 = vadd.f32 %v934_v4, %v930_v0  ;;  %v938_v22 = vadd.f32 %v934_v4, %v931_v58  ;;  %v939_v13 = vadd.f32 %v934_v4, %v932_v1 }
 0x128   :  { %v955_v20 = vadd.f32 %v952_v2, %v934_v4  ;;  %v956_v14 = vadd.f32 %v953_v3, %v934_v4  ;;  %v957_v15 = vadd.f32 %v954_v5, %v934_v4  ;;  %v970_v29 = vadd.f32 %v967_v9, %v934_v4 }
 0x129   :  { %v940_v16 = vmax.f32 %v936_v12, 0.0  ;;  %v941_v39 = vmax.f32 %v937_v11, 0.0  ;;  %v942_v17 = vmax.f32 %v938_v22, 0.0  ;;  %v943_v35 = vmax.f32 %v939_v13, 0.0 }
 0x12a   :  { %v958_v18 = vmax.f32 %v955_v20, 0.0  ;;  %v959_v46 = vmax.f32 %v956_v14, 0.0  ;;  %v960_v19 = vmax.f32 %v957_v15, 0.0  ;;  %v971_v44 = vadd.f32 %v968_v26, %v934_v4 }
 0x12b   :  { %v1391_v21 = vpack.c.bf16 %v941_v39, %v940_v16  ;;  %v1396_v40 = vpack.c.bf16 %v943_v35, %v942_v17  ;;  %v972_v23 = vadd.f32 %v969_v10, %v934_v4  ;;  %v973_v50 = vmax.f32 %v970_v29, 0.0 }
 0x12c   :  { %v963_v25 = vpack.c.bf16 %v960_v19, %v960_v19  ;;  %v1401_v27 = vpack.c.bf16 %v959_v46, %v958_v18  ;;  %v974_v28 = vmax.f32 %v971_v44, 0.0  ;;  %v985_v30 = vadd.f32 %v982_v7, %v934_v4 }
 0x12d   :  { %1392 = vst [vmem:[%s1895_s11] sm:$0xff] %v1391_v21   ;;  %v975_v31 = vmax.f32 %v972_v23, 0.0  ;;  %v986_v32 = vadd.f32 %v983_v6, %v934_v4  ;;  %v987_v33 = vadd.f32 %v984_v8, %v934_v4 }
 0x12e   :  { %1413 = vst [vmem:[%s1895_s11 + $0x8] sm:$0xff] %v1396_v40   ;;  %v1406_v34 = vpack.c.bf16 %v974_v28, %v973_v50  ;;  %v988_v36 = vmax.f32 %v985_v30, 0.0 }
 0x12f   :  { %1402 = vst [vmem:[%s1896_s12] sm:$0xff] %v1401_v27   ;;  %v978_v37 = vpack.c.bf16 %v975_v31, %v975_v31  ;;  %v989_v38 = vmax.f32 %v986_v32, 0.0  ;;  %v990_v41 = vmax.f32 %v987_v33, 0.0 }
 0x130   :  { %966 = vst [vmem:[%s1896_s12 + $0x8] sm:$0xf] %v963_v25 }
 0x131   :  { %1407 = vst [vmem:[%s1897_s13] sm:$0xff] %v1406_v34   ;;  %v993_v42 = vpack.c.bf16 %v990_v41, %v990_v41  ;;  %v1411_v43 = vpack.c.bf16 %v989_v38, %v988_v36 }
 0x132   :  { %981 = vst [vmem:[%s1897_s13 + $0x8] sm:$0xf] %v978_v37 }
 0x133   :  { %1412 = vst [vmem:[%s1898_s14] sm:$0xff] %v1411_v43  }
 0x134   :  { %996 = vst [vmem:[%s1898_s14 + $0x8] sm:$0x1] %v993_v42 }

// kernel: dcae_forward.14
= control target key start
LH: loop header
LB: loop body
LE: loop exit
PB: predicated region body
PF: predicated region fallthrough
CT: control target
= control target key end

     0   :  { %vm831_vm0 = vcmask 1041408   ;;  %s2880_s4 = inlined_call_operand.vmem [shape: bf16[256,128], index: 4, kind: input, shape index: {}]   ;;  %s2881_s8 = inlined_call_operand.vmem [shape: f32[1,128], index: 8, kind: input, shape index: {}]   ;;  %s2882_s0 = inlined_call_operand.vmem [shape: bf16[98,256], index: 0, kind: input, shape index: {}]   ;;  %s2883_s6 = inlined_call_operand.vmem [shape: bf16[128,128], index: 6, kind: input, shape index: {}]   ;;  %s2884_s5 = inlined_call_operand.vmem [shape: bf16[128,128], index: 5, kind: input, shape index: {}]   ;;  %s2885_s7 = inlined_call_operand.vmem [shape: bf16[128,128], index: 7, kind: input, shape index: {}]   ;;  %s2886_s2 = inlined_call_operand.vmem [shape: bf16[98,128], index: 2, kind: input, shape index: {}]   ;;  %s2887_s1 = inlined_call_operand.vmem [shape: bf16[98,128], index: 1, kind: input, shape index: {}]   ;;  %s2888_s3 = inlined_call_operand.vmem [shape: bf16[98,128], index: 3, kind: input, shape index: {}]   ;;  %s2889_s9 = inlined_call_operand.vmem [shape: f32[1,128], index: 9, kind: input, shape index: {}]   ;;  %s2890_s10 = inlined_call_operand.vmem [shape: f32[1,128], index: 10, kind: input, shape index: {}]   ;;  %s2891_s11 = inlined_call_operand.vmem [shape: bf16[98,128], index: 11, kind: output, shape index: {0}]   ;;  %s2892_s12 = inlined_call_operand.vmem [shape: bf16[98,128], index: 12, kind: output, shape index: {1}]   ;;  %s2893_s13 = inlined_call_operand.vmem [shape: bf16[98,128], index: 13, kind: output, shape index: {2}]   ;;  %s2894_s14 = inlined_call_operand.vmem [shape: bf16[98,128], index: 14, kind: output, shape index: {3}]  }
   0x1   :  { %v1691_v0 = vld [vmem:[%s2880_s4 + $0x38] sm:$0xff]  ;;  %v1690_v1 = vld [vmem:[%s2880_s4 + $0x30] sm:$0xff]  ;;  %v1689_v2 = vld [vmem:[%s2880_s4 + $0x28] sm:$0xff] }
   0x2   :  { %254 = vmatpush.bf16.msra.mxu0 %v1691_v0  ;;  %1882 = vmatpush.bf16.msra.mxu1 %v1691_v0  ;;  %v1688_v3 = vld [vmem:[%s2880_s4 + $0x20] sm:$0xff]  ;;  %v1687_v4 = vld [vmem:[%s2880_s4 + $0x18] sm:$0xff]  ;;  %v1686_v5 = vld [vmem:[%s2880_s4 + $0x10] sm:$0xff] }
   0x3   :  { %1883 = vmatpush.bf16.msra.mxu2 %v1691_v0  ;;  %1884 = vmatpush.bf16.msra.mxu3 %v1691_v0  ;;  %v1685_v6 = vld [vmem:[%s2880_s4 + $0x8] sm:$0xff]  ;;  %v2012_v7 = vld [vmem:[%s2882_s0 + $0x60] sm:$0x11]  ;;  %v1727_v16 = vld [vmem:[%s2883_s6 + $0x38] sm:$0xff] }
   0x4   :  { %v1684_v8 = vld [vmem:[%s2880_s4] sm:$0xff]  ;;  %v1673_v10 = vld [vmem:[%s2882_s0 + $0x4] sm:$0xf0]  ;;  %v128_v15 = vunpack.c.l.b16 %v2012_v7  ;;  %v1713_v17 = vld [vmem:[%s2884_s5 + $0x38] sm:$0xff] }
   0x5   :  { %v1394_v9 = vld [vmem:[%s2882_s0] sm:$0xf]  ;;  %v1677_v12 = vld [vmem:[%s2882_s0 + $0x24] sm:$0xf0]  ;;  %v1699_v21 = vld [vmem:[%s2880_s4 + $0x78] sm:$0xff] }
   0x6   :  { %255 = vmatpush.bf16.msra.mxu0 %v1690_v1  ;;  %1885 = vmatpush.bf16.msra.mxu1 %v1690_v1  ;;  %v1410_v11 = vld [vmem:[%s2882_s0 + $0x20] sm:$0xf]  ;;  %v1681_v14 = vld [vmem:[%s2882_s0 + $0x44] sm:$0xf0]  ;;  %v1395_v18 = vor.u32 %v1673_v10, %v1394_v9  ;;  %v1741_v22 = vld [vmem:[%s2885_s7 + $0x38] sm:$0xff]  ;;  %v142_v23 = vpack.c.b16 %v128_v15, %v128_v15 }
   0x7   :  { %1886 = vmatpush.bf16.msra.mxu2 %v1690_v1  ;;  %1887 = vmatpush.bf16.msra.mxu3 %v1690_v1  ;;  %v1426_v13 = vld [vmem:[%s2882_s0 + $0x40] sm:$0xf]  ;;  %v1411_v19 = vor.u32 %v1677_v12, %v1410_v11  ;;  %v1726_v24 = vld [vmem:[%s2883_s6 + $0x30] sm:$0xff]  ;;  %v1725_v28 = vld [vmem:[%s2883_s6 + $0x28] sm:$0xff] }
   0x8   :  { %v1427_v20 = vor.u32 %v1681_v14, %v1426_v13  ;;  %v1712_v25 = vld [vmem:[%s2884_s5 + $0x30] sm:$0xff]  ;;  %v1711_v29 = vld [vmem:[%s2884_s5 + $0x28] sm:$0xff]  ;;  %v1724_v32 = vld [vmem:[%s2883_s6 + $0x20] sm:$0xff] }
   0x9   :  { %v1698_v26 = vld [vmem:[%s2880_s4 + $0x70] sm:$0xff]  ;;  %v1697_v30 = vld [vmem:[%s2880_s4 + $0x68] sm:$0xff]  ;;  %v1710_v33 = vld [vmem:[%s2884_s5 + $0x20] sm:$0xff] }
   0xa   :  { %256 = vmatpush.bf16.msra.mxu0 %v1689_v2  ;;  %1888 = vmatpush.bf16.msra.mxu1 %v1689_v2  ;;  %v1740_v27 = vld [vmem:[%s2885_s7 + $0x30] sm:$0xff]  ;;  %v1739_v31 = vld [vmem:[%s2885_s7 + $0x28] sm:$0xff]  ;;  %v1696_v34 = vld [vmem:[%s2880_s4 + $0x60] sm:$0xff] }
   0xb   :  { %1889 = vmatpush.bf16.msra.mxu2 %v1689_v2  ;;  %1890 = vmatpush.bf16.msra.mxu3 %v1689_v2  ;;  %v1402_v35 = vld [vmem:[%s2882_s0 + $0x10] sm:$0xf]  ;;  %v1675_v36 = vld [vmem:[%s2882_s0 + $0x14] sm:$0xf0]  ;;  %v1738_v39 = vld [vmem:[%s2885_s7 + $0x20] sm:$0xff] }
   0xc   :  { %v1418_v37 = vld [vmem:[%s2882_s0 + $0x30] sm:$0xf]  ;;  %v1679_v38 = vld [vmem:[%s2882_s0 + $0x34] sm:$0xf0]  ;;  %v1403_v44 = vor.u32 %v1675_v36, %v1402_v35  ;;  %v1721_v53 = vld [vmem:[%s2883_s6 + $0x8] sm:$0xff] }
   0xd   :  { %v1434_v40 = vld [vmem:[%s2882_s0 + $0x50] sm:$0xf]  ;;  %v1683_v41 = vld [vmem:[%s2882_s0 + $0x54] sm:$0xf0]  ;;  %v1419_v45 = vor.u32 %v1679_v38, %v1418_v37  ;;  %v1707_v54 = vld [vmem:[%s2884_s5 + $0x8] sm:$0xff]  ;;  %v129_v38 = vunpack.c.h.b16 %v2012_v7 }
   0xe   :  { %257 = vmatpush.bf16.msra.mxu0 %v1688_v3  ;;  %1891 = vmatpush.bf16.msra.mxu1 %v1688_v3  ;;  %v1723_v42 = vld [vmem:[%s2883_s6 + $0x18] sm:$0xff]  ;;  %v1435_v46 = vor.u32 %v1683_v41, %v1434_v40  ;;  %v1722_v49 = vld [vmem:[%s2883_s6 + $0x10] sm:$0xff]  ;;  %v1693_v55 = vld [vmem:[%s2880_s4 + $0x48] sm:$0xff] }
   0xf   :  { %1892 = vmatpush.bf16.msra.mxu2 %v1688_v3  ;;  %1893 = vmatpush.bf16.msra.mxu3 %v1688_v3  ;;  %v1709_v43 = vld [vmem:[%s2884_s5 + $0x18] sm:$0xff]  ;;  %v1708_v50 = vld [vmem:[%s2884_s5 + $0x10] sm:$0xff]  ;;  %v1735_v56 = vld [vmem:[%s2885_s7 + $0x8] sm:$0xff] }
  0x10   :  { %v1695_v47 = vld [vmem:[%s2880_s4 + $0x58] sm:$0xff]  ;;  %v1694_v51 = vld [vmem:[%s2880_s4 + $0x50] sm:$0xff]  ;;  %v1720_v57 = vld [vmem:[%s2883_s6] sm:$0xff] }
  0x11   :  { %v1737_v48 = vld [vmem:[%s2885_s7 + $0x18] sm:$0xff]  ;;  %v1736_v52 = vld [vmem:[%s2885_s7 + $0x10] sm:$0xff]  ;;  %v1706_v58 = vld [vmem:[%s2884_s5] sm:$0xff] }
  0x12   :  { %258 = vmatpush.bf16.msra.mxu0 %v1687_v4  ;;  %1894 = vmatpush.bf16.msra.mxu1 %v1687_v4  ;;  %v1692_v59 = vld [vmem:[%s2880_s4 + $0x40] sm:$0xff]  ;;  %v1396_v61 = vld [vmem:[%s2882_s0 + $0x8] sm:$0xf0]  ;;  %v1674_v3 = vld [vmem:[%s2882_s0 + $0x14] sm:$0xf] }
  0x13   :  { %1895 = vmatpush.bf16.msra.mxu2 %v1687_v4  ;;  %1896 = vmatpush.bf16.msra.mxu3 %v1687_v4  ;;  %v1672_v60 = vld [vmem:[%s2882_s0 + $0x4] sm:$0xf]  ;;  %v1404_v4 = vld [vmem:[%s2882_s0 + $0x18] sm:$0xf0]  ;;  %v1729_v9 = vld [vmem:[%s2888_s3 + $0x8] sm:$0xff] }
  0x14   :  { %v1714_v62 = vld [vmem:[%s2886_s2] sm:$0xff]  ;;  %v1399_v0 = vor.u32 %v1672_v60, %v1396_v61  ;;  %v1412_v11 = vld [vmem:[%s2882_s0 + $0x28] sm:$0xf0]  ;;  %v1716_v12 = vld [vmem:[%s2886_s2 + $0x10] sm:$0xff] }
  0x15   :  { %v1734_v63 = vld [vmem:[%s2885_s7] sm:$0xff]  ;;  %v1702_v14 = vld [vmem:[%s2887_s1 + $0x10] sm:$0xff] }
  0x16   :  { %259 = vmatpush.bf16.msra.mxu0 %v1686_v5  ;;  %1897 = vmatpush.bf16.msra.mxu1 %v1686_v5  ;;  %v1700_v1 = vld [vmem:[%s2887_s1] sm:$0xff]  ;;  %v1730_v15 = vld [vmem:[%s2888_s3 + $0x10] sm:$0xff] }
  0x17   :  { %1898 = vmatpush.bf16.msra.mxu2 %v1686_v5  ;;  %1899 = vmatpush.bf16.msra.mxu3 %v1686_v5  ;;  %v1728_v2 = vld [vmem:[%s2888_s3] sm:$0xff]  ;;  %v1715_v5 = vld [vmem:[%s2886_s2 + $0x8] sm:$0xff]  ;;  %v352_v36 = vld [vmem:[%s2887_s1 + $0x30] sm:$0x1] }
  0x18   :  { %v1676_v10 = vld [vmem:[%s2882_s0 + $0x24] sm:$0xf]  ;;  %v672_v37 = vld [vmem:[%s2888_s3 + $0x30] sm:$0x1] }
  0x19   :  { %v1415_v13 = vor.u32 %v1676_v10, %v1412_v11  ;;  %v714_v40 = vunpack.c.l.b16 %v672_v37 }
  0x1a   :  { %260 = vmatpush.bf16.msra.mxu0 %v1685_v6  ;;  %1900 = vmatpush.bf16.msra.mxu1 %v1685_v6 }
  0x1b   :  { %1901 = vmatpush.bf16.msra.mxu2 %v1685_v6  ;;  %1902 = vmatpush.bf16.msra.mxu3 %v1685_v6  ;;  %v1407_v6 = vor.u32 %v1674_v3, %v1404_v4 }
  0x1e   :  { %261 = vmatpush.bf16.msra.mxu0 %v1684_v8  ;;  %1903 = vmatpush.bf16.msra.mxu1 %v1684_v8 }
  0x1f   :  { %1904 = vmatpush.bf16.msra.mxu2 %v1684_v8  ;;  %1905 = vmatpush.bf16.msra.mxu3 %v1684_v8  ;;  %v1701_v8 = vld [vmem:[%s2887_s1 + $0x8] sm:$0xff] }
  0x21   :  { %262 = vmatmul.bf16.vlgmr.msra.gmra.mxu0 %v1395_v18  ;;  %272 = vmatmul.bf16.vlgmr.msra.gmra.mxu1 %v1411_v19  ;;  %v1717_v18 = vld [vmem:[%s2886_s2 + $0x18] sm:$0xff] }
  0x22   :  { %282 = vmatmul.bf16.vlgmr.msra.gmra.mxu2 %v1427_v20  ;;  %297 = vmatpush.bf16.msrb.mxu1 %v1699_v21  ;;  %v1703_v20 = vld [vmem:[%s2887_s1 + $0x18] sm:$0xff] }
  0x23   :  { %617 = vmatpush.bf16.msrb.mxu3 %v1727_v16  ;;  %457 = vmatpush.bf16.msrb.mxu2 %v1713_v17  ;;  %v1678_v16 = vld [vmem:[%s2882_s0 + $0x34] sm:$0xf]  ;;  %v1420_v17 = vld [vmem:[%s2882_s0 + $0x38] sm:$0xf0] }
  0x24   :  { %777 = vmatpush.bf16.msrb.mxu0 %v1741_v22  ;;  %292 = vmatmul.bf16.vlgmr.msra.gmra.mxu3 %v142_v23  ;;  %v1423_v19 = vor.u32 %v1678_v16, %v1420_v17  ;;  %v1731_v21 = vld [vmem:[%s2888_s3 + $0x18] sm:$0xff]  ;;  %v1680_v22 = vld [vmem:[%s2882_s0 + $0x44] sm:$0xf]  ;;  %v1428_v23 = vld [vmem:[%s2882_s0 + $0x48] sm:$0xf0] }
  0x26   :  { %298 = vmatpush.bf16.msrb.mxu1 %v1698_v26  ;;  %v1704_v26 = vld [vmem:[%s2887_s1 + $0x20] sm:$0xff] }
  0x27   :  { %618 = vmatpush.bf16.msrb.mxu3 %v1726_v24  ;;  %458 = vmatpush.bf16.msrb.mxu2 %v1712_v25  ;;  %v1718_v24 = vld [vmem:[%s2886_s2 + $0x20] sm:$0xff]  ;;  %v1431_v25 = vor.u32 %v1680_v22, %v1428_v23 }
  0x28   :  { %778 = vmatpush.bf16.msrb.mxu0 %v1740_v27  ;;  %v1732_v27 = vld [vmem:[%s2888_s3 + $0x20] sm:$0xff] }
  0x2a   :  { %299 = vmatpush.bf16.msrb.mxu1 %v1697_v30  ;;  %v1719_v30 = vld [vmem:[%s2886_s2 + $0x28] sm:$0xff] }
  0x2b   :  { %619 = vmatpush.bf16.msrb.mxu3 %v1725_v28  ;;  %459 = vmatpush.bf16.msrb.mxu2 %v1711_v29  ;;  %v1682_v28 = vld [vmem:[%s2882_s0 + $0x54] sm:$0xf]  ;;  %v1436_v29 = vld [vmem:[%s2882_s0 + $0x58] sm:$0xf0] }
  0x2c   :  { %779 = vmatpush.bf16.msrb.mxu0 %v1739_v31  ;;  %v1439_v31 = vor.u32 %v1682_v28, %v1436_v29 }
  0x2e   :  { %300 = vmatpush.bf16.msrb.mxu1 %v1696_v34  ;;  %v512_v34 = vld [vmem:[%s2886_s2 + $0x30] sm:$0x1] }
  0x2f   :  { %620 = vmatpush.bf16.msrb.mxu3 %v1724_v32  ;;  %460 = vmatpush.bf16.msrb.mxu2 %v1710_v33  ;;  %v1705_v32 = vld [vmem:[%s2887_s1 + $0x28] sm:$0xff]  ;;  %v554_v35 = vunpack.c.l.b16 %v512_v34 }
  0x30   :  { %780 = vmatpush.bf16.msrb.mxu0 %v1738_v39  ;;  %v1733_v33 = vld [vmem:[%s2888_s3 + $0x28] sm:$0xff]  ;;  %v394_v39 = vunpack.c.l.b16 %v352_v36 }
  0x31   :  { %267 = vmatmul.bf16.gmra.mxu0 %v1403_v44  ;;  %277 = vmatmul.bf16.gmra.mxu1 %v1419_v45  ;;  %v561_v41 = vpack.c.b16 %v554_v35, %v554_v35 }
  0x32   :  { %287 = vmatmul.bf16.gmra.mxu2 %v1435_v46  ;;  %301 = vmatpush.bf16.msrb.mxu1 %v1695_v47  ;;  %v401_v45 = vpack.c.b16 %v394_v39, %v394_v39  ;;  %v721_v46 = vpack.c.b16 %v714_v40, %v714_v40 }
  0x33   :  { %621 = vmatpush.bf16.msrb.mxu3 %v1723_v42  ;;  %461 = vmatpush.bf16.msrb.mxu2 %v1709_v43  ;;  %v143_v42 = vpack.c.b16 %v129_v38, %v129_v38 }
  0x34   :  { %781 = vmatpush.bf16.msrb.mxu0 %v1737_v48 }
  0x36   :  { %302 = vmatpush.bf16.msrb.mxu1 %v1694_v51 }
  0x37   :  { %622 = vmatpush.bf16.msrb.mxu3 %v1722_v49  ;;  %462 = vmatpush.bf16.msrb.mxu2 %v1708_v50 }
  0x38   :  { %782 = vmatpush.bf16.msrb.mxu0 %v1736_v52 }
  0x3a   :  { %303 = vmatpush.bf16.msrb.mxu1 %v1693_v55 }
  0x3b   :  { %623 = vmatpush.bf16.msrb.mxu3 %v1721_v53  ;;  %463 = vmatpush.bf16.msrb.mxu2 %v1707_v54 }
  0x3c   :  { %783 = vmatpush.bf16.msrb.mxu0 %v1735_v56 }
  0x3e   :  { %304 = vmatpush.bf16.msrb.mxu1 %v1692_v59 }
  0x3f   :  { %624 = vmatpush.bf16.msrb.mxu3 %v1720_v57  ;;  %464 = vmatpush.bf16.msrb.mxu2 %v1706_v58  ;;  %v2261_v57 = vld [vmem:[%s2881_s8] ss:$0 sm:$0xff] }
  0x40   :  { %784 = vmatpush.bf16.msrb.mxu0 %v1734_v63 }
  0x41   :  { %305 = vmatmul.bf16.vlgmr.msrb.gmra.mxu1 %v1399_v0 }
  0x42   :  { %625 = vmatmul.bf16.vlgmr.msrb.gmra.mxu3 %v1714_v62  ;;  %465 = vmatmul.bf16.vlgmr.msrb.gmra.mxu2 %v1700_v1 }
  0x43   :  { %785 = vmatmul.bf16.vlgmr.msrb.gmra.mxu0 %v1728_v2 }
  0x51   :  { %310 = vmatmul.bf16.gmra.mxu1 %v1407_v6 }
  0x52   :  { %630 = vmatmul.bf16.gmra.mxu3 %v1715_v5  ;;  %470 = vmatmul.bf16.gmra.mxu2 %v1701_v8 }
  0x53   :  { %790 = vmatmul.bf16.gmra.mxu0 %v1729_v9 }
  0x61   :  { %315 = vmatmul.bf16.gmra.mxu1 %v1415_v13 }
  0x62   :  { %635 = vmatmul.bf16.gmra.mxu3 %v1716_v12  ;;  %475 = vmatmul.bf16.gmra.mxu2 %v1702_v14 }
  0x63   :  { %795 = vmatmul.bf16.gmra.mxu0 %v1730_v15 }
  0x71   :  { %320 = vmatmul.bf16.gmra.mxu1 %v1423_v19 }
  0x72   :  { %640 = vmatmul.bf16.gmra.mxu3 %v1717_v18  ;;  %480 = vmatmul.bf16.gmra.mxu2 %v1703_v20 }
  0x73   :  { %800 = vmatmul.bf16.gmra.mxu0 %v1731_v21 }
  0x81   :  { %325 = vmatmul.bf16.gmra.mxu1 %v1431_v25 }
  0x82   :  { %645 = vmatmul.bf16.gmra.mxu3 %v1718_v24  ;;  %485 = vmatmul.bf16.gmra.mxu2 %v1704_v26 }
  0x83   :  { %805 = vmatmul.bf16.gmra.mxu0 %v1732_v27 }
  0x91   :  { %330 = vmatmul.bf16.gmra.mxu1 %v1439_v31 }
  0x92   :  { %650 = vmatmul.bf16.gmra.mxu3 %v1719_v30  ;;  %490 = vmatmul.bf16.gmra.mxu2 %v1705_v32 }
  0x93   :  { %810 = vmatmul.bf16.gmra.mxu0 %v1733_v33 }
  0x9e   :  { %v263_v43 = vpop.f32.mrf.mxu0  ;;  %v273_v44 = vpop.f32.mrf.mxu1 }
  0x9f   :  { %v264_v58 = vadd.f32 %v2261_v57, %v263_v43  ;;  %v274_v19 = vadd.f32 %v2261_v57, %v273_v44 }
  0xa1   :  { %335 = vmatmul.bf16.gmra.mxu1 %v143_v42 }
  0xa2   :  { %655 = vmatmul.bf16.gmra.mxu3 %v561_v41  ;;  %495 = vmatmul.bf16.gmra.mxu2 %v401_v45 }
  0xa3   :  { %815 = vmatmul.bf16.gmra.mxu0 %v721_v46 }
  0xa5   :  { %v2250_v47 = vpop.f32.mrf.mxu2 }
  0xa6   :  { %v265_v48 = vpop.f32.mrf.mxu0  ;;  %v275_v49 = vpop.f32.mrf.mxu1 }
  0xa7   :  { %v2252_v50 = vpop.f32.mrf.mxu3  ;;  %v266_v0 = vadd.f32 %v2261_v57, %v265_v48  ;;  %v276_v25 = vadd.f32 %v2261_v57, %v275_v49 }
  0xad   :  { %v2254_v51 = vpop.f32.mrf.mxu2 }
  0xae   :  { %v268_v7 = vpop.f32.mrf.mxu0  ;;  %v278_v52 = vpop.f32.mrf.mxu1 }
  0xaf   :  { %v295_v53 = vpop.f32.mrf.mxu3  ;;  %v269_v6 = vadd.f32 %v2261_v57, %v268_v7  ;;  %v279_v31 = vadd.f32 %v2261_v57, %v278_v52 }
  0xb5   :  { %v2256_v54 = vpop.f32.mrf.mxu2 }
  0xb6   :  { %v270_v55 = vpop.f32.mrf.mxu0  ;;  %v280_v56 = vpop.f32.mrf.mxu1 }
  0xb7   :  { %v271_v13 = vadd.f32 %v2261_v57, %v270_v55  ;;  %v281_v37 = vadd.f32 %v2261_v57, %v280_v56 }
  0xbd   :  { %v2264_v59 = vpop.f32.mrf.mxu2 }
  0xbe   :  { %v306_v60 = vpop.f32.mrf.mxu1 }
  0xbf   :  { %v2266_v61 = vadd.f32 %v306_v60, %v264_v58 }
  0xc0   :  { %v786_v62 = vpop.f32.mrf.mxu0 }
  0xc1   :  { %v2306_v52 = vadd.f32 %v2261_v57, %v786_v62 }
  0xc3   :  { %2935 = vst [vmem:[#allocation2_spill] sm:$0xff] %v2306_v52 }
  0xc5   :  { %v626_v63 = vpop.f32.mrf.mxu3  ;;  %v2269_v1 = vpop.f32.mrf.mxu2 }
  0xc6   :  { %v308_v2 = vpop.f32.mrf.mxu1 }
  0xc7   :  { %v2271_v3 = vadd.f32 %v308_v2, %v266_v0  ;;  %v284_v0 = vadd.f32 %v2261_v57, %v2250_v47 }
  0xc8   :  { %v788_v4 = vpop.f32.mrf.mxu0 }
  0xc9   :  { %v2309_v53 = vadd.f32 %v2261_v57, %v788_v4  ;;  %v820_v58 = vadd.f32 %v2271_v3, %v2266_v61 }
  0xcb   :  { %2936 = vst [vmem:[#allocation3_spill] sm:$0xff] %v2309_v53  ;;  %v881_v62 = vadd.f32 %v2309_v53, %v2306_v52 }
  0xcd   :  { %v628_v5 = vpop.f32.mrf.mxu3  ;;  %v468_v8 = vpop.f32.mrf.mxu2 }
  0xce   :  { %v311_v9 = vpop.f32.mrf.mxu1  ;;  %v2319_v60 = vadd.f32 %v2261_v57, %v628_v5  ;;  %v2326_v2 = vadd.f32 %v2261_v57, %v468_v8  ;;  %v2338_v5 = vadd.f32 %v2261_v57, %v626_v63  ;;  %v2346_v8 = vadd.f32 %v2261_v57, %v2269_v1 }
  0xcf   :  { %v2274_v10 = vadd.f32 %v311_v9, %v269_v6  ;;  %v2335_v9 = vadd.f32 %v2261_v57, %v2252_v50 }
  0xd0   :  { %v791_v11 = vpop.f32.mrf.mxu0 }
  0xd1   :  { %v2314_v56 = vadd.f32 %v2261_v57, %v791_v11  ;;  %v821_v47 = vadd.f32 %v820_v58, %v2274_v10 }
  0xd3   :  { %2937 = vst [vmem:[#allocation4_spill] sm:$0xff] %v2314_v56 }
  0xd5   :  { %v631_v12 = vpop.f32.mrf.mxu3  ;;  %v471_v14 = vpop.f32.mrf.mxu2 }
  0xd6   :  { %v313_v15 = vpop.f32.mrf.mxu1  ;;  %v2342_v11 = vadd.f32 %v2261_v57, %v631_v12  ;;  %v861_v12 = vadd.f32 %v2319_v60, %v2338_v5 }
  0xd7   :  { %v2277_v16 = vadd.f32 %v313_v15, %v271_v13  ;;  %v882_v15 = vadd.f32 %v881_v62, %v2314_v56 }
  0xd8   :  { %v793_v17 = vpop.f32.mrf.mxu0 }
  0xd9   :  { %v2329_v4 = vadd.f32 %v2261_v57, %v793_v17  ;;  %v2350_v17 = vadd.f32 %v2261_v57, %v471_v14 }
  0xdb   :  { %2938 = vst [vmem:[#allocation5_spill] sm:$0xff] %v2329_v4  ;;  %v883_v14 = vadd.f32 %v882_v15, %v2329_v4 }
  0xdd   :  { %v633_v18 = vpop.f32.mrf.mxu3  ;;  %v473_v20 = vpop.f32.mrf.mxu2 }
  0xde   :  { %v316_v21 = vpop.f32.mrf.mxu1  ;;  %v2361_v1 = vadd.f32 %v2261_v57, %v633_v18 }
  0xdf   :  { %v2280_v22 = vadd.f32 %v316_v21, %v274_v19  ;;  %v286_v19 = vadd.f32 %v2261_v57, %v2254_v51  ;;  %v822_v21 = vadd.f32 %v821_v47, %v2277_v16  ;;  %v289_v51 = vadd.f32 %v2261_v57, %v2256_v54 }
  0xe0   :  { %v796_v23 = vpop.f32.mrf.mxu0  ;;  %2940 = vst [vmem:[#allocation7_spill] sm:$0xff] %v2361_v1  ;;  %v291_v54 = vadd.f32 %v2261_v57, %v2264_v59 }
  0xe1   :  { %v2353_v50 = vadd.f32 %v2261_v57, %v796_v23  ;;  %v2367_v23 = vadd.f32 %v2261_v57, %v473_v20 }
  0xe3   :  { %2939 = vst [vmem:[#allocation6_spill] sm:$0xff] %v2353_v50  ;;  %v884_v58 = vadd.f32 %v883_v14, %v2353_v50 }
  0xe5   :  { %v636_v24 = vpop.f32.mrf.mxu3  ;;  %v476_v26 = vpop.f32.mrf.mxu2 }
  0xe6   :  { %v318_v27 = vpop.f32.mrf.mxu1  ;;  %v2377_v18 = vadd.f32 %v2261_v57, %v636_v24  ;;  %v2382_v20 = vadd.f32 %v2261_v57, %v476_v26 }
  0xe7   :  { %v2283_v28 = vadd.f32 %v318_v27, %v276_v25  ;;  %v841_v25 = vadd.f32 %v2326_v2, %v2346_v8 }
  0xe8   :  { %v798_v29 = vpop.f32.mrf.mxu0  ;;  %2942 = vst [vmem:[#allocation9_spill] sm:$0xff] %v2377_v18 }
  0xe9   :  { %v2370_v27 = vadd.f32 %v2261_v57, %v798_v29 }
  0xeb   :  { %2941 = vst [vmem:[#allocation8_spill] sm:$0xff] %v2370_v27 }
  0xed   :  { %v638_v30 = vpop.f32.mrf.mxu3  ;;  %v478_v32 = vpop.f32.mrf.mxu2 }
  0xee   :  { %v321_v33 = vpop.f32.mrf.mxu1  ;;  %v2392_v24 = vadd.f32 %v2261_v57, %v638_v30  ;;  %v2397_v26 = vadd.f32 %v2261_v57, %v478_v32 }
  0xef   :  { %v2286_v34 = vadd.f32 %v321_v33, %v279_v31  ;;  %v862_v31 = vadd.f32 %v861_v12, %v2342_v11  ;;  %v823_v33 = vadd.f32 %v822_v21, %v2280_v22  ;;  %v885_v12 = vadd.f32 %v884_v58, %v2370_v27 }
  0xf0   :  { %v801_v35 = vpop.f32.mrf.mxu0  ;;  %2944 = vst [vmem:[#allocation11_spill] sm:$0xff] %v2392_v24 }
  0xf1   :  { %v2385_v29 = vadd.f32 %v2261_v57, %v801_v35  ;;  %v863_v62 = vadd.f32 %v862_v31, %v2361_v1  ;;  %v824_v47 = vadd.f32 %v823_v33, %v2283_v28 }
  0xf3   :  { %2943 = vst [vmem:[#allocation10_spill] sm:$0xff] %v2385_v29  ;;  %v864_v59 = vadd.f32 %v863_v62, %v2377_v18  ;;  %v886_v32 = vadd.f32 %v885_v12, %v2385_v29 }
  0xf5   :  { %v2288_v36 = vpop.f32.mrf.mxu3  ;;  %v2291_v38 = vpop.f32.mrf.mxu2  ;;  %v865_v62 = vadd.f32 %v864_v59, %v2392_v24 }
  0xf6   :  { %v323_v39 = vpop.f32.mrf.mxu1  ;;  %v2406_v14 = vadd.f32 %v2261_v57, %v2288_v36 }
  0xf7   :  { %v2293_v40 = vadd.f32 %v323_v39, %v281_v37  ;;  %v842_v39 = vadd.f32 %v841_v25, %v2350_v17  ;;  %v825_v25 = vadd.f32 %v824_v47, %v2286_v34 }
  0xf8   :  { %v803_v41 = vpop.f32.mrf.mxu0  ;;  %2946 = vst [vmem:[#allocation13_spill] sm:$0xff] %v2406_v14  ;;  %v866_v12 = vadd.f32 %v865_v62, %v2406_v14 }
  0xf9   :  { %v843_v15 = vadd.f32 %v842_v39, %v2367_v23  ;;  %v2400_v35 = vadd.f32 %v2261_v57, %v803_v41  ;;  %v2414_v41 = vadd.f32 %v2261_v57, %v2291_v38  ;;  %v826_v36 = vadd.f32 %v825_v25, %v2293_v40 }
  0xfb   :  { %2945 = vst [vmem:[#allocation12_spill] sm:$0xff] %v2400_v35  ;;  %v844_v33 = vadd.f32 %v843_v15, %v2382_v20  ;;  %v887_v15 = vadd.f32 %v886_v32, %v2400_v35 }
  0xfd   :  { %v2295_v42 = vpop.f32.mrf.mxu3  ;;  %v2297_v43 = vpop.f32.mrf.mxu2  ;;  %v845_v47 = vadd.f32 %v844_v33, %v2397_v26 }
  0xfe   :  { %v326_v44 = vpop.f32.mrf.mxu1  ;;  %v2431_v38 = vadd.f32 %v2261_v57, %v2297_v43 }
  0xff   :  { %v2408_v30 = vadd.f32 %v326_v44, %v284_v0  ;;  %v2423_v44 = vadd.f32 %v2261_v57, %v2295_v42  ;;  %v846_v25 = vadd.f32 %v845_v47, %v2414_v41 }
 0x100   :  { %v806_v45 = vpop.f32.mrf.mxu0 }
 0x101   :  { %v2417_v39 = vadd.f32 %v2261_v57, %v806_v45  ;;  %2948 = vst [vmem:[#allocation15_spill] sm:$0xff] %v2423_v44  ;;  %v827_v59 = vadd.f32 %v826_v36, %v2408_v30  ;;  %v867_v32 = vadd.f32 %v866_v12, %v2423_v44 }
 0x103   :  { %2947 = vst [vmem:[#allocation14_spill] sm:$0xff] %v2417_v39  ;;  %v888_v43 = vadd.f32 %v887_v15, %v2417_v39 }
 0x105   :  { %v2299_v46 = vpop.f32.mrf.mxu3  ;;  %v2301_v48 = vpop.f32.mrf.mxu2 }
 0x106   :  { %v328_v49 = vpop.f32.mrf.mxu1  ;;  %v2441_v42 = vadd.f32 %v2261_v57, %v2299_v46  ;;  %v2449_v33 = vadd.f32 %v2261_v57, %v2301_v48 }
 0x107   :  { %v2425_v0 = vadd.f32 %v328_v49, %v286_v19 }
 0x108   :  { %v2303_v7 = vpop.f32.mrf.mxu0  ;;  %2950 = vst [vmem:[#allocation17_spill] sm:$0xff] %v2441_v42 }
 0x109   :  { %v2435_v45 = vadd.f32 %v2261_v57, %v2303_v7  ;;  %v828_v62 = vadd.f32 %v827_v59, %v2425_v0 }
 0x10b   :  { %2949 = vst [vmem:[#allocation16_spill] sm:$0xff] %v2435_v45  ;;  %v889_v36 = vadd.f32 %v888_v43, %v2435_v45 }
 0x10d   :  { %v2311_v55 = vpop.f32.mrf.mxu3  ;;  %v2331_v6 = vpop.f32.mrf.mxu2 }
 0x10e   :  { %v331_v13 = vpop.f32.mrf.mxu1  ;;  %v2458_v46 = vadd.f32 %v2261_v57, %v2311_v55 }
 0x10f   :  { %v2443_v49 = vadd.f32 %v331_v13, %v289_v51  ;;  %v847_v51 = vadd.f32 %v846_v25, %v2431_v38 }
 0x110   :  { %v811_v63 = vpop.f32.mrf.mxu0  ;;  %2952 = vst [vmem:[#allocation19_spill] sm:$0xff] %v2458_v46 }
 0x111   :  { %v2452_v7 = vadd.f32 %v2261_v57, %v811_v63  ;;  %v868_v63 = vadd.f32 %v867_v32, %v2441_v42  ;;  %v829_v15 = vadd.f32 %v828_v62, %v2443_v49 }
 0x113   :  { %2951 = vst [vmem:[#allocation18_spill] sm:$0xff] %v2452_v7  ;;  %v890_v59 = vadd.f32 %v889_v36, %v2452_v7  ;;  %v869_v43 = vadd.f32 %v868_v63, %v2458_v46  ;;  %v1912_v36 = vmov 392.0  }
 0x114   :  { %1908 = vrcp.f32 %v1912_v36 }
 0x115   :  { %v651_v37 = vpop.f32.mrf.mxu3  ;;  %v491_v21 = vpop.f32.mrf.mxu2 }
 0x116   :  { %v333_v31 = vpop.f32.mrf.mxu1  ;;  %v2470_v12 = vadd.f32 %v2261_v57, %v651_v37 }
 0x117   :  { %v2460_v13 = vadd.f32 %v333_v31, %v291_v54  ;;  %v848_v54 = vadd.f32 %v847_v51, %v2449_v33  ;;  %v2475_v31 = vadd.f32 %v2261_v57, %v2331_v6  ;;  %v2490_v51 = vadd.f32 %v2261_v57, %v491_v21 }
 0x118   :  { %v813_v58 = vpop.f32.mrf.mxu0  ;;  %2954 = vst [vmem:[#allocation21_spill] sm:$0xff] %v2470_v12  ;;  %v870_v63 = vadd.f32 %v869_v43, %v2470_v12 }
 0x119   :  { %v2465_v48 = vadd.f32 %v2261_v57, %v813_v58  ;;  %v830_v32 = vadd.f32 %v829_v15, %v2460_v13 }
 0x11b   :  { %2953 = vst [vmem:[#allocation20_spill] sm:$0xff] %v2465_v48  ;;  %v891_v6 = vadd.f32 %v890_v59, %v2465_v48 }
 0x11d   :  { %v653_v19 = vpop.f32.mrf.mxu3  ;;  %v493_v47 = vpop.f32.mrf.mxu2 }
 0x11e   :  { %v336_v55 = vpop.f32.mrf.mxu1  ;;  %v2484_v37 = vadd.f32 %v2261_v57, %v653_v19  ;;  %v2500_v7 = vadd.f32 %v2261_v57, %v493_v47 }
 0x11f   :  { %v2479_v58 = vadd.f32 %v336_v55, %v2335_v9 }
 0x120   :  { %v816_v25 = vpop.f32.mrf.mxu0  ;;  %2955 = vst [vmem:[#allocation22_spill] sm:$0xff] %v2484_v37  ;;  %v871_v48 = vadd.f32 %v870_v63, %v2484_v37 }
 0x121   :  { %v2487_v62 = vadd.f32 %v2261_v57, %v816_v25  ;;  %v832_v9 = vsel %vm831_vm0, %v2479_v58, 0.0  ;;  %v849_v25 = vadd.f32 %v848_v54, %v2475_v31 }
 0x122   :  { %v833_v55 = vadd.f32 %v832_v9, %v830_v32 }
 0x123   :  { %2956 = vst [vmem:[#allocation23_spill] sm:$0xff] %v2487_v62  ;;  %v892_v19 = vsel %vm831_vm0, %v2487_v62, 0.0  ;;  %v850_v36 = vadd.f32 %v849_v25, %v2490_v51 }
 0x124   :  { %v893_v21 = vadd.f32 %v892_v19, %v891_v6  ;;  %v834_v45 = vrot.slane %v833_v55, 4  ;;  %v1909_v6 = vpop.eup %1908 }
 0x125   :  { %v656_v15 = vpop.f32.mrf.mxu3  ;;  %v496_v9 = vpop.f32.mrf.mxu2  ;;  %v851_v19 = vadd.f32 %v850_v36, %v2500_v7  ;;  %vm906_vm1 = vweird.f32 %v1909_v6 }
 0x126   :  { %v2503_v59 = vadd.f32 %v2261_v57, %v656_v15  ;;  %v894_v43 = vrot.slane %v893_v21, 4  ;;  %v835_v62 = vadd.f32 %v834_v45, %v833_v55  ;;  %v2510_v54 = vadd.f32 %v2261_v57, %v496_v9  ;;  %v338_v47 = vpop.f32.mrf.mxu1 }
 0x128   :  { %2957 = vst [vmem:[#allocation24_spill] sm:$0xff] %v2503_v59  ;;  %v872_v32 = vsel %vm831_vm0, %v2503_v59, 0.0  ;;  %v818_v15 = vpop.f32.mrf.mxu0  ;;  %v852_v63 = vsel %vm831_vm0, %v2510_v54, 0.0  ;;  %v836_v25 = vrot.slane %v835_v62, 2  ;;  %v895_v29 = vadd.f32 %v894_v43, %v893_v21 }
 0x129   :  { %v873_v39 = vadd.f32 %v872_v32, %v871_v48  ;;  %v853_v37 = vadd.f32 %v852_v63, %v851_v19  ;;  %v902_v59 = vmul.f32 392.0, %v1909_v6 }
 0x12a   :  { %v837_v55 = vadd.f32 %v836_v25, %v835_v62  ;;  %v896_v57 = vrot.slane %v895_v29, 2 }
 0x12b   :  { %v874_v35 = vrot.slane %v873_v39, 4  ;;  %v854_v45 = vrot.slane %v853_v37, 4  ;;  %v903_v47 = vsub.f32 1.0, %v902_v59 }
 0x12c   :  { %v838_v15 = vrot.slane %v837_v55, 1  ;;  %v897_v46 = vadd.f32 %v896_v57, %v895_v29 }
 0x12d   :  { %v875_v27 = vadd.f32 %v874_v35, %v873_v39  ;;  %v658_v12 = vpop.f32.mrf.mxu3  ;;  %v855_v32 = vadd.f32 %v854_v45, %v853_v37  ;;  %v498_v9 = vpop.f32.mrf.mxu2  ;;  %v904_v42 = vmul.f32 %v1909_v6, %v903_v47 }
 0x12e   :  { %v839_v21 = vadd.f32 %v838_v15, %v837_v55  ;;  %v898_v43 = vrot.slane %v897_v46, 1 }
 0x12f   :  { %v876_v48 = vrot.slane %v875_v27, 2  ;;  %v856_v36 = vrot.slane %v855_v32, 2  ;;  %v905_v39 = vadd.f32 %v1909_v6, %v904_v42 }
 0x130   :  { %v899_v62 = vadd.f32 %v898_v43, %v897_v46 }
 0x131   :  { %v877_v50 = vadd.f32 %v876_v48, %v875_v27  ;;  %v857_v4 = vadd.f32 %v856_v36, %v855_v32  ;;  %v2515_v37 = vsel %vm906_vm1, %v1909_v6, %v905_v39 }
 0x133   :  { %v878_v56 = vrot.slane %v877_v50, 1  ;;  %v858_v44 = vrot.slane %v857_v4, 1 }
 0x135   :  { %v859_v35 = vadd.f32 %v858_v44, %v857_v4  ;;  %v879_v12 = vadd.f32 %v878_v56, %v877_v50 }
 0x137   :  { %v860_v19 = vadd.f32 %v859_v35, %v839_v21 }
 0x139   :  { %v880_v63 = vadd.f32 %v879_v12, %v860_v19 }
 0x13b   :  { %v900_v59 = vadd.f32 %v899_v62, %v880_v63 }
 0x13d   :  { %v2518_v27 = vmul.f32 %v2515_v37, %v900_v59 }
 0x13f   :  { %v909_v29 = vsub.f32 %v2266_v61, %v2518_v27  ;;  %v910_v25 = vsub.f32 %v2271_v3, %v2518_v27  ;;  %v911_v4 = vsub.f32 %v2274_v10, %v2518_v27  ;;  %v912_v44 = vsub.f32 %v2277_v16, %v2518_v27 }
 0x140   :  { %v913_v42 = vsub.f32 %v2280_v22, %v2518_v27  ;;  %v955_v45 = vsub.f32 %v2346_v8, %v2518_v27  ;;  %v956_v48 = vsub.f32 %v2326_v2, %v2518_v27  ;;  %v914_v55 = vsub.f32 %v2283_v28, %v2518_v27 }
 0x141   :  { %v922_v56 = vmul.f32 %v909_v29, %v909_v29  ;;  %v923_v50 = vmul.f32 %v910_v25, %v910_v25  ;;  %v924_v46 = vmul.f32 %v911_v4, %v911_v4  ;;  %v925_v57 = vmul.f32 %v912_v44, %v912_v44 }
 0x142   :  { %v915_v9 = vsub.f32 %v2286_v34, %v2518_v27  ;;  %v926_v47 = vmul.f32 %v913_v42, %v913_v42  ;;  %v957_v15 = vsub.f32 %v2350_v17, %v2518_v27  ;;  %v968_v21 = vmul.f32 %v955_v45, %v955_v45 }
 0x143   :  { %v935_v6 = vadd.f32 %v923_v50, %v922_v56  ;;  %v916_v43 = vsub.f32 %v2293_v40, %v2518_v27  ;;  %v969_v35 = vmul.f32 %v956_v48, %v956_v48  ;;  %v927_v39 = vmul.f32 %v914_v55, %v914_v55 }
 0x144   :  { %v958_v19 = vsub.f32 %v2367_v23, %v2518_v27  ;;  %v917_v62 = vsub.f32 %v2408_v30, %v2518_v27  ;;  %v928_v63 = vmul.f32 %v915_v9, %v915_v9  ;;  %v959_v29 = vsub.f32 %v2382_v20, %v2518_v27 }
 0x145   :  { %v936_v32 = vadd.f32 %v935_v6, %v924_v46  ;;  %v970_v25 = vmul.f32 %v957_v15, %v957_v15  ;;  %v981_v4 = vadd.f32 %v969_v35, %v968_v21  ;;  %v918_v56 = vsub.f32 %v2425_v0, %v2518_v27 }
 0x146   :  { %v929_v50 = vmul.f32 %v916_v43, %v916_v43  ;;  %v1001_v44 = vsub.f32 %v2338_v5, %v2518_v27  ;;  %v1002_v42 = vsub.f32 %v2319_v60, %v2518_v27  ;;  %v960_v6 = vsub.f32 %v2397_v26, %v2518_v27 }
 0x147   :  { %v937_v36 = vadd.f32 %v936_v32, %v925_v57  ;;  %v971_v45 = vmul.f32 %v958_v19, %v958_v19  ;;  %v982_v48 = vadd.f32 %v981_v4, %v970_v25  ;;  %v919_v55 = vsub.f32 %v2443_v49, %v2518_v27 }
 0x148   :  { %v920_v57 = vsub.f32 %v2460_v13, %v2518_v27  ;;  %v921_v32 = vsub.f32 %v2479_v58, %v2518_v27  ;;  %v930_v9 = vmul.f32 %v917_v62, %v917_v62  ;;  %v972_v15 = vmul.f32 %v959_v29, %v959_v29 }
 0x149   :  { %v938_v12 = vadd.f32 %v937_v36, %v926_v47  ;;  %v961_v36 = vsub.f32 %v2414_v41, %v2518_v27  ;;  %v983_v21 = vadd.f32 %v982_v48, %v971_v45  ;;  %v931_v43 = vmul.f32 %v918_v56, %v918_v56 }
 0x14a   :  { %v1003_v35 = vsub.f32 %v2342_v11, %v2518_v27  ;;  %v932_v4 = vmul.f32 %v919_v55, %v919_v55  ;;  %v933_v62 = vmul.f32 %v920_v57, %v920_v57  ;;  %v1004_v29 = vsub.f32 %v2361_v1, %v2518_v27 }
 0x14b   :  { %v939_v59 = vadd.f32 %v938_v12, %v927_v39  ;;  %v1014_v39 = vmul.f32 %v1001_v44, %v1001_v44  ;;  %v1015_v12 = vmul.f32 %v1002_v42, %v1002_v42  ;;  %v984_v25 = vadd.f32 %v983_v21, %v972_v15 }
 0x14c   :  { %v934_v56 = vmul.f32 %v921_v32, %v921_v32  ;;  %v974_v45 = vmul.f32 %v961_v36, %v961_v36  ;;  %v964_v44 = vsub.f32 %v2475_v31, %v2518_v27  ;;  %v1005_v42 = vsub.f32 %v2377_v18, %v2518_v27 }
 0x14d   :  { %v940_v46 = vadd.f32 %v939_v59, %v928_v63  ;;  %v962_v63 = vsub.f32 %v2431_v38, %v2518_v27  ;;  %v973_v59 = vmul.f32 %v960_v6, %v960_v6  ;;  %v1016_v6 = vmul.f32 %v1003_v35, %v1003_v35 }
 0x14e   :  { %v965_v55 = vsub.f32 %v2490_v51, %v2518_v27  ;;  %v967_v57 = vsub.f32 %v2510_v54, %v2518_v27  ;;  %v1006_v36 = vsub.f32 %v2392_v24, %v2518_v27  ;;  %v1017_v21 = vmul.f32 %v1004_v29, %v1004_v29 }
 0x14f   :  { %v941_v47 = vadd.f32 %v940_v46, %v929_v50  ;;  %v963_v50 = vsub.f32 %v2449_v33, %v2518_v27  ;;  %v985_v48 = vadd.f32 %v984_v25, %v973_v59  ;;  %v1047_v35 = vsub.f32 %v2306_v52, %v2518_v27 }
 0x150   :  { %v1018_v25 = vmul.f32 %v1005_v42, %v1005_v42  ;;  %v980_v29 = vmul.f32 %v967_v57, %v967_v57  ;;  %v2960_v42 = vld [vmem:[#allocation17_spill] sm:$0xff] }
 0x151   :  { %v942_v19 = vadd.f32 %v941_v47, %v930_v9  ;;  %v1027_v9 = vadd.f32 %v1015_v12, %v1014_v39  ;;  %v975_v47 = vmul.f32 %v962_v63, %v962_v63  ;;  %v986_v15 = vadd.f32 %v985_v48, %v974_v45 }
 0x152   :  { %v976_v32 = vmul.f32 %v963_v50, %v963_v50  ;;  %v1048_v39 = vsub.f32 %v2309_v53, %v2518_v27  ;;  %v966_v12 = vsub.f32 %v2500_v7, %v2518_v27  ;;  %v1007_v63 = vsub.f32 %v2406_v14, %v2518_v27 }
 0x153   :  { %v943_v46 = vadd.f32 %v942_v19, %v931_v43  ;;  %v1028_v43 = vadd.f32 %v1027_v9, %v1016_v6  ;;  %v987_v59 = vadd.f32 %v986_v15, %v975_v47  ;;  %v977_v45 = vmul.f32 %v964_v44, %v964_v44  ;;  %v2959_v15 = vld [vmem:[#allocation4_spill] sm:$0xff] }
 0x154   :  { %v978_v48 = vmul.f32 %v965_v55, %v965_v55  ;;  %v1019_v9 = vmul.f32 %v1006_v36, %v1006_v36  ;;  %v1049_v53 = vsub.f32 %v2959_v15, %v2518_v27  ;;  %v1060_v18 = vmul.f32 %v1047_v35, %v1047_v35  ;;  %v2961_v36 = vld [vmem:[#allocation5_spill] sm:$0xff]  ;;  %v2966_v15 = vld [vmem:[#allocation8_spill] sm:$0xff] }
 0x155   :  { %v944_v19 = vadd.f32 %v943_v46, %v932_v4  ;;  %v1029_v50 = vadd.f32 %v1028_v43, %v1017_v21  ;;  %v988_v6 = vadd.f32 %v987_v59, %v976_v32  ;;  %v2958_v4 = vld [vmem:[#allocation15_spill] sm:$0xff]  ;;  %v1061_v1 = vmul.f32 %v1048_v39, %v1048_v39  ;;  %v2963_v39 = vld [vmem:[#allocation6_spill] sm:$0xff] }
 0x156   :  { %v1008_v46 = vsub.f32 %v2958_v4, %v2518_v27  ;;  %v946_v14 = vsel %vm831_vm0, %v934_v56, 0.0  ;;  %v1009_v44 = vsub.f32 %v2960_v42, %v2518_v27  ;;  %v1020_v55 = vmul.f32 %v1007_v63, %v1007_v63 }
 0x157   :  { %v1030_v47 = vadd.f32 %v1029_v50, %v1018_v25  ;;  %v945_v52 = vadd.f32 %v944_v19, %v933_v62  ;;  %v989_v24 = vadd.f32 %v988_v6, %v977_v45  ;;  %v979_v32 = vmul.f32 %v966_v12, %v966_v12  ;;  %v2962_v25 = vld [vmem:[#allocation19_spill] sm:$0xff]  ;;  %v2964_v12 = vld [vmem:[#allocation21_spill] sm:$0xff] }
 0x158   :  { %v992_v43 = vsel %vm831_vm0, %v980_v29, 0.0  ;;  %v1050_v59 = vsub.f32 %v2961_v36, %v2518_v27  ;;  %v1010_v62 = vsub.f32 %v2962_v25, %v2518_v27  ;;  %v1021_v19 = vmul.f32 %v1008_v46, %v1008_v46 }
 0x159   :  { %v1031_v57 = vadd.f32 %v1030_v47, %v1019_v9  ;;  %v990_v21 = vadd.f32 %v989_v24, %v978_v48  ;;  %v1051_v56 = vsub.f32 %v2963_v39, %v2518_v27  ;;  %v947_v50 = vadd.f32 %v946_v14, %v945_v52  ;;  %v2965_v48 = vld [vmem:[#allocation24_spill] sm:$0xff]  ;;  %v2967_v39 = vld [vmem:[#allocation22_spill] sm:$0xff] }
 0x15a   :  { %v1062_v6 = vmul.f32 %v1049_v53, %v1049_v53  ;;  %v1073_v63 = vadd.f32 %v1061_v1, %v1060_v18  ;;  %v1011_v24 = vsub.f32 %v2964_v12, %v2518_v27  ;;  %v1013_v29 = vsub.f32 %v2965_v48, %v2518_v27  ;;  %v2968_v1 = vld [vmem:[#allocation10_spill] sm:$0xff] }
 0x15b   :  { %v1032_v35 = vadd.f32 %v1031_v57, %v1020_v55  ;;  %v991_v45 = vadd.f32 %v990_v21, %v979_v32  ;;  %v1022_v9 = vmul.f32 %v1009_v44, %v1009_v44  ;;  %v1052_v46 = vsub.f32 %v2966_v15, %v2518_v27 }
 0x15c   :  { %v1063_v55 = vmul.f32 %v1050_v59, %v1050_v59  ;;  %v1074_v57 = vadd.f32 %v1073_v63, %v1062_v6  ;;  %v1012_v52 = vsub.f32 %v2967_v39, %v2518_v27  ;;  %v1023_v14 = vmul.f32 %v1010_v62, %v1010_v62  ;;  %v2970_v62 = vld [vmem:[#allocation14_spill] sm:$0xff] }
 0x15d   :  { %v1033_v47 = vadd.f32 %v1032_v35, %v1021_v19  ;;  %v993_v36 = vadd.f32 %v992_v43, %v991_v45  ;;  %v1053_v18 = vsub.f32 %v2968_v1, %v2518_v27  ;;  %v948_v32 = vrot.slane %v947_v50, 4  ;;  %v2969_v35 = vld [vmem:[#allocation12_spill] sm:$0xff] }
 0x15e   :  { %v1064_v12 = vmul.f32 %v1051_v56, %v1051_v56  ;;  %v1075_v48 = vadd.f32 %v1074_v57, %v1063_v55  ;;  %v1024_v44 = vmul.f32 %v1011_v24, %v1011_v24  ;;  %v1026_v43 = vmul.f32 %v1013_v29, %v1013_v29  ;;  %v2971_v24 = vld [vmem:[#allocation16_spill] sm:$0xff] }
 0x15f   :  { %v1034_v53 = vadd.f32 %v1033_v47, %v1022_v9  ;;  %v994_v21 = vrot.slane %v993_v36, 4  ;;  %v1054_v45 = vsub.f32 %v2969_v35, %v2518_v27  ;;  %v1065_v59 = vmul.f32 %v1052_v46, %v1052_v46 }
 0x160   :  { %v1076_v6 = vadd.f32 %v1075_v48, %v1064_v12  ;;  %v1025_v63 = vmul.f32 %v1012_v52, %v1012_v52  ;;  %v1055_v9 = vsub.f32 %v2970_v62, %v2518_v27  ;;  %v949_v47 = vadd.f32 %v948_v32, %v947_v50  ;;  %v2972_v12 = vld [vmem:[#allocation18_spill] sm:$0xff] }
 0x161   :  { %v1035_v19 = vadd.f32 %v1034_v53, %v1023_v14  ;;  %v995_v39 = vadd.f32 %v994_v21, %v993_v36  ;;  %v1066_v1 = vmul.f32 %v1053_v18, %v1053_v18  ;;  %v1038_v56 = vsel %vm831_vm0, %v1026_v43, 0.0  ;;  %v2973_v36 = vld [vmem:[#allocation23_spill] sm:$0xff] }
 0x162   :  { %v1077_v25 = vadd.f32 %v1076_v6, %v1065_v59  ;;  %v1056_v29 = vsub.f32 %v2971_v24, %v2518_v27  ;;  %v1067_v55 = vmul.f32 %v1054_v45, %v1054_v45  ;;  %v1057_v48 = vsub.f32 %v2972_v12, %v2518_v27 }
 0x163   :  { %v1036_v15 = vadd.f32 %v1035_v19, %v1024_v44  ;;  %v950_v46 = vrot.slane %v949_v47, 2  ;;  %v996_v52 = vrot.slane %v995_v39, 2  ;;  %v1068_v53 = vmul.f32 %v1055_v9, %v1055_v9 }
 0x164   :  { %v1078_v57 = vadd.f32 %v1077_v25, %v1066_v1  ;;  %v1059_v18 = vsub.f32 %v2973_v36, %v2518_v27  ;;  %v1069_v21 = vmul.f32 %v1056_v29, %v1056_v29 }
 0x165   :  { %v1037_v42 = vadd.f32 %v1036_v15, %v1025_v63  ;;  %v2974_v15 = vld [vmem:[#allocation20_spill] sm:$0xff]  ;;  %v951_v45 = vadd.f32 %v950_v46, %v949_v47  ;;  %v997_v25 = vadd.f32 %v996_v52, %v995_v39 }
 0x166   :  { %v1079_v44 = vadd.f32 %v1078_v57, %v1067_v55  ;;  %v1058_v32 = vsub.f32 %v2974_v15, %v2518_v27  ;;  %v1072_v59 = vmul.f32 %v1059_v18, %v1059_v18 }
 0x167   :  { %v1039_v14 = vadd.f32 %v1038_v56, %v1037_v42  ;;  %v1070_v42 = vmul.f32 %v1057_v48, %v1057_v48  ;;  %v952_v9 = vrot.slane %v951_v45, 1  ;;  %v998_v55 = vrot.slane %v997_v25, 1 }
 0x168   :  { %v1080_v19 = vadd.f32 %v1079_v44, %v1068_v53  ;;  %v1071_v63 = vmul.f32 %v1058_v32, %v1058_v32  ;;  %v1084_v12 = vsel %vm831_vm0, %v1072_v59, 0.0 }
 0x169   :  { %v1040_v50 = vrot.slane %v1039_v14, 4  ;;  %v953_v62 = vadd.f32 %v952_v9, %v951_v45  ;;  %v999_v15 = vadd.f32 %v998_v55, %v997_v25 }
 0x16a   :  { %v1081_v1 = vadd.f32 %v1080_v19, %v1069_v21 }
 0x16b   :  { %v1041_v43 = vadd.f32 %v1040_v50, %v1039_v14  ;;  %v1000_v47 = vadd.f32 %v999_v15, %v953_v62  ;;  %v1094_v62 = vld [vmem:[%s2889_s9] sm:$0x1] }
 0x16c   :  { %v1082_v56 = vadd.f32 %v1081_v1, %v1070_v42 }
 0x16d   :  { %v1042_v6 = vrot.slane %v1041_v43, 2 }
 0x16e   :  { %v1083_v57 = vadd.f32 %v1082_v56, %v1071_v63 }
 0x16f   :  { %v1043_v36 = vadd.f32 %v1042_v6, %v1041_v43 }
 0x170   :  { %v1085_v24 = vadd.f32 %v1084_v12, %v1083_v57 }
 0x171   :  { %v1044_v53 = vrot.slane %v1043_v36, 1 }
 0x172   :  { %v1086_v29 = vrot.slane %v1085_v24, 4 }
 0x173   :  { %v1045_v48 = vadd.f32 %v1044_v53, %v1043_v36 }
 0x174   :  { %v1087_v14 = vadd.f32 %v1086_v29, %v1085_v24 }
 0x175   :  { %v1046_v52 = vadd.f32 %v1045_v48, %v1000_v47 }
 0x176   :  { %v1088_v39 = vrot.slane %v1087_v14, 2 }
 0x178   :  { %v1089_v46 = vadd.f32 %v1088_v39, %v1087_v14 }
 0x17a   :  { %v1090_v44 = vrot.slane %v1089_v46, 1 }
 0x17c   :  { %v1091_v50 = vadd.f32 %v1090_v44, %v1089_v46 }
 0x17e   :  { %v1092_v18 = vadd.f32 %v1091_v50, %v1046_v52 }
 0x180   :  { %v1093_v32 = vmul.f32 %v1092_v18, %v2515_v37  ;;  %v1107_v37 = vld [vmem:[%s2890_s10] sm:$0x1] }
 0x182   :  { %v1095_v21 = vadd.f32 1e-05, %v1093_v32 }
 0x184   :  { %1910 = vrsqrt.f32 %v1095_v21  ;;  %vm1102_vm3 = vweird.f32 %v1095_v21 }
 0x18a   :  { %v1911_v19 = vpop.eup %1910 }
 0x18b   :  { %v1097_v43 = vmul.f32 %v1911_v19, %v1095_v21  ;;  %vm1103_vm2 = vweird.f32 %v1911_v19 }
 0x18c   :  { %vm1104_vm4 = vmor %vm1102_vm3, %vm1103_vm2 }
 0x18d   :  { %v1098_v12 = vmul.f32 %v1911_v19, %v1097_v43 }
 0x18f   :  { %v1099_v45 = vmul.f32 0.5, %v1098_v12 }
 0x191   :  { %v1100_v25 = vsub.f32 1.5, %v1099_v45 }
 0x193   :  { %v1101_v24 = vmul.f32 %v1911_v19, %v1100_v25 }
 0x195   :  { %v1105_v36 = vsel %vm1104_vm4, %v1911_v19, %v1101_v24 }
 0x196   :  { %v1106_v15 = vmul.f32 %v1105_v36, %v1094_v62 }
 0x198   :  { %v1108_v42 = vmul.f32 %v1106_v15, %v2518_v27  ;;  %v2636_v1 = vperm.slane %v1106_v15, 0 }
 0x19a   :  { %v1109_v59 = vsub.f32 %v1107_v37, %v1108_v42  ;;  %v1113_v6 = vmul.f32 %v2636_v1, %v2266_v61  ;;  %v1114_v63 = vmul.f32 %v2636_v1, %v2271_v3  ;;  %v1115_v56 = vmul.f32 %v2636_v1, %v2274_v10 }
 0x19b   :  { %v1116_v9 = vmul.f32 %v2636_v1, %v2277_v16  ;;  %v1117_v55 = vmul.f32 %v2636_v1, %v2280_v22  ;;  %v1118_v27 = vmul.f32 %v2636_v1, %v2283_v28  ;;  %v1119_v57 = vmul.f32 %v2636_v1, %v2286_v34 }
 0x19c   :  { %v1120_v61 = vmul.f32 %v2636_v1, %v2293_v40  ;;  %v1121_v3 = vmul.f32 %v2636_v1, %v2408_v30  ;;  %v1122_v10 = vmul.f32 %v2636_v1, %v2425_v0  ;;  %v1123_v16 = vmul.f32 %v2636_v1, %v2443_v49 }
 0x19d   :  { %v1124_v22 = vmul.f32 %v2636_v1, %v2460_v13  ;;  %v1125_v28 = vmul.f32 %v2636_v1, %v2479_v58  ;;  %v2664_v29 = vperm.slane %v1109_v59, 0  ;;  %v1181_v34 = vmul.f32 %v2636_v1, %v2346_v8 }
 0x19e   :  { %v1182_v40 = vmul.f32 %v2636_v1, %v2326_v2  ;;  %v1183_v30 = vmul.f32 %v2636_v1, %v2350_v17  ;;  %v1184_v0 = vmul.f32 %v2636_v1, %v2367_v23  ;;  %v1185_v49 = vmul.f32 %v2636_v1, %v2382_v20 }
 0x19f   :  { %v1129_v13 = vadd.f32 %v2664_v29, %v1113_v6  ;;  %v1130_v58 = vadd.f32 %v2664_v29, %v1114_v63  ;;  %v1131_v53 = vadd.f32 %v2664_v29, %v1115_v56  ;;  %v1132_v8 = vadd.f32 %v2664_v29, %v1116_v9 }
 0x1a0   :  { %v1133_v14 = vadd.f32 %v2664_v29, %v1117_v55  ;;  %v1134_v2 = vadd.f32 %v2664_v29, %v1118_v27  ;;  %v1135_v17 = vadd.f32 %v2664_v29, %v1119_v57  ;;  %v1136_v47 = vadd.f32 %v2664_v29, %v1120_v61 }
 0x1a1   :  { %v1137_v23 = vadd.f32 %v2664_v29, %v1121_v3  ;;  %v1138_v20 = vadd.f32 %v2664_v29, %v1122_v10  ;;  %v1139_v39 = vadd.f32 %v2664_v29, %v1123_v16  ;;  %v1140_v48 = vadd.f32 %v2664_v29, %v1124_v22 }
 0x1a2   :  { %v1141_v46 = vadd.f32 %v2664_v29, %v1125_v28  ;;  %v1142_v52 = vmax.f32 %v1129_v13, 0.0  ;;  %v1143_v44 = vmax.f32 %v1130_v58, 0.0  ;;  %v1144_v50 = vmax.f32 %v1131_v53, 0.0 }
 0x1a3   :  { %v1145_v18 = vmax.f32 %v1132_v8, 0.0  ;;  %v1146_v32 = vmax.f32 %v1133_v14, 0.0  ;;  %v1147_v21 = vmax.f32 %v1134_v2, 0.0  ;;  %v1148_v19 = vmax.f32 %v1135_v17, 0.0 }
 0x1a4   :  { %v1149_v43 = vmax.f32 %v1136_v47, 0.0  ;;  %v1150_v12 = vmax.f32 %v1137_v23, 0.0  ;;  %v1151_v45 = vmax.f32 %v1138_v20, 0.0  ;;  %v1152_v25 = vmax.f32 %v1139_v39, 0.0 }
 0x1a5   :  { %v1153_v62 = vmax.f32 %v1140_v48, 0.0  ;;  %v1154_v24 = vmax.f32 %v1141_v46, 0.0  ;;  %v1745_v36 = vpack.c.bf16 %v1143_v44, %v1142_v52  ;;  %v1750_v15 = vpack.c.bf16 %v1145_v18, %v1144_v50 }
 0x1a6   :  { %v1755_v37 = vpack.c.bf16 %v1147_v21, %v1146_v32  ;;  %v1760_v42 = vpack.c.bf16 %v1149_v43, %v1148_v19  ;;  %v1765_v59 = vpack.c.bf16 %v1151_v45, %v1150_v12  ;;  %v1186_v6 = vmul.f32 %v2636_v1, %v2397_v26  ;;  %v2975_v43 = vld [vmem:[#allocation7_spill] sm:$0xff]  ;;  %v2976_v45 = vld [vmem:[#allocation9_spill] sm:$0xff] }
 0x1a7   :  { %v1167_v63 = vpack.c.bf16 %v1154_v24, %v1154_v24  ;;  %1746 = vst [vmem:[%s2891_s11] sm:$0xff] %v1745_v36   ;;  %v1770_v56 = vpack.c.bf16 %v1153_v62, %v1152_v25  ;;  %v1187_v9 = vmul.f32 %v2636_v1, %v2414_v41  ;;  %v1188_v55 = vmul.f32 %v2636_v1, %v2431_v38  ;;  %v2977_v62 = vld [vmem:[#allocation11_spill] sm:$0xff] }
 0x1a8   :  { %1862 = vst [vmem:[%s2891_s11 + $0x8] sm:$0xff] %v1750_v15   ;;  %v1189_v27 = vmul.f32 %v2636_v1, %v2449_v33  ;;  %v1190_v26 = vmul.f32 %v2636_v1, %v2475_v31  ;;  %v1191_v57 = vmul.f32 %v2636_v1, %v2490_v51  ;;  %v1192_v61 = vmul.f32 %v2636_v1, %v2500_v7 }
 0x1a9   :  { %1863 = vst [vmem:[%s2891_s11 + $0x10] sm:$0xff] %v1755_v37   ;;  %v1193_v41 = vmul.f32 %v2636_v1, %v2510_v54  ;;  %v1194_v38 = vadd.f32 %v1181_v34, %v2664_v29  ;;  %v1195_v33 = vadd.f32 %v1182_v40, %v2664_v29  ;;  %v1196_v3 = vadd.f32 %v1183_v30, %v2664_v29  ;;  %v2980_v37 = vld [vmem:[#allocation19_spill] sm:$0xff] }
 0x1aa   :  { %1864 = vst [vmem:[%s2891_s11 + $0x18] sm:$0xff] %v1760_v42   ;;  %v1197_v31 = vadd.f32 %v1184_v0, %v2664_v29  ;;  %v1198_v7 = vadd.f32 %v1185_v49, %v2664_v29  ;;  %v1199_v51 = vadd.f32 %v1186_v6, %v2664_v29  ;;  %v1200_v10 = vadd.f32 %v1187_v9, %v2664_v29  ;;  %v2983_v9 = vld [vmem:[#allocation24_spill] sm:$0xff] }
 0x1ab   :  { %1865 = vst [vmem:[%s2891_s11 + $0x20] sm:$0xff] %v1765_v59   ;;  %v1201_v54 = vadd.f32 %v1188_v55, %v2664_v29  ;;  %v1202_v16 = vadd.f32 %v1189_v27, %v2664_v29  ;;  %v1203_v22 = vadd.f32 %v1190_v26, %v2664_v29  ;;  %v1204_v28 = vadd.f32 %v1191_v57, %v2664_v29  ;;  %v2981_v59 = vld [vmem:[#allocation21_spill] sm:$0xff] }
 0x1ac   :  { %1866 = vst [vmem:[%s2891_s11 + $0x28] sm:$0xff] %v1770_v56   ;;  %v1205_v34 = vadd.f32 %v1192_v61, %v2664_v29  ;;  %v1206_v40 = vadd.f32 %v1193_v41, %v2664_v29  ;;  %v1207_v30 = vmax.f32 %v1194_v38, 0.0  ;;  %v1208_v0 = vmax.f32 %v1195_v33, 0.0 }
 0x1ad   :  { %1180 = vst [vmem:[%s2891_s11 + $0x30] sm:$0x1] %v1167_v63  ;;  %v1209_v49 = vmax.f32 %v1196_v3, 0.0  ;;  %v1210_v13 = vmax.f32 %v1197_v31, 0.0  ;;  %v1211_v58 = vmax.f32 %v1198_v7, 0.0  ;;  %v1212_v53 = vmax.f32 %v1199_v51, 0.0 }
 0x1ae   :  { %v1213_v8 = vmax.f32 %v1200_v10, 0.0  ;;  %v1214_v14 = vmax.f32 %v1201_v54, 0.0  ;;  %v1215_v2 = vmax.f32 %v1202_v16, 0.0  ;;  %v1216_v17 = vmax.f32 %v1203_v22, 0.0  ;;  %v2982_v63 = vld [vmem:[#allocation22_spill] sm:$0xff] }
 0x1af   :  { %v1217_v47 = vmax.f32 %v1204_v28, 0.0  ;;  %v1218_v23 = vmax.f32 %v1205_v34, 0.0  ;;  %v1219_v20 = vmax.f32 %v1206_v40, 0.0  ;;  %v1775_v39 = vpack.c.bf16 %v1208_v0, %v1207_v30 }
 0x1b0   :  { %v1780_v48 = vpack.c.bf16 %v1210_v13, %v1209_v49  ;;  %v1785_v46 = vpack.c.bf16 %v1212_v53, %v1211_v58  ;;  %v1790_v52 = vpack.c.bf16 %v1214_v14, %v1213_v8  ;;  %v1795_v44 = vpack.c.bf16 %v1216_v17, %v1215_v2 }
 0x1b1   :  { %v1232_v50 = vpack.c.bf16 %v1219_v20, %v1219_v20  ;;  %1776 = vst [vmem:[%s2892_s12] sm:$0xff] %v1775_v39   ;;  %v1800_v18 = vpack.c.bf16 %v1218_v23, %v1217_v47  ;;  %v1246_v32 = vmul.f32 %v2636_v1, %v2338_v5  ;;  %v1247_v21 = vmul.f32 %v2636_v1, %v2319_v60  ;;  %v2978_v60 = vld [vmem:[#allocation13_spill] sm:$0xff]  ;;  %v2984_v39 = vld [vmem:[#allocation2_spill] sm:$0xff] }
 0x1b2   :  { %1867 = vst [vmem:[%s2892_s12 + $0x8] sm:$0xff] %v1780_v48   ;;  %v1248_v19 = vmul.f32 %v2636_v1, %v2342_v11  ;;  %v1249_v12 = vmul.f32 %v2636_v1, %v2975_v43  ;;  %v1250_v25 = vmul.f32 %v2636_v1, %v2976_v45  ;;  %v1251_v24 = vmul.f32 %v2636_v1, %v2977_v62  ;;  %v2979_v11 = vld [vmem:[#allocation17_spill] sm:$0xff] }
 0x1b3   :  { %1868 = vst [vmem:[%s2892_s12 + $0x10] sm:$0xff] %v1785_v46   ;;  %v1252_v5 = vmul.f32 %v2636_v1, %v2978_v60  ;;  %v1253_v36 = vmul.f32 %v2636_v1, %v2958_v4  ;;  %v1254_v15 = vmul.f32 %v2636_v1, %v2979_v11  ;;  %v1255_v42 = vmul.f32 %v2636_v1, %v2980_v37  ;;  %v2991_v60 = vld [vmem:[#allocation14_spill] sm:$0xff] }
 0x1b4   :  { %1869 = vst [vmem:[%s2892_s12 + $0x18] sm:$0xff] %v1790_v52   ;;  %v1256_v6 = vmul.f32 %v2636_v1, %v2981_v59  ;;  %v1257_v56 = vmul.f32 %v2636_v1, %v2982_v63  ;;  %v1258_v55 = vmul.f32 %v2636_v1, %v2983_v9  ;;  %v1259_v4 = vadd.f32 %v1246_v32, %v2664_v29  ;;  %v2985_v52 = vld [vmem:[#allocation3_spill] sm:$0xff]  ;;  %v2987_v32 = vld [vmem:[#allocation5_spill] sm:$0xff] }
 0x1b5   :  { %1870 = vst [vmem:[%s2892_s12 + $0x20] sm:$0xff] %v1795_v44   ;;  %v1260_v27 = vadd.f32 %v1247_v21, %v2664_v29  ;;  %v1261_v26 = vadd.f32 %v1248_v19, %v2664_v29  ;;  %v1262_v57 = vadd.f32 %v1249_v12, %v2664_v29  ;;  %v1263_v61 = vadd.f32 %v1250_v25, %v2664_v29  ;;  %v2988_v19 = vld [vmem:[#allocation6_spill] sm:$0xff]  ;;  %v2989_v12 = vld [vmem:[#allocation8_spill] sm:$0xff] }
 0x1b6   :  { %1871 = vst [vmem:[%s2892_s12 + $0x28] sm:$0xff] %v1800_v18   ;;  %v1264_v41 = vadd.f32 %v1251_v24, %v2664_v29  ;;  %v1265_v38 = vadd.f32 %v1252_v5, %v2664_v29  ;;  %v1266_v33 = vadd.f32 %v1253_v36, %v2664_v29  ;;  %v1267_v3 = vadd.f32 %v1254_v15, %v2664_v29  ;;  %v2990_v25 = vld [vmem:[#allocation10_spill] sm:$0xff]  ;;  %v2992_v36 = vld [vmem:[#allocation16_spill] sm:$0xff] }
 0x1b7   :  { %1245 = vst [vmem:[%s2892_s12 + $0x30] sm:$0x1] %v1232_v50  ;;  %v1268_v31 = vadd.f32 %v1255_v42, %v2664_v29  ;;  %v1269_v7 = vadd.f32 %v1256_v6, %v2664_v29  ;;  %v1270_v51 = vadd.f32 %v1257_v56, %v2664_v29  ;;  %v1271_v10 = vadd.f32 %v1258_v55, %v2664_v29  ;;  %v2986_v50 = vld [vmem:[#allocation4_spill] sm:$0xff]  ;;  %v2993_v15 = vld [vmem:[#allocation18_spill] sm:$0xff] }
 0x1b8   :  { %v1272_v54 = vmax.f32 %v1259_v4, 0.0  ;;  %v1273_v16 = vmax.f32 %v1260_v27, 0.0  ;;  %v1274_v22 = vmax.f32 %v1261_v26, 0.0  ;;  %v1275_v28 = vmax.f32 %v1262_v57, 0.0  ;;  %v2994_v42 = vld [vmem:[#allocation20_spill] sm:$0xff] }
 0x1b9   :  { %v1276_v34 = vmax.f32 %v1263_v61, 0.0  ;;  %v1277_v40 = vmax.f32 %v1264_v41, 0.0  ;;  %v1278_v30 = vmax.f32 %v1265_v38, 0.0  ;;  %v1279_v0 = vmax.f32 %v1266_v33, 0.0 }
 0x1ba   :  { %v1280_v49 = vmax.f32 %v1267_v3, 0.0  ;;  %v1281_v13 = vmax.f32 %v1268_v31, 0.0  ;;  %v1282_v58 = vmax.f32 %v1269_v7, 0.0  ;;  %v1283_v53 = vmax.f32 %v1270_v51, 0.0 }
 0x1bb   :  { %v1284_v8 = vmax.f32 %v1271_v10, 0.0  ;;  %v1805_v14 = vpack.c.bf16 %v1273_v16, %v1272_v54  ;;  %v1810_v2 = vpack.c.bf16 %v1275_v28, %v1274_v22  ;;  %v1815_v17 = vpack.c.bf16 %v1277_v40, %v1276_v34 }
 0x1bc   :  { %v1820_v47 = vpack.c.bf16 %v1279_v0, %v1278_v30  ;;  %v1825_v23 = vpack.c.bf16 %v1281_v13, %v1280_v49  ;;  %v1830_v20 = vpack.c.bf16 %v1283_v53, %v1282_v58  ;;  %v1311_v48 = vmul.f32 %v2636_v1, %v2984_v39 }
 0x1bd   :  { %v1297_v46 = vpack.c.bf16 %v1284_v8, %v1284_v8  ;;  %1806 = vst [vmem:[%s2893_s13] sm:$0xff] %v1805_v14   ;;  %v1312_v44 = vmul.f32 %v2636_v1, %v2985_v52  ;;  %v1313_v18 = vmul.f32 %v2636_v1, %v2986_v50  ;;  %v1314_v21 = vmul.f32 %v2636_v1, %v2987_v32 }
 0x1be   :  { %1872 = vst [vmem:[%s2893_s13 + $0x8] sm:$0xff] %v1810_v2   ;;  %v1315_v43 = vmul.f32 %v2636_v1, %v2988_v19  ;;  %v1316_v45 = vmul.f32 %v2636_v1, %v2989_v12  ;;  %v1317_v62 = vmul.f32 %v2636_v1, %v2990_v25  ;;  %v1318_v24 = vmul.f32 %v2636_v1, %v2969_v35  ;;  %v2995_v35 = vld [vmem:[#allocation23_spill] sm:$0xff] }
 0x1bf   :  { %1873 = vst [vmem:[%s2893_s13 + $0x10] sm:$0xff] %v1815_v17   ;;  %v1319_v5 = vmul.f32 %v2636_v1, %v2991_v60  ;;  %v1320_v11 = vmul.f32 %v2636_v1, %v2992_v36  ;;  %v1321_v37 = vmul.f32 %v2636_v1, %v2993_v15  ;;  %v1322_v59 = vmul.f32 %v2636_v1, %v2994_v42 }
 0x1c0   :  { %1874 = vst [vmem:[%s2893_s13 + $0x18] sm:$0xff] %v1820_v47   ;;  %v1323_v6 = vmul.f32 %v2636_v1, %v2995_v35  ;;  %v1324_v63 = vadd.f32 %v1311_v48, %v2664_v29  ;;  %v1325_v56 = vadd.f32 %v1312_v44, %v2664_v29  ;;  %v1326_v9 = vadd.f32 %v1313_v18, %v2664_v29 }
 0x1c1   :  { %1875 = vst [vmem:[%s2893_s13 + $0x20] sm:$0xff] %v1825_v23   ;;  %v1327_v55 = vadd.f32 %v1314_v21, %v2664_v29  ;;  %v1328_v4 = vadd.f32 %v1315_v43, %v2664_v29  ;;  %v1329_v27 = vadd.f32 %v1316_v45, %v2664_v29  ;;  %v1330_v26 = vadd.f32 %v1317_v62, %v2664_v29 }
 0x1c2   :  { %1876 = vst [vmem:[%s2893_s13 + $0x28] sm:$0xff] %v1830_v20   ;;  %v1331_v1 = vadd.f32 %v1318_v24, %v2664_v29  ;;  %v1332_v57 = vadd.f32 %v1319_v5, %v2664_v29  ;;  %v1333_v61 = vadd.f32 %v1320_v11, %v2664_v29  ;;  %v1334_v41 = vadd.f32 %v1321_v37, %v2664_v29 }
 0x1c3   :  { %1310 = vst [vmem:[%s2893_s13 + $0x30] sm:$0x1] %v1297_v46  ;;  %v1335_v38 = vadd.f32 %v1322_v59, %v2664_v29  ;;  %v1336_v33 = vadd.f32 %v1323_v6, %v2664_v29  ;;  %v1337_v3 = vmax.f32 %v1324_v63, 0.0  ;;  %v1338_v31 = vmax.f32 %v1325_v56, 0.0 }
 0x1c4   :  { %v1339_v7 = vmax.f32 %v1326_v9, 0.0  ;;  %v1340_v51 = vmax.f32 %v1327_v55, 0.0  ;;  %v1341_v10 = vmax.f32 %v1328_v4, 0.0  ;;  %v1342_v54 = vmax.f32 %v1329_v27, 0.0 }
 0x1c5   :  { %v1343_v16 = vmax.f32 %v1330_v26, 0.0  ;;  %v1344_v22 = vmax.f32 %v1331_v1, 0.0  ;;  %v1345_v28 = vmax.f32 %v1332_v57, 0.0  ;;  %v1346_v34 = vmax.f32 %v1333_v61, 0.0 }
 0x1c6   :  { %v1347_v40 = vmax.f32 %v1334_v41, 0.0  ;;  %v1348_v30 = vmax.f32 %v1335_v38, 0.0  ;;  %v1349_v0 = vmax.f32 %v1336_v33, 0.0  ;;  %v1835_v49 = vpack.c.bf16 %v1338_v31, %v1337_v3 }
 0x1c7   :  { %v1840_v13 = vpack.c.bf16 %v1340_v51, %v1339_v7  ;;  %v1845_v58 = vpack.c.bf16 %v1342_v54, %v1341_v10  ;;  %v1850_v53 = vpack.c.bf16 %v1344_v22, %v1343_v16  ;;  %v1855_v29 = vpack.c.bf16 %v1346_v34, %v1345_v28 }
 0x1c8   :  { %1836 = vst [vmem:[%s2894_s14] sm:$0xff] %v1835_v49   ;;  %v1860_v8 = vpack.c.bf16 %v1348_v30, %v1347_v40  ;;  %v1362_v14 = vpack.c.bf16 %v1349_v0, %v1349_v0 }
 0x1c9   :  { %1877 = vst [vmem:[%s2894_s14 + $0x8] sm:$0xff] %v1840_v13  }
 0x1ca   :  { %1878 = vst [vmem:[%s2894_s14 + $0x10] sm:$0xff] %v1845_v58  }
 0x1cb   :  { %1879 = vst [vmem:[%s2894_s14 + $0x18] sm:$0xff] %v1850_v53  }
 0x1cc   :  { %1880 = vst [vmem:[%s2894_s14 + $0x20] sm:$0xff] %v1855_v29  }
 0x1cd   :  { %1881 = vst [vmem:[%s2894_s14 + $0x28] sm:$0xff] %v1860_v8  }
 0x1ce   :  { %1375 = vst [vmem:[%s2894_s14 + $0x30] sm:$0x1] %v1362_v14 }

// kernel: dcae_forward.15
= control target key start
LH: loop header
LB: loop body
LE: loop exit
PB: predicated region body
PF: predicated region fallthrough
CT: control target
= control target key end

     0   :  { %s4375_s4 = inlined_call_operand.vmem [shape: bf16[128,128], index: 4, kind: input, shape index: {}]   ;;  %s4376_s5 = inlined_call_operand.vmem [shape: bf16[128,128], index: 5, kind: input, shape index: {}]   ;;  %s4377_s6 = inlined_call_operand.vmem [shape: bf16[128,128], index: 6, kind: input, shape index: {}]   ;;  %s4378_s7 = inlined_call_operand.vmem [shape: bf16[128,128], index: 7, kind: input, shape index: {}]   ;;  %s4379_s8 = inlined_call_operand.vmem [shape: f32[1,128], index: 8, kind: input, shape index: {}]   ;;  %s4380_s0 = inlined_call_operand.vmem [shape: bf16[392,128], index: 0, kind: input, shape index: {}]   ;;  %s4381_s1 = inlined_call_operand.vmem [shape: bf16[392,128], index: 1, kind: input, shape index: {}]   ;;  %s4382_s2 = inlined_call_operand.vmem [shape: bf16[392,128], index: 2, kind: input, shape index: {}]   ;;  %s4383_s3 = inlined_call_operand.vmem [shape: bf16[392,128], index: 3, kind: input, shape index: {}]   ;;  %s4384_s9 = inlined_call_operand.vmem [shape: f32[392,128], index: 9, kind: output, shape index: {0}]   ;;  %s4385_s10 = inlined_call_operand.vmem [shape: f32[392,128], index: 10, kind: output, shape index: {1}]   ;;  %s4386_s11 = inlined_call_operand.vmem [shape: f32[392,128], index: 11, kind: output, shape index: {2}]   ;;  %s4387_s12 = inlined_call_operand.vmem [shape: f32[392,128], index: 12, kind: output, shape index: {3}]  }
   0x1   :  { %v2579_v0 = vld [vmem:[%s4375_s4 + $0x38] sm:$0xff]  ;;  %v2578_v4 = vld [vmem:[%s4375_s4 + $0x30] sm:$0xff]  ;;  %v2577_v8 = vld [vmem:[%s4375_s4 + $0x28] sm:$0xff] }
   0x2   :  { %v2611_v1 = vld [vmem:[%s4376_s5 + $0x38] sm:$0xff]  ;;  %301 = vmatpush.bf16.msra.mxu0 %v2579_v0  ;;  %v2610_v5 = vld [vmem:[%s4376_s5 + $0x30] sm:$0xff]  ;;  %v2609_v9 = vld [vmem:[%s4376_s5 + $0x28] sm:$0xff] }
   0x3   :  { %v2643_v2 = vld [vmem:[%s4377_s6 + $0x38] sm:$0xff]  ;;  %797 = vmatpush.bf16.msra.mxu1 %v2611_v1  ;;  %v2642_v6 = vld [vmem:[%s4377_s6 + $0x30] sm:$0xff]  ;;  %v2641_v10 = vld [vmem:[%s4377_s6 + $0x28] sm:$0xff] }
   0x4   :  { %v2675_v3 = vld [vmem:[%s4378_s7 + $0x38] sm:$0xff]  ;;  %1293 = vmatpush.bf16.msra.mxu2 %v2643_v2  ;;  %v2674_v7 = vld [vmem:[%s4378_s7 + $0x30] sm:$0xff]  ;;  %v2673_v11 = vld [vmem:[%s4378_s7 + $0x28] sm:$0xff] }
   0x5   :  { %1789 = vmatpush.bf16.msra.mxu3 %v2675_v3  ;;  %v2576_v12 = vld [vmem:[%s4375_s4 + $0x20] sm:$0xff]  ;;  %v2575_v16 = vld [vmem:[%s4375_s4 + $0x18] sm:$0xff]  ;;  %v2574_v20 = vld [vmem:[%s4375_s4 + $0x10] sm:$0xff] }
   0x6   :  { %302 = vmatpush.bf16.msra.mxu0 %v2578_v4  ;;  %v2608_v13 = vld [vmem:[%s4376_s5 + $0x20] sm:$0xff]  ;;  %v2607_v17 = vld [vmem:[%s4376_s5 + $0x18] sm:$0xff]  ;;  %v2606_v21 = vld [vmem:[%s4376_s5 + $0x10] sm:$0xff] }
   0x7   :  { %798 = vmatpush.bf16.msra.mxu1 %v2610_v5  ;;  %v2640_v14 = vld [vmem:[%s4377_s6 + $0x20] sm:$0xff]  ;;  %v2639_v18 = vld [vmem:[%s4377_s6 + $0x18] sm:$0xff]  ;;  %v2638_v22 = vld [vmem:[%s4377_s6 + $0x10] sm:$0xff] }
   0x8   :  { %1294 = vmatpush.bf16.msra.mxu2 %v2642_v6  ;;  %v2672_v15 = vld [vmem:[%s4378_s7 + $0x20] sm:$0xff]  ;;  %v2671_v19 = vld [vmem:[%s4378_s7 + $0x18] sm:$0xff]  ;;  %v2670_v23 = vld [vmem:[%s4378_s7 + $0x10] sm:$0xff] }
   0x9   :  { %1790 = vmatpush.bf16.msra.mxu3 %v2674_v7  ;;  %v2573_v24 = vld [vmem:[%s4375_s4 + $0x8] sm:$0xff]  ;;  %v2572_v28 = vld [vmem:[%s4375_s4] sm:$0xff]  ;;  %v2550_v40 = vld [vmem:[%s4380_s0 + $0x10] sm:$0xff] }
   0xa   :  { %303 = vmatpush.bf16.msra.mxu0 %v2577_v8  ;;  %v2605_v25 = vld [vmem:[%s4376_s5 + $0x8] sm:$0xff]  ;;  %v2604_v29 = vld [vmem:[%s4376_s5] sm:$0xff]  ;;  %v2582_v41 = vld [vmem:[%s4381_s1 + $0x10] sm:$0xff] }
   0xb   :  { %799 = vmatpush.bf16.msra.mxu1 %v2609_v9  ;;  %v2637_v26 = vld [vmem:[%s4377_s6 + $0x8] sm:$0xff]  ;;  %v2636_v30 = vld [vmem:[%s4377_s6] sm:$0xff]  ;;  %v2614_v42 = vld [vmem:[%s4382_s2 + $0x10] sm:$0xff] }
   0xc   :  { %1295 = vmatpush.bf16.msra.mxu2 %v2641_v10  ;;  %v2669_v27 = vld [vmem:[%s4378_s7 + $0x8] sm:$0xff]  ;;  %v2668_v31 = vld [vmem:[%s4378_s7] sm:$0xff]  ;;  %v2646_v43 = vld [vmem:[%s4383_s3 + $0x10] sm:$0xff] }
   0xd   :  { %1791 = vmatpush.bf16.msra.mxu3 %v2673_v11  ;;  %v2548_v32 = vld [vmem:[%s4380_s0] sm:$0xff]  ;;  %v2549_v36 = vld [vmem:[%s4380_s0 + $0x8] sm:$0xff]  ;;  %v2551_v44 = vld [vmem:[%s4380_s0 + $0x18] sm:$0xff] }
   0xe   :  { %304 = vmatpush.bf16.msra.mxu0 %v2576_v12  ;;  %v2580_v33 = vld [vmem:[%s4381_s1] sm:$0xff]  ;;  %v2581_v37 = vld [vmem:[%s4381_s1 + $0x8] sm:$0xff]  ;;  %v2583_v45 = vld [vmem:[%s4381_s1 + $0x18] sm:$0xff] }
   0xf   :  { %800 = vmatpush.bf16.msra.mxu1 %v2608_v13  ;;  %v2612_v34 = vld [vmem:[%s4382_s2] sm:$0xff]  ;;  %v2613_v38 = vld [vmem:[%s4382_s2 + $0x8] sm:$0xff]  ;;  %v2615_v46 = vld [vmem:[%s4382_s2 + $0x18] sm:$0xff] }
  0x10   :  { %1296 = vmatpush.bf16.msra.mxu2 %v2640_v14  ;;  %v2644_v35 = vld [vmem:[%s4383_s3] sm:$0xff]  ;;  %v2645_v39 = vld [vmem:[%s4383_s3 + $0x8] sm:$0xff]  ;;  %v2647_v47 = vld [vmem:[%s4383_s3 + $0x18] sm:$0xff] }
  0x11   :  { %1792 = vmatpush.bf16.msra.mxu3 %v2672_v15  ;;  %v2552_v48 = vld [vmem:[%s4380_s0 + $0x20] sm:$0xff]  ;;  %v2553_v52 = vld [vmem:[%s4380_s0 + $0x28] sm:$0xff]  ;;  %v2554_v56 = vld [vmem:[%s4380_s0 + $0x30] sm:$0xff] }
  0x12   :  { %305 = vmatpush.bf16.msra.mxu0 %v2575_v16  ;;  %v2584_v49 = vld [vmem:[%s4381_s1 + $0x20] sm:$0xff]  ;;  %v2585_v53 = vld [vmem:[%s4381_s1 + $0x28] sm:$0xff]  ;;  %v2586_v57 = vld [vmem:[%s4381_s1 + $0x30] sm:$0xff] }
  0x13   :  { %801 = vmatpush.bf16.msra.mxu1 %v2607_v17  ;;  %v2616_v50 = vld [vmem:[%s4382_s2 + $0x20] sm:$0xff]  ;;  %v2617_v54 = vld [vmem:[%s4382_s2 + $0x28] sm:$0xff]  ;;  %v2618_v58 = vld [vmem:[%s4382_s2 + $0x30] sm:$0xff] }
  0x14   :  { %1297 = vmatpush.bf16.msra.mxu2 %v2639_v18  ;;  %v2648_v51 = vld [vmem:[%s4383_s3 + $0x20] sm:$0xff]  ;;  %v2649_v55 = vld [vmem:[%s4383_s3 + $0x28] sm:$0xff]  ;;  %v2650_v59 = vld [vmem:[%s4383_s3 + $0x30] sm:$0xff] }
  0x15   :  { %1793 = vmatpush.bf16.msra.mxu3 %v2671_v19  ;;  %v2555_v60 = vld [vmem:[%s4380_s0 + $0x38] sm:$0xff]  ;;  %v3340_v0 = vld [vmem:[%s4379_s8] ss:$0 sm:$0xff] }
  0x16   :  { %306 = vmatpush.bf16.msra.mxu0 %v2574_v20  ;;  %v2587_v61 = vld [vmem:[%s4381_s1 + $0x38] sm:$0xff]  ;;  %v3345_v1 = vld [vmem:[%s4379_s8] ss:$0 sm:$0xff] }
  0x17   :  { %802 = vmatpush.bf16.msra.mxu1 %v2606_v21  ;;  %v2619_v62 = vld [vmem:[%s4382_s2 + $0x38] sm:$0xff]  ;;  %v2556_v2 = vld [vmem:[%s4380_s0 + $0x40] sm:$0xff] }
  0x18   :  { %1298 = vmatpush.bf16.msra.mxu2 %v2638_v22  ;;  %v2651_v63 = vld [vmem:[%s4383_s3 + $0x38] sm:$0xff]  ;;  %v2588_v3 = vld [vmem:[%s4381_s1 + $0x40] sm:$0xff] }
  0x19   :  { %1794 = vmatpush.bf16.msra.mxu3 %v2670_v23  ;;  %v2620_v6 = vld [vmem:[%s4382_s2 + $0x40] sm:$0xff] }
  0x1a   :  { %307 = vmatpush.bf16.msra.mxu0 %v2573_v24  ;;  %v2652_v7 = vld [vmem:[%s4383_s3 + $0x40] sm:$0xff]  ;;  %v2557_v24 = vld [vmem:[%s4380_s0 + $0x48] sm:$0xff] }
  0x1b   :  { %803 = vmatpush.bf16.msra.mxu1 %v2605_v25  ;;  %v3364_v10 = vld [vmem:[%s4379_s8] ss:$0 sm:$0xff]  ;;  %v2589_v25 = vld [vmem:[%s4381_s1 + $0x48] sm:$0xff] }
  0x1c   :  { %1299 = vmatpush.bf16.msra.mxu2 %v2637_v26  ;;  %v3369_v11 = vld [vmem:[%s4379_s8] ss:$0 sm:$0xff] }
  0x1d   :  { %1795 = vmatpush.bf16.msra.mxu3 %v2669_v27 }
  0x1e   :  { %308 = vmatpush.bf16.msra.mxu0 %v2572_v28 }
  0x1f   :  { %804 = vmatpush.bf16.msra.mxu1 %v2604_v29 }
  0x20   :  { %1300 = vmatpush.bf16.msra.mxu2 %v2636_v30 }
  0x21   :  { %1796 = vmatpush.bf16.msra.mxu3 %v2668_v31  ;;  %309 = vmatmul.bf16.vlgmr.msra.gmra.mxu0 %v2548_v32  ;;  %v2621_v31 = vld [vmem:[%s4382_s2 + $0x48] sm:$0xff] }
  0x22   :  { %805 = vmatmul.bf16.vlgmr.msra.gmra.mxu1 %v2580_v33  ;;  %v2653_v32 = vld [vmem:[%s4383_s3 + $0x48] sm:$0xff] }
  0x23   :  { %1301 = vmatmul.bf16.vlgmr.msra.gmra.mxu2 %v2612_v34 }
  0x24   :  { %1797 = vmatmul.bf16.vlgmr.msra.gmra.mxu3 %v2644_v35 }
  0x31   :  { %314 = vmatmul.bf16.gmra.mxu0 %v2549_v36 }
  0x32   :  { %810 = vmatmul.bf16.gmra.mxu1 %v2581_v37 }
  0x33   :  { %1306 = vmatmul.bf16.gmra.mxu2 %v2613_v38 }
  0x34   :  { %1802 = vmatmul.bf16.gmra.mxu3 %v2645_v39 }
  0x41   :  { %319 = vmatmul.bf16.gmra.mxu0 %v2550_v40 }
  0x42   :  { %815 = vmatmul.bf16.gmra.mxu1 %v2582_v41 }
  0x43   :  { %1311 = vmatmul.bf16.gmra.mxu2 %v2614_v42 }
  0x44   :  { %1807 = vmatmul.bf16.gmra.mxu3 %v2646_v43 }
  0x51   :  { %324 = vmatmul.bf16.gmra.mxu0 %v2551_v44 }
  0x52   :  { %820 = vmatmul.bf16.gmra.mxu1 %v2583_v45 }
  0x53   :  { %1316 = vmatmul.bf16.gmra.mxu2 %v2615_v46 }
  0x54   :  { %1812 = vmatmul.bf16.gmra.mxu3 %v2647_v47 }
  0x61   :  { %329 = vmatmul.bf16.gmra.mxu0 %v2552_v48 }
  0x62   :  { %825 = vmatmul.bf16.gmra.mxu1 %v2584_v49 }
  0x63   :  { %1321 = vmatmul.bf16.gmra.mxu2 %v2616_v50 }
  0x64   :  { %1817 = vmatmul.bf16.gmra.mxu3 %v2648_v51 }
  0x71   :  { %334 = vmatmul.bf16.gmra.mxu0 %v2553_v52  ;;  %v2558_v52 = vld [vmem:[%s4380_s0 + $0x50] sm:$0xff] }
  0x72   :  { %830 = vmatmul.bf16.gmra.mxu1 %v2585_v53  ;;  %v2590_v53 = vld [vmem:[%s4381_s1 + $0x50] sm:$0xff] }
  0x73   :  { %1326 = vmatmul.bf16.gmra.mxu2 %v2617_v54 }
  0x74   :  { %1822 = vmatmul.bf16.gmra.mxu3 %v2649_v55 }
  0x81   :  { %339 = vmatmul.bf16.gmra.mxu0 %v2554_v56 }
  0x82   :  { %835 = vmatmul.bf16.gmra.mxu1 %v2586_v57 }
  0x83   :  { %1331 = vmatmul.bf16.gmra.mxu2 %v2618_v58 }
  0x84   :  { %1827 = vmatmul.bf16.gmra.mxu3 %v2650_v59  ;;  %v2622_v59 = vld [vmem:[%s4382_s2 + $0x50] sm:$0xff] }
  0x91   :  { %344 = vmatmul.bf16.gmra.mxu0 %v2555_v60  ;;  %v2654_v60 = vld [vmem:[%s4383_s3 + $0x50] sm:$0xff] }
  0x92   :  { %840 = vmatmul.bf16.gmra.mxu1 %v2587_v61 }
  0x93   :  { %1336 = vmatmul.bf16.gmra.mxu2 %v2619_v62 }
  0x94   :  { %1832 = vmatmul.bf16.gmra.mxu3 %v2651_v63 }
  0x9e   :  { %v310_v4 = vpop.f32.mrf.mxu0 }
  0x9f   :  { %v806_v5 = vpop.f32.mrf.mxu1  ;;  %v311_v8 = vadd.f32 %v3340_v0, %v310_v4 }
  0xa0   :  { %v807_v9 = vadd.f32 %v3345_v1, %v806_v5 }
  0xa1   :  { %2680 = vtanh.f32 %v311_v8  ;;  %349 = vmatmul.bf16.gmra.mxu0 %v2556_v2 }
  0xa2   :  { %845 = vmatmul.bf16.gmra.mxu1 %v2588_v3  ;;  %2682 = vtanh.f32 %v807_v9 }
  0xa3   :  { %1341 = vmatmul.bf16.gmra.mxu2 %v2620_v6 }
  0xa4   :  { %1837 = vmatmul.bf16.gmra.mxu3 %v2652_v7 }
  0xa6   :  { %v1302_v12 = vpop.f32.mrf.mxu2  ;;  %v312_v16 = vpop.f32.mrf.mxu0 }
  0xa7   :  { %v1798_v13 = vpop.f32.mrf.mxu3  ;;  %v1303_v14 = vadd.f32 %v3364_v10, %v1302_v12  ;;  %v808_v17 = vpop.f32.mrf.mxu1  ;;  %v313_v19 = vadd.f32 %v3340_v0, %v312_v16 }
  0xa8   :  { %v1799_v15 = vadd.f32 %v3369_v11, %v1798_v13  ;;  %v2681_v18 = vpop.eup %2680  ;;  %v809_v20 = vadd.f32 %v3345_v1, %v808_v17 }
  0xa9   :  { %v2683_v21 = vpop.eup %2682  ;;  %483 = vst [vmem:[%s4384_s9] sm:$0xff] %v2681_v18  ;;  %2684 = vtanh.f32 %v1303_v14 }
  0xaa   :  { %979 = vst [vmem:[%s4385_s10] sm:$0xff] %v2683_v21  ;;  %2686 = vtanh.f32 %v1799_v15  ;;  %v2591_v21 = vld [vmem:[%s4381_s1 + $0x58] sm:$0xff] }
  0xab   :  { %2688 = vtanh.f32 %v313_v19 }
  0xac   :  { %2690 = vtanh.f32 %v809_v20  ;;  %v2559_v20 = vld [vmem:[%s4380_s0 + $0x58] sm:$0xff] }
  0xae   :  { %v1304_v22 = vpop.f32.mrf.mxu2  ;;  %v315_v29 = vpop.f32.mrf.mxu0 }
  0xaf   :  { %v1800_v23 = vpop.f32.mrf.mxu3  ;;  %v2685_v26 = vpop.eup %2684  ;;  %v1305_v27 = vadd.f32 %v3364_v10, %v1304_v22  ;;  %v316_v34 = vadd.f32 %v3340_v0, %v315_v29 }
  0xb0   :  { %v1801_v28 = vadd.f32 %v3369_v11, %v1800_v23  ;;  %v811_v30 = vpop.f32.mrf.mxu1  ;;  %v2687_v33 = vpop.eup %2686  ;;  %1475 = vst [vmem:[%s4386_s11] sm:$0xff] %v2685_v26 }
  0xb1   :  { %v812_v35 = vadd.f32 %v3345_v1, %v811_v30  ;;  %v2689_v36 = vpop.eup %2688  ;;  %1971 = vst [vmem:[%s4387_s12] sm:$0xff] %v2687_v33  ;;  %2692 = vtanh.f32 %v1305_v27  ;;  %354 = vmatmul.bf16.gmra.mxu0 %v2557_v24  ;;  %v2623_v27 = vld [vmem:[%s4382_s2 + $0x58] sm:$0xff] }
  0xb2   :  { %v2691_v37 = vpop.eup %2690  ;;  %484 = vst [vmem:[%s4384_s9 + $0x8] sm:$0xff] %v2689_v36  ;;  %2694 = vtanh.f32 %v1801_v28  ;;  %850 = vmatmul.bf16.gmra.mxu1 %v2589_v25  ;;  %v2655_v28 = vld [vmem:[%s4383_s3 + $0x58] sm:$0xff] }
  0xb3   :  { %980 = vst [vmem:[%s4385_s10 + $0x8] sm:$0xff] %v2691_v37  ;;  %2696 = vtanh.f32 %v316_v34  ;;  %1346 = vmatmul.bf16.gmra.mxu2 %v2621_v31 }
  0xb4   :  { %1842 = vmatmul.bf16.gmra.mxu3 %v2653_v32  ;;  %2698 = vtanh.f32 %v812_v35 }
  0xb6   :  { %v1307_v38 = vpop.f32.mrf.mxu2  ;;  %v317_v43 = vpop.f32.mrf.mxu0 }
  0xb7   :  { %v1803_v39 = vpop.f32.mrf.mxu3  ;;  %v2693_v40 = vpop.eup %2692  ;;  %v1308_v41 = vadd.f32 %v3364_v10, %v1307_v38  ;;  %v318_v46 = vadd.f32 %v3340_v0, %v317_v43 }
  0xb8   :  { %v1804_v42 = vadd.f32 %v3369_v11, %v1803_v39  ;;  %v813_v44 = vpop.f32.mrf.mxu1  ;;  %v2695_v45 = vpop.eup %2694  ;;  %1476 = vst [vmem:[%s4386_s11 + $0x8] sm:$0xff] %v2693_v40 }
  0xb9   :  { %v814_v47 = vadd.f32 %v3345_v1, %v813_v44  ;;  %v2697_v48 = vpop.eup %2696  ;;  %1972 = vst [vmem:[%s4387_s12 + $0x8] sm:$0xff] %v2695_v45  ;;  %2700 = vtanh.f32 %v1308_v41 }
  0xba   :  { %v2699_v49 = vpop.eup %2698  ;;  %485 = vst [vmem:[%s4384_s9 + $0x10] sm:$0xff] %v2697_v48  ;;  %2702 = vtanh.f32 %v1804_v42  ;;  %v2560_v48 = vld [vmem:[%s4380_s0 + $0x60] sm:$0xff] }
  0xbb   :  { %981 = vst [vmem:[%s4385_s10 + $0x10] sm:$0xff] %v2699_v49  ;;  %2704 = vtanh.f32 %v318_v46  ;;  %v2592_v49 = vld [vmem:[%s4381_s1 + $0x60] sm:$0xff] }
  0xbc   :  { %2706 = vtanh.f32 %v814_v47 }
  0xbe   :  { %v1309_v50 = vpop.f32.mrf.mxu2  ;;  %v320_v57 = vpop.f32.mrf.mxu0 }
  0xbf   :  { %v1805_v51 = vpop.f32.mrf.mxu3  ;;  %v2701_v54 = vpop.eup %2700  ;;  %v1310_v55 = vadd.f32 %v3364_v10, %v1309_v50  ;;  %v321_v62 = vadd.f32 %v3340_v0, %v320_v57 }
  0xc0   :  { %v1806_v56 = vadd.f32 %v3369_v11, %v1805_v51  ;;  %v816_v58 = vpop.f32.mrf.mxu1  ;;  %v2703_v61 = vpop.eup %2702  ;;  %1477 = vst [vmem:[%s4386_s11 + $0x10] sm:$0xff] %v2701_v54 }
  0xc1   :  { %v817_v63 = vadd.f32 %v3345_v1, %v816_v58  ;;  %v2705_v2 = vpop.eup %2704  ;;  %1973 = vst [vmem:[%s4387_s12 + $0x10] sm:$0xff] %v2703_v61  ;;  %2708 = vtanh.f32 %v1310_v55  ;;  %359 = vmatmul.bf16.gmra.mxu0 %v2558_v52  ;;  %v2624_v55 = vld [vmem:[%s4382_s2 + $0x60] sm:$0xff] }
  0xc2   :  { %v2707_v3 = vpop.eup %2706  ;;  %486 = vst [vmem:[%s4384_s9 + $0x18] sm:$0xff] %v2705_v2  ;;  %2710 = vtanh.f32 %v1806_v56  ;;  %855 = vmatmul.bf16.gmra.mxu1 %v2590_v53  ;;  %v2656_v56 = vld [vmem:[%s4383_s3 + $0x60] sm:$0xff] }
  0xc3   :  { %982 = vst [vmem:[%s4385_s10 + $0x18] sm:$0xff] %v2707_v3  ;;  %2712 = vtanh.f32 %v321_v62  ;;  %1351 = vmatmul.bf16.gmra.mxu2 %v2622_v59 }
  0xc4   :  { %1847 = vmatmul.bf16.gmra.mxu3 %v2654_v60  ;;  %2714 = vtanh.f32 %v817_v63 }
  0xc6   :  { %v1312_v4 = vpop.f32.mrf.mxu2  ;;  %v322_v9 = vpop.f32.mrf.mxu0 }
  0xc7   :  { %v1808_v5 = vpop.f32.mrf.mxu3  ;;  %v2709_v6 = vpop.eup %2708  ;;  %v1313_v7 = vadd.f32 %v3364_v10, %v1312_v4  ;;  %v323_v14 = vadd.f32 %v3340_v0, %v322_v9 }
  0xc8   :  { %v1809_v8 = vadd.f32 %v3369_v11, %v1808_v5  ;;  %v818_v12 = vpop.f32.mrf.mxu1  ;;  %v2711_v13 = vpop.eup %2710  ;;  %1478 = vst [vmem:[%s4386_s11 + $0x18] sm:$0xff] %v2709_v6 }
  0xc9   :  { %v819_v15 = vadd.f32 %v3345_v1, %v818_v12  ;;  %v2713_v16 = vpop.eup %2712  ;;  %1974 = vst [vmem:[%s4387_s12 + $0x18] sm:$0xff] %v2711_v13  ;;  %2716 = vtanh.f32 %v1313_v7 }
  0xca   :  { %v2715_v17 = vpop.eup %2714  ;;  %487 = vst [vmem:[%s4384_s9 + $0x20] sm:$0xff] %v2713_v16  ;;  %2718 = vtanh.f32 %v1809_v8  ;;  %v2561_v16 = vld [vmem:[%s4380_s0 + $0x68] sm:$0xff] }
  0xcb   :  { %983 = vst [vmem:[%s4385_s10 + $0x20] sm:$0xff] %v2715_v17  ;;  %2720 = vtanh.f32 %v323_v14  ;;  %v2593_v17 = vld [vmem:[%s4381_s1 + $0x68] sm:$0xff] }
  0xcc   :  { %2722 = vtanh.f32 %v819_v15 }
  0xce   :  { %v1314_v18 = vpop.f32.mrf.mxu2  ;;  %v325_v25 = vpop.f32.mrf.mxu0 }
  0xcf   :  { %v1810_v19 = vpop.f32.mrf.mxu3  ;;  %v2717_v22 = vpop.eup %2716  ;;  %v1315_v23 = vadd.f32 %v3364_v10, %v1314_v18  ;;  %v326_v30 = vadd.f32 %v3340_v0, %v325_v25 }
  0xd0   :  { %v1811_v24 = vadd.f32 %v3369_v11, %v1810_v19  ;;  %v821_v26 = vpop.f32.mrf.mxu1  ;;  %v2719_v29 = vpop.eup %2718  ;;  %1479 = vst [vmem:[%s4386_s11 + $0x20] sm:$0xff] %v2717_v22 }
  0xd1   :  { %v822_v31 = vadd.f32 %v3345_v1, %v821_v26  ;;  %v2721_v32 = vpop.eup %2720  ;;  %1975 = vst [vmem:[%s4387_s12 + $0x20] sm:$0xff] %v2719_v29  ;;  %2724 = vtanh.f32 %v1315_v23  ;;  %364 = vmatmul.bf16.gmra.mxu0 %v2559_v20  ;;  %v2625_v23 = vld [vmem:[%s4382_s2 + $0x68] sm:$0xff] }
  0xd2   :  { %v2723_v33 = vpop.eup %2722  ;;  %488 = vst [vmem:[%s4384_s9 + $0x28] sm:$0xff] %v2721_v32  ;;  %2726 = vtanh.f32 %v1811_v24  ;;  %860 = vmatmul.bf16.gmra.mxu1 %v2591_v21  ;;  %v2657_v24 = vld [vmem:[%s4383_s3 + $0x68] sm:$0xff] }
  0xd3   :  { %984 = vst [vmem:[%s4385_s10 + $0x28] sm:$0xff] %v2723_v33  ;;  %2728 = vtanh.f32 %v326_v30  ;;  %1356 = vmatmul.bf16.gmra.mxu2 %v2623_v27 }
  0xd4   :  { %1852 = vmatmul.bf16.gmra.mxu3 %v2655_v28  ;;  %2730 = vtanh.f32 %v822_v31 }
  0xd6   :  { %v1317_v34 = vpop.f32.mrf.mxu2  ;;  %v327_v39 = vpop.f32.mrf.mxu0 }
  0xd7   :  { %v1813_v35 = vpop.f32.mrf.mxu3  ;;  %v2725_v36 = vpop.eup %2724  ;;  %v1318_v37 = vadd.f32 %v3364_v10, %v1317_v34  ;;  %v328_v42 = vadd.f32 %v3340_v0, %v327_v39 }
  0xd8   :  { %v1814_v38 = vadd.f32 %v3369_v11, %v1813_v35  ;;  %v823_v40 = vpop.f32.mrf.mxu1  ;;  %v2727_v41 = vpop.eup %2726  ;;  %1480 = vst [vmem:[%s4386_s11 + $0x28] sm:$0xff] %v2725_v36 }
  0xd9   :  { %v824_v43 = vadd.f32 %v3345_v1, %v823_v40  ;;  %v2729_v44 = vpop.eup %2728  ;;  %1976 = vst [vmem:[%s4387_s12 + $0x28] sm:$0xff] %v2727_v41  ;;  %2732 = vtanh.f32 %v1318_v37 }
  0xda   :  { %v2731_v45 = vpop.eup %2730  ;;  %489 = vst [vmem:[%s4384_s9 + $0x30] sm:$0xff] %v2729_v44  ;;  %2734 = vtanh.f32 %v1814_v38  ;;  %v2562_v44 = vld [vmem:[%s4380_s0 + $0x70] sm:$0xff] }
  0xdb   :  { %985 = vst [vmem:[%s4385_s10 + $0x30] sm:$0xff] %v2731_v45  ;;  %2736 = vtanh.f32 %v328_v42  ;;  %v2594_v45 = vld [vmem:[%s4381_s1 + $0x70] sm:$0xff] }
  0xdc   :  { %2738 = vtanh.f32 %v824_v43 }
  0xde   :  { %v1319_v46 = vpop.f32.mrf.mxu2  ;;  %v330_v53 = vpop.f32.mrf.mxu0 }
  0xdf   :  { %v1815_v47 = vpop.f32.mrf.mxu3  ;;  %v2733_v50 = vpop.eup %2732  ;;  %v1320_v51 = vadd.f32 %v3364_v10, %v1319_v46  ;;  %v331_v58 = vadd.f32 %v3340_v0, %v330_v53 }
  0xe0   :  { %v1816_v52 = vadd.f32 %v3369_v11, %v1815_v47  ;;  %v826_v54 = vpop.f32.mrf.mxu1  ;;  %v2735_v57 = vpop.eup %2734  ;;  %1481 = vst [vmem:[%s4386_s11 + $0x30] sm:$0xff] %v2733_v50 }
  0xe1   :  { %v827_v59 = vadd.f32 %v3345_v1, %v826_v54  ;;  %v2737_v60 = vpop.eup %2736  ;;  %1977 = vst [vmem:[%s4387_s12 + $0x30] sm:$0xff] %v2735_v57  ;;  %2740 = vtanh.f32 %v1320_v51  ;;  %369 = vmatmul.bf16.gmra.mxu0 %v2560_v48  ;;  %v2626_v51 = vld [vmem:[%s4382_s2 + $0x70] sm:$0xff] }
  0xe2   :  { %v2739_v61 = vpop.eup %2738  ;;  %490 = vst [vmem:[%s4384_s9 + $0x38] sm:$0xff] %v2737_v60  ;;  %2742 = vtanh.f32 %v1816_v52  ;;  %865 = vmatmul.bf16.gmra.mxu1 %v2592_v49  ;;  %v2658_v52 = vld [vmem:[%s4383_s3 + $0x70] sm:$0xff] }
  0xe3   :  { %986 = vst [vmem:[%s4385_s10 + $0x38] sm:$0xff] %v2739_v61  ;;  %2744 = vtanh.f32 %v331_v58  ;;  %1361 = vmatmul.bf16.gmra.mxu2 %v2624_v55 }
  0xe4   :  { %1857 = vmatmul.bf16.gmra.mxu3 %v2656_v56  ;;  %2746 = vtanh.f32 %v827_v59 }
  0xe6   :  { %v1322_v62 = vpop.f32.mrf.mxu2  ;;  %v332_v5 = vpop.f32.mrf.mxu0 }
  0xe7   :  { %v1818_v63 = vpop.f32.mrf.mxu3  ;;  %v2741_v2 = vpop.eup %2740  ;;  %v1323_v3 = vadd.f32 %v3364_v10, %v1322_v62  ;;  %v333_v8 = vadd.f32 %v3340_v0, %v332_v5 }
  0xe8   :  { %v1819_v4 = vadd.f32 %v3369_v11, %v1818_v63  ;;  %v828_v6 = vpop.f32.mrf.mxu1  ;;  %v2743_v7 = vpop.eup %2742  ;;  %1482 = vst [vmem:[%s4386_s11 + $0x38] sm:$0xff] %v2741_v2 }
  0xe9   :  { %v829_v9 = vadd.f32 %v3345_v1, %v828_v6  ;;  %v2745_v12 = vpop.eup %2744  ;;  %1978 = vst [vmem:[%s4387_s12 + $0x38] sm:$0xff] %v2743_v7  ;;  %2748 = vtanh.f32 %v1323_v3 }
  0xea   :  { %v2747_v13 = vpop.eup %2746  ;;  %491 = vst [vmem:[%s4384_s9 + $0x40] sm:$0xff] %v2745_v12  ;;  %2750 = vtanh.f32 %v1819_v4  ;;  %v2563_v12 = vld [vmem:[%s4380_s0 + $0x78] sm:$0xff] }
  0xeb   :  { %987 = vst [vmem:[%s4385_s10 + $0x40] sm:$0xff] %v2747_v13  ;;  %2752 = vtanh.f32 %v333_v8  ;;  %v2595_v13 = vld [vmem:[%s4381_s1 + $0x78] sm:$0xff] }
  0xec   :  { %2754 = vtanh.f32 %v829_v9 }
  0xee   :  { %v1324_v14 = vpop.f32.mrf.mxu2  ;;  %v335_v21 = vpop.f32.mrf.mxu0 }
  0xef   :  { %v1820_v15 = vpop.f32.mrf.mxu3  ;;  %v2749_v18 = vpop.eup %2748  ;;  %v1325_v19 = vadd.f32 %v3364_v10, %v1324_v14  ;;  %v336_v26 = vadd.f32 %v3340_v0, %v335_v21 }
  0xf0   :  { %v1821_v20 = vadd.f32 %v3369_v11, %v1820_v15  ;;  %v831_v22 = vpop.f32.mrf.mxu1  ;;  %v2751_v25 = vpop.eup %2750  ;;  %1483 = vst [vmem:[%s4386_s11 + $0x40] sm:$0xff] %v2749_v18 }
  0xf1   :  { %v832_v27 = vadd.f32 %v3345_v1, %v831_v22  ;;  %v2753_v28 = vpop.eup %2752  ;;  %1979 = vst [vmem:[%s4387_s12 + $0x40] sm:$0xff] %v2751_v25  ;;  %2756 = vtanh.f32 %v1325_v19  ;;  %374 = vmatmul.bf16.gmra.mxu0 %v2561_v16  ;;  %v2627_v19 = vld [vmem:[%s4382_s2 + $0x78] sm:$0xff] }
  0xf2   :  { %v2755_v29 = vpop.eup %2754  ;;  %492 = vst [vmem:[%s4384_s9 + $0x48] sm:$0xff] %v2753_v28  ;;  %2758 = vtanh.f32 %v1821_v20  ;;  %870 = vmatmul.bf16.gmra.mxu1 %v2593_v17  ;;  %v2659_v20 = vld [vmem:[%s4383_s3 + $0x78] sm:$0xff] }
  0xf3   :  { %988 = vst [vmem:[%s4385_s10 + $0x48] sm:$0xff] %v2755_v29  ;;  %2760 = vtanh.f32 %v336_v26  ;;  %1366 = vmatmul.bf16.gmra.mxu2 %v2625_v23 }
  0xf4   :  { %1862 = vmatmul.bf16.gmra.mxu3 %v2657_v24  ;;  %2762 = vtanh.f32 %v832_v27 }
  0xf6   :  { %v1327_v30 = vpop.f32.mrf.mxu2  ;;  %v337_v35 = vpop.f32.mrf.mxu0 }
  0xf7   :  { %v1823_v31 = vpop.f32.mrf.mxu3  ;;  %v2757_v32 = vpop.eup %2756  ;;  %v1328_v33 = vadd.f32 %v3364_v10, %v1327_v30  ;;  %v338_v38 = vadd.f32 %v3340_v0, %v337_v35 }
  0xf8   :  { %v1824_v34 = vadd.f32 %v3369_v11, %v1823_v31  ;;  %v833_v36 = vpop.f32.mrf.mxu1  ;;  %v2759_v37 = vpop.eup %2758  ;;  %1484 = vst [vmem:[%s4386_s11 + $0x48] sm:$0xff] %v2757_v32 }
  0xf9   :  { %v834_v39 = vadd.f32 %v3345_v1, %v833_v36  ;;  %v2761_v40 = vpop.eup %2760  ;;  %1980 = vst [vmem:[%s4387_s12 + $0x48] sm:$0xff] %v2759_v37  ;;  %2764 = vtanh.f32 %v1328_v33 }
  0xfa   :  { %v2763_v41 = vpop.eup %2762  ;;  %493 = vst [vmem:[%s4384_s9 + $0x50] sm:$0xff] %v2761_v40  ;;  %2766 = vtanh.f32 %v1824_v34  ;;  %v2564_v40 = vld [vmem:[%s4380_s0 + $0x80] sm:$0xff] }
  0xfb   :  { %989 = vst [vmem:[%s4385_s10 + $0x50] sm:$0xff] %v2763_v41  ;;  %2768 = vtanh.f32 %v338_v38  ;;  %v2596_v41 = vld [vmem:[%s4381_s1 + $0x80] sm:$0xff] }
  0xfc   :  { %2770 = vtanh.f32 %v834_v39 }
  0xfe   :  { %v1329_v42 = vpop.f32.mrf.mxu2  ;;  %v340_v49 = vpop.f32.mrf.mxu0 }
  0xff   :  { %v1825_v43 = vpop.f32.mrf.mxu3  ;;  %v2765_v46 = vpop.eup %2764  ;;  %v1330_v47 = vadd.f32 %v3364_v10, %v1329_v42  ;;  %v341_v54 = vadd.f32 %v3340_v0, %v340_v49 }
 0x100   :  { %v1826_v48 = vadd.f32 %v3369_v11, %v1825_v43  ;;  %v836_v50 = vpop.f32.mrf.mxu1  ;;  %v2767_v53 = vpop.eup %2766  ;;  %1485 = vst [vmem:[%s4386_s11 + $0x50] sm:$0xff] %v2765_v46 }
 0x101   :  { %v837_v55 = vadd.f32 %v3345_v1, %v836_v50  ;;  %v2769_v56 = vpop.eup %2768  ;;  %1981 = vst [vmem:[%s4387_s12 + $0x50] sm:$0xff] %v2767_v53  ;;  %2772 = vtanh.f32 %v1330_v47  ;;  %379 = vmatmul.bf16.gmra.mxu0 %v2562_v44  ;;  %v2628_v47 = vld [vmem:[%s4382_s2 + $0x80] sm:$0xff] }
 0x102   :  { %v2771_v57 = vpop.eup %2770  ;;  %494 = vst [vmem:[%s4384_s9 + $0x58] sm:$0xff] %v2769_v56  ;;  %2774 = vtanh.f32 %v1826_v48  ;;  %875 = vmatmul.bf16.gmra.mxu1 %v2594_v45  ;;  %v2660_v48 = vld [vmem:[%s4383_s3 + $0x80] sm:$0xff] }
 0x103   :  { %990 = vst [vmem:[%s4385_s10 + $0x58] sm:$0xff] %v2771_v57  ;;  %2776 = vtanh.f32 %v341_v54  ;;  %1371 = vmatmul.bf16.gmra.mxu2 %v2626_v51 }
 0x104   :  { %1867 = vmatmul.bf16.gmra.mxu3 %v2658_v52  ;;  %2778 = vtanh.f32 %v837_v55 }
 0x106   :  { %v1332_v58 = vpop.f32.mrf.mxu2  ;;  %v342_v63 = vpop.f32.mrf.mxu0 }
 0x107   :  { %v1828_v59 = vpop.f32.mrf.mxu3  ;;  %v2773_v60 = vpop.eup %2772  ;;  %v1333_v61 = vadd.f32 %v3364_v10, %v1332_v58  ;;  %v343_v4 = vadd.f32 %v3340_v0, %v342_v63 }
 0x108   :  { %v1829_v62 = vadd.f32 %v3369_v11, %v1828_v59  ;;  %v838_v2 = vpop.f32.mrf.mxu1  ;;  %v2775_v3 = vpop.eup %2774  ;;  %1486 = vst [vmem:[%s4386_s11 + $0x58] sm:$0xff] %v2773_v60 }
 0x109   :  { %v839_v5 = vadd.f32 %v3345_v1, %v838_v2  ;;  %v2777_v6 = vpop.eup %2776  ;;  %1982 = vst [vmem:[%s4387_s12 + $0x58] sm:$0xff] %v2775_v3  ;;  %2780 = vtanh.f32 %v1333_v61 }
 0x10a   :  { %v2779_v7 = vpop.eup %2778  ;;  %495 = vst [vmem:[%s4384_s9 + $0x60] sm:$0xff] %v2777_v6  ;;  %2782 = vtanh.f32 %v1829_v62  ;;  %v2565_v6 = vld [vmem:[%s4380_s0 + $0x88] sm:$0xff] }
 0x10b   :  { %991 = vst [vmem:[%s4385_s10 + $0x60] sm:$0xff] %v2779_v7  ;;  %2784 = vtanh.f32 %v343_v4  ;;  %v2597_v7 = vld [vmem:[%s4381_s1 + $0x88] sm:$0xff] }
 0x10c   :  { %2786 = vtanh.f32 %v839_v5 }
 0x10e   :  { %v1334_v8 = vpop.f32.mrf.mxu2  ;;  %v345_v17 = vpop.f32.mrf.mxu0 }
 0x10f   :  { %v1830_v9 = vpop.f32.mrf.mxu3  ;;  %v2781_v14 = vpop.eup %2780  ;;  %v1335_v15 = vadd.f32 %v3364_v10, %v1334_v8  ;;  %v346_v22 = vadd.f32 %v3340_v0, %v345_v17 }
 0x110   :  { %v1831_v16 = vadd.f32 %v3369_v11, %v1830_v9  ;;  %v841_v18 = vpop.f32.mrf.mxu1  ;;  %v2783_v21 = vpop.eup %2782  ;;  %1487 = vst [vmem:[%s4386_s11 + $0x60] sm:$0xff] %v2781_v14 }
 0x111   :  { %v842_v23 = vadd.f32 %v3345_v1, %v841_v18  ;;  %v2785_v24 = vpop.eup %2784  ;;  %1983 = vst [vmem:[%s4387_s12 + $0x60] sm:$0xff] %v2783_v21  ;;  %2788 = vtanh.f32 %v1335_v15  ;;  %384 = vmatmul.bf16.gmra.mxu0 %v2563_v12  ;;  %v2629_v15 = vld [vmem:[%s4382_s2 + $0x88] sm:$0xff] }
 0x112   :  { %v2787_v25 = vpop.eup %2786  ;;  %496 = vst [vmem:[%s4384_s9 + $0x68] sm:$0xff] %v2785_v24  ;;  %2790 = vtanh.f32 %v1831_v16  ;;  %880 = vmatmul.bf16.gmra.mxu1 %v2595_v13  ;;  %v2661_v16 = vld [vmem:[%s4383_s3 + $0x88] sm:$0xff] }
 0x113   :  { %992 = vst [vmem:[%s4385_s10 + $0x68] sm:$0xff] %v2787_v25  ;;  %2792 = vtanh.f32 %v346_v22  ;;  %1376 = vmatmul.bf16.gmra.mxu2 %v2627_v19 }
 0x114   :  { %1872 = vmatmul.bf16.gmra.mxu3 %v2659_v20  ;;  %2794 = vtanh.f32 %v842_v23 }
 0x116   :  { %v1337_v26 = vpop.f32.mrf.mxu2  ;;  %v347_v31 = vpop.f32.mrf.mxu0 }
 0x117   :  { %v1833_v27 = vpop.f32.mrf.mxu3  ;;  %v2789_v28 = vpop.eup %2788  ;;  %v1338_v29 = vadd.f32 %v3364_v10, %v1337_v26  ;;  %v348_v34 = vadd.f32 %v3340_v0, %v347_v31 }
 0x118   :  { %v1834_v30 = vadd.f32 %v3369_v11, %v1833_v27  ;;  %v843_v32 = vpop.f32.mrf.mxu1  ;;  %v2791_v33 = vpop.eup %2790  ;;  %1488 = vst [vmem:[%s4386_s11 + $0x68] sm:$0xff] %v2789_v28 }
 0x119   :  { %v844_v35 = vadd.f32 %v3345_v1, %v843_v32  ;;  %v2793_v36 = vpop.eup %2792  ;;  %1984 = vst [vmem:[%s4387_s12 + $0x68] sm:$0xff] %v2791_v33  ;;  %2796 = vtanh.f32 %v1338_v29 }
 0x11a   :  { %v2795_v37 = vpop.eup %2794  ;;  %497 = vst [vmem:[%s4384_s9 + $0x70] sm:$0xff] %v2793_v36  ;;  %2798 = vtanh.f32 %v1834_v30  ;;  %v2566_v36 = vld [vmem:[%s4380_s0 + $0x90] sm:$0xff] }
 0x11b   :  { %993 = vst [vmem:[%s4385_s10 + $0x70] sm:$0xff] %v2795_v37  ;;  %2800 = vtanh.f32 %v348_v34  ;;  %v2598_v37 = vld [vmem:[%s4381_s1 + $0x90] sm:$0xff] }
 0x11c   :  { %2802 = vtanh.f32 %v844_v35 }
 0x11e   :  { %v1339_v38 = vpop.f32.mrf.mxu2  ;;  %v350_v45 = vpop.f32.mrf.mxu0 }
 0x11f   :  { %v1835_v39 = vpop.f32.mrf.mxu3  ;;  %v2797_v42 = vpop.eup %2796  ;;  %v1340_v43 = vadd.f32 %v3364_v10, %v1339_v38  ;;  %v351_v50 = vadd.f32 %v3340_v0, %v350_v45 }
 0x120   :  { %v1836_v44 = vadd.f32 %v3369_v11, %v1835_v39  ;;  %v846_v46 = vpop.f32.mrf.mxu1  ;;  %v2799_v49 = vpop.eup %2798  ;;  %1489 = vst [vmem:[%s4386_s11 + $0x70] sm:$0xff] %v2797_v42 }
 0x121   :  { %v847_v51 = vadd.f32 %v3345_v1, %v846_v46  ;;  %v2801_v52 = vpop.eup %2800  ;;  %1985 = vst [vmem:[%s4387_s12 + $0x70] sm:$0xff] %v2799_v49  ;;  %2804 = vtanh.f32 %v1340_v43  ;;  %389 = vmatmul.bf16.gmra.mxu0 %v2564_v40  ;;  %v2630_v43 = vld [vmem:[%s4382_s2 + $0x90] sm:$0xff] }
 0x122   :  { %v2803_v53 = vpop.eup %2802  ;;  %498 = vst [vmem:[%s4384_s9 + $0x78] sm:$0xff] %v2801_v52  ;;  %2806 = vtanh.f32 %v1836_v44  ;;  %885 = vmatmul.bf16.gmra.mxu1 %v2596_v41  ;;  %v2662_v44 = vld [vmem:[%s4383_s3 + $0x90] sm:$0xff] }
 0x123   :  { %994 = vst [vmem:[%s4385_s10 + $0x78] sm:$0xff] %v2803_v53  ;;  %2808 = vtanh.f32 %v351_v50  ;;  %1381 = vmatmul.bf16.gmra.mxu2 %v2628_v47 }
 0x124   :  { %1877 = vmatmul.bf16.gmra.mxu3 %v2660_v48  ;;  %2810 = vtanh.f32 %v847_v51 }
 0x126   :  { %v1342_v54 = vpop.f32.mrf.mxu2  ;;  %v352_v59 = vpop.f32.mrf.mxu0 }
 0x127   :  { %v1838_v55 = vpop.f32.mrf.mxu3  ;;  %v2805_v56 = vpop.eup %2804  ;;  %v1343_v57 = vadd.f32 %v3364_v10, %v1342_v54  ;;  %v353_v62 = vadd.f32 %v3340_v0, %v352_v59 }
 0x128   :  { %v1839_v58 = vadd.f32 %v3369_v11, %v1838_v55  ;;  %v848_v60 = vpop.f32.mrf.mxu1  ;;  %v2807_v61 = vpop.eup %2806  ;;  %1490 = vst [vmem:[%s4386_s11 + $0x78] sm:$0xff] %v2805_v56 }
 0x129   :  { %v849_v63 = vadd.f32 %v3345_v1, %v848_v60  ;;  %v2809_v2 = vpop.eup %2808  ;;  %1986 = vst [vmem:[%s4387_s12 + $0x78] sm:$0xff] %v2807_v61  ;;  %2812 = vtanh.f32 %v1343_v57 }
 0x12a   :  { %v2811_v3 = vpop.eup %2810  ;;  %499 = vst [vmem:[%s4384_s9 + $0x80] sm:$0xff] %v2809_v2  ;;  %2814 = vtanh.f32 %v1839_v58 }
 0x12b   :  { %995 = vst [vmem:[%s4385_s10 + $0x80] sm:$0xff] %v2811_v3  ;;  %2816 = vtanh.f32 %v353_v62  ;;  %v2567_v62 = vld [vmem:[%s4380_s0 + $0x98] sm:$0xff] }
 0x12c   :  { %2818 = vtanh.f32 %v849_v63  ;;  %v2599_v63 = vld [vmem:[%s4381_s1 + $0x98] sm:$0xff] }
 0x12e   :  { %v1344_v4 = vpop.f32.mrf.mxu2  ;;  %v355_v13 = vpop.f32.mrf.mxu0 }
 0x12f   :  { %v1840_v5 = vpop.f32.mrf.mxu3  ;;  %v2813_v8 = vpop.eup %2812  ;;  %v1345_v9 = vadd.f32 %v3364_v10, %v1344_v4  ;;  %v356_v18 = vadd.f32 %v3340_v0, %v355_v13 }
 0x130   :  { %v1841_v12 = vadd.f32 %v3369_v11, %v1840_v5  ;;  %v851_v14 = vpop.f32.mrf.mxu1  ;;  %v2815_v17 = vpop.eup %2814  ;;  %1491 = vst [vmem:[%s4386_s11 + $0x80] sm:$0xff] %v2813_v8  ;;  %v2663_v8 = vld [vmem:[%s4383_s3 + $0x98] sm:$0xff] }
 0x131   :  { %v852_v19 = vadd.f32 %v3345_v1, %v851_v14  ;;  %v2817_v20 = vpop.eup %2816  ;;  %1987 = vst [vmem:[%s4387_s12 + $0x80] sm:$0xff] %v2815_v17  ;;  %2820 = vtanh.f32 %v1345_v9  ;;  %394 = vmatmul.bf16.gmra.mxu0 %v2565_v6 }
 0x132   :  { %v2819_v21 = vpop.eup %2818  ;;  %500 = vst [vmem:[%s4384_s9 + $0x88] sm:$0xff] %v2817_v20  ;;  %2822 = vtanh.f32 %v1841_v12  ;;  %890 = vmatmul.bf16.gmra.mxu1 %v2597_v7  ;;  %v2631_v7 = vld [vmem:[%s4382_s2 + $0x98] sm:$0xff]  ;;  %v3847_v12 = vld [vmem:[%s4379_s8] ss:$0 sm:$0xff] }
 0x133   :  { %996 = vst [vmem:[%s4385_s10 + $0x88] sm:$0xff] %v2819_v21  ;;  %2824 = vtanh.f32 %v356_v18  ;;  %1386 = vmatmul.bf16.gmra.mxu2 %v2629_v15  ;;  %v3868_v21 = vld [vmem:[%s4379_s8] ss:$0 sm:$0xff] }
 0x134   :  { %1882 = vmatmul.bf16.gmra.mxu3 %v2661_v16  ;;  %2826 = vtanh.f32 %v852_v19  ;;  %v3862_v19 = vld [vmem:[%s4379_s8] ss:$0 sm:$0xff] }
 0x136   :  { %v1347_v22 = vpop.f32.mrf.mxu2  ;;  %v357_v27 = vpop.f32.mrf.mxu0 }
 0x137   :  { %v1843_v23 = vpop.f32.mrf.mxu3  ;;  %v2821_v24 = vpop.eup %2820  ;;  %v1348_v25 = vadd.f32 %v3364_v10, %v1347_v22  ;;  %v358_v30 = vadd.f32 %v3340_v0, %v357_v27 }
 0x138   :  { %v1844_v26 = vadd.f32 %v3369_v11, %v1843_v23  ;;  %v853_v28 = vpop.f32.mrf.mxu1  ;;  %v2823_v29 = vpop.eup %2822  ;;  %1492 = vst [vmem:[%s4386_s11 + $0x88] sm:$0xff] %v2821_v24 }
 0x139   :  { %v854_v31 = vadd.f32 %v3345_v1, %v853_v28  ;;  %v2825_v32 = vpop.eup %2824  ;;  %1988 = vst [vmem:[%s4387_s12 + $0x88] sm:$0xff] %v2823_v29  ;;  %2828 = vtanh.f32 %v1348_v25 }
 0x13a   :  { %v2827_v33 = vpop.eup %2826  ;;  %501 = vst [vmem:[%s4384_s9 + $0x90] sm:$0xff] %v2825_v32  ;;  %2830 = vtanh.f32 %v1844_v26  ;;  %v2568_v32 = vld [vmem:[%s4380_s0 + $0xa0] sm:$0xff] }
 0x13b   :  { %997 = vst [vmem:[%s4385_s10 + $0x90] sm:$0xff] %v2827_v33  ;;  %2832 = vtanh.f32 %v358_v30  ;;  %v2600_v33 = vld [vmem:[%s4381_s1 + $0xa0] sm:$0xff] }
 0x13c   :  { %2834 = vtanh.f32 %v854_v31 }
 0x13e   :  { %v1349_v34 = vpop.f32.mrf.mxu2  ;;  %v360_v41 = vpop.f32.mrf.mxu0 }
 0x13f   :  { %v1845_v35 = vpop.f32.mrf.mxu3  ;;  %v2829_v38 = vpop.eup %2828  ;;  %v1350_v39 = vadd.f32 %v3364_v10, %v1349_v34  ;;  %v361_v46 = vadd.f32 %v3340_v0, %v360_v41 }
 0x140   :  { %v1846_v40 = vadd.f32 %v3369_v11, %v1845_v35  ;;  %v856_v42 = vpop.f32.mrf.mxu1  ;;  %v2831_v45 = vpop.eup %2830  ;;  %1493 = vst [vmem:[%s4386_s11 + $0x90] sm:$0xff] %v2829_v38 }
 0x141   :  { %v857_v47 = vadd.f32 %v3345_v1, %v856_v42  ;;  %v2833_v48 = vpop.eup %2832  ;;  %1989 = vst [vmem:[%s4387_s12 + $0x90] sm:$0xff] %v2831_v45  ;;  %2836 = vtanh.f32 %v1350_v39  ;;  %399 = vmatmul.bf16.gmra.mxu0 %v2566_v36  ;;  %v2632_v39 = vld [vmem:[%s4382_s2 + $0xa0] sm:$0xff] }
 0x142   :  { %v2835_v49 = vpop.eup %2834  ;;  %502 = vst [vmem:[%s4384_s9 + $0x98] sm:$0xff] %v2833_v48  ;;  %2838 = vtanh.f32 %v1846_v40  ;;  %895 = vmatmul.bf16.gmra.mxu1 %v2598_v37  ;;  %v2664_v40 = vld [vmem:[%s4383_s3 + $0xa0] sm:$0xff] }
 0x143   :  { %998 = vst [vmem:[%s4385_s10 + $0x98] sm:$0xff] %v2835_v49  ;;  %2840 = vtanh.f32 %v361_v46  ;;  %1391 = vmatmul.bf16.gmra.mxu2 %v2630_v43 }
 0x144   :  { %1887 = vmatmul.bf16.gmra.mxu3 %v2662_v44  ;;  %2842 = vtanh.f32 %v857_v47 }
 0x146   :  { %v1352_v50 = vpop.f32.mrf.mxu2  ;;  %v362_v55 = vpop.f32.mrf.mxu0 }
 0x147   :  { %v1848_v51 = vpop.f32.mrf.mxu3  ;;  %v2837_v52 = vpop.eup %2836  ;;  %v1353_v53 = vadd.f32 %v3364_v10, %v1352_v50  ;;  %v363_v58 = vadd.f32 %v3340_v0, %v362_v55 }
 0x148   :  { %v1849_v54 = vadd.f32 %v3369_v11, %v1848_v51  ;;  %v858_v56 = vpop.f32.mrf.mxu1  ;;  %v2839_v57 = vpop.eup %2838  ;;  %1494 = vst [vmem:[%s4386_s11 + $0x98] sm:$0xff] %v2837_v52 }
 0x149   :  { %v859_v59 = vadd.f32 %v3345_v1, %v858_v56  ;;  %v2841_v60 = vpop.eup %2840  ;;  %1990 = vst [vmem:[%s4387_s12 + $0x98] sm:$0xff] %v2839_v57  ;;  %2844 = vtanh.f32 %v1353_v53 }
 0x14a   :  { %v2843_v61 = vpop.eup %2842  ;;  %503 = vst [vmem:[%s4384_s9 + $0xa0] sm:$0xff] %v2841_v60  ;;  %2846 = vtanh.f32 %v1849_v54  ;;  %v2569_v60 = vld [vmem:[%s4380_s0 + $0xa8] sm:$0xff] }
 0x14b   :  { %999 = vst [vmem:[%s4385_s10 + $0xa0] sm:$0xff] %v2843_v61  ;;  %2848 = vtanh.f32 %v363_v58  ;;  %v2601_v61 = vld [vmem:[%s4381_s1 + $0xa8] sm:$0xff] }
 0x14c   :  { %2850 = vtanh.f32 %v859_v59 }
 0x14e   :  { %v1354_v0 = vpop.f32.mrf.mxu2  ;;  %v365_v5 = vpop.f32.mrf.mxu0 }
 0x14f   :  { %v1850_v1 = vpop.f32.mrf.mxu3  ;;  %v2845_v2 = vpop.eup %2844  ;;  %v1355_v3 = vadd.f32 %v3364_v10, %v1354_v0  ;;  %v3841_v10 = vld [vmem:[%s4379_s8] ss:$0 sm:$0xff] }
 0x150   :  { %v1851_v4 = vadd.f32 %v3369_v11, %v1850_v1  ;;  %v861_v6 = vpop.f32.mrf.mxu1  ;;  %v2847_v9 = vpop.eup %2846  ;;  %1495 = vst [vmem:[%s4386_s11 + $0xa0] sm:$0xff] %v2845_v2  ;;  %v366_v11 = vadd.f32 %v3841_v10, %v365_v5 }
 0x151   :  { %v862_v13 = vadd.f32 %v3847_v12, %v861_v6  ;;  %v2849_v14 = vpop.eup %2848  ;;  %1991 = vst [vmem:[%s4387_s12 + $0xa0] sm:$0xff] %v2847_v9  ;;  %2852 = vtanh.f32 %v1355_v3  ;;  %404 = vmatmul.bf16.gmra.mxu0 %v2567_v62  ;;  %v2633_v3 = vld [vmem:[%s4382_s2 + $0xa8] sm:$0xff] }
 0x152   :  { %v2851_v15 = vpop.eup %2850  ;;  %504 = vst [vmem:[%s4384_s9 + $0xa8] sm:$0xff] %v2849_v14  ;;  %2854 = vtanh.f32 %v1851_v4  ;;  %900 = vmatmul.bf16.gmra.mxu1 %v2599_v63  ;;  %v2665_v4 = vld [vmem:[%s4383_s3 + $0xa8] sm:$0xff] }
 0x153   :  { %1000 = vst [vmem:[%s4385_s10 + $0xa8] sm:$0xff] %v2851_v15  ;;  %2856 = vtanh.f32 %v366_v11  ;;  %1396 = vmatmul.bf16.gmra.mxu2 %v2631_v7 }
 0x154   :  { %1892 = vmatmul.bf16.gmra.mxu3 %v2663_v8  ;;  %2858 = vtanh.f32 %v862_v13 }
 0x156   :  { %v1357_v16 = vpop.f32.mrf.mxu2  ;;  %v367_v23 = vpop.f32.mrf.mxu0 }
 0x157   :  { %v1853_v17 = vpop.f32.mrf.mxu3  ;;  %v2853_v18 = vpop.eup %2852  ;;  %v1358_v20 = vadd.f32 %v3862_v19, %v1357_v16  ;;  %v368_v26 = vadd.f32 %v3841_v10, %v367_v23 }
 0x158   :  { %v1854_v22 = vadd.f32 %v3868_v21, %v1853_v17  ;;  %v863_v24 = vpop.f32.mrf.mxu1  ;;  %v2855_v25 = vpop.eup %2854  ;;  %1496 = vst [vmem:[%s4386_s11 + $0xa8] sm:$0xff] %v2853_v18 }
 0x159   :  { %v864_v27 = vadd.f32 %v3847_v12, %v863_v24  ;;  %v2857_v28 = vpop.eup %2856  ;;  %1992 = vst [vmem:[%s4387_s12 + $0xa8] sm:$0xff] %v2855_v25  ;;  %2860 = vtanh.f32 %v1358_v20 }
 0x15a   :  { %v2859_v29 = vpop.eup %2858  ;;  %505 = vst [vmem:[%s4384_s9 + $0xb0] sm:$0xff] %v2857_v28  ;;  %2862 = vtanh.f32 %v1854_v22  ;;  %v2570_v28 = vld [vmem:[%s4380_s0 + $0xb0] sm:$0xff] }
 0x15b   :  { %1001 = vst [vmem:[%s4385_s10 + $0xb0] sm:$0xff] %v2859_v29  ;;  %2864 = vtanh.f32 %v368_v26  ;;  %v2602_v29 = vld [vmem:[%s4381_s1 + $0xb0] sm:$0xff] }
 0x15c   :  { %2866 = vtanh.f32 %v864_v27 }
 0x15e   :  { %v1359_v30 = vpop.f32.mrf.mxu2  ;;  %v370_v37 = vpop.f32.mrf.mxu0 }
 0x15f   :  { %v1855_v31 = vpop.f32.mrf.mxu3  ;;  %v2861_v34 = vpop.eup %2860  ;;  %v1360_v35 = vadd.f32 %v3862_v19, %v1359_v30  ;;  %v371_v42 = vadd.f32 %v3841_v10, %v370_v37 }
 0x160   :  { %v1856_v36 = vadd.f32 %v3868_v21, %v1855_v31  ;;  %v866_v38 = vpop.f32.mrf.mxu1  ;;  %v2863_v41 = vpop.eup %2862  ;;  %1497 = vst [vmem:[%s4386_s11 + $0xb0] sm:$0xff] %v2861_v34 }
 0x161   :  { %v867_v43 = vadd.f32 %v3847_v12, %v866_v38  ;;  %v2865_v44 = vpop.eup %2864  ;;  %1993 = vst [vmem:[%s4387_s12 + $0xb0] sm:$0xff] %v2863_v41  ;;  %2868 = vtanh.f32 %v1360_v35  ;;  %409 = vmatmul.bf16.gmra.mxu0 %v2568_v32  ;;  %v2634_v35 = vld [vmem:[%s4382_s2 + $0xb0] sm:$0xff] }
 0x162   :  { %v2867_v45 = vpop.eup %2866  ;;  %506 = vst [vmem:[%s4384_s9 + $0xb8] sm:$0xff] %v2865_v44  ;;  %2870 = vtanh.f32 %v1856_v36  ;;  %905 = vmatmul.bf16.gmra.mxu1 %v2600_v33  ;;  %v2666_v36 = vld [vmem:[%s4383_s3 + $0xb0] sm:$0xff] }
 0x163   :  { %1002 = vst [vmem:[%s4385_s10 + $0xb8] sm:$0xff] %v2867_v45  ;;  %2872 = vtanh.f32 %v371_v42  ;;  %1401 = vmatmul.bf16.gmra.mxu2 %v2632_v39 }
 0x164   :  { %1897 = vmatmul.bf16.gmra.mxu3 %v2664_v40  ;;  %2874 = vtanh.f32 %v867_v43 }
 0x166   :  { %v1362_v46 = vpop.f32.mrf.mxu2  ;;  %v372_v51 = vpop.f32.mrf.mxu0 }
 0x167   :  { %v1858_v47 = vpop.f32.mrf.mxu3  ;;  %v2869_v48 = vpop.eup %2868  ;;  %v1363_v49 = vadd.f32 %v3862_v19, %v1362_v46  ;;  %v373_v54 = vadd.f32 %v3841_v10, %v372_v51 }
 0x168   :  { %v1859_v50 = vadd.f32 %v3868_v21, %v1858_v47  ;;  %v868_v52 = vpop.f32.mrf.mxu1  ;;  %v2871_v53 = vpop.eup %2870  ;;  %1498 = vst [vmem:[%s4386_s11 + $0xb8] sm:$0xff] %v2869_v48 }
 0x169   :  { %v869_v55 = vadd.f32 %v3847_v12, %v868_v52  ;;  %v2873_v56 = vpop.eup %2872  ;;  %1994 = vst [vmem:[%s4387_s12 + $0xb8] sm:$0xff] %v2871_v53  ;;  %2876 = vtanh.f32 %v1363_v49 }
 0x16a   :  { %v2875_v57 = vpop.eup %2874  ;;  %507 = vst [vmem:[%s4384_s9 + $0xc0] sm:$0xff] %v2873_v56  ;;  %2878 = vtanh.f32 %v1859_v50  ;;  %v2571_v56 = vld [vmem:[%s4380_s0 + $0xb8] sm:$0xff] }
 0x16b   :  { %1003 = vst [vmem:[%s4385_s10 + $0xc0] sm:$0xff] %v2875_v57  ;;  %2880 = vtanh.f32 %v373_v54  ;;  %v2603_v57 = vld [vmem:[%s4381_s1 + $0xb8] sm:$0xff] }
 0x16c   :  { %2882 = vtanh.f32 %v869_v55 }
 0x16e   :  { %v1364_v58 = vpop.f32.mrf.mxu2  ;;  %v375_v63 = vpop.f32.mrf.mxu0 }
 0x16f   :  { %v1860_v59 = vpop.f32.mrf.mxu3  ;;  %v2877_v0 = vpop.eup %2876  ;;  %v1365_v1 = vadd.f32 %v3862_v19, %v1364_v58  ;;  %v376_v6 = vadd.f32 %v3841_v10, %v375_v63 }
 0x170   :  { %v1861_v62 = vadd.f32 %v3868_v21, %v1860_v59  ;;  %v871_v2 = vpop.f32.mrf.mxu1  ;;  %v2879_v5 = vpop.eup %2878  ;;  %1499 = vst [vmem:[%s4386_s11 + $0xc0] sm:$0xff] %v2877_v0 }
 0x171   :  { %v872_v7 = vadd.f32 %v3847_v12, %v871_v2  ;;  %v2881_v8 = vpop.eup %2880  ;;  %1995 = vst [vmem:[%s4387_s12 + $0xc0] sm:$0xff] %v2879_v5  ;;  %2884 = vtanh.f32 %v1365_v1  ;;  %414 = vmatmul.bf16.gmra.mxu0 %v2569_v60  ;;  %v2635_v1 = vld [vmem:[%s4382_s2 + $0xb8] sm:$0xff] }
 0x172   :  { %v2883_v9 = vpop.eup %2882  ;;  %508 = vst [vmem:[%s4384_s9 + $0xc8] sm:$0xff] %v2881_v8  ;;  %2886 = vtanh.f32 %v1861_v62  ;;  %910 = vmatmul.bf16.gmra.mxu1 %v2601_v61  ;;  %v2667_v62 = vld [vmem:[%s4383_s3 + $0xb8] sm:$0xff] }
 0x173   :  { %1004 = vst [vmem:[%s4385_s10 + $0xc8] sm:$0xff] %v2883_v9  ;;  %2888 = vtanh.f32 %v376_v6  ;;  %1406 = vmatmul.bf16.gmra.mxu2 %v2633_v3 }
 0x174   :  { %1902 = vmatmul.bf16.gmra.mxu3 %v2665_v4  ;;  %2890 = vtanh.f32 %v872_v7 }
 0x176   :  { %v1367_v11 = vpop.f32.mrf.mxu2  ;;  %v377_v17 = vpop.f32.mrf.mxu0 }
 0x177   :  { %v1863_v13 = vpop.f32.mrf.mxu3  ;;  %v2885_v14 = vpop.eup %2884  ;;  %v1368_v15 = vadd.f32 %v3862_v19, %v1367_v11  ;;  %v378_v22 = vadd.f32 %v3841_v10, %v377_v17 }
 0x178   :  { %v1864_v16 = vadd.f32 %v3868_v21, %v1863_v13  ;;  %v873_v18 = vpop.f32.mrf.mxu1  ;;  %v2887_v20 = vpop.eup %2886  ;;  %1500 = vst [vmem:[%s4386_s11 + $0xc8] sm:$0xff] %v2885_v14 }
 0x179   :  { %v874_v23 = vadd.f32 %v3847_v12, %v873_v18  ;;  %v2889_v24 = vpop.eup %2888  ;;  %1996 = vst [vmem:[%s4387_s12 + $0xc8] sm:$0xff] %v2887_v20  ;;  %2892 = vtanh.f32 %v1368_v15  ;;  %v84_v15 = vld [vmem:[%s4380_s0 + $0xc0] sm:$0xf] }
 0x17a   :  { %v2891_v25 = vpop.eup %2890  ;;  %509 = vst [vmem:[%s4384_s9 + $0xd0] sm:$0xff] %v2889_v24  ;;  %2894 = vtanh.f32 %v1864_v16  ;;  %v580_v16 = vld [vmem:[%s4381_s1 + $0xc0] sm:$0xf] }
 0x17b   :  { %1005 = vst [vmem:[%s4385_s10 + $0xd0] sm:$0xff] %v2891_v25  ;;  %2896 = vtanh.f32 %v378_v22  ;;  %v1076_v22 = vld [vmem:[%s4382_s2 + $0xc0] sm:$0xf] }
 0x17c   :  { %2898 = vtanh.f32 %v874_v23  ;;  %v1572_v23 = vld [vmem:[%s4383_s3 + $0xc0] sm:$0xf] }
 0x17e   :  { %v1369_v26 = vpop.f32.mrf.mxu2  ;;  %v380_v33 = vpop.f32.mrf.mxu0 }
 0x17f   :  { %v1865_v27 = vpop.f32.mrf.mxu3  ;;  %v2893_v30 = vpop.eup %2892  ;;  %v1370_v31 = vadd.f32 %v3862_v19, %v1369_v26  ;;  %v381_v38 = vadd.f32 %v3841_v10, %v380_v33  ;;  %v202_v26 = vunpack.c.l.b16 %v84_v15 }
 0x180   :  { %v1866_v32 = vadd.f32 %v3868_v21, %v1865_v27  ;;  %v876_v34 = vpop.f32.mrf.mxu1  ;;  %v2895_v37 = vpop.eup %2894  ;;  %1501 = vst [vmem:[%s4386_s11 + $0xd0] sm:$0xff] %v2893_v30  ;;  %v698_v27 = vunpack.c.l.b16 %v580_v16 }
 0x181   :  { %v877_v39 = vadd.f32 %v3847_v12, %v876_v34  ;;  %v2897_v40 = vpop.eup %2896  ;;  %1997 = vst [vmem:[%s4387_s12 + $0xd0] sm:$0xff] %v2895_v37  ;;  %2900 = vtanh.f32 %v1370_v31  ;;  %419 = vmatmul.bf16.gmra.mxu0 %v2570_v28  ;;  %v1194_v28 = vunpack.c.l.b16 %v1076_v22 }
 0x182   :  { %v2899_v41 = vpop.eup %2898  ;;  %510 = vst [vmem:[%s4384_s9 + $0xd8] sm:$0xff] %v2897_v40  ;;  %2902 = vtanh.f32 %v1866_v32  ;;  %915 = vmatmul.bf16.gmra.mxu1 %v2602_v29  ;;  %v1690_v29 = vunpack.c.l.b16 %v1572_v23  ;;  %v227_v32 = vpack.c.b16 %v202_v26, %v202_v26  ;;  %v723_v33 = vpack.c.b16 %v698_v27, %v698_v27 }
 0x183   :  { %1006 = vst [vmem:[%s4385_s10 + $0xd8] sm:$0xff] %v2899_v41  ;;  %2904 = vtanh.f32 %v381_v38  ;;  %1411 = vmatmul.bf16.gmra.mxu2 %v2634_v35 }
 0x184   :  { %1907 = vmatmul.bf16.gmra.mxu3 %v2666_v36  ;;  %2906 = vtanh.f32 %v877_v39  ;;  %v1219_v39 = vpack.c.b16 %v1194_v28, %v1194_v28  ;;  %v1715_v40 = vpack.c.b16 %v1690_v29, %v1690_v29 }
 0x186   :  { %v1372_v42 = vpop.f32.mrf.mxu2  ;;  %v382_v47 = vpop.f32.mrf.mxu0 }
 0x187   :  { %v1868_v43 = vpop.f32.mrf.mxu3  ;;  %v2901_v44 = vpop.eup %2900  ;;  %v1373_v45 = vadd.f32 %v3862_v19, %v1372_v42  ;;  %v383_v50 = vadd.f32 %v3841_v10, %v382_v47 }
 0x188   :  { %v1869_v46 = vadd.f32 %v3868_v21, %v1868_v43  ;;  %v878_v48 = vpop.f32.mrf.mxu1  ;;  %v2903_v49 = vpop.eup %2902  ;;  %1502 = vst [vmem:[%s4386_s11 + $0xd8] sm:$0xff] %v2901_v44 }
 0x189   :  { %v879_v51 = vadd.f32 %v3847_v12, %v878_v48  ;;  %v2905_v52 = vpop.eup %2904  ;;  %1998 = vst [vmem:[%s4387_s12 + $0xd8] sm:$0xff] %v2903_v49  ;;  %2908 = vtanh.f32 %v1373_v45 }
 0x18a   :  { %v2907_v53 = vpop.eup %2906  ;;  %511 = vst [vmem:[%s4384_s9 + $0xe0] sm:$0xff] %v2905_v52  ;;  %2910 = vtanh.f32 %v1869_v46 }
 0x18b   :  { %1007 = vst [vmem:[%s4385_s10 + $0xe0] sm:$0xff] %v2907_v53  ;;  %2912 = vtanh.f32 %v383_v50 }
 0x18c   :  { %2914 = vtanh.f32 %v879_v51 }
 0x18e   :  { %v1374_v54 = vpop.f32.mrf.mxu2  ;;  %v385_v61 = vpop.f32.mrf.mxu0 }
 0x18f   :  { %v1870_v55 = vpop.f32.mrf.mxu3  ;;  %v2909_v58 = vpop.eup %2908  ;;  %v1375_v59 = vadd.f32 %v3862_v19, %v1374_v54  ;;  %v386_v2 = vadd.f32 %v3841_v10, %v385_v61 }
 0x190   :  { %v1871_v60 = vadd.f32 %v3868_v21, %v1870_v55  ;;  %v881_v0 = vpop.f32.mrf.mxu1  ;;  %v2911_v63 = vpop.eup %2910  ;;  %1503 = vst [vmem:[%s4386_s11 + $0xe0] sm:$0xff] %v2909_v58 }
 0x191   :  { %v882_v3 = vadd.f32 %v3847_v12, %v881_v0  ;;  %v2913_v4 = vpop.eup %2912  ;;  %1999 = vst [vmem:[%s4387_s12 + $0xe0] sm:$0xff] %v2911_v63  ;;  %2916 = vtanh.f32 %v1375_v59  ;;  %424 = vmatmul.bf16.gmra.mxu0 %v2571_v56 }
 0x192   :  { %v2915_v5 = vpop.eup %2914  ;;  %512 = vst [vmem:[%s4384_s9 + $0xe8] sm:$0xff] %v2913_v4  ;;  %2918 = vtanh.f32 %v1871_v60  ;;  %920 = vmatmul.bf16.gmra.mxu1 %v2603_v57 }
 0x193   :  { %1008 = vst [vmem:[%s4385_s10 + $0xe8] sm:$0xff] %v2915_v5  ;;  %2920 = vtanh.f32 %v386_v2  ;;  %1416 = vmatmul.bf16.gmra.mxu2 %v2635_v1 }
 0x194   :  { %1912 = vmatmul.bf16.gmra.mxu3 %v2667_v62  ;;  %2922 = vtanh.f32 %v882_v3 }
 0x196   :  { %v1377_v6 = vpop.f32.mrf.mxu2  ;;  %v387_v13 = vpop.f32.mrf.mxu0 }
 0x197   :  { %v1873_v7 = vpop.f32.mrf.mxu3  ;;  %v2917_v8 = vpop.eup %2916  ;;  %v1378_v9 = vadd.f32 %v3862_v19, %v1377_v6  ;;  %v388_v18 = vadd.f32 %v3841_v10, %v387_v13 }
 0x198   :  { %v1874_v11 = vadd.f32 %v3868_v21, %v1873_v7  ;;  %v883_v14 = vpop.f32.mrf.mxu1  ;;  %v2919_v17 = vpop.eup %2918  ;;  %1504 = vst [vmem:[%s4386_s11 + $0xe8] sm:$0xff] %v2917_v8 }
 0x199   :  { %v884_v20 = vadd.f32 %v3847_v12, %v883_v14  ;;  %v2921_v24 = vpop.eup %2920  ;;  %2000 = vst [vmem:[%s4387_s12 + $0xe8] sm:$0xff] %v2919_v17  ;;  %2924 = vtanh.f32 %v1378_v9 }
 0x19a   :  { %v2923_v25 = vpop.eup %2922  ;;  %513 = vst [vmem:[%s4384_s9 + $0xf0] sm:$0xff] %v2921_v24  ;;  %2926 = vtanh.f32 %v1874_v11 }
 0x19b   :  { %1009 = vst [vmem:[%s4385_s10 + $0xf0] sm:$0xff] %v2923_v25  ;;  %2928 = vtanh.f32 %v388_v18 }
 0x19c   :  { %2930 = vtanh.f32 %v884_v20 }
 0x19e   :  { %v1379_v30 = vpop.f32.mrf.mxu2  ;;  %v390_v37 = vpop.f32.mrf.mxu0 }
 0x19f   :  { %v1875_v31 = vpop.f32.mrf.mxu3  ;;  %v2925_v34 = vpop.eup %2924  ;;  %v1380_v35 = vadd.f32 %v3862_v19, %v1379_v30  ;;  %v391_v42 = vadd.f32 %v3841_v10, %v390_v37 }
 0x1a0   :  { %v1876_v36 = vadd.f32 %v3868_v21, %v1875_v31  ;;  %v886_v38 = vpop.f32.mrf.mxu1  ;;  %v2927_v41 = vpop.eup %2926  ;;  %1505 = vst [vmem:[%s4386_s11 + $0xf0] sm:$0xff] %v2925_v34 }
 0x1a1   :  { %v887_v43 = vadd.f32 %v3847_v12, %v886_v38  ;;  %v2929_v44 = vpop.eup %2928  ;;  %2001 = vst [vmem:[%s4387_s12 + $0xf0] sm:$0xff] %v2927_v41  ;;  %2932 = vtanh.f32 %v1380_v35  ;;  %429 = vmatmul.bf16.gmra.mxu0 %v227_v32 }
 0x1a2   :  { %v2931_v45 = vpop.eup %2930  ;;  %514 = vst [vmem:[%s4384_s9 + $0xf8] sm:$0xff] %v2929_v44  ;;  %2934 = vtanh.f32 %v1876_v36  ;;  %925 = vmatmul.bf16.gmra.mxu1 %v723_v33 }
 0x1a3   :  { %1010 = vst [vmem:[%s4385_s10 + $0xf8] sm:$0xff] %v2931_v45  ;;  %2936 = vtanh.f32 %v391_v42  ;;  %1421 = vmatmul.bf16.gmra.mxu2 %v1219_v39 }
 0x1a4   :  { %1917 = vmatmul.bf16.gmra.mxu3 %v1715_v40  ;;  %2938 = vtanh.f32 %v887_v43 }
 0x1a6   :  { %v1382_v46 = vpop.f32.mrf.mxu2  ;;  %v392_v51 = vpop.f32.mrf.mxu0 }
 0x1a7   :  { %v1878_v47 = vpop.f32.mrf.mxu3  ;;  %v2933_v48 = vpop.eup %2932  ;;  %v1383_v49 = vadd.f32 %v3862_v19, %v1382_v46  ;;  %v393_v54 = vadd.f32 %v3841_v10, %v392_v51 }
 0x1a8   :  { %v1879_v50 = vadd.f32 %v3868_v21, %v1878_v47  ;;  %v888_v52 = vpop.f32.mrf.mxu1  ;;  %v2935_v53 = vpop.eup %2934  ;;  %1506 = vst [vmem:[%s4386_s11 + $0xf8] sm:$0xff] %v2933_v48 }
 0x1a9   :  { %v889_v55 = vadd.f32 %v3847_v12, %v888_v52  ;;  %v2937_v56 = vpop.eup %2936  ;;  %2002 = vst [vmem:[%s4387_s12 + $0xf8] sm:$0xff] %v2935_v53  ;;  %2940 = vtanh.f32 %v1383_v49 }
 0x1aa   :  { %v2939_v57 = vpop.eup %2938  ;;  %515 = vst [vmem:[%s4384_s9 + $0x100] sm:$0xff] %v2937_v56  ;;  %2942 = vtanh.f32 %v1879_v50 }
 0x1ab   :  { %1011 = vst [vmem:[%s4385_s10 + $0x100] sm:$0xff] %v2939_v57  ;;  %2944 = vtanh.f32 %v393_v54 }
 0x1ac   :  { %2946 = vtanh.f32 %v889_v55 }
 0x1ae   :  { %v1384_v58 = vpop.f32.mrf.mxu2  ;;  %v395_v1 = vpop.f32.mrf.mxu0 }
 0x1af   :  { %v1880_v59 = vpop.f32.mrf.mxu3  ;;  %v2941_v60 = vpop.eup %2940  ;;  %v1385_v61 = vadd.f32 %v3862_v19, %v1384_v58  ;;  %v396_v2 = vadd.f32 %v3841_v10, %v395_v1 }
 0x1b0   :  { %v1881_v0 = vadd.f32 %v3868_v21, %v1880_v59  ;;  %v891_v62 = vpop.f32.mrf.mxu1  ;;  %v2943_v63 = vpop.eup %2942  ;;  %1507 = vst [vmem:[%s4386_s11 + $0x100] sm:$0xff] %v2941_v60 }
 0x1b1   :  { %v892_v3 = vadd.f32 %v3847_v12, %v891_v62  ;;  %v2945_v4 = vpop.eup %2944  ;;  %2003 = vst [vmem:[%s4387_s12 + $0x100] sm:$0xff] %v2943_v63  ;;  %2948 = vtanh.f32 %v1385_v61 }
 0x1b2   :  { %v2947_v5 = vpop.eup %2946  ;;  %516 = vst [vmem:[%s4384_s9 + $0x108] sm:$0xff] %v2945_v4  ;;  %2950 = vtanh.f32 %v1881_v0 }
 0x1b3   :  { %1012 = vst [vmem:[%s4385_s10 + $0x108] sm:$0xff] %v2947_v5  ;;  %2952 = vtanh.f32 %v396_v2 }
 0x1b4   :  { %2954 = vtanh.f32 %v892_v3 }
 0x1b6   :  { %v1387_v6 = vpop.f32.mrf.mxu2  ;;  %v397_v13 = vpop.f32.mrf.mxu0 }
 0x1b7   :  { %v1883_v7 = vpop.f32.mrf.mxu3  ;;  %v2949_v8 = vpop.eup %2948  ;;  %v1388_v9 = vadd.f32 %v3862_v19, %v1387_v6  ;;  %v398_v16 = vadd.f32 %v3841_v10, %v397_v13 }
 0x1b8   :  { %v1884_v11 = vadd.f32 %v3868_v21, %v1883_v7  ;;  %v893_v14 = vpop.f32.mrf.mxu1  ;;  %v2951_v15 = vpop.eup %2950  ;;  %1508 = vst [vmem:[%s4386_s11 + $0x108] sm:$0xff] %v2949_v8 }
 0x1b9   :  { %v894_v17 = vadd.f32 %v3847_v12, %v893_v14  ;;  %v2953_v18 = vpop.eup %2952  ;;  %2004 = vst [vmem:[%s4387_s12 + $0x108] sm:$0xff] %v2951_v15  ;;  %2956 = vtanh.f32 %v1388_v9 }
 0x1ba   :  { %v2955_v20 = vpop.eup %2954  ;;  %517 = vst [vmem:[%s4384_s9 + $0x110] sm:$0xff] %v2953_v18  ;;  %2958 = vtanh.f32 %v1884_v11 }
 0x1bb   :  { %1013 = vst [vmem:[%s4385_s10 + $0x110] sm:$0xff] %v2955_v20  ;;  %2960 = vtanh.f32 %v398_v16 }
 0x1bc   :  { %2962 = vtanh.f32 %v894_v17 }
 0x1be   :  { %v1389_v22 = vpop.f32.mrf.mxu2  ;;  %v400_v27 = vpop.f32.mrf.mxu0 }
 0x1bf   :  { %v1885_v23 = vpop.f32.mrf.mxu3  ;;  %v2957_v24 = vpop.eup %2956  ;;  %v1390_v25 = vadd.f32 %v3862_v19, %v1389_v22  ;;  %v401_v30 = vadd.f32 %v3841_v10, %v400_v27 }
 0x1c0   :  { %v1886_v26 = vadd.f32 %v3868_v21, %v1885_v23  ;;  %v896_v28 = vpop.f32.mrf.mxu1  ;;  %v2959_v29 = vpop.eup %2958  ;;  %1509 = vst [vmem:[%s4386_s11 + $0x110] sm:$0xff] %v2957_v24 }
 0x1c1   :  { %v897_v31 = vadd.f32 %v3847_v12, %v896_v28  ;;  %v2961_v32 = vpop.eup %2960  ;;  %2005 = vst [vmem:[%s4387_s12 + $0x110] sm:$0xff] %v2959_v29  ;;  %2964 = vtanh.f32 %v1390_v25 }
 0x1c2   :  { %v2963_v33 = vpop.eup %2962  ;;  %518 = vst [vmem:[%s4384_s9 + $0x118] sm:$0xff] %v2961_v32  ;;  %2966 = vtanh.f32 %v1886_v26 }
 0x1c3   :  { %1014 = vst [vmem:[%s4385_s10 + $0x118] sm:$0xff] %v2963_v33  ;;  %2968 = vtanh.f32 %v401_v30 }
 0x1c4   :  { %2970 = vtanh.f32 %v897_v31 }
 0x1c6   :  { %v1392_v34 = vpop.f32.mrf.mxu2  ;;  %v402_v39 = vpop.f32.mrf.mxu0 }
 0x1c7   :  { %v1888_v35 = vpop.f32.mrf.mxu3  ;;  %v2965_v36 = vpop.eup %2964  ;;  %v1393_v37 = vadd.f32 %v3862_v19, %v1392_v34  ;;  %v403_v42 = vadd.f32 %v3841_v10, %v402_v39 }
 0x1c8   :  { %v1889_v38 = vadd.f32 %v3868_v21, %v1888_v35  ;;  %v898_v40 = vpop.f32.mrf.mxu1  ;;  %v2967_v41 = vpop.eup %2966  ;;  %1510 = vst [vmem:[%s4386_s11 + $0x118] sm:$0xff] %v2965_v36 }
 0x1c9   :  { %v899_v43 = vadd.f32 %v3847_v12, %v898_v40  ;;  %v2969_v44 = vpop.eup %2968  ;;  %2006 = vst [vmem:[%s4387_s12 + $0x118] sm:$0xff] %v2967_v41  ;;  %2972 = vtanh.f32 %v1393_v37 }
 0x1ca   :  { %v2971_v45 = vpop.eup %2970  ;;  %519 = vst [vmem:[%s4384_s9 + $0x120] sm:$0xff] %v2969_v44  ;;  %2974 = vtanh.f32 %v1889_v38 }
 0x1cb   :  { %1015 = vst [vmem:[%s4385_s10 + $0x120] sm:$0xff] %v2971_v45  ;;  %2976 = vtanh.f32 %v403_v42 }
 0x1cc   :  { %2978 = vtanh.f32 %v899_v43 }
 0x1ce   :  { %v1394_v46 = vpop.f32.mrf.mxu2  ;;  %v405_v51 = vpop.f32.mrf.mxu0 }
 0x1cf   :  { %v1890_v47 = vpop.f32.mrf.mxu3  ;;  %v2973_v48 = vpop.eup %2972  ;;  %v1395_v49 = vadd.f32 %v3862_v19, %v1394_v46  ;;  %v406_v54 = vadd.f32 %v3841_v10, %v405_v51 }
 0x1d0   :  { %v1891_v50 = vadd.f32 %v3868_v21, %v1890_v47  ;;  %v901_v52 = vpop.f32.mrf.mxu1  ;;  %v2975_v53 = vpop.eup %2974  ;;  %1511 = vst [vmem:[%s4386_s11 + $0x120] sm:$0xff] %v2973_v48 }
 0x1d1   :  { %v902_v55 = vadd.f32 %v3847_v12, %v901_v52  ;;  %v2977_v56 = vpop.eup %2976  ;;  %2007 = vst [vmem:[%s4387_s12 + $0x120] sm:$0xff] %v2975_v53  ;;  %2980 = vtanh.f32 %v1395_v49 }
 0x1d2   :  { %v2979_v57 = vpop.eup %2978  ;;  %520 = vst [vmem:[%s4384_s9 + $0x128] sm:$0xff] %v2977_v56  ;;  %2982 = vtanh.f32 %v1891_v50 }
 0x1d3   :  { %1016 = vst [vmem:[%s4385_s10 + $0x128] sm:$0xff] %v2979_v57  ;;  %2984 = vtanh.f32 %v406_v54 }
 0x1d4   :  { %2986 = vtanh.f32 %v902_v55 }
 0x1d6   :  { %v1397_v58 = vpop.f32.mrf.mxu2  ;;  %v407_v1 = vpop.f32.mrf.mxu0 }
 0x1d7   :  { %v1893_v59 = vpop.f32.mrf.mxu3  ;;  %v2981_v60 = vpop.eup %2980  ;;  %v1398_v61 = vadd.f32 %v3862_v19, %v1397_v58  ;;  %v408_v2 = vadd.f32 %v3841_v10, %v407_v1 }
 0x1d8   :  { %v1894_v0 = vadd.f32 %v3868_v21, %v1893_v59  ;;  %v903_v62 = vpop.f32.mrf.mxu1  ;;  %v2983_v63 = vpop.eup %2982  ;;  %1512 = vst [vmem:[%s4386_s11 + $0x128] sm:$0xff] %v2981_v60 }
 0x1d9   :  { %v904_v3 = vadd.f32 %v3847_v12, %v903_v62  ;;  %v2985_v4 = vpop.eup %2984  ;;  %2008 = vst [vmem:[%s4387_s12 + $0x128] sm:$0xff] %v2983_v63  ;;  %2988 = vtanh.f32 %v1398_v61 }
 0x1da   :  { %v2987_v5 = vpop.eup %2986  ;;  %521 = vst [vmem:[%s4384_s9 + $0x130] sm:$0xff] %v2985_v4  ;;  %2990 = vtanh.f32 %v1894_v0 }
 0x1db   :  { %1017 = vst [vmem:[%s4385_s10 + $0x130] sm:$0xff] %v2987_v5  ;;  %2992 = vtanh.f32 %v408_v2 }
 0x1dc   :  { %2994 = vtanh.f32 %v904_v3 }
 0x1de   :  { %v1399_v6 = vpop.f32.mrf.mxu2  ;;  %v410_v13 = vpop.f32.mrf.mxu0 }
 0x1df   :  { %v1895_v7 = vpop.f32.mrf.mxu3  ;;  %v2989_v8 = vpop.eup %2988  ;;  %v1400_v9 = vadd.f32 %v3862_v19, %v1399_v6  ;;  %v411_v16 = vadd.f32 %v3841_v10, %v410_v13 }
 0x1e0   :  { %v1896_v11 = vadd.f32 %v3868_v21, %v1895_v7  ;;  %v906_v14 = vpop.f32.mrf.mxu1  ;;  %v2991_v15 = vpop.eup %2990  ;;  %1513 = vst [vmem:[%s4386_s11 + $0x130] sm:$0xff] %v2989_v8 }
 0x1e1   :  { %v907_v17 = vadd.f32 %v3847_v12, %v906_v14  ;;  %v2993_v18 = vpop.eup %2992  ;;  %2009 = vst [vmem:[%s4387_s12 + $0x130] sm:$0xff] %v2991_v15  ;;  %2996 = vtanh.f32 %v1400_v9  ;;  %v4289_v14 = vld [vmem:[%s4379_s8] ss:$0 sm:$0xff] }
 0x1e2   :  { %v2995_v20 = vpop.eup %2994  ;;  %522 = vst [vmem:[%s4384_s9 + $0x138] sm:$0xff] %v2993_v18  ;;  %2998 = vtanh.f32 %v1896_v11 }
 0x1e3   :  { %1018 = vst [vmem:[%s4385_s10 + $0x138] sm:$0xff] %v2995_v20  ;;  %3000 = vtanh.f32 %v411_v16  ;;  %v4295_v16 = vld [vmem:[%s4379_s8] ss:$0 sm:$0xff] }
 0x1e4   :  { %3002 = vtanh.f32 %v907_v17 }
 0x1e6   :  { %v1402_v22 = vpop.f32.mrf.mxu2  ;;  %v412_v27 = vpop.f32.mrf.mxu0 }
 0x1e7   :  { %v1898_v23 = vpop.f32.mrf.mxu3  ;;  %v2997_v24 = vpop.eup %2996  ;;  %v1403_v25 = vadd.f32 %v3862_v19, %v1402_v22  ;;  %v413_v30 = vadd.f32 %v3841_v10, %v412_v27 }
 0x1e8   :  { %v1899_v26 = vadd.f32 %v3868_v21, %v1898_v23  ;;  %v908_v28 = vpop.f32.mrf.mxu1  ;;  %v2999_v29 = vpop.eup %2998  ;;  %1514 = vst [vmem:[%s4386_s11 + $0x138] sm:$0xff] %v2997_v24 }
 0x1e9   :  { %v909_v31 = vadd.f32 %v3847_v12, %v908_v28  ;;  %v3001_v32 = vpop.eup %3000  ;;  %2010 = vst [vmem:[%s4387_s12 + $0x138] sm:$0xff] %v2999_v29  ;;  %3004 = vtanh.f32 %v1403_v25 }
 0x1ea   :  { %v3003_v33 = vpop.eup %3002  ;;  %523 = vst [vmem:[%s4384_s9 + $0x140] sm:$0xff] %v3001_v32  ;;  %3006 = vtanh.f32 %v1899_v26 }
 0x1eb   :  { %1019 = vst [vmem:[%s4385_s10 + $0x140] sm:$0xff] %v3003_v33  ;;  %3008 = vtanh.f32 %v413_v30 }
 0x1ec   :  { %3010 = vtanh.f32 %v909_v31 }
 0x1ee   :  { %v1404_v34 = vpop.f32.mrf.mxu2  ;;  %v415_v39 = vpop.f32.mrf.mxu0 }
 0x1ef   :  { %v1900_v35 = vpop.f32.mrf.mxu3  ;;  %v3005_v36 = vpop.eup %3004  ;;  %v1405_v37 = vadd.f32 %v3862_v19, %v1404_v34  ;;  %v416_v42 = vadd.f32 %v3841_v10, %v415_v39 }
 0x1f0   :  { %v1901_v38 = vadd.f32 %v3868_v21, %v1900_v35  ;;  %v911_v40 = vpop.f32.mrf.mxu1  ;;  %v3007_v41 = vpop.eup %3006  ;;  %1515 = vst [vmem:[%s4386_s11 + $0x140] sm:$0xff] %v3005_v36  ;;  %v3078_v35 = vld [vmem:[%s4379_s8] ss:$0 sm:$0xff] }
 0x1f1   :  { %v912_v43 = vadd.f32 %v3847_v12, %v911_v40  ;;  %v3009_v44 = vpop.eup %3008  ;;  %2011 = vst [vmem:[%s4387_s12 + $0x140] sm:$0xff] %v3007_v41  ;;  %3012 = vtanh.f32 %v1405_v37  ;;  %v3079_v37 = vld [vmem:[%s4379_s8] ss:$0 sm:$0xff] }
 0x1f2   :  { %v3011_v45 = vpop.eup %3010  ;;  %524 = vst [vmem:[%s4384_s9 + $0x148] sm:$0xff] %v3009_v44  ;;  %3014 = vtanh.f32 %v1901_v38 }
 0x1f3   :  { %1020 = vst [vmem:[%s4385_s10 + $0x148] sm:$0xff] %v3011_v45  ;;  %3016 = vtanh.f32 %v416_v42 }
 0x1f4   :  { %3018 = vtanh.f32 %v912_v43 }
 0x1f6   :  { %v1407_v46 = vpop.f32.mrf.mxu2  ;;  %v417_v51 = vpop.f32.mrf.mxu0 }
 0x1f7   :  { %v1903_v47 = vpop.f32.mrf.mxu3  ;;  %v3013_v48 = vpop.eup %3012  ;;  %v1408_v49 = vadd.f32 %v3862_v19, %v1407_v46  ;;  %v418_v54 = vadd.f32 %v3841_v10, %v417_v51 }
 0x1f8   :  { %v1904_v50 = vadd.f32 %v3868_v21, %v1903_v47  ;;  %v913_v52 = vpop.f32.mrf.mxu1  ;;  %v3015_v53 = vpop.eup %3014  ;;  %1516 = vst [vmem:[%s4386_s11 + $0x148] sm:$0xff] %v3013_v48 }
 0x1f9   :  { %v914_v55 = vadd.f32 %v3847_v12, %v913_v52  ;;  %v3017_v56 = vpop.eup %3016  ;;  %2012 = vst [vmem:[%s4387_s12 + $0x148] sm:$0xff] %v3015_v53  ;;  %3020 = vtanh.f32 %v1408_v49 }
 0x1fa   :  { %v3019_v57 = vpop.eup %3018  ;;  %525 = vst [vmem:[%s4384_s9 + $0x150] sm:$0xff] %v3017_v56  ;;  %3022 = vtanh.f32 %v1904_v50 }
 0x1fb   :  { %1021 = vst [vmem:[%s4385_s10 + $0x150] sm:$0xff] %v3019_v57  ;;  %3024 = vtanh.f32 %v418_v54 }
 0x1fc   :  { %3026 = vtanh.f32 %v914_v55 }
 0x1fe   :  { %v1409_v58 = vpop.f32.mrf.mxu2  ;;  %v420_v1 = vpop.f32.mrf.mxu0 }
 0x1ff   :  { %v1905_v59 = vpop.f32.mrf.mxu3  ;;  %v3021_v60 = vpop.eup %3020  ;;  %v1410_v61 = vadd.f32 %v3862_v19, %v1409_v58  ;;  %v421_v2 = vadd.f32 %v3841_v10, %v420_v1 }
 0x200   :  { %v1906_v0 = vadd.f32 %v3868_v21, %v1905_v59  ;;  %v916_v62 = vpop.f32.mrf.mxu1  ;;  %v3023_v63 = vpop.eup %3022  ;;  %1517 = vst [vmem:[%s4386_s11 + $0x150] sm:$0xff] %v3021_v60 }
 0x201   :  { %v917_v3 = vadd.f32 %v3847_v12, %v916_v62  ;;  %v3025_v4 = vpop.eup %3024  ;;  %2013 = vst [vmem:[%s4387_s12 + $0x150] sm:$0xff] %v3023_v63  ;;  %3028 = vtanh.f32 %v1410_v61 }
 0x202   :  { %v3027_v5 = vpop.eup %3026  ;;  %526 = vst [vmem:[%s4384_s9 + $0x158] sm:$0xff] %v3025_v4  ;;  %3030 = vtanh.f32 %v1906_v0 }
 0x203   :  { %1022 = vst [vmem:[%s4385_s10 + $0x158] sm:$0xff] %v3027_v5  ;;  %3032 = vtanh.f32 %v421_v2 }
 0x204   :  { %3034 = vtanh.f32 %v917_v3 }
 0x206   :  { %v1412_v10 = vpop.f32.mrf.mxu2  ;;  %v422_v9 = vpop.f32.mrf.mxu0 }
 0x207   :  { %v1908_v12 = vpop.f32.mrf.mxu3  ;;  %v3029_v6 = vpop.eup %3028  ;;  %v1413_v7 = vadd.f32 %v3862_v19, %v1412_v10  ;;  %v423_v15 = vadd.f32 %v4289_v14, %v422_v9 }
 0x208   :  { %v1909_v8 = vadd.f32 %v3868_v21, %v1908_v12  ;;  %v918_v11 = vpop.f32.mrf.mxu1  ;;  %v3031_v13 = vpop.eup %3030  ;;  %1518 = vst [vmem:[%s4386_s11 + $0x158] sm:$0xff] %v3029_v6 }
 0x209   :  { %v919_v17 = vadd.f32 %v4295_v16, %v918_v11  ;;  %v3033_v18 = vpop.eup %3032  ;;  %2014 = vst [vmem:[%s4387_s12 + $0x158] sm:$0xff] %v3031_v13  ;;  %3036 = vtanh.f32 %v1413_v7 }
 0x20a   :  { %v3035_v20 = vpop.eup %3034  ;;  %527 = vst [vmem:[%s4384_s9 + $0x160] sm:$0xff] %v3033_v18  ;;  %3038 = vtanh.f32 %v1909_v8 }
 0x20b   :  { %1023 = vst [vmem:[%s4385_s10 + $0x160] sm:$0xff] %v3035_v20  ;;  %3040 = vtanh.f32 %v423_v15 }
 0x20c   :  { %3042 = vtanh.f32 %v919_v17 }
 0x20e   :  { %v1414_v22 = vpop.f32.mrf.mxu2  ;;  %v425_v27 = vpop.f32.mrf.mxu0 }
 0x20f   :  { %v1910_v23 = vpop.f32.mrf.mxu3  ;;  %v3037_v24 = vpop.eup %3036  ;;  %v1415_v25 = vadd.f32 %v3862_v19, %v1414_v22  ;;  %v426_v30 = vadd.f32 %v4289_v14, %v425_v27 }
 0x210   :  { %v1911_v26 = vadd.f32 %v3868_v21, %v1910_v23  ;;  %v921_v28 = vpop.f32.mrf.mxu1  ;;  %v3039_v29 = vpop.eup %3038  ;;  %1519 = vst [vmem:[%s4386_s11 + $0x160] sm:$0xff] %v3037_v24 }
 0x211   :  { %v922_v31 = vadd.f32 %v4295_v16, %v921_v28  ;;  %v3041_v32 = vpop.eup %3040  ;;  %2015 = vst [vmem:[%s4387_s12 + $0x160] sm:$0xff] %v3039_v29  ;;  %3044 = vtanh.f32 %v1415_v25 }
 0x212   :  { %v3043_v19 = vpop.eup %3042  ;;  %528 = vst [vmem:[%s4384_s9 + $0x168] sm:$0xff] %v3041_v32  ;;  %3046 = vtanh.f32 %v1911_v26 }
 0x213   :  { %1024 = vst [vmem:[%s4385_s10 + $0x168] sm:$0xff] %v3043_v19  ;;  %3048 = vtanh.f32 %v426_v30 }
 0x214   :  { %3050 = vtanh.f32 %v922_v31 }
 0x216   :  { %v1417_v21 = vpop.f32.mrf.mxu2  ;;  %v427_v39 = vpop.f32.mrf.mxu0 }
 0x217   :  { %v1913_v33 = vpop.f32.mrf.mxu3  ;;  %v3045_v34 = vpop.eup %3044  ;;  %v1418_v36 = vadd.f32 %v3078_v35, %v1417_v21  ;;  %v428_v42 = vadd.f32 %v4289_v14, %v427_v39 }
 0x218   :  { %v1914_v38 = vadd.f32 %v3079_v37, %v1913_v33  ;;  %v923_v40 = vpop.f32.mrf.mxu1  ;;  %v3047_v41 = vpop.eup %3046  ;;  %1520 = vst [vmem:[%s4386_s11 + $0x168] sm:$0xff] %v3045_v34 }
 0x219   :  { %v924_v43 = vadd.f32 %v4295_v16, %v923_v40  ;;  %v3049_v44 = vpop.eup %3048  ;;  %2016 = vst [vmem:[%s4387_s12 + $0x168] sm:$0xff] %v3047_v41  ;;  %3052 = vtanh.f32 %v1418_v36 }
 0x21a   :  { %v3051_v45 = vpop.eup %3050  ;;  %529 = vst [vmem:[%s4384_s9 + $0x170] sm:$0xff] %v3049_v44  ;;  %3054 = vtanh.f32 %v1914_v38 }
 0x21b   :  { %1025 = vst [vmem:[%s4385_s10 + $0x170] sm:$0xff] %v3051_v45  ;;  %3056 = vtanh.f32 %v428_v42 }
 0x21c   :  { %3058 = vtanh.f32 %v924_v43 }
 0x21e   :  { %v1419_v46 = vpop.f32.mrf.mxu2  ;;  %v430_v51 = vpop.f32.mrf.mxu0 }
 0x21f   :  { %v1915_v47 = vpop.f32.mrf.mxu3  ;;  %v3053_v48 = vpop.eup %3052  ;;  %v1420_v49 = vadd.f32 %v3078_v35, %v1419_v46  ;;  %v431_v54 = vadd.f32 %v4289_v14, %v430_v51 }
 0x220   :  { %v1916_v50 = vadd.f32 %v3079_v37, %v1915_v47  ;;  %v926_v52 = vpop.f32.mrf.mxu1  ;;  %v3055_v53 = vpop.eup %3054  ;;  %1521 = vst [vmem:[%s4386_s11 + $0x170] sm:$0xff] %v3053_v48 }
 0x221   :  { %v927_v55 = vadd.f32 %v4295_v16, %v926_v52  ;;  %v3057_v56 = vpop.eup %3056  ;;  %2017 = vst [vmem:[%s4387_s12 + $0x170] sm:$0xff] %v3055_v53  ;;  %3060 = vtanh.f32 %v1420_v49 }
 0x222   :  { %v3059_v57 = vpop.eup %3058  ;;  %530 = vst [vmem:[%s4384_s9 + $0x178] sm:$0xff] %v3057_v56  ;;  %3062 = vtanh.f32 %v1916_v50 }
 0x223   :  { %1026 = vst [vmem:[%s4385_s10 + $0x178] sm:$0xff] %v3059_v57  ;;  %3064 = vtanh.f32 %v431_v54 }
 0x224   :  { %3066 = vtanh.f32 %v927_v55 }
 0x226   :  { %v1422_v58 = vpop.f32.mrf.mxu2  ;;  %v432_v1 = vpop.f32.mrf.mxu0 }
 0x227   :  { %v1918_v59 = vpop.f32.mrf.mxu3  ;;  %v3061_v60 = vpop.eup %3060  ;;  %v1423_v61 = vadd.f32 %v3078_v35, %v1422_v58 }
 0x228   :  { %v1919_v0 = vadd.f32 %v3079_v37, %v1918_v59  ;;  %v928_v62 = vpop.f32.mrf.mxu1  ;;  %v3063_v63 = vpop.eup %3062  ;;  %1522 = vst [vmem:[%s4386_s11 + $0x178] sm:$0xff] %v3061_v60 }
 0x229   :  { %v3065_v2 = vpop.eup %3064  ;;  %2018 = vst [vmem:[%s4387_s12 + $0x178] sm:$0xff] %v3063_v63  ;;  %3068 = vtanh.f32 %v1423_v61 }
 0x22a   :  { %v3067_v3 = vpop.eup %3066  ;;  %531 = vst [vmem:[%s4384_s9 + $0x180] sm:$0xff] %v3065_v2  ;;  %3070 = vtanh.f32 %v1919_v0 }
 0x22b   :  { %1027 = vst [vmem:[%s4385_s10 + $0x180] sm:$0xff] %v3067_v3 }
 0x22e   :  { %v1424_v4 = vpop.f32.mrf.mxu2 }
 0x22f   :  { %v1920_v5 = vpop.f32.mrf.mxu3  ;;  %v3069_v10 = vpop.eup %3068 }
 0x230   :  { %v3071_v12 = vpop.eup %3070  ;;  %1523 = vst [vmem:[%s4386_s11 + $0x180] sm:$0xff] %v3069_v10 }
 0x231   :  { %2019 = vst [vmem:[%s4387_s12 + $0x180] sm:$0xff] %v3071_v12 }

// kernel: dcae_forward.8
= control target key start
LH: loop header
LB: loop body
LE: loop exit
PB: predicated region body
PF: predicated region fallthrough
CT: control target
= control target key end

     0   :  { %s2013_s1 = inlined_call_operand.vmem [shape: bf16[128,128], index: 1, kind: input, shape index: {}]   ;;  %s2014_s2 = inlined_call_operand.vmem [shape: f32[1,128], index: 2, kind: input, shape index: {}]   ;;  %s2015_s0 = inlined_call_operand.vmem [shape: bf16[392,128], index: 0, kind: input, shape index: {}]   ;;  %s2016_s3 = inlined_call_operand.vmem [shape: f32[1,128], index: 3, kind: input, shape index: {}]   ;;  %s2017_s4 = inlined_call_operand.vmem [shape: f32[1,128], index: 4, kind: input, shape index: {}]   ;;  %s2018_s5 = inlined_call_operand.vmem [shape: bf16[392,128], index: 5, kind: output, shape index: {}]  }
   0x1   :  { %v1063_v0 = vld [vmem:[%s2013_s1 + $0x38] sm:$0xff]  ;;  %v1062_v1 = vld [vmem:[%s2013_s1 + $0x30] sm:$0xff]  ;;  %v1061_v2 = vld [vmem:[%s2013_s1 + $0x28] sm:$0xff] }
   0x2   :  { %285 = vmatpush.bf16.msra.mxu0 %v1063_v0  ;;  %1207 = vmatpush.bf16.msra.mxu1 %v1063_v0  ;;  %v1060_v3 = vld [vmem:[%s2013_s1 + $0x20] sm:$0xff]  ;;  %v1059_v4 = vld [vmem:[%s2013_s1 + $0x18] sm:$0xff]  ;;  %v1058_v5 = vld [vmem:[%s2013_s1 + $0x10] sm:$0xff] }
   0x3   :  { %1208 = vmatpush.bf16.msra.mxu2 %v1063_v0  ;;  %1209 = vmatpush.bf16.msra.mxu3 %v1063_v0  ;;  %v1057_v6 = vld [vmem:[%s2013_s1 + $0x8] sm:$0xff]  ;;  %v1056_v7 = vld [vmem:[%s2013_s1] sm:$0xff]  ;;  %v1038_v9 = vld [vmem:[%s2015_s0 + $0x30] sm:$0xff] }
   0x4   :  { %v1032_v8 = vld [vmem:[%s2015_s0] sm:$0xff]  ;;  %v1033_v11 = vld [vmem:[%s2015_s0 + $0x8] sm:$0xff]  ;;  %v1039_v12 = vld [vmem:[%s2015_s0 + $0x38] sm:$0xff] }
   0x5   :  { %v1044_v10 = vld [vmem:[%s2015_s0 + $0x60] sm:$0xff]  ;;  %v1045_v13 = vld [vmem:[%s2015_s0 + $0x68] sm:$0xff]  ;;  %v1034_v14 = vld [vmem:[%s2015_s0 + $0x10] sm:$0xff] }
   0x6   :  { %286 = vmatpush.bf16.msra.mxu0 %v1062_v1  ;;  %1210 = vmatpush.bf16.msra.mxu1 %v1062_v1  ;;  %v1040_v15 = vld [vmem:[%s2015_s0 + $0x40] sm:$0xff]  ;;  %v1046_v16 = vld [vmem:[%s2015_s0 + $0x70] sm:$0xff]  ;;  %v1051_v17 = vld [vmem:[%s2015_s0 + $0x98] sm:$0xff] }
   0x7   :  { %1211 = vmatpush.bf16.msra.mxu2 %v1062_v1  ;;  %1212 = vmatpush.bf16.msra.mxu3 %v1062_v1  ;;  %v1035_v18 = vld [vmem:[%s2015_s0 + $0x18] sm:$0xff]  ;;  %v1041_v19 = vld [vmem:[%s2015_s0 + $0x48] sm:$0xff]  ;;  %v1052_v21 = vld [vmem:[%s2015_s0 + $0xa0] sm:$0xff] }
   0x8   :  { %v1047_v20 = vld [vmem:[%s2015_s0 + $0x78] sm:$0xff]  ;;  %v1036_v22 = vld [vmem:[%s2015_s0 + $0x20] sm:$0xff]  ;;  %v1042_v23 = vld [vmem:[%s2015_s0 + $0x50] sm:$0xff] }
   0x9   :  { %v1048_v24 = vld [vmem:[%s2015_s0 + $0x80] sm:$0xff]  ;;  %v1053_v25 = vld [vmem:[%s2015_s0 + $0xa8] sm:$0xff]  ;;  %v1043_v27 = vld [vmem:[%s2015_s0 + $0x58] sm:$0xff] }
   0xa   :  { %287 = vmatpush.bf16.msra.mxu0 %v1061_v2  ;;  %1213 = vmatpush.bf16.msra.mxu1 %v1061_v2  ;;  %v1037_v26 = vld [vmem:[%s2015_s0 + $0x28] sm:$0xff]  ;;  %v1054_v29 = vld [vmem:[%s2015_s0 + $0xb0] sm:$0xff]  ;;  %v1055_v31 = vld [vmem:[%s2015_s0 + $0xb8] sm:$0xff] }
   0xb   :  { %1214 = vmatpush.bf16.msra.mxu2 %v1061_v2  ;;  %1215 = vmatpush.bf16.msra.mxu3 %v1061_v2  ;;  %v1049_v28 = vld [vmem:[%s2015_s0 + $0x88] sm:$0xff]  ;;  %v1050_v30 = vld [vmem:[%s2015_s0 + $0x90] sm:$0xff]  ;;  %v68_v32 = vld [vmem:[%s2015_s0 + $0xc0] sm:$0xf] }
   0xc   :  { %v186_v33 = vunpack.c.l.b16 %v68_v32  ;;  %v1388_v60 = vld [vmem:[%s2014_s2] ss:$0 sm:$0xff] }
   0xe   :  { %288 = vmatpush.bf16.msra.mxu0 %v1060_v3  ;;  %1216 = vmatpush.bf16.msra.mxu1 %v1060_v3  ;;  %v211_v34 = vpack.c.b16 %v186_v33, %v186_v33 }
   0xf   :  { %1217 = vmatpush.bf16.msra.mxu2 %v1060_v3  ;;  %1218 = vmatpush.bf16.msra.mxu3 %v1060_v3 }
  0x12   :  { %289 = vmatpush.bf16.msra.mxu0 %v1059_v4  ;;  %1219 = vmatpush.bf16.msra.mxu1 %v1059_v4 }
  0x13   :  { %1220 = vmatpush.bf16.msra.mxu2 %v1059_v4  ;;  %1221 = vmatpush.bf16.msra.mxu3 %v1059_v4 }
  0x16   :  { %290 = vmatpush.bf16.msra.mxu0 %v1058_v5  ;;  %1222 = vmatpush.bf16.msra.mxu1 %v1058_v5 }
  0x17   :  { %1223 = vmatpush.bf16.msra.mxu2 %v1058_v5  ;;  %1224 = vmatpush.bf16.msra.mxu3 %v1058_v5 }
  0x1a   :  { %291 = vmatpush.bf16.msra.mxu0 %v1057_v6  ;;  %1225 = vmatpush.bf16.msra.mxu1 %v1057_v6 }
  0x1b   :  { %1226 = vmatpush.bf16.msra.mxu2 %v1057_v6  ;;  %1227 = vmatpush.bf16.msra.mxu3 %v1057_v6 }
  0x1e   :  { %292 = vmatpush.bf16.msra.mxu0 %v1056_v7  ;;  %1228 = vmatpush.bf16.msra.mxu1 %v1056_v7 }
  0x1f   :  { %1229 = vmatpush.bf16.msra.mxu2 %v1056_v7  ;;  %1230 = vmatpush.bf16.msra.mxu3 %v1056_v7 }
  0x21   :  { %293 = vmatmul.bf16.vlgmr.msra.gmra.mxu0 %v1032_v8  ;;  %323 = vmatmul.bf16.vlgmr.msra.gmra.mxu1 %v1038_v9 }
  0x22   :  { %353 = vmatmul.bf16.vlgmr.msra.gmra.mxu2 %v1044_v10  ;;  %388 = vmatmul.bf16.vlgmr.msra.gmra.mxu3 %v1051_v17 }
  0x31   :  { %298 = vmatmul.bf16.gmra.mxu0 %v1033_v11  ;;  %328 = vmatmul.bf16.gmra.mxu1 %v1039_v12 }
  0x32   :  { %358 = vmatmul.bf16.gmra.mxu2 %v1045_v13  ;;  %393 = vmatmul.bf16.gmra.mxu3 %v1052_v21 }
  0x41   :  { %303 = vmatmul.bf16.gmra.mxu0 %v1034_v14  ;;  %333 = vmatmul.bf16.gmra.mxu1 %v1040_v15 }
  0x42   :  { %363 = vmatmul.bf16.gmra.mxu2 %v1046_v16  ;;  %398 = vmatmul.bf16.gmra.mxu3 %v1053_v25 }
  0x51   :  { %308 = vmatmul.bf16.gmra.mxu0 %v1035_v18  ;;  %338 = vmatmul.bf16.gmra.mxu1 %v1041_v19 }
  0x52   :  { %368 = vmatmul.bf16.gmra.mxu2 %v1047_v20  ;;  %403 = vmatmul.bf16.gmra.mxu3 %v1054_v29 }
  0x61   :  { %313 = vmatmul.bf16.gmra.mxu0 %v1036_v22  ;;  %343 = vmatmul.bf16.gmra.mxu1 %v1042_v23 }
  0x62   :  { %373 = vmatmul.bf16.gmra.mxu2 %v1048_v24  ;;  %408 = vmatmul.bf16.gmra.mxu3 %v1055_v31 }
  0x71   :  { %318 = vmatmul.bf16.gmra.mxu0 %v1037_v26  ;;  %348 = vmatmul.bf16.gmra.mxu1 %v1043_v27 }
  0x72   :  { %378 = vmatmul.bf16.gmra.mxu2 %v1049_v28  ;;  %413 = vmatmul.bf16.gmra.mxu3 %v211_v34 }
  0x82   :  { %383 = vmatmul.bf16.gmra.mxu2 %v1050_v30 }
  0x9e   :  { %v294_v35 = vpop.f32.mrf.mxu0  ;;  %v324_v36 = vpop.f32.mrf.mxu1 }
  0x9f   :  { %v1398_v0 = vadd.f32 %v1388_v60, %v294_v35  ;;  %v1450_v32 = vadd.f32 %v1388_v60, %v324_v36 }
  0xa5   :  { %v1367_v38 = vpop.f32.mrf.mxu2  ;;  %v1375_v50 = vpop.f32.mrf.mxu3 }
  0xa6   :  { %v296_v37 = vpop.f32.mrf.mxu0  ;;  %v326_v39 = vpop.f32.mrf.mxu1 }
  0xa7   :  { %v1393_v62 = vadd.f32 %v1388_v60, %v296_v37  ;;  %v1454_v34 = vadd.f32 %v1388_v60, %v326_v39 }
  0xa9   :  { %v418_v3 = vadd.f32 %v1393_v62, %v1398_v0 }
  0xad   :  { %v1369_v41 = vpop.f32.mrf.mxu2  ;;  %v1379_v54 = vpop.f32.mrf.mxu3 }
  0xae   :  { %v299_v40 = vpop.f32.mrf.mxu0  ;;  %v329_v42 = vpop.f32.mrf.mxu1 }
  0xaf   :  { %v1401_v1 = vadd.f32 %v1388_v60, %v299_v40  ;;  %v1458_v37 = vadd.f32 %v1388_v60, %v329_v42 }
  0xb1   :  { %v419_v6 = vadd.f32 %v418_v3, %v1401_v1 }
  0xb5   :  { %v1371_v44 = vpop.f32.mrf.mxu2  ;;  %v1383_v57 = vpop.f32.mrf.mxu3 }
  0xb6   :  { %v301_v43 = vpop.f32.mrf.mxu0  ;;  %v331_v45 = vpop.f32.mrf.mxu1 }
  0xb7   :  { %v1406_v4 = vadd.f32 %v1388_v60, %v301_v43  ;;  %v1462_v43 = vadd.f32 %v1388_v60, %v331_v45 }
  0xb9   :  { %2031 = vst [vmem:[#allocation2_spill] sm:$0xff] %v1406_v4  ;;  %v420_v9 = vadd.f32 %v419_v6, %v1406_v4 }
  0xbd   :  { %v1373_v47 = vpop.f32.mrf.mxu2  ;;  %v1390_v61 = vpop.f32.mrf.mxu3 }
  0xbe   :  { %v304_v46 = vpop.f32.mrf.mxu0  ;;  %v334_v49 = vpop.f32.mrf.mxu1 }
  0xbf   :  { %v1410_v7 = vadd.f32 %v1388_v60, %v304_v46 }
  0xc1   :  { %2032 = vst [vmem:[#allocation3_spill] sm:$0xff] %v1410_v7  ;;  %v421_v11 = vadd.f32 %v420_v9, %v1410_v7 }
  0xc5   :  { %v1377_v52 = vpop.f32.mrf.mxu2  ;;  %v1412_v8 = vpop.f32.mrf.mxu3 }
  0xc6   :  { %v306_v48 = vpop.f32.mrf.mxu0  ;;  %v336_v53 = vpop.f32.mrf.mxu1 }
  0xc7   :  { %v1416_v10 = vadd.f32 %v1388_v60, %v306_v48 }
  0xc9   :  { %v422_v14 = vadd.f32 %v421_v11, %v1416_v10 }
  0xcd   :  { %v1381_v56 = vpop.f32.mrf.mxu2  ;;  %v1432_v20 = vpop.f32.mrf.mxu3 }
  0xce   :  { %v309_v51 = vpop.f32.mrf.mxu0  ;;  %v339_v58 = vpop.f32.mrf.mxu1 }
  0xcf   :  { %v1420_v12 = vadd.f32 %v1388_v60, %v309_v51  ;;  %v1468_v51 = vadd.f32 %v1388_v60, %v334_v49  ;;  %v1476_v3 = vadd.f32 %v1388_v60, %v339_v58 }
  0xd1   :  { %v423_v18 = vadd.f32 %v422_v14, %v1420_v12 }
  0xd5   :  { %v1395_v63 = vpop.f32.mrf.mxu2  ;;  %v1447_v31 = vpop.f32.mrf.mxu3 }
  0xd6   :  { %v311_v55 = vpop.f32.mrf.mxu0  ;;  %v341_v2 = vpop.f32.mrf.mxu1 }
  0xd7   :  { %v1426_v15 = vadd.f32 %v1388_v60, %v311_v55 }
  0xd9   :  { %v424_v21 = vadd.f32 %v423_v18, %v1426_v15 }
  0xdd   :  { %v1422_v13 = vpop.f32.mrf.mxu2  ;;  %v1465_v36 = vpop.f32.mrf.mxu3 }
  0xde   :  { %v314_v59 = vpop.f32.mrf.mxu0  ;;  %v344_v17 = vpop.f32.mrf.mxu1 }
  0xdf   :  { %v1430_v19 = vadd.f32 %v1388_v60, %v314_v59  ;;  %v1472_v59 = vadd.f32 %v1388_v60, %v336_v53  ;;  %v1484_v9 = vadd.f32 %v1388_v60, %v344_v17 }
  0xe1   :  { %v425_v23 = vadd.f32 %v424_v21, %v1430_v19 }
  0xe5   :  { %v374_v27 = vpop.f32.mrf.mxu2  ;;  %v409_v49 = vpop.f32.mrf.mxu3 }
  0xe6   :  { %v316_v5 = vpop.f32.mrf.mxu0  ;;  %v346_v30 = vpop.f32.mrf.mxu1 }
  0xe7   :  { %v1436_v22 = vadd.f32 %v1388_v60, %v316_v5  ;;  %v1480_v5 = vadd.f32 %v1388_v60, %v341_v2  ;;  %v1488_v14 = vadd.f32 %v1388_v60, %v346_v30 }
  0xe9   :  { %v426_v25 = vadd.f32 %v425_v23, %v1436_v22 }
  0xed   :  { %v376_v48 = vpop.f32.mrf.mxu2  ;;  %v411_v17 = vpop.f32.mrf.mxu3 }
  0xee   :  { %v319_v16 = vpop.f32.mrf.mxu0  ;;  %v349_v55 = vpop.f32.mrf.mxu1 }
  0xef   :  { %v1440_v24 = vadd.f32 %v1388_v60, %v319_v16  ;;  %v1493_v2 = vadd.f32 %v1388_v60, %v349_v55 }
  0xf1   :  { %v427_v28 = vadd.f32 %v426_v25, %v1440_v24  ;;  %v1501_v25 = vadd.f32 %v1388_v60, %v1367_v38 }
  0xf5   :  { %v379_v53 = vpop.f32.mrf.mxu2 }
  0xf6   :  { %v321_v26 = vpop.f32.mrf.mxu0  ;;  %v351_v16 = vpop.f32.mrf.mxu1 }
  0xf7   :  { %v1445_v29 = vadd.f32 %v1388_v60, %v321_v26  ;;  %v1497_v23 = vadd.f32 %v1388_v60, %v351_v16  ;;  %v1540_v16 = vadd.f32 %v1388_v60, %v374_v27 }
  0xf9   :  { %v428_v33 = vadd.f32 %v427_v28, %v1445_v29  ;;  %v1506_v28 = vadd.f32 %v1388_v60, %v1369_v41  ;;  %v1521_v41 = vadd.f32 %v1388_v60, %v1377_v52 }
  0xfb   :  { %v429_v35 = vadd.f32 %v428_v33, %v1450_v32 }
  0xfd   :  { %v430_v40 = vadd.f32 %v429_v35, %v1454_v34  ;;  %v381_v33 = vpop.f32.mrf.mxu2  ;;  %v1511_v35 = vadd.f32 %v1388_v60, %v1371_v44 }
  0xff   :  { %v431_v46 = vadd.f32 %v430_v40, %v1458_v37 }
 0x101   :  { %v432_v39 = vadd.f32 %v431_v46, %v1462_v43  ;;  %v1516_v46 = vadd.f32 %v1388_v60, %v1373_v47 }
 0x103   :  { %v433_v42 = vadd.f32 %v432_v39, %v1468_v51  ;;  %v414_v39 = vpop.f32.mrf.mxu3 }
 0x105   :  { %v434_v45 = vadd.f32 %v433_v42, %v1472_v59  ;;  %v1526_v42 = vadd.f32 %v1388_v60, %v1381_v56 }
 0x107   :  { %v435_v6 = vadd.f32 %v434_v45, %v1476_v3  ;;  %v1531_v45 = vadd.f32 %v1388_v60, %v1395_v63 }
 0x109   :  { %v436_v11 = vadd.f32 %v435_v6, %v1480_v5  ;;  %v384_v6 = vpop.f32.mrf.mxu2 }
 0x10b   :  { %v437_v58 = vadd.f32 %v436_v11, %v1484_v9  ;;  %v1536_v11 = vadd.f32 %v1388_v60, %v1422_v13 }
 0x10d   :  { %v438_v18 = vadd.f32 %v437_v58, %v1488_v14  ;;  %v416_v58 = vpop.f32.mrf.mxu3 }
 0x10e   :  { %v1580_v58 = vadd.f32 %v1388_v60, %v1390_v61 }
 0x10f   :  { %v439_v21 = vadd.f32 %v438_v18, %v1493_v2  ;;  %v1544_v18 = vadd.f32 %v1388_v60, %v376_v48 }
 0x110   :  { %2033 = vst [vmem:[#allocation4_spill] sm:$0xff] %v1580_v58 }
 0x111   :  { %v440_v26 = vadd.f32 %v439_v21, %v1497_v23  ;;  %v1548_v21 = vadd.f32 %v1388_v60, %v379_v53  ;;  %v1565_v53 = vadd.f32 %v1388_v60, %v1375_v50 }
 0x113   :  { %v441_v30 = vadd.f32 %v440_v26, %v1501_v25 }
 0x115   :  { %v442_v40 = vadd.f32 %v441_v30, %v1506_v28  ;;  %v1553_v30 = vadd.f32 %v1388_v60, %v381_v33  ;;  %v1570_v33 = vadd.f32 %v1388_v60, %v1379_v54 }
 0x117   :  { %v443_v38 = vadd.f32 %v442_v40, %v1511_v35  ;;  %v386_v40 = vpop.f32.mrf.mxu2 }
 0x119   :  { %v444_v55 = vadd.f32 %v443_v38, %v1516_v46  ;;  %v1557_v38 = vadd.f32 %v1388_v60, %v384_v6  ;;  %v1575_v6 = vadd.f32 %v1388_v60, %v1383_v57 }
 0x11b   :  { %v445_v44 = vadd.f32 %v444_v55, %v1521_v41  ;;  %v1561_v55 = vadd.f32 %v1388_v60, %v386_v40  ;;  %v1604_v40 = vadd.f32 %v1388_v60, %v409_v49 }
 0x11d   :  { %v446_v47 = vadd.f32 %v445_v44, %v1526_v42  ;;  %2038 = vst [vmem:[#allocation9_spill] sm:$0xff] %v1604_v40 }
 0x11f   :  { %v447_v52 = vadd.f32 %v446_v47, %v1531_v45 }
 0x121   :  { %v448_v56 = vadd.f32 %v447_v52, %v1536_v11 }
 0x123   :  { %v449_v63 = vadd.f32 %v448_v56, %v1540_v16  ;;  %v1585_v56 = vadd.f32 %v1388_v60, %v1412_v8 }
 0x125   :  { %v450_v26 = vadd.f32 %v449_v63, %v1544_v18  ;;  %2034 = vst [vmem:[#allocation5_spill] sm:$0xff] %v1585_v56  ;;  %v1590_v63 = vadd.f32 %v1388_v60, %v1432_v20 }
 0x127   :  { %v451_v13 = vadd.f32 %v450_v26, %v1548_v21  ;;  %2035 = vst [vmem:[#allocation6_spill] sm:$0xff] %v1590_v63  ;;  %v1595_v26 = vadd.f32 %v1388_v60, %v1447_v31  ;;  %v1612_v31 = vadd.f32 %v1388_v60, %v414_v39 }
 0x129   :  { %v452_v27 = vadd.f32 %v451_v13, %v1553_v30  ;;  %2036 = vst [vmem:[#allocation7_spill] sm:$0xff] %v1595_v26  ;;  %v1600_v13 = vadd.f32 %v1388_v60, %v1465_v36 }
 0x12a   :  { %2040 = vst [vmem:[#allocation11_spill] sm:$0xff] %v1612_v31 }
 0x12b   :  { %v453_v48 = vadd.f32 %v452_v27, %v1557_v38  ;;  %2037 = vst [vmem:[#allocation8_spill] sm:$0xff] %v1600_v13 }
 0x12d   :  { %v454_v44 = vadd.f32 %v453_v48, %v1561_v55  ;;  %v1609_v48 = vadd.f32 %v1388_v60, %v411_v17 }
 0x12f   :  { %v455_v47 = vadd.f32 %v454_v44, %v1565_v53  ;;  %2039 = vst [vmem:[#allocation10_spill] sm:$0xff] %v1609_v48 }
 0x131   :  { %v456_v52 = vadd.f32 %v455_v47, %v1570_v33  ;;  %v1237_v47 = vmov 392.0  }
 0x132   :  { %1233 = vrcp.f32 %v1237_v47 }
 0x133   :  { %v457_v50 = vadd.f32 %v456_v52, %v1575_v6 }
 0x135   :  { %v458_v54 = vadd.f32 %v457_v50, %v1580_v58 }
 0x137   :  { %v459_v57 = vadd.f32 %v458_v54, %v1585_v56 }
 0x138   :  { %v1234_v50 = vpop.eup %1233 }
 0x139   :  { %v460_v61 = vadd.f32 %v459_v57, %v1590_v63  ;;  %v473_v54 = vmul.f32 392.0, %v1234_v50  ;;  %vm477_vm0 = vweird.f32 %v1234_v50 }
 0x13b   :  { %v461_v8 = vadd.f32 %v460_v61, %v1595_v26  ;;  %v474_v61 = vsub.f32 1.0, %v473_v54 }
 0x13d   :  { %v462_v20 = vadd.f32 %v461_v8, %v1600_v13 }
 0x13f   :  { %v463_v27 = vadd.f32 %v462_v20, %v1604_v40  ;;  %v475_v20 = vmul.f32 %v1234_v50, %v474_v61 }
 0x141   :  { %v464_v44 = vadd.f32 %v463_v27, %v1609_v48  ;;  %v476_v17 = vadd.f32 %v1234_v50, %v475_v20 }
 0x143   :  { %v465_v36 = vadd.f32 %v464_v44, %v1612_v31  ;;  %v1616_v60 = vsel %vm477_vm0, %v1234_v50, %v476_v17 }
 0x145   :  { %v466_v52 = vrot.slane %v465_v36, 4 }
 0x147   :  { %v467_v49 = vadd.f32 %v466_v52, %v465_v36 }
 0x149   :  { %v468_v57 = vrot.slane %v467_v49, 2 }
 0x14b   :  { %v469_v8 = vadd.f32 %v468_v57, %v467_v49 }
 0x14d   :  { %v470_v40 = vrot.slane %v469_v8, 1 }
 0x14f   :  { %v471_v13 = vadd.f32 %v470_v40, %v469_v8 }
 0x151   :  { %v1619_v39 = vmul.f32 %v1616_v60, %v471_v13 }
 0x153   :  { %v480_v27 = vsub.f32 %v1398_v0, %v1619_v39  ;;  %v481_v44 = vsub.f32 %v1393_v62, %v1619_v39  ;;  %v482_v36 = vsub.f32 %v1401_v1, %v1619_v39  ;;  %v483_v49 = vsub.f32 %v1406_v4, %v1619_v39 }
 0x154   :  { %v484_v40 = vsub.f32 %v1410_v7, %v1619_v39  ;;  %v485_v54 = vsub.f32 %v1416_v10, %v1619_v39  ;;  %v486_v8 = vsub.f32 %v1420_v12, %v1619_v39  ;;  %v488_v7 = vsub.f32 %v1430_v19, %v1619_v39 }
 0x155   :  { %v529_v47 = vmul.f32 %v480_v27, %v480_v27  ;;  %v530_v52 = vmul.f32 %v481_v44, %v481_v44  ;;  %v531_v50 = vmul.f32 %v482_v36, %v482_v36  ;;  %v532_v57 = vmul.f32 %v483_v49, %v483_v49 }
 0x156   :  { %v533_v20 = vmul.f32 %v484_v40, %v484_v40  ;;  %v487_v27 = vsub.f32 %v1426_v15, %v1619_v39  ;;  %v534_v44 = vmul.f32 %v485_v54, %v485_v54  ;;  %v535_v36 = vmul.f32 %v486_v8, %v486_v8 }
 0x157   :  { %v578_v13 = vadd.f32 %v530_v52, %v529_v47  ;;  %v489_v52 = vsub.f32 %v1436_v22, %v1619_v39  ;;  %v537_v40 = vmul.f32 %v488_v7, %v488_v7 }
 0x158   :  { %v536_v49 = vmul.f32 %v487_v27, %v487_v27 }
 0x159   :  { %v579_v61 = vadd.f32 %v578_v13, %v531_v50  ;;  %v490_v13 = vsub.f32 %v1440_v24, %v1619_v39  ;;  %v538_v54 = vmul.f32 %v489_v52, %v489_v52 }
 0x15b   :  { %v580_v17 = vadd.f32 %v579_v61, %v532_v57  ;;  %v491_v61 = vsub.f32 %v1445_v29, %v1619_v39  ;;  %v539_v8 = vmul.f32 %v490_v13, %v490_v13 }
 0x15d   :  { %v581_v4 = vadd.f32 %v580_v17, %v533_v20  ;;  %v492_v17 = vsub.f32 %v1450_v32, %v1619_v39  ;;  %v540_v27 = vmul.f32 %v491_v61, %v491_v61 }
 0x15f   :  { %v582_v47 = vadd.f32 %v581_v4, %v534_v44  ;;  %v493_v44 = vsub.f32 %v1454_v34, %v1619_v39  ;;  %v541_v7 = vmul.f32 %v492_v17, %v492_v17 }
 0x161   :  { %v583_v50 = vadd.f32 %v582_v47, %v535_v36  ;;  %v494_v47 = vsub.f32 %v1458_v37, %v1619_v39  ;;  %v542_v52 = vmul.f32 %v493_v44, %v493_v44 }
 0x163   :  { %v584_v57 = vadd.f32 %v583_v50, %v536_v49  ;;  %v495_v50 = vsub.f32 %v1462_v43, %v1619_v39  ;;  %v543_v13 = vmul.f32 %v494_v47, %v494_v47 }
 0x165   :  { %v585_v20 = vadd.f32 %v584_v57, %v537_v40  ;;  %v496_v57 = vsub.f32 %v1468_v51, %v1619_v39  ;;  %v544_v61 = vmul.f32 %v495_v50, %v495_v50 }
 0x167   :  { %v586_v4 = vadd.f32 %v585_v20, %v538_v54  ;;  %v497_v20 = vsub.f32 %v1472_v59, %v1619_v39  ;;  %v545_v17 = vmul.f32 %v496_v57, %v496_v57 }
 0x169   :  { %v587_v36 = vadd.f32 %v586_v4, %v539_v8  ;;  %v498_v4 = vsub.f32 %v1476_v3, %v1619_v39  ;;  %v546_v44 = vmul.f32 %v497_v20, %v497_v20 }
 0x16b   :  { %v588_v49 = vadd.f32 %v587_v36, %v540_v27  ;;  %v499_v36 = vsub.f32 %v1480_v5, %v1619_v39  ;;  %v547_v47 = vmul.f32 %v498_v4, %v498_v4 }
 0x16d   :  { %v589_v40 = vadd.f32 %v588_v49, %v541_v7  ;;  %v500_v49 = vsub.f32 %v1484_v9, %v1619_v39  ;;  %v548_v50 = vmul.f32 %v499_v36, %v499_v36 }
 0x16f   :  { %v590_v54 = vadd.f32 %v589_v40, %v542_v52  ;;  %v501_v40 = vsub.f32 %v1488_v14, %v1619_v39  ;;  %v549_v57 = vmul.f32 %v500_v49, %v500_v49 }
 0x171   :  { %v591_v8 = vadd.f32 %v590_v54, %v543_v13  ;;  %v502_v54 = vsub.f32 %v1493_v2, %v1619_v39  ;;  %v550_v20 = vmul.f32 %v501_v40, %v501_v40 }
 0x173   :  { %v592_v27 = vadd.f32 %v591_v8, %v544_v61  ;;  %v503_v8 = vsub.f32 %v1497_v23, %v1619_v39  ;;  %v551_v4 = vmul.f32 %v502_v54, %v502_v54 }
 0x175   :  { %v593_v7 = vadd.f32 %v592_v27, %v545_v17  ;;  %v504_v27 = vsub.f32 %v1501_v25, %v1619_v39  ;;  %v552_v36 = vmul.f32 %v503_v8, %v503_v8 }
 0x177   :  { %v594_v52 = vadd.f32 %v593_v7, %v546_v44  ;;  %v505_v7 = vsub.f32 %v1506_v28, %v1619_v39  ;;  %v553_v49 = vmul.f32 %v504_v27, %v504_v27 }
 0x179   :  { %v595_v13 = vadd.f32 %v594_v52, %v547_v47  ;;  %v506_v52 = vsub.f32 %v1511_v35, %v1619_v39  ;;  %v554_v40 = vmul.f32 %v505_v7, %v505_v7 }
 0x17b   :  { %v596_v61 = vadd.f32 %v595_v13, %v548_v50  ;;  %v507_v13 = vsub.f32 %v1516_v46, %v1619_v39  ;;  %v555_v54 = vmul.f32 %v506_v52, %v506_v52 }
 0x17d   :  { %v597_v17 = vadd.f32 %v596_v61, %v549_v57  ;;  %v508_v61 = vsub.f32 %v1521_v41, %v1619_v39  ;;  %v556_v8 = vmul.f32 %v507_v13, %v507_v13 }
 0x17f   :  { %v598_v44 = vadd.f32 %v597_v17, %v550_v20  ;;  %v509_v17 = vsub.f32 %v1526_v42, %v1619_v39  ;;  %v557_v27 = vmul.f32 %v508_v61, %v508_v61 }
 0x181   :  { %v599_v47 = vadd.f32 %v598_v44, %v551_v4  ;;  %v510_v44 = vsub.f32 %v1531_v45, %v1619_v39  ;;  %v558_v7 = vmul.f32 %v509_v17, %v509_v17 }
 0x183   :  { %v600_v50 = vadd.f32 %v599_v47, %v552_v36  ;;  %v511_v47 = vsub.f32 %v1536_v11, %v1619_v39  ;;  %v559_v52 = vmul.f32 %v510_v44, %v510_v44 }
 0x185   :  { %v601_v57 = vadd.f32 %v600_v50, %v553_v49  ;;  %v512_v50 = vsub.f32 %v1540_v16, %v1619_v39  ;;  %v560_v13 = vmul.f32 %v511_v47, %v511_v47 }
 0x187   :  { %v602_v20 = vadd.f32 %v601_v57, %v554_v40  ;;  %v513_v57 = vsub.f32 %v1544_v18, %v1619_v39  ;;  %v561_v61 = vmul.f32 %v512_v50, %v512_v50 }
 0x189   :  { %v603_v4 = vadd.f32 %v602_v20, %v555_v54  ;;  %v514_v20 = vsub.f32 %v1548_v21, %v1619_v39  ;;  %v562_v17 = vmul.f32 %v513_v57, %v513_v57 }
 0x18b   :  { %v604_v36 = vadd.f32 %v603_v4, %v556_v8  ;;  %v515_v4 = vsub.f32 %v1553_v30, %v1619_v39  ;;  %v563_v44 = vmul.f32 %v514_v20, %v514_v20 }
 0x18d   :  { %v605_v49 = vadd.f32 %v604_v36, %v557_v27  ;;  %v516_v36 = vsub.f32 %v1557_v38, %v1619_v39  ;;  %v564_v47 = vmul.f32 %v515_v4, %v515_v4 }
 0x18f   :  { %v606_v40 = vadd.f32 %v605_v49, %v558_v7  ;;  %v517_v49 = vsub.f32 %v1561_v55, %v1619_v39  ;;  %v565_v50 = vmul.f32 %v516_v36, %v516_v36 }
 0x191   :  { %v607_v54 = vadd.f32 %v606_v40, %v559_v52  ;;  %v518_v40 = vsub.f32 %v1565_v53, %v1619_v39  ;;  %v566_v57 = vmul.f32 %v517_v49, %v517_v49 }
 0x193   :  { %v608_v8 = vadd.f32 %v607_v54, %v560_v13  ;;  %v519_v54 = vsub.f32 %v1570_v33, %v1619_v39  ;;  %v567_v20 = vmul.f32 %v518_v40, %v518_v40 }
 0x195   :  { %v609_v27 = vadd.f32 %v608_v8, %v561_v61  ;;  %v520_v8 = vsub.f32 %v1575_v6, %v1619_v39  ;;  %v568_v4 = vmul.f32 %v519_v54, %v519_v54 }
 0x197   :  { %v610_v7 = vadd.f32 %v609_v27, %v562_v17  ;;  %v521_v27 = vsub.f32 %v1580_v58, %v1619_v39  ;;  %v569_v36 = vmul.f32 %v520_v8, %v520_v8 }
 0x199   :  { %v611_v52 = vadd.f32 %v610_v7, %v563_v44  ;;  %v522_v7 = vsub.f32 %v1585_v56, %v1619_v39  ;;  %v570_v49 = vmul.f32 %v521_v27, %v521_v27 }
 0x19b   :  { %v612_v13 = vadd.f32 %v611_v52, %v564_v47  ;;  %v523_v52 = vsub.f32 %v1590_v63, %v1619_v39  ;;  %v571_v40 = vmul.f32 %v522_v7, %v522_v7 }
 0x19d   :  { %v613_v61 = vadd.f32 %v612_v13, %v565_v50  ;;  %v524_v13 = vsub.f32 %v1595_v26, %v1619_v39  ;;  %v572_v54 = vmul.f32 %v523_v52, %v523_v52 }
 0x19f   :  { %v614_v17 = vadd.f32 %v613_v61, %v566_v57  ;;  %v2041_v61 = vld [vmem:[#allocation8_spill] sm:$0xff]  ;;  %v573_v8 = vmul.f32 %v524_v13, %v524_v13 }
 0x1a0   :  { %v525_v58 = vsub.f32 %v2041_v61, %v1619_v39 }
 0x1a1   :  { %v615_v44 = vadd.f32 %v614_v17, %v567_v20  ;;  %v2042_v17 = vld [vmem:[#allocation9_spill] sm:$0xff] }
 0x1a2   :  { %v526_v56 = vsub.f32 %v2042_v17, %v1619_v39  ;;  %v574_v27 = vmul.f32 %v525_v58, %v525_v58 }
 0x1a3   :  { %v616_v47 = vadd.f32 %v615_v44, %v568_v4  ;;  %v527_v44 = vsub.f32 %v1609_v48, %v1619_v39 }
 0x1a4   :  { %v575_v7 = vmul.f32 %v526_v56, %v526_v56 }
 0x1a5   :  { %v617_v50 = vadd.f32 %v616_v47, %v569_v36  ;;  %v528_v47 = vsub.f32 %v1612_v31, %v1619_v39 }
 0x1a7   :  { %v618_v57 = vadd.f32 %v617_v50, %v570_v49  ;;  %v576_v50 = vmul.f32 %v527_v44, %v527_v44  ;;  %v577_v61 = vmul.f32 %v528_v47, %v528_v47 }
 0x1a9   :  { %v619_v20 = vadd.f32 %v618_v57, %v571_v40 }
 0x1ab   :  { %v620_v4 = vadd.f32 %v619_v20, %v572_v54 }
 0x1ad   :  { %v621_v36 = vadd.f32 %v620_v4, %v573_v8 }
 0x1af   :  { %v622_v49 = vadd.f32 %v621_v36, %v574_v27 }
 0x1b1   :  { %v623_v26 = vadd.f32 %v622_v49, %v575_v7  ;;  %v2043_v49 = vld [vmem:[#allocation2_spill] sm:$0xff] }
 0x1b3   :  { %v624_v52 = vadd.f32 %v623_v26, %v576_v50  ;;  %v633_v26 = vld [vmem:[%s2016_s3] sm:$0x1] }
 0x1b5   :  { %v625_v40 = vadd.f32 %v624_v52, %v577_v61  ;;  %v2044_v52 = vld [vmem:[#allocation3_spill] sm:$0xff] }
 0x1b7   :  { %v626_v57 = vrot.slane %v625_v40, 4 }
 0x1b9   :  { %v627_v63 = vadd.f32 %v626_v57, %v625_v40 }
 0x1bb   :  { %v628_v17 = vrot.slane %v627_v63, 2 }
 0x1bd   :  { %v629_v13 = vadd.f32 %v628_v17, %v627_v63 }
 0x1bf   :  { %v630_v54 = vrot.slane %v629_v13, 1 }
 0x1c1   :  { %v631_v20 = vadd.f32 %v630_v54, %v629_v13 }
 0x1c3   :  { %v632_v48 = vmul.f32 %v631_v20, %v1616_v60 }
 0x1c5   :  { %v634_v58 = vadd.f32 1e-05, %v632_v48  ;;  %v646_v48 = vld [vmem:[%s2017_s4] sm:$0x1] }
 0x1c7   :  { %1235 = vrsqrt.f32 %v634_v58  ;;  %vm641_vm2 = vweird.f32 %v634_v58 }
 0x1cd   :  { %v1236_v8 = vpop.eup %1235 }
 0x1ce   :  { %v636_v4 = vmul.f32 %v1236_v8, %v634_v58  ;;  %vm642_vm1 = vweird.f32 %v1236_v8 }
 0x1cf   :  { %vm643_vm3 = vmor %vm641_vm2, %vm642_vm1 }
 0x1d0   :  { %v637_v31 = vmul.f32 %v1236_v8, %v636_v4 }
 0x1d2   :  { %v638_v56 = vmul.f32 0.5, %v637_v31 }
 0x1d4   :  { %v639_v27 = vsub.f32 1.5, %v638_v56 }
 0x1d6   :  { %v640_v44 = vmul.f32 %v1236_v8, %v639_v27 }
 0x1d8   :  { %v644_v63 = vsel %vm643_vm3, %v1236_v8, %v640_v44 }
 0x1d9   :  { %v645_v61 = vmul.f32 %v644_v63, %v633_v26  ;;  %v2052_v63 = vld [vmem:[#allocation11_spill] sm:$0xff] }
 0x1db   :  { %v647_v17 = vmul.f32 %v645_v61, %v1619_v39  ;;  %v650_v60 = vperm.slane %v645_v61, 0 }
 0x1dd   :  { %v648_v36 = vsub.f32 %v646_v48, %v647_v17  ;;  %v652_v31 = vmul.f32 %v650_v60, %v1398_v0  ;;  %v653_v47 = vmul.f32 %v650_v60, %v1393_v62  ;;  %v654_v7 = vmul.f32 %v650_v60, %v1401_v1 }
 0x1de   :  { %v655_v50 = vmul.f32 %v650_v60, %v2043_v49  ;;  %v656_v40 = vmul.f32 %v650_v60, %v2044_v52  ;;  %v657_v57 = vmul.f32 %v650_v60, %v1416_v10  ;;  %v658_v39 = vmul.f32 %v650_v60, %v1420_v12 }
 0x1df   :  { %v659_v13 = vmul.f32 %v650_v60, %v1426_v15  ;;  %v660_v54 = vmul.f32 %v650_v60, %v1430_v19  ;;  %v661_v20 = vmul.f32 %v650_v60, %v1436_v22  ;;  %v662_v0 = vmul.f32 %v650_v60, %v1440_v24 }
 0x1e0   :  { %v663_v62 = vmul.f32 %v650_v60, %v1445_v29  ;;  %v664_v1 = vmul.f32 %v650_v60, %v1450_v32  ;;  %v665_v58 = vmul.f32 %v650_v60, %v1454_v34  ;;  %v666_v8 = vmul.f32 %v650_v60, %v1458_v37 }
 0x1e1   :  { %v667_v10 = vmul.f32 %v650_v60, %v1462_v43  ;;  %v668_v12 = vmul.f32 %v650_v60, %v1468_v51  ;;  %v669_v15 = vmul.f32 %v650_v60, %v1472_v59  ;;  %v670_v19 = vmul.f32 %v650_v60, %v1476_v3 }
 0x1e2   :  { %v671_v22 = vmul.f32 %v650_v60, %v1480_v5  ;;  %v672_v24 = vmul.f32 %v650_v60, %v1484_v9  ;;  %v673_v29 = vmul.f32 %v650_v60, %v1488_v14  ;;  %v674_v32 = vmul.f32 %v650_v60, %v1493_v2 }
 0x1e3   :  { %v675_v34 = vmul.f32 %v650_v60, %v1497_v23  ;;  %v676_v37 = vmul.f32 %v650_v60, %v1501_v25  ;;  %v677_v43 = vmul.f32 %v650_v60, %v1506_v28  ;;  %v678_v51 = vmul.f32 %v650_v60, %v1511_v35 }
 0x1e4   :  { %v679_v59 = vmul.f32 %v650_v60, %v1516_v46  ;;  %v680_v3 = vmul.f32 %v650_v60, %v1521_v41  ;;  %v681_v5 = vmul.f32 %v650_v60, %v1526_v42  ;;  %v682_v9 = vmul.f32 %v650_v60, %v1531_v45 }
 0x1e5   :  { %v683_v14 = vmul.f32 %v650_v60, %v1536_v11  ;;  %v684_v2 = vmul.f32 %v650_v60, %v1540_v16  ;;  %v685_v23 = vmul.f32 %v650_v60, %v1544_v18  ;;  %v686_v25 = vmul.f32 %v650_v60, %v1548_v21  ;;  %v2045_v16 = vld [vmem:[#allocation4_spill] sm:$0xff]  ;;  %v2046_v21 = vld [vmem:[#allocation5_spill] sm:$0xff] }
 0x1e6   :  { %v687_v28 = vmul.f32 %v650_v60, %v1553_v30  ;;  %v1764_v35 = vmul.f32 %v650_v60, %v1557_v38  ;;  %v1766_v46 = vperm.slane %v648_v36, 0  ;;  %v1769_v41 = vmul.f32 %v650_v60, %v1561_v55  ;;  %v2047_v38 = vld [vmem:[#allocation6_spill] sm:$0xff]  ;;  %v2048_v55 = vld [vmem:[#allocation7_spill] sm:$0xff] }
 0x1e7   :  { %v1772_v42 = vmul.f32 %v650_v60, %v1565_v53  ;;  %v1775_v45 = vmul.f32 %v650_v60, %v1570_v33  ;;  %v1778_v11 = vmul.f32 %v650_v60, %v1575_v6  ;;  %v1781_v18 = vmul.f32 %v650_v60, %v2045_v16  ;;  %v2049_v53 = vld [vmem:[#allocation8_spill] sm:$0xff]  ;;  %v2050_v33 = vld [vmem:[#allocation9_spill] sm:$0xff]  ;;  %v2051_v6 = vld [vmem:[#allocation10_spill] sm:$0xff] }
 0x1e8   :  { %v1784_v30 = vmul.f32 %v650_v60, %v2046_v21  ;;  %v1787_v4 = vmul.f32 %v650_v60, %v2047_v38  ;;  %v1790_v56 = vmul.f32 %v650_v60, %v2048_v55  ;;  %v1793_v27 = vmul.f32 %v650_v60, %v2049_v53 }
 0x1e9   :  { %v1796_v44 = vmul.f32 %v650_v60, %v2050_v33  ;;  %v1799_v26 = vmul.f32 %v650_v60, %v2051_v6  ;;  %v1802_v61 = vmul.f32 %v650_v60, %v2052_v63  ;;  %v704_v17 = vadd.f32 %v1766_v46, %v652_v31 }
 0x1ea   :  { %v705_v48 = vadd.f32 %v1766_v46, %v653_v47  ;;  %v706_v36 = vadd.f32 %v1766_v46, %v654_v7  ;;  %v707_v49 = vadd.f32 %v1766_v46, %v655_v50  ;;  %v708_v52 = vadd.f32 %v1766_v46, %v656_v40 }
 0x1eb   :  { %v709_v16 = vadd.f32 %v1766_v46, %v657_v57  ;;  %v710_v21 = vadd.f32 %v1766_v46, %v658_v39  ;;  %v711_v38 = vadd.f32 %v1766_v46, %v659_v13  ;;  %v712_v55 = vadd.f32 %v1766_v46, %v660_v54 }
 0x1ec   :  { %v713_v60 = vadd.f32 %v1766_v46, %v661_v20  ;;  %v714_v31 = vadd.f32 %v1766_v46, %v662_v0  ;;  %v715_v47 = vadd.f32 %v1766_v46, %v663_v62  ;;  %v716_v7 = vadd.f32 %v1766_v46, %v664_v1 }
 0x1ed   :  { %v717_v50 = vadd.f32 %v1766_v46, %v665_v58  ;;  %v1819_v40 = vadd.f32 %v1766_v46, %v666_v8  ;;  %v719_v57 = vadd.f32 %v1766_v46, %v667_v10  ;;  %v1823_v39 = vadd.f32 %v1766_v46, %v668_v12 }
 0x1ee   :  { %v1826_v13 = vadd.f32 %v1766_v46, %v669_v15  ;;  %v1829_v54 = vadd.f32 %v1766_v46, %v670_v19  ;;  %v1832_v20 = vadd.f32 %v1766_v46, %v671_v22  ;;  %v1835_v0 = vadd.f32 %v1766_v46, %v672_v24 }
 0x1ef   :  { %v1838_v62 = vadd.f32 %v1766_v46, %v673_v29  ;;  %v1841_v1 = vadd.f32 %v1766_v46, %v674_v32  ;;  %v1844_v58 = vadd.f32 %v1766_v46, %v675_v34  ;;  %v1847_v8 = vadd.f32 %v1766_v46, %v676_v37 }
 0x1f0   :  { %v1850_v10 = vadd.f32 %v1766_v46, %v677_v43  ;;  %v1853_v12 = vadd.f32 %v1766_v46, %v678_v51  ;;  %v1856_v15 = vadd.f32 %v1766_v46, %v679_v59  ;;  %v1859_v19 = vadd.f32 %v1766_v46, %v680_v3 }
 0x1f1   :  { %v1862_v22 = vadd.f32 %v1766_v46, %v681_v5  ;;  %v1865_v24 = vadd.f32 %v1766_v46, %v682_v9  ;;  %v1868_v29 = vadd.f32 %v1766_v46, %v683_v14  ;;  %v753_v32 = vmax.f32 %v704_v17, 0.0 }
 0x1f2   :  { %v754_v34 = vmax.f32 %v705_v48, 0.0  ;;  %v755_v37 = vmax.f32 %v706_v36, 0.0  ;;  %v756_v43 = vmax.f32 %v707_v49, 0.0  ;;  %v757_v51 = vmax.f32 %v708_v52, 0.0 }
 0x1f3   :  { %v758_v53 = vmax.f32 %v709_v16, 0.0  ;;  %v759_v59 = vmax.f32 %v710_v21, 0.0  ;;  %v760_v33 = vmax.f32 %v711_v38, 0.0  ;;  %v1871_v3 = vadd.f32 %v1766_v46, %v684_v2 }
 0x1f4   :  { %v1874_v5 = vadd.f32 %v1766_v46, %v685_v23  ;;  %v761_v6 = vmax.f32 %v712_v55, 0.0  ;;  %v762_v9 = vmax.f32 %v713_v60, 0.0  ;;  %v1877_v63 = vadd.f32 %v1766_v46, %v686_v25 }
 0x1f5   :  { %v1880_v14 = vadd.f32 %v1766_v46, %v687_v28  ;;  %v763_v17 = vmax.f32 %v714_v31, 0.0  ;;  %v764_v48 = vmax.f32 %v715_v47, 0.0  ;;  %v765_v36 = vmax.f32 %v716_v7, 0.0 }
 0x1f6   :  { %v766_v49 = vmax.f32 %v717_v50, 0.0  ;;  %v1067_v52 = vpack.c.bf16 %v754_v34, %v753_v32  ;;  %v1072_v16 = vpack.c.bf16 %v756_v43, %v755_v37  ;;  %v767_v2 = vmax.f32 %v1819_v40, 0.0 }
 0x1f7   :  { %v768_v21 = vmax.f32 %v719_v57, 0.0  ;;  %v1077_v38 = vpack.c.bf16 %v758_v53, %v757_v51  ;;  %v1082_v23 = vpack.c.bf16 %v760_v33, %v759_v59  ;;  %v1885_v55 = vadd.f32 %v1766_v46, %v1764_v35 }
 0x1f8   :  { %v769_v25 = vmax.f32 %v1823_v39, 0.0  ;;  %v770_v28 = vmax.f32 %v1826_v13, 0.0  ;;  %1068 = vst [vmem:[%s2018_s5] sm:$0xff] %v1067_v52   ;;  %v1087_v60 = vpack.c.bf16 %v762_v9, %v761_v6  ;;  %v1894_v31 = vadd.f32 %v1766_v46, %v1769_v41 }
 0x1f9   :  { %v771_v47 = vmax.f32 %v1829_v54, 0.0  ;;  %v772_v7 = vmax.f32 %v1832_v20, 0.0  ;;  %1184 = vst [vmem:[%s2018_s5 + $0x8] sm:$0xff] %v1072_v16   ;;  %v1092_v35 = vpack.c.bf16 %v764_v48, %v763_v17  ;;  %v1903_v50 = vadd.f32 %v1766_v46, %v1772_v42 }
 0x1fa   :  { %v773_v40 = vmax.f32 %v1835_v0, 0.0  ;;  %v774_v57 = vmax.f32 %v1838_v62, 0.0  ;;  %1185 = vst [vmem:[%s2018_s5 + $0x10] sm:$0xff] %v1077_v38   ;;  %v1097_v41 = vpack.c.bf16 %v766_v49, %v765_v36  ;;  %v743_v39 = vadd.f32 %v1766_v46, %v1775_v45 }
 0x1fb   :  { %v775_v13 = vmax.f32 %v1841_v1, 0.0  ;;  %v776_v54 = vmax.f32 %v1844_v58, 0.0  ;;  %1186 = vst [vmem:[%s2018_s5 + $0x18] sm:$0xff] %v1082_v23   ;;  %v1102_v42 = vpack.c.bf16 %v768_v21, %v767_v2  ;;  %v744_v20 = vadd.f32 %v1766_v46, %v1778_v11 }
 0x1fc   :  { %v777_v0 = vmax.f32 %v1847_v8, 0.0  ;;  %v778_v62 = vmax.f32 %v1850_v10, 0.0  ;;  %1187 = vst [vmem:[%s2018_s5 + $0x20] sm:$0xff] %v1087_v60   ;;  %v1107_v45 = vpack.c.bf16 %v770_v28, %v769_v25  ;;  %v745_v1 = vadd.f32 %v1766_v46, %v1781_v18 }
 0x1fd   :  { %v779_v58 = vmax.f32 %v1853_v12, 0.0  ;;  %v780_v32 = vmax.f32 %v1856_v15, 0.0  ;;  %1188 = vst [vmem:[%s2018_s5 + $0x28] sm:$0xff] %v1092_v35   ;;  %v1112_v11 = vpack.c.bf16 %v772_v7, %v771_v47  ;;  %v746_v8 = vadd.f32 %v1766_v46, %v1784_v30 }
 0x1fe   :  { %v781_v10 = vmax.f32 %v1859_v19, 0.0  ;;  %v782_v34 = vmax.f32 %v1862_v22, 0.0  ;;  %1189 = vst [vmem:[%s2018_s5 + $0x30] sm:$0xff] %v1097_v41   ;;  %v1117_v18 = vpack.c.bf16 %v774_v57, %v773_v40  ;;  %v747_v12 = vadd.f32 %v1766_v46, %v1787_v4 }
 0x1ff   :  { %v783_v15 = vmax.f32 %v1865_v24, 0.0  ;;  %v784_v37 = vmax.f32 %v1868_v29, 0.0  ;;  %1190 = vst [vmem:[%s2018_s5 + $0x38] sm:$0xff] %v1102_v42   ;;  %v1122_v30 = vpack.c.bf16 %v776_v54, %v775_v13  ;;  %v748_v19 = vadd.f32 %v1766_v46, %v1790_v56 }
 0x200   :  { %v785_v22 = vmax.f32 %v1871_v3, 0.0  ;;  %v786_v43 = vmax.f32 %v1874_v5, 0.0  ;;  %1191 = vst [vmem:[%s2018_s5 + $0x40] sm:$0xff] %v1107_v45   ;;  %v1127_v4 = vpack.c.bf16 %v778_v62, %v777_v0  ;;  %v749_v24 = vadd.f32 %v1766_v46, %v1793_v27 }
 0x201   :  { %v787_v29 = vmax.f32 %v1877_v63, 0.0  ;;  %v788_v51 = vmax.f32 %v1880_v14, 0.0  ;;  %1192 = vst [vmem:[%s2018_s5 + $0x48] sm:$0xff] %v1112_v11   ;;  %v1132_v56 = vpack.c.bf16 %v780_v32, %v779_v58  ;;  %v750_v53 = vadd.f32 %v1766_v46, %v1796_v44 }
 0x202   :  { %v789_v59 = vmax.f32 %v1885_v55, 0.0  ;;  %v790_v33 = vmax.f32 %v1894_v31, 0.0  ;;  %1193 = vst [vmem:[%s2018_s5 + $0x50] sm:$0xff] %v1117_v18   ;;  %v1137_v27 = vpack.c.bf16 %v782_v34, %v781_v10  ;;  %v751_v3 = vadd.f32 %v1766_v46, %v1799_v26 }
 0x203   :  { %v791_v5 = vmax.f32 %v1903_v50, 0.0  ;;  %v792_v6 = vmax.f32 %v743_v39, 0.0  ;;  %1194 = vst [vmem:[%s2018_s5 + $0x58] sm:$0xff] %v1122_v30   ;;  %v1142_v44 = vpack.c.bf16 %v784_v37, %v783_v15  ;;  %v752_v9 = vadd.f32 %v1766_v46, %v1802_v61 }
 0x204   :  { %v793_v63 = vmax.f32 %v744_v20, 0.0  ;;  %v794_v14 = vmax.f32 %v745_v1, 0.0  ;;  %1195 = vst [vmem:[%s2018_s5 + $0x60] sm:$0xff] %v1127_v4   ;;  %v1147_v17 = vpack.c.bf16 %v786_v43, %v785_v22  ;;  %v795_v48 = vmax.f32 %v746_v8, 0.0 }
 0x205   :  { %v796_v26 = vmax.f32 %v747_v12, 0.0  ;;  %1196 = vst [vmem:[%s2018_s5 + $0x68] sm:$0xff] %v1132_v56   ;;  %v1152_v36 = vpack.c.bf16 %v788_v51, %v787_v29  ;;  %v797_v49 = vmax.f32 %v748_v19, 0.0  ;;  %v798_v52 = vmax.f32 %v749_v24, 0.0 }
 0x206   :  { %1197 = vst [vmem:[%s2018_s5 + $0x70] sm:$0xff] %v1137_v27   ;;  %v1157_v46 = vpack.c.bf16 %v790_v33, %v789_v59  ;;  %v799_v61 = vmax.f32 %v750_v53, 0.0  ;;  %v800_v16 = vmax.f32 %v751_v3, 0.0  ;;  %v1162_v2 = vpack.c.bf16 %v792_v6, %v791_v5 }
 0x207   :  { %1198 = vst [vmem:[%s2018_s5 + $0x78] sm:$0xff] %v1142_v44   ;;  %v801_v21 = vmax.f32 %v752_v9, 0.0  ;;  %v1167_v38 = vpack.c.bf16 %v794_v14, %v793_v63  ;;  %v1172_v23 = vpack.c.bf16 %v796_v26, %v795_v48  ;;  %v1177_v55 = vpack.c.bf16 %v798_v52, %v797_v49 }
 0x208   :  { %1199 = vst [vmem:[%s2018_s5 + $0x80] sm:$0xff] %v1147_v17   ;;  %v1182_v25 = vpack.c.bf16 %v800_v16, %v799_v61 }
 0x209   :  { %1200 = vst [vmem:[%s2018_s5 + $0x88] sm:$0xff] %v1152_v36   ;;  %v850_v28 = vpack.c.bf16 %v801_v21, %v801_v21 }
 0x20a   :  { %1201 = vst [vmem:[%s2018_s5 + $0x90] sm:$0xff] %v1157_v46  }
 0x20b   :  { %1202 = vst [vmem:[%s2018_s5 + $0x98] sm:$0xff] %v1162_v2  }
 0x20c   :  { %1203 = vst [vmem:[%s2018_s5 + $0xa0] sm:$0xff] %v1167_v38  }
 0x20d   :  { %1204 = vst [vmem:[%s2018_s5 + $0xa8] sm:$0xff] %v1172_v23  }
 0x20e   :  { %1205 = vst [vmem:[%s2018_s5 + $0xb0] sm:$0xff] %v1177_v55  }
 0x20f   :  { %1206 = vst [vmem:[%s2018_s5 + $0xb8] sm:$0xff] %v1182_v25  }
 0x210   :  { %899 = vst [vmem:[%s2018_s5 + $0xc0] sm:$0xf] %v850_v28 }

// kernel: dcae_forward.9
= control target key start
LH: loop header
LB: loop body
LE: loop exit
PB: predicated region body
PF: predicated region fallthrough
CT: control target
= control target key end

     0   :  { %vm329_vm0 = vcmask 1041408   ;;  %s947_s1 = inlined_call_operand.vmem [shape: bf16[256,128], index: 1, kind: input, shape index: {}]   ;;  %s948_s2 = inlined_call_operand.vmem [shape: f32[1,128], index: 2, kind: input, shape index: {}]   ;;  %s949_s0 = inlined_call_operand.vmem [shape: bf16[98,256], index: 0, kind: input, shape index: {}]   ;;  %s950_s3 = inlined_call_operand.vmem [shape: f32[1,128], index: 3, kind: input, shape index: {}]   ;;  %s951_s4 = inlined_call_operand.vmem [shape: f32[1,128], index: 4, kind: input, shape index: {}]   ;;  %s952_s5 = inlined_call_operand.vmem [shape: bf16[98,128], index: 5, kind: output, shape index: {}]  }
   0x1   :  { %v614_v0 = vld [vmem:[%s947_s1 + $0x38] sm:$0xff]  ;;  %v613_v2 = vld [vmem:[%s947_s1 + $0x30] sm:$0xff]  ;;  %v612_v4 = vld [vmem:[%s947_s1 + $0x28] sm:$0xff] }
   0x2   :  { %v622_v1 = vld [vmem:[%s947_s1 + $0x78] sm:$0xff]  ;;  %232 = vmatpush.bf16.msra.mxu0 %v614_v0  ;;  %v621_v3 = vld [vmem:[%s947_s1 + $0x70] sm:$0xff]  ;;  %658 = vmatpush.bf16.msra.mxu2 %v614_v0  ;;  %v620_v5 = vld [vmem:[%s947_s1 + $0x68] sm:$0xff] }
   0x3   :  { %275 = vmatpush.bf16.msra.mxu1 %v622_v1  ;;  %666 = vmatpush.bf16.msra.mxu3 %v622_v1  ;;  %v611_v6 = vld [vmem:[%s947_s1 + $0x20] sm:$0xff]  ;;  %v610_v8 = vld [vmem:[%s947_s1 + $0x18] sm:$0xff]  ;;  %v609_v10 = vld [vmem:[%s947_s1 + $0x10] sm:$0xff] }
   0x4   :  { %v619_v7 = vld [vmem:[%s947_s1 + $0x60] sm:$0xff]  ;;  %v618_v9 = vld [vmem:[%s947_s1 + $0x58] sm:$0xff]  ;;  %v617_v11 = vld [vmem:[%s947_s1 + $0x50] sm:$0xff] }
   0x5   :  { %v608_v12 = vld [vmem:[%s947_s1 + $0x8] sm:$0xff]  ;;  %v607_v14 = vld [vmem:[%s947_s1] sm:$0xff]  ;;  %v509_v20 = vld [vmem:[%s949_s0 + $0x30] sm:$0xf] }
   0x6   :  { %233 = vmatpush.bf16.msra.mxu0 %v613_v2  ;;  %659 = vmatpush.bf16.msra.mxu2 %v613_v2  ;;  %v616_v13 = vld [vmem:[%s947_s1 + $0x48] sm:$0xff]  ;;  %v615_v15 = vld [vmem:[%s947_s1 + $0x40] sm:$0xff]  ;;  %v602_v21 = vld [vmem:[%s949_s0 + $0x34] sm:$0xf0] }
   0x7   :  { %276 = vmatpush.bf16.msra.mxu1 %v621_v3  ;;  %667 = vmatpush.bf16.msra.mxu3 %v621_v3  ;;  %v485_v16 = vld [vmem:[%s949_s0] sm:$0xf]  ;;  %v596_v17 = vld [vmem:[%s949_s0 + $0x4] sm:$0xf0]  ;;  %v595_v18 = vld [vmem:[%s949_s0 + $0x4] sm:$0xf]  ;;  %v510_v26 = vor.u32 %v602_v21, %v509_v20 }
   0x8   :  { %v487_v19 = vld [vmem:[%s949_s0 + $0x8] sm:$0xf0]  ;;  %v603_v22 = vld [vmem:[%s949_s0 + $0x44] sm:$0xf]  ;;  %v486_v24 = vor.u32 %v596_v17, %v485_v16  ;;  %v493_v28 = vld [vmem:[%s949_s0 + $0x10] sm:$0xf] }
   0x9   :  { %v519_v23 = vld [vmem:[%s949_s0 + $0x48] sm:$0xf0]  ;;  %v490_v25 = vor.u32 %v595_v18, %v487_v19  ;;  %v598_v29 = vld [vmem:[%s949_s0 + $0x14] sm:$0xf0]  ;;  %v597_v30 = vld [vmem:[%s949_s0 + $0x14] sm:$0xf] }
   0xa   :  { %234 = vmatpush.bf16.msra.mxu0 %v612_v4  ;;  %660 = vmatpush.bf16.msra.mxu2 %v612_v4  ;;  %v522_v27 = vor.u32 %v603_v22, %v519_v23  ;;  %v495_v31 = vld [vmem:[%s949_s0 + $0x18] sm:$0xf0]  ;;  %v517_v32 = vld [vmem:[%s949_s0 + $0x40] sm:$0xf]  ;;  %v604_v33 = vld [vmem:[%s949_s0 + $0x44] sm:$0xf0]  ;;  %v494_v36 = vor.u32 %v598_v29, %v493_v28 }
   0xb   :  { %277 = vmatpush.bf16.msra.mxu1 %v620_v5  ;;  %668 = vmatpush.bf16.msra.mxu3 %v620_v5  ;;  %v605_v34 = vld [vmem:[%s949_s0 + $0x54] sm:$0xf]  ;;  %v527_v35 = vld [vmem:[%s949_s0 + $0x58] sm:$0xf0]  ;;  %v498_v37 = vor.u32 %v597_v30, %v495_v31  ;;  %v518_v38 = vor.u32 %v604_v33, %v517_v32  ;;  %v501_v40 = vld [vmem:[%s949_s0 + $0x20] sm:$0xf] }
   0xc   :  { %v530_v39 = vor.u32 %v605_v34, %v527_v35  ;;  %v32_v41 = vld [vmem:[%s949_s0 + $0x60] sm:$0x11]  ;;  %v600_v42 = vld [vmem:[%s949_s0 + $0x24] sm:$0xf0]  ;;  %v503_v44 = vld [vmem:[%s949_s0 + $0x28] sm:$0xf0] }
   0xd   :  { %v599_v43 = vld [vmem:[%s949_s0 + $0x24] sm:$0xf]  ;;  %v107_v45 = vunpack.c.h.b16 %v32_v41  ;;  %v525_v46 = vld [vmem:[%s949_s0 + $0x50] sm:$0xf]  ;;  %v606_v47 = vld [vmem:[%s949_s0 + $0x54] sm:$0xf0]  ;;  %v502_v48 = vor.u32 %v600_v42, %v501_v40  ;;  %v106_v54 = vunpack.c.l.b16 %v32_v41 }
   0xe   :  { %235 = vmatpush.bf16.msra.mxu0 %v611_v6  ;;  %661 = vmatpush.bf16.msra.mxu2 %v611_v6  ;;  %v506_v49 = vor.u32 %v599_v43, %v503_v44  ;;  %v526_v50 = vor.u32 %v606_v47, %v525_v46  ;;  %v601_v52 = vld [vmem:[%s949_s0 + $0x34] sm:$0xf]  ;;  %v511_v53 = vld [vmem:[%s949_s0 + $0x38] sm:$0xf0]  ;;  %v680_v41 = vmov 98.0  }
   0xf   :  { %278 = vmatpush.bf16.msra.mxu1 %v619_v7  ;;  %669 = vmatpush.bf16.msra.mxu3 %v619_v7  ;;  %v121_v51 = vpack.c.b16 %v107_v45, %v107_v45  ;;  %v514_v55 = vor.u32 %v601_v52, %v511_v53  ;;  %v120_v56 = vpack.c.b16 %v106_v54, %v106_v54  ;;  %676 = vrcp.f32 %v680_v41 }
  0x12   :  { %236 = vmatpush.bf16.msra.mxu0 %v610_v8  ;;  %662 = vmatpush.bf16.msra.mxu2 %v610_v8 }
  0x13   :  { %279 = vmatpush.bf16.msra.mxu1 %v618_v9  ;;  %670 = vmatpush.bf16.msra.mxu3 %v618_v9 }
  0x16   :  { %237 = vmatpush.bf16.msra.mxu0 %v609_v10  ;;  %663 = vmatpush.bf16.msra.mxu2 %v609_v10 }
  0x17   :  { %280 = vmatpush.bf16.msra.mxu1 %v617_v11  ;;  %671 = vmatpush.bf16.msra.mxu3 %v617_v11  ;;  %v675_v11 = vld [vmem:[%s948_s2] ss:$0 sm:$0xff] }
  0x1a   :  { %238 = vmatpush.bf16.msra.mxu0 %v608_v12  ;;  %664 = vmatpush.bf16.msra.mxu2 %v608_v12 }
  0x1b   :  { %281 = vmatpush.bf16.msra.mxu1 %v616_v13  ;;  %672 = vmatpush.bf16.msra.mxu3 %v616_v13 }
  0x1e   :  { %239 = vmatpush.bf16.msra.mxu0 %v607_v14  ;;  %665 = vmatpush.bf16.msra.mxu2 %v607_v14 }
  0x1f   :  { %282 = vmatpush.bf16.msra.mxu1 %v615_v15  ;;  %673 = vmatpush.bf16.msra.mxu3 %v615_v15 }
  0x21   :  { %240 = vmatmul.bf16.vlgmr.msra.gmra.mxu0 %v486_v24  ;;  %255 = vmatmul.bf16.vlgmr.msra.gmra.mxu2 %v510_v26 }
  0x22   :  { %283 = vmatmul.bf16.vlgmr.msra.gmra.mxu1 %v490_v25  ;;  %303 = vmatmul.bf16.vlgmr.msra.gmra.mxu3 %v522_v27 }
  0x31   :  { %245 = vmatmul.bf16.gmra.mxu0 %v494_v36  ;;  %260 = vmatmul.bf16.gmra.mxu2 %v518_v38 }
  0x32   :  { %288 = vmatmul.bf16.gmra.mxu1 %v498_v37  ;;  %308 = vmatmul.bf16.gmra.mxu3 %v530_v39 }
  0x41   :  { %250 = vmatmul.bf16.gmra.mxu0 %v502_v48  ;;  %265 = vmatmul.bf16.gmra.mxu2 %v526_v50  ;;  %v677_v50 = vpop.eup %676 }
  0x42   :  { %293 = vmatmul.bf16.gmra.mxu1 %v506_v49  ;;  %313 = vmatmul.bf16.gmra.mxu3 %v121_v51  ;;  %vm343_vm1 = vweird.f32 %v677_v50 }
  0x51   :  { %270 = vmatmul.bf16.gmra.mxu2 %v120_v56 }
  0x52   :  { %298 = vmatmul.bf16.gmra.mxu1 %v514_v55 }
  0x9e   :  { %v241_v57 = vpop.f32.mrf.mxu0 }
  0x9f   :  { %v284_v58 = vpop.f32.mrf.mxu1  ;;  %v242_v16 = vadd.f32 %v675_v11, %v241_v57 }
  0xa1   :  { %v839_v21 = vadd.f32 %v284_v58, %v242_v16  ;;  %v339_v58 = vmul.f32 98.0, %v677_v50 }
  0xa4   :  { %v256_v59 = vpop.f32.mrf.mxu2 }
  0xa5   :  { %v304_v60 = vpop.f32.mrf.mxu3  ;;  %v257_v32 = vadd.f32 %v675_v11, %v256_v59 }
  0xa6   :  { %v243_v61 = vpop.f32.mrf.mxu0 }
  0xa7   :  { %v286_v62 = vpop.f32.mrf.mxu1  ;;  %v244_v12 = vadd.f32 %v675_v11, %v243_v61 }
  0xa9   :  { %v837_v18 = vadd.f32 %v286_v62, %v244_v12 }
  0xab   :  { %v318_v24 = vadd.f32 %v837_v18, %v839_v21 }
  0xac   :  { %v258_v63 = vpop.f32.mrf.mxu2 }
  0xad   :  { %v306_v0 = vpop.f32.mrf.mxu3  ;;  %v259_v37 = vadd.f32 %v675_v11, %v258_v63  ;;  %v340_v63 = vsub.f32 1.0, %v339_v58 }
  0xae   :  { %v246_v1 = vpop.f32.mrf.mxu0 }
  0xaf   :  { %v289_v2 = vpop.f32.mrf.mxu1  ;;  %v247_v17 = vadd.f32 %v675_v11, %v246_v1 }
  0xb1   :  { %v841_v22 = vadd.f32 %v289_v2, %v247_v17  ;;  %v341_v2 = vmul.f32 %v677_v50, %v340_v63 }
  0xb3   :  { %v319_v30 = vadd.f32 %v318_v24, %v841_v22 }
  0xb4   :  { %v261_v3 = vpop.f32.mrf.mxu2 }
  0xb5   :  { %v309_v4 = vpop.f32.mrf.mxu3  ;;  %v262_v38 = vadd.f32 %v675_v11, %v261_v3 }
  0xb6   :  { %v248_v5 = vpop.f32.mrf.mxu0 }
  0xb7   :  { %v291_v6 = vpop.f32.mrf.mxu1  ;;  %v249_v19 = vadd.f32 %v675_v11, %v248_v5  ;;  %v860_v47 = vadd.f32 %v304_v60, %v262_v38  ;;  %v342_v5 = vadd.f32 %v677_v50, %v341_v2 }
  0xb9   :  { %v845_v25 = vadd.f32 %v291_v6, %v249_v19 }
  0xbb   :  { %v320_v33 = vadd.f32 %v319_v30, %v845_v25 }
  0xbc   :  { %v263_v7 = vpop.f32.mrf.mxu2 }
  0xbd   :  { %v311_v8 = vpop.f32.mrf.mxu3  ;;  %v264_v43 = vadd.f32 %v675_v11, %v263_v7 }
  0xbe   :  { %v251_v10 = vpop.f32.mrf.mxu0 }
  0xbf   :  { %v294_v9 = vpop.f32.mrf.mxu1  ;;  %v252_v23 = vadd.f32 %v675_v11, %v251_v10  ;;  %v863_v51 = vadd.f32 %v306_v0, %v264_v43 }
  0xc1   :  { %v848_v31 = vadd.f32 %v294_v9, %v252_v23  ;;  %v344_v9 = vsel %vm343_vm1, %v677_v50, %v342_v5 }
  0xc3   :  { %v321_v35 = vadd.f32 %v320_v33, %v848_v31 }
  0xc4   :  { %v266_v13 = vpop.f32.mrf.mxu2 }
  0xc5   :  { %v314_v14 = vpop.f32.mrf.mxu3  ;;  %v267_v48 = vadd.f32 %v675_v11, %v266_v13 }
  0xc6   :  { %v253_v20 = vpop.f32.mrf.mxu0 }
  0xc7   :  { %v296_v15 = vpop.f32.mrf.mxu1  ;;  %v254_v26 = vadd.f32 %v675_v11, %v253_v20  ;;  %v868_v55 = vadd.f32 %v309_v4, %v267_v48 }
  0xc9   :  { %v851_v34 = vadd.f32 %v296_v15, %v254_v26 }
  0xcb   :  { %v322_v39 = vadd.f32 %v321_v35, %v851_v34 }
  0xcc   :  { %v268_v27 = vpop.f32.mrf.mxu2 }
  0xcd   :  { %v316_v28 = vpop.f32.mrf.mxu3  ;;  %v269_v52 = vadd.f32 %v675_v11, %v268_v27 }
  0xcf   :  { %v299_v29 = vpop.f32.mrf.mxu1  ;;  %v871_v59 = vadd.f32 %v311_v8, %v269_v52 }
  0xd0   :  { %v854_v36 = vadd.f32 %v299_v29, %v257_v32 }
  0xd2   :  { %v323_v44 = vadd.f32 %v322_v39, %v854_v36 }
  0xd4   :  { %v271_v40 = vpop.f32.mrf.mxu2 }
  0xd5   :  { %v272_v46 = vadd.f32 %v675_v11, %v271_v40 }
  0xd7   :  { %v301_v42 = vpop.f32.mrf.mxu1  ;;  %v866_v54 = vadd.f32 %v314_v14, %v272_v46 }
  0xd8   :  { %v858_v45 = vadd.f32 %v301_v42, %v259_v37 }
  0xd9   :  { %v330_v61 = vsel %vm329_vm0, %v866_v54, 0.0 }
  0xda   :  { %v324_v49 = vadd.f32 %v323_v44, %v858_v45 }
  0xdc   :  { %v325_v53 = vadd.f32 %v324_v49, %v860_v47  ;;  %v273_v57 = vpop.f32.mrf.mxu2 }
  0xde   :  { %v326_v56 = vadd.f32 %v325_v53, %v863_v51 }
  0xe0   :  { %v327_v60 = vadd.f32 %v326_v56, %v868_v55 }
  0xe2   :  { %v328_v62 = vadd.f32 %v327_v60, %v871_v59 }
  0xe4   :  { %v331_v0 = vadd.f32 %v330_v61, %v328_v62 }
  0xe6   :  { %v332_v1 = vrot.slane %v331_v0, 4 }
  0xe8   :  { %v333_v3 = vadd.f32 %v332_v1, %v331_v0 }
  0xea   :  { %v334_v4 = vrot.slane %v333_v3, 2 }
  0xec   :  { %v335_v6 = vadd.f32 %v334_v4, %v333_v3 }
  0xee   :  { %v336_v7 = vrot.slane %v335_v6, 1 }
  0xf0   :  { %v337_v8 = vadd.f32 %v336_v7, %v335_v6 }
  0xf2   :  { %v877_v10 = vmul.f32 %v344_v9, %v337_v8 }
  0xf4   :  { %v346_v11 = vsub.f32 %v839_v21, %v877_v10  ;;  %v347_v12 = vsub.f32 %v837_v18, %v877_v10  ;;  %v348_v13 = vsub.f32 %v841_v22, %v877_v10  ;;  %v349_v16 = vsub.f32 %v845_v25, %v877_v10 }
  0xf5   :  { %v350_v17 = vsub.f32 %v848_v31, %v877_v10  ;;  %v351_v23 = vsub.f32 %v851_v34, %v877_v10  ;;  %v352_v27 = vsub.f32 %v854_v36, %v877_v10  ;;  %v353_v30 = vsub.f32 %v858_v45, %v877_v10 }
  0xf6   :  { %v359_v14 = vmul.f32 %v346_v11, %v346_v11  ;;  %v360_v15 = vmul.f32 %v347_v12, %v347_v12  ;;  %v361_v19 = vmul.f32 %v348_v13, %v348_v13  ;;  %v362_v24 = vmul.f32 %v349_v16, %v349_v16 }
  0xf7   :  { %v363_v28 = vmul.f32 %v350_v17, %v350_v17  ;;  %v364_v32 = vmul.f32 %v351_v23, %v351_v23  ;;  %v354_v35 = vsub.f32 %v860_v47, %v877_v10  ;;  %v365_v37 = vmul.f32 %v352_v27, %v352_v27 }
  0xf8   :  { %v372_v20 = vadd.f32 %v360_v15, %v359_v14  ;;  %v355_v39 = vsub.f32 %v863_v51, %v877_v10  ;;  %v366_v40 = vmul.f32 %v353_v30, %v353_v30  ;;  %v356_v42 = vsub.f32 %v868_v55, %v877_v10  ;;  %v392_v14 = vld [vmem:[%s950_s3] sm:$0x1] }
  0xf9   :  { %v367_v43 = vmul.f32 %v354_v35, %v354_v35  ;;  %v358_v46 = vsub.f32 %v866_v54, %v877_v10  ;;  %v357_v48 = vsub.f32 %v871_v59, %v877_v10 }
  0xfa   :  { %v373_v26 = vadd.f32 %v372_v20, %v361_v19  ;;  %v368_v49 = vmul.f32 %v355_v39, %v355_v39  ;;  %v369_v52 = vmul.f32 %v356_v42, %v356_v42 }
  0xfb   :  { %v371_v56 = vmul.f32 %v358_v46, %v358_v46  ;;  %v370_v57 = vmul.f32 %v357_v48, %v357_v48 }
  0xfc   :  { %v374_v29 = vadd.f32 %v373_v26, %v362_v24 }
  0xfd   :  { %v383_v61 = vsel %vm329_vm0, %v371_v56, 0.0 }
  0xfe   :  { %v375_v33 = vadd.f32 %v374_v29, %v363_v28 }
 0x100   :  { %v376_v38 = vadd.f32 %v375_v33, %v364_v32 }
 0x102   :  { %v377_v41 = vadd.f32 %v376_v38, %v365_v37 }
 0x104   :  { %v378_v44 = vadd.f32 %v377_v41, %v366_v40 }
 0x106   :  { %v379_v50 = vadd.f32 %v378_v44, %v367_v43 }
 0x108   :  { %v380_v53 = vadd.f32 %v379_v50, %v368_v49 }
 0x10a   :  { %v381_v58 = vadd.f32 %v380_v53, %v369_v52 }
 0x10c   :  { %v382_v60 = vadd.f32 %v381_v58, %v370_v57 }
 0x10e   :  { %v384_v62 = vadd.f32 %v383_v61, %v382_v60 }
 0x110   :  { %v385_v63 = vrot.slane %v384_v62, 4 }
 0x112   :  { %v386_v0 = vadd.f32 %v385_v63, %v384_v62 }
 0x114   :  { %v387_v1 = vrot.slane %v386_v0, 2 }
 0x116   :  { %v388_v2 = vadd.f32 %v387_v1, %v386_v0 }
 0x118   :  { %v389_v3 = vrot.slane %v388_v2, 1 }
 0x11a   :  { %v390_v4 = vadd.f32 %v389_v3, %v388_v2 }
 0x11c   :  { %v391_v5 = vmul.f32 %v390_v4, %v344_v9  ;;  %v405_v9 = vld [vmem:[%s951_s4] sm:$0x1] }
 0x11e   :  { %v393_v6 = vadd.f32 1e-05, %v391_v5 }
 0x120   :  { %678 = vrsqrt.f32 %v393_v6  ;;  %vm400_vm3 = vweird.f32 %v393_v6 }
 0x126   :  { %v679_v7 = vpop.eup %678 }
 0x127   :  { %v395_v8 = vmul.f32 %v679_v7, %v393_v6  ;;  %vm401_vm2 = vweird.f32 %v679_v7 }
 0x128   :  { %vm402_vm4 = vmor %vm400_vm3, %vm401_vm2 }
 0x129   :  { %v396_v11 = vmul.f32 %v679_v7, %v395_v8 }
 0x12b   :  { %v397_v12 = vmul.f32 0.5, %v396_v11 }
 0x12d   :  { %v398_v13 = vsub.f32 1.5, %v397_v12 }
 0x12f   :  { %v399_v15 = vmul.f32 %v679_v7, %v398_v13 }
 0x131   :  { %v403_v16 = vsel %vm402_vm4, %v679_v7, %v399_v15 }
 0x132   :  { %v404_v17 = vmul.f32 %v403_v16, %v392_v14 }
 0x134   :  { %v406_v19 = vmul.f32 %v404_v17, %v877_v10  ;;  %v409_v20 = vperm.slane %v404_v17, 0 }
 0x136   :  { %v407_v23 = vsub.f32 %v405_v9, %v406_v19  ;;  %v411_v24 = vmul.f32 %v409_v20, %v839_v21  ;;  %v412_v26 = vmul.f32 %v409_v20, %v837_v18  ;;  %v413_v27 = vmul.f32 %v409_v20, %v841_v22 }
 0x137   :  { %v414_v28 = vmul.f32 %v409_v20, %v845_v25  ;;  %v415_v29 = vmul.f32 %v409_v20, %v848_v31  ;;  %v416_v30 = vmul.f32 %v409_v20, %v851_v34  ;;  %v417_v32 = vmul.f32 %v409_v20, %v854_v36 }
 0x138   :  { %v418_v33 = vmul.f32 %v409_v20, %v858_v45  ;;  %v419_v10 = vmul.f32 %v409_v20, %v860_v47  ;;  %v425_v35 = vperm.slane %v407_v23, 0  ;;  %v420_v37 = vmul.f32 %v409_v20, %v863_v51 }
 0x139   :  { %v421_v21 = vmul.f32 %v409_v20, %v868_v55  ;;  %v422_v18 = vmul.f32 %v409_v20, %v871_v59  ;;  %v423_v22 = vmul.f32 %v409_v20, %v866_v54 }
 0x13a   :  { %v427_v25 = vadd.f32 %v425_v35, %v411_v24  ;;  %v428_v38 = vadd.f32 %v425_v35, %v412_v26  ;;  %v429_v31 = vadd.f32 %v425_v35, %v413_v27  ;;  %v430_v39 = vadd.f32 %v425_v35, %v414_v28 }
 0x13b   :  { %v431_v34 = vadd.f32 %v425_v35, %v415_v29  ;;  %v432_v40 = vadd.f32 %v425_v35, %v416_v30  ;;  %v433_v36 = vadd.f32 %v425_v35, %v417_v32  ;;  %v434_v41 = vadd.f32 %v425_v35, %v418_v33 }
 0x13c   :  { %v435_v45 = vadd.f32 %v425_v35, %v419_v10  ;;  %v436_v42 = vadd.f32 %v425_v35, %v420_v37  ;;  %v437_v47 = vadd.f32 %v425_v35, %v421_v21  ;;  %v438_v43 = vadd.f32 %v425_v35, %v422_v18 }
 0x13d   :  { %v439_v44 = vadd.f32 %v425_v35, %v423_v22  ;;  %v440_v51 = vmax.f32 %v427_v25, 0.0  ;;  %v441_v46 = vmax.f32 %v428_v38, 0.0  ;;  %v442_v55 = vmax.f32 %v429_v31, 0.0 }
 0x13e   :  { %v443_v48 = vmax.f32 %v430_v39, 0.0  ;;  %v444_v59 = vmax.f32 %v431_v34, 0.0  ;;  %v445_v49 = vmax.f32 %v432_v40, 0.0  ;;  %v446_v54 = vmax.f32 %v433_v36, 0.0 }
 0x13f   :  { %v447_v50 = vmax.f32 %v434_v41, 0.0  ;;  %v448_v52 = vmax.f32 %v435_v45, 0.0  ;;  %v449_v53 = vmax.f32 %v436_v42, 0.0  ;;  %v450_v56 = vmax.f32 %v437_v47, 0.0 }
 0x140   :  { %v451_v57 = vmax.f32 %v438_v43, 0.0  ;;  %v452_v58 = vmax.f32 %v439_v44, 0.0  ;;  %v626_v60 = vpack.c.bf16 %v441_v46, %v440_v51  ;;  %v631_v61 = vpack.c.bf16 %v443_v48, %v442_v55 }
 0x141   :  { %v636_v62 = vpack.c.bf16 %v445_v49, %v444_v59  ;;  %v641_v63 = vpack.c.bf16 %v447_v50, %v446_v54  ;;  %v646_v0 = vpack.c.bf16 %v449_v53, %v448_v52 }
 0x142   :  { %627 = vst [vmem:[%s952_s5] sm:$0xff] %v626_v60   ;;  %v651_v1 = vpack.c.bf16 %v451_v57, %v450_v56  ;;  %v465_v2 = vpack.c.bf16 %v452_v58, %v452_v58 }
 0x143   :  { %653 = vst [vmem:[%s952_s5 + $0x8] sm:$0xff] %v631_v61  }
 0x144   :  { %654 = vst [vmem:[%s952_s5 + $0x10] sm:$0xff] %v636_v62  }
 0x145   :  { %655 = vst [vmem:[%s952_s5 + $0x18] sm:$0xff] %v641_v63  }
 0x146   :  { %656 = vst [vmem:[%s952_s5 + $0x20] sm:$0xff] %v646_v0  }
 0x147   :  { %657 = vst [vmem:[%s952_s5 + $0x28] sm:$0xff] %v651_v1  }
 0x148   :  { %478 = vst [vmem:[%s952_s5 + $0x30] sm:$0x1] %v465_v2 }

// kernel: dcae_forward.10
= control target key start
LH: loop header
LB: loop body
LE: loop exit
PB: predicated region body
PF: predicated region fallthrough
CT: control target
= control target key end

     0   :  { %s897_s1 = inlined_call_operand.vmem [shape: bf16[512,128], index: 1, kind: input, shape index: {}]   ;;  %s898_s2 = inlined_call_operand.vmem [shape: f32[1,128], index: 2, kind: input, shape index: {}]   ;;  %s899_s0 = inlined_call_operand.vmem [shape: bf16[32,512], index: 0, kind: input, shape index: {}]   ;;  %s900_s3 = inlined_call_operand.vmem [shape: f32[1,128], index: 3, kind: input, shape index: {}]   ;;  %s901_s4 = inlined_call_operand.vmem [shape: f32[1,128], index: 4, kind: input, shape index: {}]   ;;  %s902_s5 = inlined_call_operand.vmem [shape: bf16[32,128], index: 5, kind: output, shape index: {}]  }
   0x1   :  { %v660_v0 = vld [vmem:[%s897_s1 + $0x38] sm:$0xff]  ;;  %v659_v4 = vld [vmem:[%s897_s1 + $0x30] sm:$0xff]  ;;  %v658_v8 = vld [vmem:[%s897_s1 + $0x28] sm:$0xff] }
   0x2   :  { %v668_v1 = vld [vmem:[%s897_s1 + $0x78] sm:$0xff]  ;;  %328 = vmatpush.bf16.msra.mxu0 %v660_v0  ;;  %v667_v5 = vld [vmem:[%s897_s1 + $0x70] sm:$0xff]  ;;  %v666_v9 = vld [vmem:[%s897_s1 + $0x68] sm:$0xff] }
   0x3   :  { %v676_v2 = vld [vmem:[%s897_s1 + $0xb8] sm:$0xff]  ;;  %347 = vmatpush.bf16.msra.mxu1 %v668_v1  ;;  %v675_v6 = vld [vmem:[%s897_s1 + $0xb0] sm:$0xff]  ;;  %v674_v10 = vld [vmem:[%s897_s1 + $0xa8] sm:$0xff] }
   0x4   :  { %v684_v3 = vld [vmem:[%s897_s1 + $0xf8] sm:$0xff]  ;;  %366 = vmatpush.bf16.msra.mxu2 %v676_v2  ;;  %v683_v7 = vld [vmem:[%s897_s1 + $0xf0] sm:$0xff]  ;;  %v682_v11 = vld [vmem:[%s897_s1 + $0xe8] sm:$0xff] }
   0x5   :  { %385 = vmatpush.bf16.msra.mxu3 %v684_v3  ;;  %v657_v12 = vld [vmem:[%s897_s1 + $0x20] sm:$0xff]  ;;  %v656_v16 = vld [vmem:[%s897_s1 + $0x18] sm:$0xff]  ;;  %v655_v20 = vld [vmem:[%s897_s1 + $0x10] sm:$0xff] }
   0x6   :  { %329 = vmatpush.bf16.msra.mxu0 %v659_v4  ;;  %v665_v13 = vld [vmem:[%s897_s1 + $0x60] sm:$0xff]  ;;  %v664_v17 = vld [vmem:[%s897_s1 + $0x58] sm:$0xff]  ;;  %v663_v21 = vld [vmem:[%s897_s1 + $0x50] sm:$0xff] }
   0x7   :  { %348 = vmatpush.bf16.msra.mxu1 %v667_v5  ;;  %v673_v14 = vld [vmem:[%s897_s1 + $0xa0] sm:$0xff]  ;;  %v672_v18 = vld [vmem:[%s897_s1 + $0x98] sm:$0xff]  ;;  %v671_v22 = vld [vmem:[%s897_s1 + $0x90] sm:$0xff] }
   0x8   :  { %367 = vmatpush.bf16.msra.mxu2 %v675_v6  ;;  %v681_v15 = vld [vmem:[%s897_s1 + $0xe0] sm:$0xff]  ;;  %v680_v19 = vld [vmem:[%s897_s1 + $0xd8] sm:$0xff]  ;;  %v679_v23 = vld [vmem:[%s897_s1 + $0xd0] sm:$0xff] }
   0x9   :  { %386 = vmatpush.bf16.msra.mxu3 %v683_v7  ;;  %v654_v24 = vld [vmem:[%s897_s1 + $0x8] sm:$0xff]  ;;  %v653_v28 = vld [vmem:[%s897_s1] sm:$0xff]  ;;  %v647_v33 = vld [vmem:[%s899_s0 + $0xc] sm:$0xf0] }
   0xa   :  { %330 = vmatpush.bf16.msra.mxu0 %v658_v8  ;;  %v662_v25 = vld [vmem:[%s897_s1 + $0x48] sm:$0xff]  ;;  %v661_v29 = vld [vmem:[%s897_s1 + $0x40] sm:$0xff]  ;;  %v489_v35 = vld [vmem:[%s899_s0 + $0x10] sm:$0xf0] }
   0xb   :  { %349 = vmatpush.bf16.msra.mxu1 %v666_v9  ;;  %v670_v26 = vld [vmem:[%s897_s1 + $0x88] sm:$0xff]  ;;  %v669_v30 = vld [vmem:[%s897_s1 + $0x80] sm:$0xff]  ;;  %v648_v37 = vld [vmem:[%s899_s0 + $0x14] sm:$0xf0]  ;;  %v702_v9 = vmov 32.0  }
   0xc   :  { %368 = vmatpush.bf16.msra.mxu2 %v674_v10  ;;  %v678_v27 = vld [vmem:[%s897_s1 + $0xc8] sm:$0xff]  ;;  %v677_v31 = vld [vmem:[%s897_s1 + $0xc0] sm:$0xff]  ;;  %v497_v39 = vld [vmem:[%s899_s0 + $0x18] sm:$0xf0]  ;;  %698 = vrcp.f32 %v702_v9 }
   0xd   :  { %387 = vmatpush.bf16.msra.mxu3 %v682_v11  ;;  %v487_v32 = vld [vmem:[%s899_s0] sm:$0xf]  ;;  %v645_v34 = vld [vmem:[%s899_s0 + $0x4] sm:$0xf]  ;;  %v495_v36 = vld [vmem:[%s899_s0 + $0x8] sm:$0xf] }
   0xe   :  { %331 = vmatpush.bf16.msra.mxu0 %v657_v12  ;;  %v646_v38 = vld [vmem:[%s899_s0 + $0xc] sm:$0xf]  ;;  %v488_v40 = vor.u32 %v647_v33, %v487_v32  ;;  %v492_v41 = vor.u32 %v645_v34, %v489_v35  ;;  %v496_v42 = vor.u32 %v648_v37, %v495_v36  ;;  %v503_v44 = vld [vmem:[%s899_s0 + $0x20] sm:$0xf]  ;;  %v651_v45 = vld [vmem:[%s899_s0 + $0x2c] sm:$0xf0] }
   0xf   :  { %350 = vmatpush.bf16.msra.mxu1 %v665_v13  ;;  %v500_v43 = vor.u32 %v646_v38, %v497_v39  ;;  %v649_v46 = vld [vmem:[%s899_s0 + $0x24] sm:$0xf]  ;;  %v505_v47 = vld [vmem:[%s899_s0 + $0x30] sm:$0xf0]  ;;  %v511_v48 = vld [vmem:[%s899_s0 + $0x28] sm:$0xf]  ;;  %v504_v52 = vor.u32 %v651_v45, %v503_v44 }
  0x10   :  { %369 = vmatpush.bf16.msra.mxu2 %v673_v14  ;;  %v652_v49 = vld [vmem:[%s899_s0 + $0x34] sm:$0xf0]  ;;  %v650_v50 = vld [vmem:[%s899_s0 + $0x2c] sm:$0xf]  ;;  %v513_v51 = vld [vmem:[%s899_s0 + $0x38] sm:$0xf0]  ;;  %v508_v53 = vor.u32 %v649_v46, %v505_v47 }
  0x11   :  { %388 = vmatpush.bf16.msra.mxu3 %v681_v15  ;;  %v512_v54 = vor.u32 %v652_v49, %v511_v48  ;;  %v516_v55 = vor.u32 %v650_v50, %v513_v51  ;;  %v697_v62 = vld [vmem:[%s898_s2] ss:$0 sm:$0xff] }
  0x12   :  { %332 = vmatpush.bf16.msra.mxu0 %v656_v16 }
  0x13   :  { %351 = vmatpush.bf16.msra.mxu1 %v664_v17  ;;  %v699_v17 = vpop.eup %698 }
  0x14   :  { %370 = vmatpush.bf16.msra.mxu2 %v672_v18  ;;  %vm418_vm0 = vweird.f32 %v699_v17 }
  0x15   :  { %389 = vmatpush.bf16.msra.mxu3 %v680_v19 }
  0x16   :  { %333 = vmatpush.bf16.msra.mxu0 %v655_v20 }
  0x17   :  { %352 = vmatpush.bf16.msra.mxu1 %v663_v21 }
  0x18   :  { %371 = vmatpush.bf16.msra.mxu2 %v671_v22 }
  0x19   :  { %390 = vmatpush.bf16.msra.mxu3 %v679_v23 }
  0x1a   :  { %334 = vmatpush.bf16.msra.mxu0 %v654_v24  ;;  %v414_v24 = vmul.f32 32.0, %v699_v17 }
  0x1b   :  { %353 = vmatpush.bf16.msra.mxu1 %v662_v25 }
  0x1c   :  { %372 = vmatpush.bf16.msra.mxu2 %v670_v26 }
  0x1d   :  { %391 = vmatpush.bf16.msra.mxu3 %v678_v27 }
  0x1e   :  { %335 = vmatpush.bf16.msra.mxu0 %v653_v28 }
  0x1f   :  { %354 = vmatpush.bf16.msra.mxu1 %v661_v29 }
  0x20   :  { %373 = vmatpush.bf16.msra.mxu2 %v669_v30  ;;  %v415_v30 = vsub.f32 1.0, %v414_v24 }
  0x21   :  { %392 = vmatpush.bf16.msra.mxu3 %v677_v31  ;;  %336 = vmatmul.bf16.vlgmr.msra.gmra.mxu0 %v488_v40 }
  0x22   :  { %355 = vmatmul.bf16.vlgmr.msra.gmra.mxu1 %v492_v41  ;;  %v416_v33 = vmul.f32 %v699_v17, %v415_v30 }
  0x23   :  { %374 = vmatmul.bf16.vlgmr.msra.gmra.mxu2 %v496_v42 }
  0x24   :  { %393 = vmatmul.bf16.vlgmr.msra.gmra.mxu3 %v500_v43  ;;  %v417_v36 = vadd.f32 %v699_v17, %v416_v33 }
  0x26   :  { %v419_v39 = vsel %vm418_vm0, %v699_v17, %v417_v36 }
  0x31   :  { %341 = vmatmul.bf16.gmra.mxu0 %v504_v52 }
  0x32   :  { %360 = vmatmul.bf16.gmra.mxu1 %v508_v53 }
  0x33   :  { %379 = vmatmul.bf16.gmra.mxu2 %v512_v54 }
  0x34   :  { %398 = vmatmul.bf16.gmra.mxu3 %v516_v55 }
  0x9e   :  { %v337_v56 = vpop.f32.mrf.mxu0 }
  0x9f   :  { %v356_v57 = vpop.f32.mrf.mxu1  ;;  %v338_v2 = vadd.f32 %v697_v62, %v337_v56 }
  0xa1   :  { %v357_v6 = vadd.f32 %v356_v57, %v338_v2  ;;  %v439_v2 = vld [vmem:[%s900_s3] sm:$0x1] }
  0xa6   :  { %v375_v58 = vpop.f32.mrf.mxu2  ;;  %v339_v60 = vpop.f32.mrf.mxu0 }
  0xa7   :  { %v394_v59 = vpop.f32.mrf.mxu3  ;;  %v358_v61 = vpop.f32.mrf.mxu1  ;;  %v340_v3 = vadd.f32 %v697_v62, %v339_v60  ;;  %v376_v14 = vadd.f32 %v375_v58, %v357_v6  ;;  %v452_v6 = vld [vmem:[%s901_s4] sm:$0x1] }
  0xa9   :  { %v359_v7 = vadd.f32 %v358_v61, %v340_v3  ;;  %v395_v20 = vadd.f32 %v394_v59, %v376_v14 }
  0xae   :  { %v377_v63 = vpop.f32.mrf.mxu2  ;;  %v342_v1 = vpop.f32.mrf.mxu0 }
  0xaf   :  { %v396_v0 = vpop.f32.mrf.mxu3  ;;  %v343_v4 = vadd.f32 %v697_v62, %v342_v1  ;;  %v361_v5 = vpop.f32.mrf.mxu1  ;;  %v378_v12 = vadd.f32 %v377_v63, %v359_v7 }
  0xb1   :  { %v362_v8 = vadd.f32 %v361_v5, %v343_v4  ;;  %v880_v18 = vadd.f32 %v396_v0, %v378_v12 }
  0xb3   :  { %v404_v25 = vadd.f32 %v880_v18, %v395_v20 }
  0xb6   :  { %v380_v10 = vpop.f32.mrf.mxu2  ;;  %v344_v13 = vpop.f32.mrf.mxu0 }
  0xb7   :  { %v399_v11 = vpop.f32.mrf.mxu3  ;;  %v381_v15 = vadd.f32 %v380_v10, %v362_v8  ;;  %v345_v16 = vadd.f32 %v697_v62, %v344_v13  ;;  %v363_v19 = vpop.f32.mrf.mxu1 }
  0xb9   :  { %v400_v21 = vadd.f32 %v399_v11, %v381_v15  ;;  %v364_v22 = vadd.f32 %v363_v19, %v345_v16 }
  0xbb   :  { %v405_v28 = vadd.f32 %v404_v25, %v400_v21 }
  0xbe   :  { %v382_v23 = vpop.f32.mrf.mxu2 }
  0xbf   :  { %v383_v26 = vadd.f32 %v382_v23, %v364_v22  ;;  %v401_v27 = vpop.f32.mrf.mxu3 }
  0xc1   :  { %v402_v29 = vadd.f32 %v401_v27, %v383_v26 }
  0xc3   :  { %v406_v31 = vadd.f32 %v405_v28, %v402_v29 }
  0xc5   :  { %v407_v32 = vrot.slane %v406_v31, 4 }
  0xc7   :  { %v408_v34 = vadd.f32 %v407_v32, %v406_v31 }
  0xc9   :  { %v409_v35 = vrot.slane %v408_v34, 2 }
  0xcb   :  { %v410_v37 = vadd.f32 %v409_v35, %v408_v34 }
  0xcd   :  { %v411_v38 = vrot.slane %v410_v37, 1 }
  0xcf   :  { %v412_v40 = vadd.f32 %v411_v38, %v410_v37 }
  0xd1   :  { %v420_v41 = vmul.f32 %v419_v39, %v412_v40 }
  0xd3   :  { %v421_v42 = vsub.f32 %v395_v20, %v420_v41  ;;  %v422_v43 = vsub.f32 %v880_v18, %v420_v41  ;;  %v423_v44 = vsub.f32 %v400_v21, %v420_v41  ;;  %v424_v45 = vsub.f32 %v402_v29, %v420_v41 }
  0xd5   :  { %v425_v46 = vmul.f32 %v421_v42, %v421_v42  ;;  %v426_v47 = vmul.f32 %v422_v43, %v422_v43  ;;  %v427_v48 = vmul.f32 %v423_v44, %v423_v44  ;;  %v428_v50 = vmul.f32 %v424_v45, %v424_v45 }
  0xd7   :  { %v429_v49 = vadd.f32 %v426_v47, %v425_v46 }
  0xd9   :  { %v430_v51 = vadd.f32 %v429_v49, %v427_v48 }
  0xdb   :  { %v431_v52 = vadd.f32 %v430_v51, %v428_v50 }
  0xdd   :  { %v432_v53 = vrot.slane %v431_v52, 4 }
  0xdf   :  { %v433_v54 = vadd.f32 %v432_v53, %v431_v52 }
  0xe1   :  { %v434_v55 = vrot.slane %v433_v54, 2 }
  0xe3   :  { %v435_v56 = vadd.f32 %v434_v55, %v433_v54 }
  0xe5   :  { %v436_v57 = vrot.slane %v435_v56, 1 }
  0xe7   :  { %v437_v58 = vadd.f32 %v436_v57, %v435_v56 }
  0xe9   :  { %v438_v59 = vmul.f32 %v437_v58, %v419_v39 }
  0xeb   :  { %v440_v60 = vadd.f32 1e-05, %v438_v59 }
  0xed   :  { %700 = vrsqrt.f32 %v440_v60  ;;  %vm447_vm2 = vweird.f32 %v440_v60 }
  0xf3   :  { %v701_v61 = vpop.eup %700 }
  0xf4   :  { %v442_v62 = vmul.f32 %v701_v61, %v440_v60  ;;  %vm448_vm1 = vweird.f32 %v701_v61 }
  0xf5   :  { %vm449_vm3 = vmor %vm447_vm2, %vm448_vm1 }
  0xf6   :  { %v443_v63 = vmul.f32 %v701_v61, %v442_v62 }
  0xf8   :  { %v444_v0 = vmul.f32 0.5, %v443_v63 }
  0xfa   :  { %v445_v1 = vsub.f32 1.5, %v444_v0 }
  0xfc   :  { %v446_v3 = vmul.f32 %v701_v61, %v445_v1 }
  0xfe   :  { %v450_v4 = vsel %vm449_vm3, %v701_v61, %v446_v3 }
  0xff   :  { %v451_v5 = vmul.f32 %v450_v4, %v439_v2 }
 0x101   :  { %v453_v7 = vmul.f32 %v451_v5, %v420_v41  ;;  %v456_v8 = vperm.slane %v451_v5, 0 }
 0x103   :  { %v454_v9 = vsub.f32 %v452_v6, %v453_v7  ;;  %v458_v10 = vmul.f32 %v456_v8, %v395_v20  ;;  %v459_v11 = vmul.f32 %v456_v8, %v880_v18  ;;  %v460_v12 = vmul.f32 %v456_v8, %v400_v21 }
 0x104   :  { %v461_v13 = vmul.f32 %v456_v8, %v402_v29 }
 0x105   :  { %v463_v14 = vperm.slane %v454_v9, 0 }
 0x107   :  { %v465_v15 = vadd.f32 %v463_v14, %v458_v10  ;;  %v466_v16 = vadd.f32 %v463_v14, %v459_v11  ;;  %v467_v17 = vadd.f32 %v463_v14, %v460_v12  ;;  %v468_v19 = vadd.f32 %v463_v14, %v461_v13 }
 0x109   :  { %v469_v22 = vmax.f32 %v465_v15, 0.0  ;;  %v470_v23 = vmax.f32 %v466_v16, 0.0  ;;  %v471_v24 = vmax.f32 %v467_v17, 0.0  ;;  %v472_v25 = vmax.f32 %v468_v19, 0.0 }
 0x10b   :  { %v688_v26 = vpack.c.bf16 %v470_v23, %v469_v22  ;;  %v693_v27 = vpack.c.bf16 %v472_v25, %v471_v24 }
 0x10d   :  { %689 = vst [vmem:[%s902_s5] sm:$0xff] %v688_v26  }
 0x10e   :  { %695 = vst [vmem:[%s902_s5 + $0x8] sm:$0xff] %v693_v27  }

// kernel: dcae_forward.11
= control target key start
LH: loop header
LB: loop body
LE: loop exit
PB: predicated region body
PF: predicated region fallthrough
CT: control target
= control target key end

     0   :  { %s1333_s0 = inlined_call_operand.vmem [shape: bf16[2,512], index: 0, kind: input, shape index: {}]   ;;  %s1334_s1 = inlined_call_operand.vmem [shape: bf16[512,256], index: 1, kind: input, shape index: {}]   ;;  %s1335_s2 = inlined_call_operand.vmem [shape: f32[1,256], index: 2, kind: input, shape index: {}]   ;;  %s1336_s3 = inlined_call_operand.vmem [shape: f32[2,128], index: 3, kind: input, shape index: {}]   ;;  %s1337_s4 = inlined_call_operand.hbm [shape: f32[2,128], index: 4, kind: output, shape index: {}]  }
   0x1   :  { %v604_v0 = vld [vmem:[%s1334_s1 + $0x70] sm:$0xf]  ;;  %v817_v1 = vld [vmem:[%s1334_s1 + $0x74] sm:$0xf0]  ;;  %v596_v11 = vld [vmem:[%s1334_s1 + $0x60] sm:$0xf] }
   0x2   :  { %v668_v2 = vld [vmem:[%s1334_s1 + $0xf0] sm:$0xf]  ;;  %v605_v3 = vor.u32 %v817_v1, %v604_v0  ;;  %v833_v4 = vld [vmem:[%s1334_s1 + $0xf4] sm:$0xf0]  ;;  %v815_v13 = vld [vmem:[%s1334_s1 + $0x64] sm:$0xf0] }
   0x3   :  { %v732_v5 = vld [vmem:[%s1334_s1 + $0x170] sm:$0xf]  ;;  %v849_v6 = vld [vmem:[%s1334_s1 + $0x174] sm:$0xf0]  ;;  %v669_v7 = vor.u32 %v833_v4, %v668_v2  ;;  %v660_v14 = vld [vmem:[%s1334_s1 + $0xe0] sm:$0xf]  ;;  %v597_v16 = vor.u32 %v815_v13, %v596_v11 }
   0x4   :  { %v733_v8 = vor.u32 %v849_v6, %v732_v5  ;;  %v796_v9 = vld [vmem:[%s1334_s1 + $0x1f0] sm:$0xf]  ;;  %v865_v10 = vld [vmem:[%s1334_s1 + $0x1f4] sm:$0xf0]  ;;  %419 = vmatpush.bf16.msra.mxu0 %v605_v3  ;;  %v831_v15 = vld [vmem:[%s1334_s1 + $0xe4] sm:$0xf0] }
   0x5   :  { %v797_v12 = vor.u32 %v865_v10, %v796_v9  ;;  %432 = vmatpush.bf16.msra.mxu1 %v669_v7  ;;  %v661_v17 = vor.u32 %v831_v15, %v660_v14  ;;  %v724_v18 = vld [vmem:[%s1334_s1 + $0x160] sm:$0xf]  ;;  %v847_v19 = vld [vmem:[%s1334_s1 + $0x164] sm:$0xf0]  ;;  %v588_v23 = vld [vmem:[%s1334_s1 + $0x50] sm:$0xf] }
   0x6   :  { %445 = vmatpush.bf16.msra.mxu2 %v733_v8  ;;  %v788_v20 = vld [vmem:[%s1334_s1 + $0x1e0] sm:$0xf]  ;;  %v725_v21 = vor.u32 %v847_v19, %v724_v18  ;;  %v863_v22 = vld [vmem:[%s1334_s1 + $0x1e4] sm:$0xf0]  ;;  %v813_v24 = vld [vmem:[%s1334_s1 + $0x54] sm:$0xf0] }
   0x7   :  { %458 = vmatpush.bf16.msra.mxu3 %v797_v12  ;;  %v789_v25 = vor.u32 %v863_v22, %v788_v20  ;;  %v652_v26 = vld [vmem:[%s1334_s1 + $0xd0] sm:$0xf]  ;;  %v829_v27 = vld [vmem:[%s1334_s1 + $0xd4] sm:$0xf0]  ;;  %v589_v29 = vor.u32 %v813_v24, %v588_v23  ;;  %v580_v35 = vld [vmem:[%s1334_s1 + $0x40] sm:$0xf] }
   0x8   :  { %v716_v28 = vld [vmem:[%s1334_s1 + $0x150] sm:$0xf]  ;;  %420 = vmatpush.bf16.msra.mxu0 %v597_v16  ;;  %v845_v30 = vld [vmem:[%s1334_s1 + $0x154] sm:$0xf0]  ;;  %v653_v33 = vor.u32 %v829_v27, %v652_v26  ;;  %v811_v36 = vld [vmem:[%s1334_s1 + $0x44] sm:$0xf0] }
   0x9   :  { %v780_v31 = vld [vmem:[%s1334_s1 + $0x1d0] sm:$0xf]  ;;  %v861_v32 = vld [vmem:[%s1334_s1 + $0x1d4] sm:$0xf0]  ;;  %433 = vmatpush.bf16.msra.mxu1 %v661_v17  ;;  %v717_v34 = vor.u32 %v845_v30, %v716_v28  ;;  %v644_v37 = vld [vmem:[%s1334_s1 + $0xc0] sm:$0xf]  ;;  %v581_v44 = vor.u32 %v811_v36, %v580_v35 }
   0xa   :  { %446 = vmatpush.bf16.msra.mxu2 %v725_v21  ;;  %v781_v38 = vor.u32 %v861_v32, %v780_v31  ;;  %v827_v39 = vld [vmem:[%s1334_s1 + $0xc4] sm:$0xf0]  ;;  %v708_v40 = vld [vmem:[%s1334_s1 + $0x140] sm:$0xf]  ;;  %v572_v47 = vld [vmem:[%s1334_s1 + $0x30] sm:$0xf] }
   0xb   :  { %459 = vmatpush.bf16.msra.mxu3 %v789_v25  ;;  %v843_v41 = vld [vmem:[%s1334_s1 + $0x144] sm:$0xf0]  ;;  %v772_v42 = vld [vmem:[%s1334_s1 + $0x1c0] sm:$0xf]  ;;  %v645_v45 = vor.u32 %v827_v39, %v644_v37  ;;  %v809_v48 = vld [vmem:[%s1334_s1 + $0x34] sm:$0xf0] }
   0xc   :  { %v859_v43 = vld [vmem:[%s1334_s1 + $0x1c4] sm:$0xf0]  ;;  %421 = vmatpush.bf16.msra.mxu0 %v589_v29  ;;  %v709_v46 = vor.u32 %v843_v41, %v708_v40  ;;  %v636_v49 = vld [vmem:[%s1334_s1 + $0xb0] sm:$0xf]  ;;  %v825_v51 = vld [vmem:[%s1334_s1 + $0xb4] sm:$0xf0]  ;;  %v573_v56 = vor.u32 %v809_v48, %v572_v47 }
   0xd   :  { %434 = vmatpush.bf16.msra.mxu1 %v653_v33  ;;  %v773_v50 = vor.u32 %v859_v43, %v772_v42  ;;  %v700_v52 = vld [vmem:[%s1334_s1 + $0x130] sm:$0xf]  ;;  %v841_v53 = vld [vmem:[%s1334_s1 + $0x134] sm:$0xf0]  ;;  %v637_v57 = vor.u32 %v825_v51, %v636_v49  ;;  %v564_v59 = vld [vmem:[%s1334_s1 + $0x20] sm:$0xf] }
   0xe   :  { %447 = vmatpush.bf16.msra.mxu2 %v717_v34  ;;  %v764_v54 = vld [vmem:[%s1334_s1 + $0x1b0] sm:$0xf]  ;;  %v857_v55 = vld [vmem:[%s1334_s1 + $0x1b4] sm:$0xf0]  ;;  %v701_v58 = vor.u32 %v841_v53, %v700_v52  ;;  %v807_v60 = vld [vmem:[%s1334_s1 + $0x24] sm:$0xf0] }
   0xf   :  { %460 = vmatpush.bf16.msra.mxu3 %v781_v38  ;;  %v628_v61 = vld [vmem:[%s1334_s1 + $0xa0] sm:$0xf]  ;;  %v765_v62 = vor.u32 %v857_v55, %v764_v54  ;;  %v823_v63 = vld [vmem:[%s1334_s1 + $0xa4] sm:$0xf0]  ;;  %v565_v4 = vor.u32 %v807_v60, %v564_v59  ;;  %v556_v7 = vld [vmem:[%s1334_s1 + $0x10] sm:$0xf] }
  0x10   :  { %422 = vmatpush.bf16.msra.mxu0 %v581_v44  ;;  %v692_v0 = vld [vmem:[%s1334_s1 + $0x120] sm:$0xf]  ;;  %v839_v1 = vld [vmem:[%s1334_s1 + $0x124] sm:$0xf0]  ;;  %v629_v5 = vor.u32 %v823_v63, %v628_v61  ;;  %v805_v8 = vld [vmem:[%s1334_s1 + $0x14] sm:$0xf0] }
  0x11   :  { %435 = vmatpush.bf16.msra.mxu1 %v645_v45  ;;  %v756_v2 = vld [vmem:[%s1334_s1 + $0x1a0] sm:$0xf]  ;;  %v855_v3 = vld [vmem:[%s1334_s1 + $0x1a4] sm:$0xf0]  ;;  %v693_v6 = vor.u32 %v839_v1, %v692_v0  ;;  %v620_v9 = vld [vmem:[%s1334_s1 + $0x90] sm:$0xf]  ;;  %v557_v17 = vor.u32 %v805_v8, %v556_v7 }
  0x12   :  { %448 = vmatpush.bf16.msra.mxu2 %v709_v46  ;;  %v757_v10 = vor.u32 %v855_v3, %v756_v2  ;;  %v821_v11 = vld [vmem:[%s1334_s1 + $0x94] sm:$0xf0]  ;;  %v684_v12 = vld [vmem:[%s1334_s1 + $0x110] sm:$0xf]  ;;  %v548_v16 = vld [vmem:[%s1334_s1] sm:$0xf] }
  0x13   :  { %461 = vmatpush.bf16.msra.mxu3 %v773_v50  ;;  %v837_v13 = vld [vmem:[%s1334_s1 + $0x114] sm:$0xf0]  ;;  %v748_v14 = vld [vmem:[%s1334_s1 + $0x190] sm:$0xf]  ;;  %v803_v18 = vld [vmem:[%s1334_s1 + $0x4] sm:$0xf0]  ;;  %v621_v21 = vor.u32 %v821_v11, %v620_v9 }
  0x14   :  { %423 = vmatpush.bf16.msra.mxu0 %v573_v56  ;;  %v853_v15 = vld [vmem:[%s1334_s1 + $0x194] sm:$0xf0]  ;;  %v612_v19 = vld [vmem:[%s1334_s1 + $0x80] sm:$0xf]  ;;  %v819_v20 = vld [vmem:[%s1334_s1 + $0x84] sm:$0xf0]  ;;  %v685_v22 = vor.u32 %v837_v13, %v684_v12  ;;  %v549_v33 = vor.u32 %v803_v18, %v548_v16 }
  0x15   :  { %436 = vmatpush.bf16.msra.mxu1 %v637_v57  ;;  %v676_v23 = vld [vmem:[%s1334_s1 + $0x100] sm:$0xf]  ;;  %v835_v24 = vld [vmem:[%s1334_s1 + $0x104] sm:$0xf0]  ;;  %v749_v26 = vor.u32 %v853_v15, %v748_v14  ;;  %v816_v28 = vld [vmem:[%s1334_s1 + $0x74] sm:$0xf]  ;;  %v613_v36 = vor.u32 %v819_v20, %v612_v19 }
  0x16   :  { %449 = vmatpush.bf16.msra.mxu2 %v701_v58  ;;  %v740_v25 = vld [vmem:[%s1334_s1 + $0x180] sm:$0xf]  ;;  %v851_v27 = vld [vmem:[%s1334_s1 + $0x184] sm:$0xf0]  ;;  %v606_v29 = vld [vmem:[%s1334_s1 + $0x78] sm:$0xf0]  ;;  %v677_v37 = vor.u32 %v835_v24, %v676_v23 }
  0x17   :  { %462 = vmatpush.bf16.msra.mxu3 %v765_v62  ;;  %v832_v30 = vld [vmem:[%s1334_s1 + $0xf4] sm:$0xf]  ;;  %v670_v31 = vld [vmem:[%s1334_s1 + $0xf8] sm:$0xf0]  ;;  %v18_v32 = vld [vmem:[%s1333_s0] sm:$0xf]  ;;  %v741_v40 = vor.u32 %v851_v27, %v740_v25  ;;  %v609_v41 = vor.u32 %v816_v28, %v606_v29 }
  0x18   :  { %424 = vmatpush.bf16.msra.mxu0 %v565_v4  ;;  %v848_v34 = vld [vmem:[%s1334_s1 + $0x174] sm:$0xf]  ;;  %v734_v35 = vld [vmem:[%s1334_s1 + $0x178] sm:$0xf0]  ;;  %90 = vst [vmem:[#allocation1] ss:$9 sm:$0xff] %v18_v32  ;;  %v673_v42 = vor.u32 %v832_v30, %v670_v31 }
  0x19   :  { %437 = vmatpush.bf16.msra.mxu1 %v629_v5  ;;  %v864_v38 = vld [vmem:[%s1334_s1 + $0x1f4] sm:$0xf]  ;;  %v798_v39 = vld [vmem:[%s1334_s1 + $0x1f8] sm:$0xf0]  ;;  %v737_v43 = vor.u32 %v848_v34, %v734_v35  ;;  %v814_v44 = vld [vmem:[%s1334_s1 + $0x64] sm:$0xf] }
  0x1a   :  { %450 = vmatpush.bf16.msra.mxu2 %v693_v6  ;;  %v598_v45 = vld [vmem:[%s1334_s1 + $0x68] sm:$0xf0]  ;;  %v830_v46 = vld [vmem:[%s1334_s1 + $0xe4] sm:$0xf]  ;;  %v801_v47 = vor.u32 %v864_v38, %v798_v39  ;;  %v812_v53 = vld [vmem:[%s1334_s1 + $0x54] sm:$0xf] }
  0x1b   :  { %463 = vmatpush.bf16.msra.mxu3 %v757_v10  ;;  %v662_v48 = vld [vmem:[%s1334_s1 + $0xe8] sm:$0xf0]  ;;  %v846_v49 = vld [vmem:[%s1334_s1 + $0x164] sm:$0xf]  ;;  %v601_v54 = vor.u32 %v814_v44, %v598_v45  ;;  %v590_v55 = vld [vmem:[%s1334_s1 + $0x58] sm:$0xf0] }
  0x1c   :  { %425 = vmatpush.bf16.msra.mxu0 %v557_v17  ;;  %v726_v50 = vld [vmem:[%s1334_s1 + $0x168] sm:$0xf0]  ;;  %v862_v51 = vld [vmem:[%s1334_s1 + $0x1e4] sm:$0xf]  ;;  %v828_v56 = vld [vmem:[%s1334_s1 + $0xd4] sm:$0xf]  ;;  %v665_v58 = vor.u32 %v830_v46, %v662_v48  ;;  %v593_v5 = vor.u32 %v812_v53, %v590_v55 }
  0x1d   :  { %438 = vmatpush.bf16.msra.mxu1 %v621_v21  ;;  %v790_v52 = vld [vmem:[%s1334_s1 + $0x1e8] sm:$0xf0]  ;;  %v654_v57 = vld [vmem:[%s1334_s1 + $0xd8] sm:$0xf0]  ;;  %v729_v59 = vor.u32 %v846_v49, %v726_v50  ;;  %v844_v0 = vld [vmem:[%s1334_s1 + $0x154] sm:$0xf] }
  0x1e   :  { %451 = vmatpush.bf16.msra.mxu2 %v685_v22  ;;  %v793_v63 = vor.u32 %v862_v51, %v790_v52  ;;  %v718_v1 = vld [vmem:[%s1334_s1 + $0x158] sm:$0xf0]  ;;  %v860_v3 = vld [vmem:[%s1334_s1 + $0x1d4] sm:$0xf]  ;;  %v657_v6 = vor.u32 %v828_v56, %v654_v57  ;;  %v810_v8 = vld [vmem:[%s1334_s1 + $0x44] sm:$0xf] }
  0x1f   :  { %464 = vmatpush.bf16.msra.mxu3 %v749_v26  ;;  %v1176_v60 = vld [vmem:[#allocation1 + $0x12] sm:$0xff]  ;;  %v1178_v61 = vld [vmem:[#allocation1] sm:$0xff]  ;;  %v1189_v2 = vld [vmem:[#allocation1 + $0x9] sm:$0xff]  ;;  %v721_v7 = vor.u32 %v844_v0, %v718_v1 }
  0x20   :  { %426 = vmatpush.bf16.msra.mxu0 %v549_v33  ;;  %v1180_v62 = vld [vmem:[#allocation1 + $0x1b] sm:$0xff]  ;;  %v582_v9 = vld [vmem:[%s1334_s1 + $0x48] sm:$0xf0]  ;;  %v826_v10 = vld [vmem:[%s1334_s1 + $0xc4] sm:$0xf] }
  0x21   :  { %439 = vmatpush.bf16.msra.mxu1 %v613_v36  ;;  %v782_v4 = vld [vmem:[%s1334_s1 + $0x1d8] sm:$0xf0]  ;;  %v646_v12 = vld [vmem:[%s1334_s1 + $0xc8] sm:$0xf0]  ;;  %v842_v13 = vld [vmem:[%s1334_s1 + $0x144] sm:$0xf]  ;;  %v585_v17 = vor.u32 %v810_v8, %v582_v9 }
  0x22   :  { %452 = vmatpush.bf16.msra.mxu2 %v677_v37  ;;  %v785_v11 = vor.u32 %v860_v3, %v782_v4  ;;  %v710_v14 = vld [vmem:[%s1334_s1 + $0x148] sm:$0xf0]  ;;  %v858_v15 = vld [vmem:[%s1334_s1 + $0x1c4] sm:$0xf]  ;;  %v649_v18 = vor.u32 %v826_v10, %v646_v12  ;;  %v808_v20 = vld [vmem:[%s1334_s1 + $0x34] sm:$0xf] }
  0x23   :  { %465 = vmatpush.bf16.msra.mxu3 %v741_v40  ;;  %427 = vmatmul.bf16.vlgmr.msra.gmra.mxu0 %v1178_v61  ;;  %v774_v16 = vld [vmem:[%s1334_s1 + $0x1c8] sm:$0xf0]  ;;  %v713_v19 = vor.u32 %v842_v13, %v710_v14  ;;  %v574_v21 = vld [vmem:[%s1334_s1 + $0x38] sm:$0xf0]  ;;  %v824_v22 = vld [vmem:[%s1334_s1 + $0xb4] sm:$0xf] }
  0x24   :  { %471 = vmatpush.bf16.msrb.mxu0 %v609_v41  ;;  %440 = vmatmul.bf16.vlgmr.msra.gmra.mxu1 %v1189_v2  ;;  %v777_v23 = vor.u32 %v858_v15, %v774_v16  ;;  %v638_v24 = vld [vmem:[%s1334_s1 + $0xb8] sm:$0xf0]  ;;  %v840_v25 = vld [vmem:[%s1334_s1 + $0x134] sm:$0xf]  ;;  %v577_v29 = vor.u32 %v808_v20, %v574_v21 }
  0x25   :  { %484 = vmatpush.bf16.msrb.mxu1 %v673_v42  ;;  %453 = vmatmul.bf16.vlgmr.msra.gmra.mxu2 %v1176_v60  ;;  %v702_v26 = vld [vmem:[%s1334_s1 + $0x138] sm:$0xf0]  ;;  %v856_v27 = vld [vmem:[%s1334_s1 + $0x1b4] sm:$0xf] }
  0x26   :  { %497 = vmatpush.bf16.msrb.mxu2 %v737_v43  ;;  %466 = vmatmul.bf16.vlgmr.msra.gmra.mxu3 %v1180_v62  ;;  %v766_v28 = vld [vmem:[%s1334_s1 + $0x1b8] sm:$0xf0] }
  0x27   :  { %510 = vmatpush.bf16.msrb.mxu3 %v801_v47 }
  0x28   :  { %472 = vmatpush.bf16.msrb.mxu0 %v601_v54 }
  0x29   :  { %485 = vmatpush.bf16.msrb.mxu1 %v665_v58 }
  0x2a   :  { %498 = vmatpush.bf16.msrb.mxu2 %v729_v59 }
  0x2b   :  { %511 = vmatpush.bf16.msrb.mxu3 %v793_v63 }
  0x2c   :  { %473 = vmatpush.bf16.msrb.mxu0 %v593_v5 }
  0x2d   :  { %486 = vmatpush.bf16.msrb.mxu1 %v657_v6 }
  0x2e   :  { %499 = vmatpush.bf16.msrb.mxu2 %v721_v7 }
  0x2f   :  { %512 = vmatpush.bf16.msrb.mxu3 %v785_v11 }
  0x30   :  { %474 = vmatpush.bf16.msrb.mxu0 %v585_v17 }
  0x31   :  { %9 = vsyncpa [#allocation3], 0  ;;  %487 = vmatpush.bf16.msrb.mxu1 %v649_v18  ;;  %v641_v30 = vor.u32 %v824_v22, %v638_v24  ;;  %v705_v31 = vor.u32 %v840_v25, %v702_v26  ;;  %v806_v32 = vld [vmem:[%s1334_s1 + $0x24] sm:$0xf]  ;;  %v566_v33 = vld [vmem:[%s1334_s1 + $0x28] sm:$0xf0]  ;;  %v769_v35 = vor.u32 %v856_v27, %v766_v28 }
  0x32   :  { %500 = vmatpush.bf16.msrb.mxu2 %v713_v19  ;;  %v822_v34 = vld [vmem:[%s1334_s1 + $0xa4] sm:$0xf]  ;;  %v630_v36 = vld [vmem:[%s1334_s1 + $0xa8] sm:$0xf0]  ;;  %v569_v41 = vor.u32 %v806_v32, %v566_v33  ;;  %v804_v44 = vld [vmem:[%s1334_s1 + $0x14] sm:$0xf] }
  0x33   :  { %513 = vmatpush.bf16.msrb.mxu3 %v777_v23  ;;  %v838_v37 = vld [vmem:[%s1334_s1 + $0x124] sm:$0xf]  ;;  %v694_v38 = vld [vmem:[%s1334_s1 + $0x128] sm:$0xf0]  ;;  %v633_v42 = vor.u32 %v822_v34, %v630_v36  ;;  %v558_v45 = vld [vmem:[%s1334_s1 + $0x18] sm:$0xf0] }
  0x34   :  { %v854_v39 = vld [vmem:[%s1334_s1 + $0x1a4] sm:$0xf]  ;;  %v758_v40 = vld [vmem:[%s1334_s1 + $0x1a8] sm:$0xf0]  ;;  %475 = vmatpush.bf16.msrb.mxu0 %v577_v29  ;;  %v697_v43 = vor.u32 %v838_v37, %v694_v38  ;;  %v820_v46 = vld [vmem:[%s1334_s1 + $0x94] sm:$0xf]  ;;  %v561_v53 = vor.u32 %v804_v44, %v558_v45 }
  0x35   :  { %488 = vmatpush.bf16.msrb.mxu1 %v641_v30  ;;  %v761_v47 = vor.u32 %v854_v39, %v758_v40  ;;  %v622_v48 = vld [vmem:[%s1334_s1 + $0x98] sm:$0xf0]  ;;  %v836_v49 = vld [vmem:[%s1334_s1 + $0x114] sm:$0xf]  ;;  %v802_v56 = vld [vmem:[%s1334_s1 + $0x4] sm:$0xf] }
  0x36   :  { %501 = vmatpush.bf16.msrb.mxu2 %v705_v31  ;;  %v686_v50 = vld [vmem:[%s1334_s1 + $0x118] sm:$0xf0]  ;;  %v852_v51 = vld [vmem:[%s1334_s1 + $0x194] sm:$0xf]  ;;  %v625_v54 = vor.u32 %v820_v46, %v622_v48  ;;  %v550_v57 = vld [vmem:[%s1334_s1 + $0x8] sm:$0xf0] }
  0x37   :  { %514 = vmatpush.bf16.msrb.mxu3 %v769_v35  ;;  %v750_v52 = vld [vmem:[%s1334_s1 + $0x198] sm:$0xf0]  ;;  %v689_v55 = vor.u32 %v836_v49, %v686_v50  ;;  %v818_v58 = vld [vmem:[%s1334_s1 + $0x84] sm:$0xf]  ;;  %v614_v63 = vld [vmem:[%s1334_s1 + $0x88] sm:$0xf0]  ;;  %v553_v5 = vor.u32 %v802_v56, %v550_v57 }
  0x38   :  { %476 = vmatpush.bf16.msrb.mxu0 %v569_v41  ;;  %v753_v59 = vor.u32 %v852_v51, %v750_v52  ;;  %v834_v0 = vld [vmem:[%s1334_s1 + $0x104] sm:$0xf]  ;;  %v678_v1 = vld [vmem:[%s1334_s1 + $0x108] sm:$0xf0]  ;;  %v617_v6 = vor.u32 %v818_v58, %v614_v63  ;;  %v83_v17 = vld [vmem:[%s1335_s2] sm:$0x3] }
  0x39   :  { %489 = vmatpush.bf16.msrb.mxu1 %v633_v42  ;;  %v850_v3 = vld [vmem:[%s1334_s1 + $0x184] sm:$0xf]  ;;  %v742_v4 = vld [vmem:[%s1334_s1 + $0x188] sm:$0xf0]  ;;  %v681_v7 = vor.u32 %v834_v0, %v678_v1  ;;  %v86_v18 = vperm.slane %v83_v17, 1  ;;  %s895_s10 = smov [#allocation2]  }
  0x3a   :  { %502 = vmatpush.bf16.msrb.mxu2 %v697_v43  ;;  %v745_v8 = vor.u32 %v850_v3, %v742_v4  ;;  %v526_v33 = vld [vmem:[%s1336_s3] sm:$0x3]  ;;  %s535_s11 = sshll.u32 %s895_s10, 4  ;;  %s537_s14 = sshll.u32 %s1337_s4, 4  ;;  %s536_s11 = int_to_ptr.vmem [resolvable:$true] %s535_s11  ;;  %s538_s14 = int_to_ptr.hbm [resolvable:$true] %s537_s14 }
  0x3b   :  { %515 = vmatpush.bf16.msrb.mxu3 %v761_v47 }
  0x3c   :  { %477 = vmatpush.bf16.msrb.mxu0 %v561_v53 }
  0x3d   :  { %490 = vmatpush.bf16.msrb.mxu1 %v625_v54 }
  0x3e   :  { %503 = vmatpush.bf16.msrb.mxu2 %v689_v55 }
  0x3f   :  { %516 = vmatpush.bf16.msrb.mxu3 %v753_v59 }
  0x40   :  { %478 = vmatpush.bf16.msrb.mxu0 %v553_v5 }
  0x41   :  { %491 = vmatpush.bf16.msrb.mxu1 %v617_v6 }
  0x42   :  { %504 = vmatpush.bf16.msrb.mxu2 %v681_v7 }
  0x43   :  { %517 = vmatpush.bf16.msrb.mxu3 %v745_v8  ;;  %479 = vmatmul.bf16.vlgmr.msrb.gmra.mxu0 %v1178_v61 }
  0x44   :  { %492 = vmatmul.bf16.vlgmr.msrb.gmra.mxu1 %v1189_v2 }
  0x45   :  { %505 = vmatmul.bf16.vlgmr.msrb.gmra.mxu2 %v1176_v60  ;;  %v85_v60 = vperm.slane %v83_v17, 0 }
  0x46   :  { %518 = vmatmul.bf16.vlgmr.msrb.gmra.mxu3 %v1180_v62 }
  0xa0   :  { %v428_v9 = vpop.f32.mrf.mxu0 }
  0xa1   :  { %v441_v10 = vpop.f32.mrf.mxu1  ;;  %v429_v26 = vadd.f32 %v428_v9, %v85_v60 }
  0xa3   :  { %v442_v29 = vadd.f32 %v441_v10, %v429_v26 }
  0xa8   :  { %v454_v11 = vpop.f32.mrf.mxu2  ;;  %v430_v13 = vpop.f32.mrf.mxu0 }
  0xa9   :  { %v467_v12 = vpop.f32.mrf.mxu3  ;;  %v443_v14 = vpop.f32.mrf.mxu1  ;;  %v455_v32 = vadd.f32 %v454_v11, %v442_v29 }
  0xab   :  { %v468_v35 = vadd.f32 %v467_v12, %v455_v32 }
  0xb0   :  { %v456_v15 = vpop.f32.mrf.mxu2 }
  0xb1   :  { %v469_v16 = vpop.f32.mrf.mxu3 }
  0xc0   :  { %v480_v61 = vpop.f32.mrf.mxu0 }
  0xc1   :  { %v481_v19 = vadd.f32 %v480_v61, %v86_v18  ;;  %v493_v2 = vpop.f32.mrf.mxu1 }
  0xc3   :  { %v494_v20 = vadd.f32 %v493_v2, %v481_v19 }
  0xc8   :  { %v506_v21 = vpop.f32.mrf.mxu2  ;;  %v482_v23 = vpop.f32.mrf.mxu0 }
  0xc9   :  { %v507_v62 = vadd.f32 %v506_v21, %v494_v20  ;;  %v519_v22 = vpop.f32.mrf.mxu3  ;;  %v495_v24 = vpop.f32.mrf.mxu1 }
  0xcb   :  { %v520_v25 = vadd.f32 %v519_v22, %v507_v62 }
  0xcd   :  { %v523_v27 = vmul.f32 0.5, %v520_v25 }
  0xcf   :  { %v524_v28 = vmul.f32 1.442695, %v523_v27 }
  0xd0   :  { %v508_v30 = vpop.f32.mrf.mxu2 }
  0xd1   :  { %867 = vpow2.f32 %v524_v28  ;;  %v521_v31 = vpop.f32.mrf.mxu3 }
  0xd7   :  { %v868_v34 = vpop.eup %867 }
  0xd8   :  { %v527_v36 = vmul.f32 %v868_v34, %v526_v33 }
  0xda   :  { %v528_v37 = vadd.f32 %v527_v36, %v468_v35 }
  0xdc   :  { %529 = vst [vmem:[#allocation2] sm:$0x3] %v528_v37 }
  0xdd   :  { %540 = dma.vmem_to_hbm [thread:$0]  %s536_s11, 32, %s538_s14, [#allocation3]  }
  0xde   :  { %893 = dma.done.wait [#allocation3], 32  }
  0xdf   :  { %894 = vsyncadd [#allocation3], 4294967264 }
  0xe0   :  { %545 = vsyncpa [#allocation3], 1 }

</bundles_post_ra>
